<compile_context>
chip_gen: v5e
topology: v5e:2x2
jax: 0.10.0
libtpu: 0.0.40
codegen_flags: <defaults>
</compile_context>

<pallas_src>
import functools

import jax
import jax.numpy as jnp
from jax.experimental import pallas as pl
from jax.experimental.pallas import tpu as pltpu


def _round_up(v, m):
    return (v + m - 1) // m * m


# ----------------------------------------------------------------------------- #
# Pallas kernel: fused conv3d (single im2col matmul) + InstanceNorm3d + PReLU
# ----------------------------------------------------------------------------- #
def _conv_in_prelu_kernel(offs, c_in, inv_count, eps,
                          x_ref, w_ref, mask_ref, a_ref, o_ref, stack_ref):
    # x_ref    : (1, C_in, L_in)     bf16  margined, zero-padded, flattened volume slab
    # w_ref    : (c_block, Kpad)     bf16  lane-dense fused weight matrix
    # mask_ref : (1, Lout)           f32   1.0 on valid output voxels, else 0.0
    # a_ref    : (1, 1)              f32   shared PReLU slope (SMEM)
    # o_ref    : (1, c_block, Lout)  bf16 (stage 1) / f32 (stage 2)
    # stack_ref: (Kpad, Lout)        f32   im2col scratch, persists across the C_out axis
    lout = o_ref.shape[-1]
    kpad = stack_ref.shape[0]
    k3c = len(offs) * c_in

    @pl.when(pl.program_id(1) == 0)
    def _build_stack():
        # im2col-in-VMEM: built once per batch element, reused for every C_out block.
        # Ref-level pl.ds slices (no value-level lane-shuffled copies of the slab).
        for oi, off in enumerate(offs):
            stack_ref[oi * c_in:(oi + 1) * c_in, :] = (
                x_ref[0, :, pl.ds(off, lout)].astype(jnp.float32))
        if kpad > k3c:                                  # zero the K-padding rows once
            stack_ref[k3c:, :] = jnp.zeros((kpad - k3c, lout), jnp.float32)

    # One fused MXU pass: (c_block, Kpad) @ (Kpad, Lout) -> f32 accumulator.
    # TODO(synk): use a bf16 scratch (skip this cast) when C_in % 16 == 0.
    acc = jnp.dot(w_ref[...], stack_ref[...].astype(jnp.bfloat16),
                  preferred_element_type=jnp.float32)

    # InstanceNorm3d (affine=False, biased var), masked single-pass stats in f32.
    m = mask_ref[...]                                   # (1, Lout)
    am = acc * m
    s1 = jnp.sum(am, axis=-1, keepdims=True)
    s2 = jnp.sum(am * acc, axis=-1, keepdims=True)
    mean = s1 * inv_count
    var = jnp.maximum(s2 * inv_count - mean * mean, 0.0)
    yn = (acc - mean) * jax.lax.rsqrt(var + eps)

    # PReLU with a single shared slope (torch.nn.PReLU() default). Invalid lanes are
    # zeroed so the stored block is directly the next stage's zero-bordered input slab.
    # TODO(synk): per-channel PReLU would need a (c_block, 1) slope block instead.
    a = a_ref[0, 0]
    y = jnp.where(yn >= 0.0, yn, a * yn) * m
    o_ref[0] = y.astype(o_ref.dtype)


def _pick_cblock(c_out, cap=256):
    cb = min(c_out, cap)
    while c_out % cb:
        cb -= 1
    return cb


def _conv_instnorm_prelu_slab(slab, w, alpha, *, dims, in_margin, lout, out_dtype):
    """One conv3d('same') + InstanceNorm3d + PReLU stage on a flattened slab layout.

    slab: (N, C_in, L_in) bf16 with slab[n,c,l] = x_padded_grid_flat[l - in_margin]
          inside the data region and 0 elsewhere.
    Returns (N, C_out, lout) out_dtype with out[n,c,l] = act(conv at base l - in_margin)
    on valid lanes and 0 elsewhere, i.e. the same slab layout with margin in_margin-shift.
    """
    N, C_in, L_in = slab.shape
    C_out, _, k, _, _ = w.shape
    D, H, W = dims
    p = (k - 1) // 2
    Dp, Hp, Wp = D + 2 * p, H + 2 * p, W + 2 * p
    k3 = k * k * k
    kpad = _round_up(k3 * C_in, 128)                    # non-ragged MXU contraction

    offs = tuple(kd * (Hp * Wp) + kh * Wp + kw
                 for kd in range(k) for kh in range(k) for kw in range(k))

    # Lane-dense fused weight matrix: column index = oi*C_in + ci (matches stack rows).
    w2d = jnp.transpose(w, (0, 2, 3, 4, 1)).reshape(C_out, k3 * C_in)
    w2d = jnp.pad(w2d, ((0, 0), (0, kpad - k3 * C_in))).astype(jnp.bfloat16)

    # Valid-lane mask: lane l is a real output voxel iff base = l - in_margin decomposes
    # into (do, ho, wo) with do < D, ho < H, wo < W on the padded grid.
    lidx = jnp.arange(lout, dtype=jnp.int32)
    base = lidx - in_margin
    d_ = base // (Hp * Wp)
    r_ = base % (Hp * Wp)
    h_ = r_ // Wp
    w_ = r_ % Wp
    valid = (base >= 0) & (d_ < D) & (h_ < H) & (w_ < W)
    mask = valid.astype(jnp.float32).reshape(1, lout)

    a2 = jnp.asarray(alpha, jnp.float32).reshape(1, 1)
    inv_count = 1.0 / float(D * H * W)

    c_block = _pick_cblock(C_out)
    grid = (N, C_out // c_block)

    flops = 2 * N * C_out * kpad * lout
    bytes_accessed = (N * C_in * L_in * 2 + C_out * kpad * 2 + lout * 4
                      + N * C_out * lout * int(jnp.dtype(out_dtype).itemsize))

    kern = functools.partial(_conv_in_prelu_kernel, offs, C_in, inv_count, 1e-5)
    return pl.pallas_call(
        kern,
        out_shape=jax.ShapeDtypeStruct((N, C_out, lout), out_dtype),
        grid=grid,
        in_specs=[
            pl.BlockSpec((1, C_in, L_in), lambda n, c: (n, 0, 0)),
            pl.BlockSpec((c_block, kpad), lambda n, c: (c, 0)),
            pl.BlockSpec((1, lout), lambda n, c: (0, 0)),
            pl.BlockSpec(memory_space=pltpu.MemorySpace.SMEM),   # PReLU slope scalar
        ],
        out_specs=pl.BlockSpec((1, c_block, lout), lambda n, c: (n, c, 0)),
        scratch_shapes=[pltpu.VMEM((kpad, lout), jnp.float32)],
        compiler_params=pltpu.CompilerParams(
            dimension_semantics=("parallel", "arbitrary"),
            vmem_limit_bytes=64 * 1024 * 1024),
        cost_estimate=pl.CostEstimate(flops=int(flops),
                                      transcendentals=int(N * C_out),
                                      bytes_accessed=int(bytes_accessed)),
    )(slab, w2d, mask, a2)


# ----------------------------------------------------------------------------- #
# FilterScaling (tiny MLPs producing per-(out_ch, in_ch) weight scales) - plain JAX.
# ----------------------------------------------------------------------------- #
def _leaky_relu(x, slope=0.2):
    return jnp.where(x > 0, x, slope * x)


def _mlp4(layers, x):
    for (Wl, bl) in layers:
        x = _leaky_relu(x @ Wl.T + bl)
    return x


def filter_scaling(p, hyperparameter, metcode, out_ch, in_ch):
    # hyperparameter: (1, 1) f32, metcode: (1, 1) int32
    emb = p["emb"][metcode[:, 0]]                                    # (1, 3)
    f1 = _mlp4(p["mapping1"], hyperparameter)                        # (1, L)
    f2 = _mlp4(p["mapping2"], emb)                                   # (1, L)
    h = jnp.concatenate([f1, f2], axis=1)                            # (1, 2L)
    h = _leaky_relu(h @ p["style1"][0].T + p["style1"][1])
    out = h @ p["style2"][0].T + p["style2"][1]                      # (1, out*in)
    return out.reshape(out_ch, in_ch)


# ----------------------------------------------------------------------------- #
# Parameter init (deterministic, synthetic)
# ----------------------------------------------------------------------------- #
def _linear(key, fan_in, fan_out):
    k1, k2 = jax.random.split(key)
    return (jax.random.normal(k1, (fan_out, fan_in), jnp.float32) * 0.1,
            jax.random.normal(k2, (fan_out,), jnp.float32) * 0.01)


def init_filter_scaling(key, in_ch, out_ch, latent):
    ks = jax.random.split(key, 11)
    mapping1 = [_linear(ks[0], 1, latent)] + [_linear(ks[i], latent, latent) for i in (1, 2, 3)]
    mapping2 = [_linear(ks[4], 3, latent)] + [_linear(ks[i], latent, latent) for i in (5, 6, 7)]
    return dict(
        emb=jax.random.normal(ks[8], (7, 3), jnp.float32),
        mapping1=mapping1,
        mapping2=mapping2,
        style1=_linear(ks[9], 2 * latent, 2 * latent),
        style2=_linear(ks[10], 2 * latent, out_ch * in_ch),
    )


def init_basic_conv3d(key, in_channels, out_channels, latent_dim, kernel_size):
    ka, kb, kc, kd = jax.random.split(key, 4)
    k = kernel_size
    return dict(
        conv1_w=jax.random.normal(ka, (out_channels, in_channels, k, k, k), jnp.float32) * 0.1,
        conv2_w=jax.random.normal(kb, (out_channels, out_channels, k, k, k), jnp.float32) * 0.1,
        fs1=init_filter_scaling(kc, in_channels, out_channels, latent_dim),
        fs2=init_filter_scaling(kd, out_channels, out_channels, latent_dim),
        alpha1=jnp.full((1, 1), 0.25, jnp.float32),   # nn.PReLU() default shared slope
        alpha2=jnp.full((1, 1), 0.25, jnp.float32),
    )


# ----------------------------------------------------------------------------- #
# BasicConv3d forward (both stages, fused slab handoff)
# ----------------------------------------------------------------------------- #
@jax.jit
def basic_conv3d_forward(params, x, lowRes, metcode):
    N, C_in, D, H, W = x.shape
    C_mid = params["conv1_w"].shape[0]
    C_out = params["conv2_w"].shape[0]
    k = params["conv1_w"].shape[-1]
    assert k % 2 == 1
    p = (k - 1) // 2                                   # 'same' padding
    Dp, Hp, Wp = D + 2 * p, H + 2 * p, W + 2 * p
    Mp = Dp * Hp * Wp
    shift = p * (Hp * Wp + Wp + 1)

    lout2 = _round_up(Mp, 128)                         # stage-2 output lanes
    lout1 = _round_up(lout2 + 2 * shift, 128)          # stage-1 output == stage-2 input
    lin1 = _round_up(lout1 + 2 * shift, 128)           # stage-1 input slab

    # FilterScaling-modulated weights (plain JAX; negligible vs conv hot path).
    s1 = filter_scaling(params["fs1"], lowRes, metcode, C_mid, C_in)
    w1 = params["conv1_w"] * s1[:, :, None, None, None]
    s2 = filter_scaling(params["fs2"], lowRes, metcode, C_out, C_mid)
    w2 = params["conv2_w"] * s2[:, :, None, None, None]

    # Stage-1 input slab: zero-padded volume, flattened, front margin 2*shift, bf16.
    xpad = jnp.pad(x, ((0, 0), (0, 0), (p, p), (p, p), (p, p))).reshape(N, C_in, Mp)
    slab1 = jnp.pad(xpad, ((0, 0), (0, 0), (2 * shift, lin1 - 2 * shift - Mp)))
    slab1 = slab1.astype(jnp.bfloat16)

    # Stage 1: its bf16 output IS stage 2's input slab (margin = shift) -- no re-layout.
    slab2 = _conv_instnorm_prelu_slab(slab1, w1, params["alpha1"], dims=(D, H, W),
                                      in_margin=2 * shift, lout=lout1,
                                      out_dtype=jnp.bfloat16)
    out2 = _conv_instnorm_prelu_slab(slab2, w2, params["alpha2"], dims=(D, H, W),
                                     in_margin=shift, lout=lout2,
                                     out_dtype=jnp.float32)

    y = out2[:, :, :Mp].reshape(N, C_out, Dp, Hp, Wp)[:, :, p:p + D, p:p + H, p:p + W]
    return y


if __name__ == "__main__":
    key = jax.random.PRNGKey(0)
    kx, kp = jax.random.split(key)

    N, C_in, C_out = 2, 4, 8
    D = H = W = 8
    latent_dim = 16
    kernel_size = 3

    x = jax.random.normal(kx, (N, C_in, D, H, W), jnp.float32)
    lowRes = jnp.array([[0.5]], jnp.float32)     # hyperparameter, shape (1, 1)
    metcode = jnp.array([[3]], jnp.int32)        # embedding index in [0, 7)

    params = init_basic_conv3d(kp, C_in, C_out, latent_dim, kernel_size)

    y = basic_conv3d_forward(params, x, lowRes, metcode)
    jax.block_until_ready(y)
    assert y.shape == (N, C_out, D, H, W), y.shape
    assert bool(jnp.all(jnp.isfinite(y)))
    print("KERNEL_OK")
</pallas_src>

<mosaic_0001>
module attributes {stable_mosaic.version = 11 : i64} {
  func.func @_conv_in_prelu_kernel(%arg0: i32, %arg1: i32, %arg2: memref<1x4x1536xbf16, #tpu.memory_space<vmem>>, %arg3: memref<8x128xbf16, #tpu.memory_space<vmem>>, %arg4: memref<1x1280xf32, #tpu.memory_space<vmem>>, %arg5: memref<1x1xf32, #tpu.memory_space<smem>>, %arg6: memref<1x8x1280xbf16, #tpu.memory_space<vmem>>, %arg7: memref<128x1280xf32, #tpu.memory_space<vmem>>) attributes {dimension_semantics = [#tpu.dimension_semantics<parallel>, #tpu.dimension_semantics<arbitrary>], iteration_bounds = array<i64: 2, 1>, scalar_prefetch = 0 : i64, scratch_operands = 1 : i64, tpu.core_type = #tpu.core_type<tc>, window_params = [{transform_indices = @transform_0, window_bounds = array<i64: 1, 4, 1536>}, {transform_indices = @transform_1, window_bounds = array<i64: 8, 128>}, {pipeline_mode = #tpu.pipeline_mode<synchronous>, transform_indices = @transform_2, window_bounds = array<i64: 1, 1280>}, {transform_indices = @transform_3, window_bounds = array<i64: 1, 1>}, {transform_indices = @transform_4, window_bounds = array<i64: 1, 8, 1280>}]} {
    %c0_i32 = arith.constant 0 : i32
    %0 = arith.cmpi eq, %arg1, %c0_i32 : i32
    %1 = arith.extui %0 : i1 to i32
    %c0_i32_0 = arith.constant 0 : i32
    %2 = arith.cmpi ne, %1, %c0_i32_0 : i32
    scf.if %2 {
      %c0_18 = arith.constant 0 : index
      %c0_19 = arith.constant 0 : index
      %c0_20 = arith.constant 0 : index
      %42 = vector.load %arg2[%c0_18, %c0_19, %c0_20] : memref<1x4x1536xbf16, #tpu.memory_space<vmem>>, vector<1x4x1280xbf16>
      %43 = vector.shape_cast %42 : vector<1x4x1280xbf16> to vector<4x1280xbf16>
      %44 = arith.extf %43 : vector<4x1280xbf16> to vector<4x1280xf32>
      %c0_21 = arith.constant 0 : index
      %c0_22 = arith.constant 0 : index
      %45 = vector.load %arg7[%c0_21, %c0_22] : memref<128x1280xf32, #tpu.memory_space<vmem>>, vector<4x1280xf32>
      tpu.vector_store %arg7[%c0_21, %c0_22], %44 {strides = array<i32>} : memref<128x1280xf32, #tpu.memory_space<vmem>>, vector<4x1280xf32>,
      %c0_23 = arith.constant 0 : index
      %c0_24 = arith.constant 0 : index
      %c1 = arith.constant 1 : index
      %46 = vector.load %arg2[%c0_23, %c0_24, %c1] : memref<1x4x1536xbf16, #tpu.memory_space<vmem>>, vector<1x4x1280xbf16>
      %47 = vector.shape_cast %46 : vector<1x4x1280xbf16> to vector<4x1280xbf16>
      %48 = arith.extf %47 : vector<4x1280xbf16> to vector<4x1280xf32>
      %c4 = arith.constant 4 : index
      %c0_25 = arith.constant 0 : index
      %49 = vector.load %arg7[%c4, %c0_25] : memref<128x1280xf32, #tpu.memory_space<vmem>>, vector<4x1280xf32>
      tpu.vector_store %arg7[%c4, %c0_25], %48 {strides = array<i32>} : memref<128x1280xf32, #tpu.memory_space<vmem>>, vector<4x1280xf32>,
      %c0_26 = arith.constant 0 : index
      %c0_27 = arith.constant 0 : index
      %c2 = arith.constant 2 : index
      %50 = vector.load %arg2[%c0_26, %c0_27, %c2] : memref<1x4x1536xbf16, #tpu.memory_space<vmem>>, vector<1x4x1280xbf16>
      %51 = vector.shape_cast %50 : vector<1x4x1280xbf16> to vector<4x1280xbf16>
      %52 = arith.extf %51 : vector<4x1280xbf16> to vector<4x1280xf32>
      %c8 = arith.constant 8 : index
      %c0_28 = arith.constant 0 : index
      %53 = vector.load %arg7[%c8, %c0_28] : memref<128x1280xf32, #tpu.memory_space<vmem>>, vector<4x1280xf32>
      tpu.vector_store %arg7[%c8, %c0_28], %52 {strides = array<i32>} : memref<128x1280xf32, #tpu.memory_space<vmem>>, vector<4x1280xf32>,
      %c0_29 = arith.constant 0 : index
      %c0_30 = arith.constant 0 : index
      %c10 = arith.constant 10 : index
      %54 = vector.load %arg2[%c0_29, %c0_30, %c10] : memref<1x4x1536xbf16, #tpu.memory_space<vmem>>, vector<1x4x1280xbf16>
      %55 = vector.shape_cast %54 : vector<1x4x1280xbf16> to vector<4x1280xbf16>
      %56 = arith.extf %55 : vector<4x1280xbf16> to vector<4x1280xf32>
      %c12 = arith.constant 12 : index
      %c0_31 = arith.constant 0 : index
      %57 = vector.load %arg7[%c12, %c0_31] : memref<128x1280xf32, #tpu.memory_space<vmem>>, vector<4x1280xf32>
      tpu.vector_store %arg7[%c12, %c0_31], %56 {strides = array<i32>} : memref<128x1280xf32, #tpu.memory_space<vmem>>, vector<4x1280xf32>,
      %c0_32 = arith.constant 0 : index
      %c0_33 = arith.constant 0 : index
      %c11 = arith.constant 11 : index
      %58 = vector.load %arg2[%c0_32, %c0_33, %c11] : memref<1x4x1536xbf16, #tpu.memory_space<vmem>>, vector<1x4x1280xbf16>
      %59 = vector.shape_cast %58 : vector<1x4x1280xbf16> to vector<4x1280xbf16>
      %60 = arith.extf %59 : vector<4x1280xbf16> to vector<4x1280xf32>
      %c16 = arith.constant 16 : index
      %c0_34 = arith.constant 0 : index
      %61 = vector.load %arg7[%c16, %c0_34] : memref<128x1280xf32, #tpu.memory_space<vmem>>, vector<4x1280xf32>
      tpu.vector_store %arg7[%c16, %c0_34], %60 {strides = array<i32>} : memref<128x1280xf32, #tpu.memory_space<vmem>>, vector<4x1280xf32>,
      %c0_35 = arith.constant 0 : index
      %c0_36 = arith.constant 0 : index
      %c12_37 = arith.constant 12 : index
      %62 = vector.load %arg2[%c0_35, %c0_36, %c12_37] : memref<1x4x1536xbf16, #tpu.memory_space<vmem>>, vector<1x4x1280xbf16>
      %63 = vector.shape_cast %62 : vector<1x4x1280xbf16> to vector<4x1280xbf16>
      %64 = arith.extf %63 : vector<4x1280xbf16> to vector<4x1280xf32>
      %c20 = arith.constant 20 : index
      %c0_38 = arith.constant 0 : index
      %65 = vector.load %arg7[%c20, %c0_38] : memref<128x1280xf32, #tpu.memory_space<vmem>>, vector<4x1280xf32>
      tpu.vector_store %arg7[%c20, %c0_38], %64 {strides = array<i32>} : memref<128x1280xf32, #tpu.memory_space<vmem>>, vector<4x1280xf32>,
      %c0_39 = arith.constant 0 : index
      %c0_40 = arith.constant 0 : index
      %c20_41 = arith.constant 20 : index
      %66 = vector.load %arg2[%c0_39, %c0_40, %c20_41] : memref<1x4x1536xbf16, #tpu.memory_space<vmem>>, vector<1x4x1280xbf16>
      %67 = vector.shape_cast %66 : vector<1x4x1280xbf16> to vector<4x1280xbf16>
      %68 = arith.extf %67 : vector<4x1280xbf16> to vector<4x1280xf32>
      %c24 = arith.constant 24 : index
      %c0_42 = arith.constant 0 : index
      %69 = vector.load %arg7[%c24, %c0_42] : memref<128x1280xf32, #tpu.memory_space<vmem>>, vector<4x1280xf32>
      tpu.vector_store %arg7[%c24, %c0_42], %68 {strides = array<i32>} : memref<128x1280xf32, #tpu.memory_space<vmem>>, vector<4x1280xf32>,
      %c0_43 = arith.constant 0 : index
      %c0_44 = arith.constant 0 : index
      %c21 = arith.constant 21 : index
      %70 = vector.load %arg2[%c0_43, %c0_44, %c21] : memref<1x4x1536xbf16, #tpu.memory_space<vmem>>, vector<1x4x1280xbf16>
      %71 = vector.shape_cast %70 : vector<1x4x1280xbf16> to vector<4x1280xbf16>
      %72 = arith.extf %71 : vector<4x1280xbf16> to vector<4x1280xf32>
      %c28 = arith.constant 28 : index
      %c0_45 = arith.constant 0 : index
      %73 = vector.load %arg7[%c28, %c0_45] : memref<128x1280xf32, #tpu.memory_space<vmem>>, vector<4x1280xf32>
      tpu.vector_store %arg7[%c28, %c0_45], %72 {strides = array<i32>} : memref<128x1280xf32, #tpu.memory_space<vmem>>, vector<4x1280xf32>,
      %c0_46 = arith.constant 0 : index
      %c0_47 = arith.constant 0 : index
      %c22 = arith.constant 22 : index
      %74 = vector.load %arg2[%c0_46, %c0_47, %c22] : memref<1x4x1536xbf16, #tpu.memory_space<vmem>>, vector<1x4x1280xbf16>
      %75 = vector.shape_cast %74 : vector<1x4x1280xbf16> to vector<4x1280xbf16>
      %76 = arith.extf %75 : vector<4x1280xbf16> to vector<4x1280xf32>
      %c32 = arith.constant 32 : index
      %c0_48 = arith.constant 0 : index
      %77 = vector.load %arg7[%c32, %c0_48] : memref<128x1280xf32, #tpu.memory_space<vmem>>, vector<4x1280xf32>
      tpu.vector_store %arg7[%c32, %c0_48], %76 {strides = array<i32>} : memref<128x1280xf32, #tpu.memory_space<vmem>>, vector<4x1280xf32>,
      %c0_49 = arith.constant 0 : index
      %c0_50 = arith.constant 0 : index
      %c100 = arith.constant 100 : index
      %78 = vector.load %arg2[%c0_49, %c0_50, %c100] : memref<1x4x1536xbf16, #tpu.memory_space<vmem>>, vector<1x4x1280xbf16>
      %79 = vector.shape_cast %78 : vector<1x4x1280xbf16> to vector<4x1280xbf16>
      %80 = arith.extf %79 : vector<4x1280xbf16> to vector<4x1280xf32>
      %c36 = arith.constant 36 : index
      %c0_51 = arith.constant 0 : index
      %81 = vector.load %arg7[%c36, %c0_51] : memref<128x1280xf32, #tpu.memory_space<vmem>>, vector<4x1280xf32>
      tpu.vector_store %arg7[%c36, %c0_51], %80 {strides = array<i32>} : memref<128x1280xf32, #tpu.memory_space<vmem>>, vector<4x1280xf32>,
      %c0_52 = arith.constant 0 : index
      %c0_53 = arith.constant 0 : index
      %c101 = arith.constant 101 : index
      %82 = vector.load %arg2[%c0_52, %c0_53, %c101] : memref<1x4x1536xbf16, #tpu.memory_space<vmem>>, vector<1x4x1280xbf16>
      %83 = vector.shape_cast %82 : vector<1x4x1280xbf16> to vector<4x1280xbf16>
      %84 = arith.extf %83 : vector<4x1280xbf16> to vector<4x1280xf32>
      %c40 = arith.constant 40 : index
      %c0_54 = arith.constant 0 : index
      %85 = vector.load %arg7[%c40, %c0_54] : memref<128x1280xf32, #tpu.memory_space<vmem>>, vector<4x1280xf32>
      tpu.vector_store %arg7[%c40, %c0_54], %84 {strides = array<i32>} : memref<128x1280xf32, #tpu.memory_space<vmem>>, vector<4x1280xf32>,
      %c0_55 = arith.constant 0 : index
      %c0_56 = arith.constant 0 : index
      %c102 = arith.constant 102 : index
      %86 = vector.load %arg2[%c0_55, %c0_56, %c102] : memref<1x4x1536xbf16, #tpu.memory_space<vmem>>, vector<1x4x1280xbf16>
      %87 = vector.shape_cast %86 : vector<1x4x1280xbf16> to vector<4x1280xbf16>
      %88 = arith.extf %87 : vector<4x1280xbf16> to vector<4x1280xf32>
      %c44 = arith.constant 44 : index
      %c0_57 = arith.constant 0 : index
      %89 = vector.load %arg7[%c44, %c0_57] : memref<128x1280xf32, #tpu.memory_space<vmem>>, vector<4x1280xf32>
      tpu.vector_store %arg7[%c44, %c0_57], %88 {strides = array<i32>} : memref<128x1280xf32, #tpu.memory_space<vmem>>, vector<4x1280xf32>,
      %c0_58 = arith.constant 0 : index
      %c0_59 = arith.constant 0 : index
      %c110 = arith.constant 110 : index
      %90 = vector.load %arg2[%c0_58, %c0_59, %c110] : memref<1x4x1536xbf16, #tpu.memory_space<vmem>>, vector<1x4x1280xbf16>
      %91 = vector.shape_cast %90 : vector<1x4x1280xbf16> to vector<4x1280xbf16>
      %92 = arith.extf %91 : vector<4x1280xbf16> to vector<4x1280xf32>
      %c48 = arith.constant 48 : index
      %c0_60 = arith.constant 0 : index
      %93 = vector.load %arg7[%c48, %c0_60] : memref<128x1280xf32, #tpu.memory_space<vmem>>, vector<4x1280xf32>
      tpu.vector_store %arg7[%c48, %c0_60], %92 {strides = array<i32>} : memref<128x1280xf32, #tpu.memory_space<vmem>>, vector<4x1280xf32>,
      %c0_61 = arith.constant 0 : index
      %c0_62 = arith.constant 0 : index
      %c111 = arith.constant 111 : index
      %94 = vector.load %arg2[%c0_61, %c0_62, %c111] : memref<1x4x1536xbf16, #tpu.memory_space<vmem>>, vector<1x4x1280xbf16>
      %95 = vector.shape_cast %94 : vector<1x4x1280xbf16> to vector<4x1280xbf16>
      %96 = arith.extf %95 : vector<4x1280xbf16> to vector<4x1280xf32>
      %c52 = arith.constant 52 : index
      %c0_63 = arith.constant 0 : index
      %97 = vector.load %arg7[%c52, %c0_63] : memref<128x1280xf32, #tpu.memory_space<vmem>>, vector<4x1280xf32>
      tpu.vector_store %arg7[%c52, %c0_63], %96 {strides = array<i32>} : memref<128x1280xf32, #tpu.memory_space<vmem>>, vector<4x1280xf32>,
      %c0_64 = arith.constant 0 : index
      %c0_65 = arith.constant 0 : index
      %c112 = arith.constant 112 : index
      %98 = vector.load %arg2[%c0_64, %c0_65, %c112] : memref<1x4x1536xbf16, #tpu.memory_space<vmem>>, vector<1x4x1280xbf16>
      %99 = vector.shape_cast %98 : vector<1x4x1280xbf16> to vector<4x1280xbf16>
      %100 = arith.extf %99 : vector<4x1280xbf16> to vector<4x1280xf32>
      %c56 = arith.constant 56 : index
      %c0_66 = arith.constant 0 : index
      %101 = vector.load %arg7[%c56, %c0_66] : memref<128x1280xf32, #tpu.memory_space<vmem>>, vector<4x1280xf32>
      tpu.vector_store %arg7[%c56, %c0_66], %100 {strides = array<i32>} : memref<128x1280xf32, #tpu.memory_space<vmem>>, vector<4x1280xf32>,
      %c0_67 = arith.constant 0 : index
      %c0_68 = arith.constant 0 : index
      %c120 = arith.constant 120 : index
      %102 = vector.load %arg2[%c0_67, %c0_68, %c120] : memref<1x4x1536xbf16, #tpu.memory_space<vmem>>, vector<1x4x1280xbf16>
      %103 = vector.shape_cast %102 : vector<1x4x1280xbf16> to vector<4x1280xbf16>
      %104 = arith.extf %103 : vector<4x1280xbf16> to vector<4x1280xf32>
      %c60 = arith.constant 60 : index
      %c0_69 = arith.constant 0 : index
      %105 = vector.load %arg7[%c60, %c0_69] : memref<128x1280xf32, #tpu.memory_space<vmem>>, vector<4x1280xf32>
      tpu.vector_store %arg7[%c60, %c0_69], %104 {strides = array<i32>} : memref<128x1280xf32, #tpu.memory_space<vmem>>, vector<4x1280xf32>,
      %c0_70 = arith.constant 0 : index
      %c0_71 = arith.constant 0 : index
      %c121 = arith.constant 121 : index
      %106 = vector.load %arg2[%c0_70, %c0_71, %c121] : memref<1x4x1536xbf16, #tpu.memory_space<vmem>>, vector<1x4x1280xbf16>
      %107 = vector.shape_cast %106 : vector<1x4x1280xbf16> to vector<4x1280xbf16>
      %108 = arith.extf %107 : vector<4x1280xbf16> to vector<4x1280xf32>
      %c64 = arith.constant 64 : index
      %c0_72 = arith.constant 0 : index
      %109 = vector.load %arg7[%c64, %c0_72] : memref<128x1280xf32, #tpu.memory_space<vmem>>, vector<4x1280xf32>
      tpu.vector_store %arg7[%c64, %c0_72], %108 {strides = array<i32>} : memref<128x1280xf32, #tpu.memory_space<vmem>>, vector<4x1280xf32>,
      %c0_73 = arith.constant 0 : index
      %c0_74 = arith.constant 0 : index
      %c122 = arith.constant 122 : index
      %110 = vector.load %arg2[%c0_73, %c0_74, %c122] : memref<1x4x1536xbf16, #tpu.memory_space<vmem>>, vector<1x4x1280xbf16>
      %111 = vector.shape_cast %110 : vector<1x4x1280xbf16> to vector<4x1280xbf16>
      %112 = arith.extf %111 : vector<4x1280xbf16> to vector<4x1280xf32>
      %c68 = arith.constant 68 : index
      %c0_75 = arith.constant 0 : index
      %113 = vector.load %arg7[%c68, %c0_75] : memref<128x1280xf32, #tpu.memory_space<vmem>>, vector<4x1280xf32>
      tpu.vector_store %arg7[%c68, %c0_75], %112 {strides = array<i32>} : memref<128x1280xf32, #tpu.memory_space<vmem>>, vector<4x1280xf32>,
      %c0_76 = arith.constant 0 : index
      %c0_77 = arith.constant 0 : index
      %c200 = arith.constant 200 : index
      %114 = vector.load %arg2[%c0_76, %c0_77, %c200] : memref<1x4x1536xbf16, #tpu.memory_space<vmem>>, vector<1x4x1280xbf16>
      %115 = vector.shape_cast %114 : vector<1x4x1280xbf16> to vector<4x1280xbf16>
      %116 = arith.extf %115 : vector<4x1280xbf16> to vector<4x1280xf32>
      %c72 = arith.constant 72 : index
      %c0_78 = arith.constant 0 : index
      %117 = vector.load %arg7[%c72, %c0_78] : memref<128x1280xf32, #tpu.memory_space<vmem>>, vector<4x1280xf32>
      tpu.vector_store %arg7[%c72, %c0_78], %116 {strides = array<i32>} : memref<128x1280xf32, #tpu.memory_space<vmem>>, vector<4x1280xf32>,
      %c0_79 = arith.constant 0 : index
      %c0_80 = arith.constant 0 : index
      %c201 = arith.constant 201 : index
      %118 = vector.load %arg2[%c0_79, %c0_80, %c201] : memref<1x4x1536xbf16, #tpu.memory_space<vmem>>, vector<1x4x1280xbf16>
      %119 = vector.shape_cast %118 : vector<1x4x1280xbf16> to vector<4x1280xbf16>
      %120 = arith.extf %119 : vector<4x1280xbf16> to vector<4x1280xf32>
      %c76 = arith.constant 76 : index
      %c0_81 = arith.constant 0 : index
      %121 = vector.load %arg7[%c76, %c0_81] : memref<128x1280xf32, #tpu.memory_space<vmem>>, vector<4x1280xf32>
      tpu.vector_store %arg7[%c76, %c0_81], %120 {strides = array<i32>} : memref<128x1280xf32, #tpu.memory_space<vmem>>, vector<4x1280xf32>,
      %c0_82 = arith.constant 0 : index
      %c0_83 = arith.constant 0 : index
      %c202 = arith.constant 202 : index
      %122 = vector.load %arg2[%c0_82, %c0_83, %c202] : memref<1x4x1536xbf16, #tpu.memory_space<vmem>>, vector<1x4x1280xbf16>
      %123 = vector.shape_cast %122 : vector<1x4x1280xbf16> to vector<4x1280xbf16>
      %124 = arith.extf %123 : vector<4x1280xbf16> to vector<4x1280xf32>
      %c80 = arith.constant 80 : index
      %c0_84 = arith.constant 0 : index
      %125 = vector.load %arg7[%c80, %c0_84] : memref<128x1280xf32, #tpu.memory_space<vmem>>, vector<4x1280xf32>
      tpu.vector_store %arg7[%c80, %c0_84], %124 {strides = array<i32>} : memref<128x1280xf32, #tpu.memory_space<vmem>>, vector<4x1280xf32>,
      %c0_85 = arith.constant 0 : index
      %c0_86 = arith.constant 0 : index
      %c210 = arith.constant 210 : index
      %126 = vector.load %arg2[%c0_85, %c0_86, %c210] : memref<1x4x1536xbf16, #tpu.memory_space<vmem>>, vector<1x4x1280xbf16>
      %127 = vector.shape_cast %126 : vector<1x4x1280xbf16> to vector<4x1280xbf16>
      %128 = arith.extf %127 : vector<4x1280xbf16> to vector<4x1280xf32>
      %c84 = arith.constant 84 : index
      %c0_87 = arith.constant 0 : index
      %129 = vector.load %arg7[%c84, %c0_87] : memref<128x1280xf32, #tpu.memory_space<vmem>>, vector<4x1280xf32>
      tpu.vector_store %arg7[%c84, %c0_87], %128 {strides = array<i32>} : memref<128x1280xf32, #tpu.memory_space<vmem>>, vector<4x1280xf32>,
      %c0_88 = arith.constant 0 : index
      %c0_89 = arith.constant 0 : index
      %c211 = arith.constant 211 : index
      %130 = vector.load %arg2[%c0_88, %c0_89, %c211] : memref<1x4x1536xbf16, #tpu.memory_space<vmem>>, vector<1x4x1280xbf16>
      %131 = vector.shape_cast %130 : vector<1x4x1280xbf16> to vector<4x1280xbf16>
      %132 = arith.extf %131 : vector<4x1280xbf16> to vector<4x1280xf32>
      %c88 = arith.constant 88 : index
      %c0_90 = arith.constant 0 : index
      %133 = vector.load %arg7[%c88, %c0_90] : memref<128x1280xf32, #tpu.memory_space<vmem>>, vector<4x1280xf32>
      tpu.vector_store %arg7[%c88, %c0_90], %132 {strides = array<i32>} : memref<128x1280xf32, #tpu.memory_space<vmem>>, vector<4x1280xf32>,
      %c0_91 = arith.constant 0 : index
      %c0_92 = arith.constant 0 : index
      %c212 = arith.constant 212 : index
      %134 = vector.load %arg2[%c0_91, %c0_92, %c212] : memref<1x4x1536xbf16, #tpu.memory_space<vmem>>, vector<1x4x1280xbf16>
      %135 = vector.shape_cast %134 : vector<1x4x1280xbf16> to vector<4x1280xbf16>
      %136 = arith.extf %135 : vector<4x1280xbf16> to vector<4x1280xf32>
      %c92 = arith.constant 92 : index
      %c0_93 = arith.constant 0 : index
      %137 = vector.load %arg7[%c92, %c0_93] : memref<128x1280xf32, #tpu.memory_space<vmem>>, vector<4x1280xf32>
      tpu.vector_store %arg7[%c92, %c0_93], %136 {strides = array<i32>} : memref<128x1280xf32, #tpu.memory_space<vmem>>, vector<4x1280xf32>,
      %c0_94 = arith.constant 0 : index
      %c0_95 = arith.constant 0 : index
      %c220 = arith.constant 220 : index
      %138 = vector.load %arg2[%c0_94, %c0_95, %c220] : memref<1x4x1536xbf16, #tpu.memory_space<vmem>>, vector<1x4x1280xbf16>
      %139 = vector.shape_cast %138 : vector<1x4x1280xbf16> to vector<4x1280xbf16>
      %140 = arith.extf %139 : vector<4x1280xbf16> to vector<4x1280xf32>
      %c96 = arith.constant 96 : index
      %c0_96 = arith.constant 0 : index
      %141 = vector.load %arg7[%c96, %c0_96] : memref<128x1280xf32, #tpu.memory_space<vmem>>, vector<4x1280xf32>
      tpu.vector_store %arg7[%c96, %c0_96], %140 {strides = array<i32>} : memref<128x1280xf32, #tpu.memory_space<vmem>>, vector<4x1280xf32>,
      %c0_97 = arith.constant 0 : index
      %c0_98 = arith.constant 0 : index
      %c221 = arith.constant 221 : index
      %142 = vector.load %arg2[%c0_97, %c0_98, %c221] : memref<1x4x1536xbf16, #tpu.memory_space<vmem>>, vector<1x4x1280xbf16>
      %143 = vector.shape_cast %142 : vector<1x4x1280xbf16> to vector<4x1280xbf16>
      %144 = arith.extf %143 : vector<4x1280xbf16> to vector<4x1280xf32>
      %c100_99 = arith.constant 100 : index
      %c0_100 = arith.constant 0 : index
      %145 = vector.load %arg7[%c100_99, %c0_100] : memref<128x1280xf32, #tpu.memory_space<vmem>>, vector<4x1280xf32>
      tpu.vector_store %arg7[%c100_99, %c0_100], %144 {strides = array<i32>} : memref<128x1280xf32, #tpu.memory_space<vmem>>, vector<4x1280xf32>,
      %c0_101 = arith.constant 0 : index
      %c0_102 = arith.constant 0 : index
      %c222 = arith.constant 222 : index
      %146 = vector.load %arg2[%c0_101, %c0_102, %c222] : memref<1x4x1536xbf16, #tpu.memory_space<vmem>>, vector<1x4x1280xbf16>
      %147 = vector.shape_cast %146 : vector<1x4x1280xbf16> to vector<4x1280xbf16>
      %148 = arith.extf %147 : vector<4x1280xbf16> to vector<4x1280xf32>
      %c104 = arith.constant 104 : index
      %c0_103 = arith.constant 0 : index
      %149 = vector.load %arg7[%c104, %c0_103] : memref<128x1280xf32, #tpu.memory_space<vmem>>, vector<4x1280xf32>
      tpu.vector_store %arg7[%c104, %c0_103], %148 {strides = array<i32>} : memref<128x1280xf32, #tpu.memory_space<vmem>>, vector<4x1280xf32>,
      %cst_104 = arith.constant 0.000000e+00 : f32
      %150 = vector.broadcast %cst_104 : f32 to vector<20x1280xf32>
      %c108 = arith.constant 108 : index
      %c0_105 = arith.constant 0 : index
      %151 = vector.load %arg7[%c108, %c0_105] : memref<128x1280xf32, #tpu.memory_space<vmem>>, vector<20x1280xf32>
      tpu.vector_store %arg7[%c108, %c0_105], %150 {strides = array<i32>} : memref<128x1280xf32, #tpu.memory_space<vmem>>, vector<20x1280xf32>,
    } else {
    }
    %c0 = arith.constant 0 : index
    %c0_1 = arith.constant 0 : index
    %3 = vector.load %arg3[%c0, %c0_1] : memref<8x128xbf16, #tpu.memory_space<vmem>>, vector<8x128xbf16>
    %c0_2 = arith.constant 0 : index
    %c0_3 = arith.constant 0 : index
    %4 = vector.load %arg7[%c0_2, %c0_3] : memref<128x1280xf32, #tpu.memory_space<vmem>>, vector<128x1280xf32>
    %5 = arith.truncf %4 : vector<128x1280xf32> to vector<128x1280xbf16>
    %cst = arith.constant dense<0.000000e+00> : vector<8x1280xf32>
    %6 = tpu.matmul %3, %5, %cst {dimension_numbers = #tpu.dot_dimension_numbers<[1], [0], [0], [1], [0, 0, 1, 1], [], []>} : vector<8x128xbf16>, vector<128x1280xbf16>, vector<8x1280xf32> -> vector<8x1280xf32>
    %c0_4 = arith.constant 0 : index
    %c0_5 = arith.constant 0 : index
    %7 = vector.load %arg4[%c0_4, %c0_5] : memref<1x1280xf32, #tpu.memory_space<vmem>>, vector<1x1280xf32>
    %8 = vector.broadcast %7 : vector<1x1280xf32> to vector<8x1280xf32>
    %9 = arith.mulf %6, %8 : vector<8x1280xf32>
    %cst_6 = arith.constant dense<0.000000e+00> : vector<8xf32>
    %10 = vector.multi_reduction <add>, %9, %cst_6 [1] : vector<8x1280xf32> to vector<8xf32>
    %11 = vector.shape_cast %10 : vector<8xf32> to vector<8x1xf32>
    %12 = arith.mulf %9, %6 : vector<8x1280xf32>
    %cst_7 = arith.constant dense<0.000000e+00> : vector<8xf32>
    %13 = vector.multi_reduction <add>, %12, %cst_7 [1] : vector<8x1280xf32> to vector<8xf32>
    %14 = vector.shape_cast %13 : vector<8xf32> to vector<8x1xf32>
    %cst_8 = arith.constant 0.001953125 : f32
    %15 = vector.broadcast %cst_8 : f32 to vector<8x1xf32>
    %16 = arith.mulf %11, %15 : vector<8x1xf32>
    %cst_9 = arith.constant 0.001953125 : f32
    %17 = vector.broadcast %cst_9 : f32 to vector<8x1xf32>
    %18 = arith.mulf %14, %17 : vector<8x1xf32>
    %19 = arith.mulf %16, %16 : vector<8x1xf32>
    %20 = arith.subf %18, %19 : vector<8x1xf32>
    %cst_10 = arith.constant 0.000000e+00 : f32
    %21 = vector.broadcast %cst_10 : f32 to vector<8x1xf32>
    %22 = arith.maximumf %20, %21 : vector<8x1xf32>
    %23 = vector.broadcast %16 : vector<8x1xf32> to vector<8x1280xf32>
    %24 = arith.subf %6, %23 : vector<8x1280xf32>
    %cst_11 = arith.constant 9.99999974E-6 : f32
    %25 = vector.broadcast %cst_11 : f32 to vector<8x1xf32>
    %26 = arith.addf %22, %25 : vector<8x1xf32>
    %27 = math.rsqrt %26 : vector<8x1xf32>
    %28 = vector.broadcast %27 : vector<8x1xf32> to vector<8x1280xf32>
    %29 = arith.mulf %24, %28 : vector<8x1280xf32>
    %c0_12 = arith.constant 0 : index
    %c0_13 = arith.constant 0 : index
    %30 = memref.load %arg5[%c0_12, %c0_13] : memref<1x1xf32, #tpu.memory_space<smem>>
    %cst_14 = arith.constant 0.000000e+00 : f32
    %31 = vector.broadcast %cst_14 : f32 to vector<8x1280xf32>
    %32 = arith.cmpf oge, %29, %31 : vector<8x1280xf32>
    %33 = vector.broadcast %30 : f32 to vector<8x1280xf32>
    %34 = arith.mulf %33, %29 : vector<8x1280xf32>
    %35 = arith.select %32, %29, %34 : vector<8x1280xi1>, vector<8x1280xf32>
    %36 = vector.broadcast %7 : vector<1x1280xf32> to vector<8x1280xf32>
    %37 = arith.mulf %35, %36 : vector<8x1280xf32>
    %38 = arith.truncf %37 : vector<8x1280xf32> to vector<8x1280xbf16>
    %c0_15 = arith.constant 0 : index
    %c0_16 = arith.constant 0 : index
    %c0_17 = arith.constant 0 : index
    %39 = vector.load %arg6[%c0_15, %c0_16, %c0_17] : memref<1x8x1280xbf16, #tpu.memory_space<vmem>>, vector<1x8x1280xbf16>
    %40 = vector.shape_cast %39 : vector<1x8x1280xbf16> to vector<8x1280xbf16>
    %41 = vector.shape_cast %38 : vector<8x1280xbf16> to vector<1x8x1280xbf16>
    tpu.vector_store %arg6[%c0_15, %c0_16, %c0_17], %41 {strides = array<i32>} : memref<1x8x1280xbf16, #tpu.memory_space<vmem>>, vector<1x8x1280xbf16>,
    return
  }
  func.func @transform_0(%arg0: i32, %arg1: i32) -> (i32, i32, i32) {
    %c0_i32 = arith.constant 0 : i32
    %c0_i32_0 = arith.constant 0 : i32
    %c0_i32_1 = arith.constant 0 : i32
    return %arg0, %c0_i32, %c0_i32_0 : i32, i32, i32
  }
  func.func @transform_1(%arg0: i32, %arg1: i32) -> (i32, i32) {
    %c0_i32 = arith.constant 0 : i32
    %c0_i32_0 = arith.constant 0 : i32
    return %arg1, %c0_i32 : i32, i32
  }
  func.func @transform_2(%arg0: i32, %arg1: i32) -> (i32, i32) {
    %c0_i32 = arith.constant 0 : i32
    %c0_i32_0 = arith.constant 0 : i32
    %c0_i32_1 = arith.constant 0 : i32
    return %c0_i32, %c0_i32_0 : i32, i32
  }
  func.func @transform_3(%arg0: i32, %arg1: i32) -> (i32, i32) {
    %c0_i32 = arith.constant 0 : i32
    %c0_i32_0 = arith.constant 0 : i32
    %c0_i32_1 = arith.constant 0 : i32
    return %c0_i32, %c0_i32_0 : i32, i32
  }
  func.func @transform_4(%arg0: i32, %arg1: i32) -> (i32, i32, i32) {
    %c0_i32 = arith.constant 0 : i32
    %c0_i32_0 = arith.constant 0 : i32
    return %arg0, %arg1, %c0_i32 : i32, i32, i32
  }
}

module attributes {stable_mosaic.version = 11 : i64} {
  func.func @_conv_in_prelu_kernel(%arg0: i32, %arg1: i32, %arg2: memref<1x8x1280xbf16, #tpu.memory_space<vmem>>, %arg3: memref<8x256xbf16, #tpu.memory_space<vmem>>, %arg4: memref<1x1024xf32, #tpu.memory_space<vmem>>, %arg5: memref<1x1xf32, #tpu.memory_space<smem>>, %arg6: memref<1x8x1024xf32, #tpu.memory_space<vmem>>, %arg7: memref<256x1024xf32, #tpu.memory_space<vmem>>) attributes {dimension_semantics = [#tpu.dimension_semantics<parallel>, #tpu.dimension_semantics<arbitrary>], iteration_bounds = array<i64: 2, 1>, scalar_prefetch = 0 : i64, scratch_operands = 1 : i64, tpu.core_type = #tpu.core_type<tc>, window_params = [{transform_indices = @transform_0, window_bounds = array<i64: 1, 8, 1280>}, {transform_indices = @transform_1, window_bounds = array<i64: 8, 256>}, {pipeline_mode = #tpu.pipeline_mode<synchronous>, transform_indices = @transform_2, window_bounds = array<i64: 1, 1024>}, {transform_indices = @transform_3, window_bounds = array<i64: 1, 1>}, {transform_indices = @transform_4, window_bounds = array<i64: 1, 8, 1024>}]} {
    %c0_i32 = arith.constant 0 : i32
    %0 = arith.cmpi eq, %arg1, %c0_i32 : i32
    %1 = arith.extui %0 : i1 to i32
    %c0_i32_0 = arith.constant 0 : i32
    %2 = arith.cmpi ne, %1, %c0_i32_0 : i32
    scf.if %2 {
      %c0_18 = arith.constant 0 : index
      %c0_19 = arith.constant 0 : index
      %c0_20 = arith.constant 0 : index
      %41 = vector.load %arg2[%c0_18, %c0_19, %c0_20] : memref<1x8x1280xbf16, #tpu.memory_space<vmem>>, vector<1x8x1024xbf16>
      %42 = vector.shape_cast %41 : vector<1x8x1024xbf16> to vector<8x1024xbf16>
      %43 = arith.extf %42 : vector<8x1024xbf16> to vector<8x1024xf32>
      %c0_21 = arith.constant 0 : index
      %c0_22 = arith.constant 0 : index
      %44 = vector.load %arg7[%c0_21, %c0_22] : memref<256x1024xf32, #tpu.memory_space<vmem>>, vector<8x1024xf32>
      tpu.vector_store %arg7[%c0_21, %c0_22], %43 {strides = array<i32>} : memref<256x1024xf32, #tpu.memory_space<vmem>>, vector<8x1024xf32>,
      %c0_23 = arith.constant 0 : index
      %c0_24 = arith.constant 0 : index
      %c1 = arith.constant 1 : index
      %45 = vector.load %arg2[%c0_23, %c0_24, %c1] : memref<1x8x1280xbf16, #tpu.memory_space<vmem>>, vector<1x8x1024xbf16>
      %46 = vector.shape_cast %45 : vector<1x8x1024xbf16> to vector<8x1024xbf16>
      %47 = arith.extf %46 : vector<8x1024xbf16> to vector<8x1024xf32>
      %c8 = arith.constant 8 : index
      %c0_25 = arith.constant 0 : index
      %48 = vector.load %arg7[%c8, %c0_25] : memref<256x1024xf32, #tpu.memory_space<vmem>>, vector<8x1024xf32>
      tpu.vector_store %arg7[%c8, %c0_25], %47 {strides = array<i32>} : memref<256x1024xf32, #tpu.memory_space<vmem>>, vector<8x1024xf32>,
      %c0_26 = arith.constant 0 : index
      %c0_27 = arith.constant 0 : index
      %c2 = arith.constant 2 : index
      %49 = vector.load %arg2[%c0_26, %c0_27, %c2] : memref<1x8x1280xbf16, #tpu.memory_space<vmem>>, vector<1x8x1024xbf16>
      %50 = vector.shape_cast %49 : vector<1x8x1024xbf16> to vector<8x1024xbf16>
      %51 = arith.extf %50 : vector<8x1024xbf16> to vector<8x1024xf32>
      %c16 = arith.constant 16 : index
      %c0_28 = arith.constant 0 : index
      %52 = vector.load %arg7[%c16, %c0_28] : memref<256x1024xf32, #tpu.memory_space<vmem>>, vector<8x1024xf32>
      tpu.vector_store %arg7[%c16, %c0_28], %51 {strides = array<i32>} : memref<256x1024xf32, #tpu.memory_space<vmem>>, vector<8x1024xf32>,
      %c0_29 = arith.constant 0 : index
      %c0_30 = arith.constant 0 : index
      %c10 = arith.constant 10 : index
      %53 = vector.load %arg2[%c0_29, %c0_30, %c10] : memref<1x8x1280xbf16, #tpu.memory_space<vmem>>, vector<1x8x1024xbf16>
      %54 = vector.shape_cast %53 : vector<1x8x1024xbf16> to vector<8x1024xbf16>
      %55 = arith.extf %54 : vector<8x1024xbf16> to vector<8x1024xf32>
      %c24 = arith.constant 24 : index
      %c0_31 = arith.constant 0 : index
      %56 = vector.load %arg7[%c24, %c0_31] : memref<256x1024xf32, #tpu.memory_space<vmem>>, vector<8x1024xf32>
      tpu.vector_store %arg7[%c24, %c0_31], %55 {strides = array<i32>} : memref<256x1024xf32, #tpu.memory_space<vmem>>, vector<8x1024xf32>,
      %c0_32 = arith.constant 0 : index
      %c0_33 = arith.constant 0 : index
      %c11 = arith.constant 11 : index
      %57 = vector.load %arg2[%c0_32, %c0_33, %c11] : memref<1x8x1280xbf16, #tpu.memory_space<vmem>>, vector<1x8x1024xbf16>
      %58 = vector.shape_cast %57 : vector<1x8x1024xbf16> to vector<8x1024xbf16>
      %59 = arith.extf %58 : vector<8x1024xbf16> to vector<8x1024xf32>
      %c32 = arith.constant 32 : index
      %c0_34 = arith.constant 0 : index
      %60 = vector.load %arg7[%c32, %c0_34] : memref<256x1024xf32, #tpu.memory_space<vmem>>, vector<8x1024xf32>
      tpu.vector_store %arg7[%c32, %c0_34], %59 {strides = array<i32>} : memref<256x1024xf32, #tpu.memory_space<vmem>>, vector<8x1024xf32>,
      %c0_35 = arith.constant 0 : index
      %c0_36 = arith.constant 0 : index
      %c12 = arith.constant 12 : index
      %61 = vector.load %arg2[%c0_35, %c0_36, %c12] : memref<1x8x1280xbf16, #tpu.memory_space<vmem>>, vector<1x8x1024xbf16>
      %62 = vector.shape_cast %61 : vector<1x8x1024xbf16> to vector<8x1024xbf16>
      %63 = arith.extf %62 : vector<8x1024xbf16> to vector<8x1024xf32>
      %c40 = arith.constant 40 : index
      %c0_37 = arith.constant 0 : index
      %64 = vector.load %arg7[%c40, %c0_37] : memref<256x1024xf32, #tpu.memory_space<vmem>>, vector<8x1024xf32>
      tpu.vector_store %arg7[%c40, %c0_37], %63 {strides = array<i32>} : memref<256x1024xf32, #tpu.memory_space<vmem>>, vector<8x1024xf32>,
      %c0_38 = arith.constant 0 : index
      %c0_39 = arith.constant 0 : index
      %c20 = arith.constant 20 : index
      %65 = vector.load %arg2[%c0_38, %c0_39, %c20] : memref<1x8x1280xbf16, #tpu.memory_space<vmem>>, vector<1x8x1024xbf16>
      %66 = vector.shape_cast %65 : vector<1x8x1024xbf16> to vector<8x1024xbf16>
      %67 = arith.extf %66 : vector<8x1024xbf16> to vector<8x1024xf32>
      %c48 = arith.constant 48 : index
      %c0_40 = arith.constant 0 : index
      %68 = vector.load %arg7[%c48, %c0_40] : memref<256x1024xf32, #tpu.memory_space<vmem>>, vector<8x1024xf32>
      tpu.vector_store %arg7[%c48, %c0_40], %67 {strides = array<i32>} : memref<256x1024xf32, #tpu.memory_space<vmem>>, vector<8x1024xf32>,
      %c0_41 = arith.constant 0 : index
      %c0_42 = arith.constant 0 : index
      %c21 = arith.constant 21 : index
      %69 = vector.load %arg2[%c0_41, %c0_42, %c21] : memref<1x8x1280xbf16, #tpu.memory_space<vmem>>, vector<1x8x1024xbf16>
      %70 = vector.shape_cast %69 : vector<1x8x1024xbf16> to vector<8x1024xbf16>
      %71 = arith.extf %70 : vector<8x1024xbf16> to vector<8x1024xf32>
      %c56 = arith.constant 56 : index
      %c0_43 = arith.constant 0 : index
      %72 = vector.load %arg7[%c56, %c0_43] : memref<256x1024xf32, #tpu.memory_space<vmem>>, vector<8x1024xf32>
      tpu.vector_store %arg7[%c56, %c0_43], %71 {strides = array<i32>} : memref<256x1024xf32, #tpu.memory_space<vmem>>, vector<8x1024xf32>,
      %c0_44 = arith.constant 0 : index
      %c0_45 = arith.constant 0 : index
      %c22 = arith.constant 22 : index
      %73 = vector.load %arg2[%c0_44, %c0_45, %c22] : memref<1x8x1280xbf16, #tpu.memory_space<vmem>>, vector<1x8x1024xbf16>
      %74 = vector.shape_cast %73 : vector<1x8x1024xbf16> to vector<8x1024xbf16>
      %75 = arith.extf %74 : vector<8x1024xbf16> to vector<8x1024xf32>
      %c64 = arith.constant 64 : index
      %c0_46 = arith.constant 0 : index
      %76 = vector.load %arg7[%c64, %c0_46] : memref<256x1024xf32, #tpu.memory_space<vmem>>, vector<8x1024xf32>
      tpu.vector_store %arg7[%c64, %c0_46], %75 {strides = array<i32>} : memref<256x1024xf32, #tpu.memory_space<vmem>>, vector<8x1024xf32>,
      %c0_47 = arith.constant 0 : index
      %c0_48 = arith.constant 0 : index
      %c100 = arith.constant 100 : index
      %77 = vector.load %arg2[%c0_47, %c0_48, %c100] : memref<1x8x1280xbf16, #tpu.memory_space<vmem>>, vector<1x8x1024xbf16>
      %78 = vector.shape_cast %77 : vector<1x8x1024xbf16> to vector<8x1024xbf16>
      %79 = arith.extf %78 : vector<8x1024xbf16> to vector<8x1024xf32>
      %c72 = arith.constant 72 : index
      %c0_49 = arith.constant 0 : index
      %80 = vector.load %arg7[%c72, %c0_49] : memref<256x1024xf32, #tpu.memory_space<vmem>>, vector<8x1024xf32>
      tpu.vector_store %arg7[%c72, %c0_49], %79 {strides = array<i32>} : memref<256x1024xf32, #tpu.memory_space<vmem>>, vector<8x1024xf32>,
      %c0_50 = arith.constant 0 : index
      %c0_51 = arith.constant 0 : index
      %c101 = arith.constant 101 : index
      %81 = vector.load %arg2[%c0_50, %c0_51, %c101] : memref<1x8x1280xbf16, #tpu.memory_space<vmem>>, vector<1x8x1024xbf16>
      %82 = vector.shape_cast %81 : vector<1x8x1024xbf16> to vector<8x1024xbf16>
      %83 = arith.extf %82 : vector<8x1024xbf16> to vector<8x1024xf32>
      %c80 = arith.constant 80 : index
      %c0_52 = arith.constant 0 : index
      %84 = vector.load %arg7[%c80, %c0_52] : memref<256x1024xf32, #tpu.memory_space<vmem>>, vector<8x1024xf32>
      tpu.vector_store %arg7[%c80, %c0_52], %83 {strides = array<i32>} : memref<256x1024xf32, #tpu.memory_space<vmem>>, vector<8x1024xf32>,
      %c0_53 = arith.constant 0 : index
      %c0_54 = arith.constant 0 : index
      %c102 = arith.constant 102 : index
      %85 = vector.load %arg2[%c0_53, %c0_54, %c102] : memref<1x8x1280xbf16, #tpu.memory_space<vmem>>, vector<1x8x1024xbf16>
      %86 = vector.shape_cast %85 : vector<1x8x1024xbf16> to vector<8x1024xbf16>
      %87 = arith.extf %86 : vector<8x1024xbf16> to vector<8x1024xf32>
      %c88 = arith.constant 88 : index
      %c0_55 = arith.constant 0 : index
      %88 = vector.load %arg7[%c88, %c0_55] : memref<256x1024xf32, #tpu.memory_space<vmem>>, vector<8x1024xf32>
      tpu.vector_store %arg7[%c88, %c0_55], %87 {strides = array<i32>} : memref<256x1024xf32, #tpu.memory_space<vmem>>, vector<8x1024xf32>,
      %c0_56 = arith.constant 0 : index
      %c0_57 = arith.constant 0 : index
      %c110 = arith.constant 110 : index
      %89 = vector.load %arg2[%c0_56, %c0_57, %c110] : memref<1x8x1280xbf16, #tpu.memory_space<vmem>>, vector<1x8x1024xbf16>
      %90 = vector.shape_cast %89 : vector<1x8x1024xbf16> to vector<8x1024xbf16>
      %91 = arith.extf %90 : vector<8x1024xbf16> to vector<8x1024xf32>
      %c96 = arith.constant 96 : index
      %c0_58 = arith.constant 0 : index
      %92 = vector.load %arg7[%c96, %c0_58] : memref<256x1024xf32, #tpu.memory_space<vmem>>, vector<8x1024xf32>
      tpu.vector_store %arg7[%c96, %c0_58], %91 {strides = array<i32>} : memref<256x1024xf32, #tpu.memory_space<vmem>>, vector<8x1024xf32>,
      %c0_59 = arith.constant 0 : index
      %c0_60 = arith.constant 0 : index
      %c111 = arith.constant 111 : index
      %93 = vector.load %arg2[%c0_59, %c0_60, %c111] : memref<1x8x1280xbf16, #tpu.memory_space<vmem>>, vector<1x8x1024xbf16>
      %94 = vector.shape_cast %93 : vector<1x8x1024xbf16> to vector<8x1024xbf16>
      %95 = arith.extf %94 : vector<8x1024xbf16> to vector<8x1024xf32>
      %c104 = arith.constant 104 : index
      %c0_61 = arith.constant 0 : index
      %96 = vector.load %arg7[%c104, %c0_61] : memref<256x1024xf32, #tpu.memory_space<vmem>>, vector<8x1024xf32>
      tpu.vector_store %arg7[%c104, %c0_61], %95 {strides = array<i32>} : memref<256x1024xf32, #tpu.memory_space<vmem>>, vector<8x1024xf32>,
      %c0_62 = arith.constant 0 : index
      %c0_63 = arith.constant 0 : index
      %c112 = arith.constant 112 : index
      %97 = vector.load %arg2[%c0_62, %c0_63, %c112] : memref<1x8x1280xbf16, #tpu.memory_space<vmem>>, vector<1x8x1024xbf16>
      %98 = vector.shape_cast %97 : vector<1x8x1024xbf16> to vector<8x1024xbf16>
      %99 = arith.extf %98 : vector<8x1024xbf16> to vector<8x1024xf32>
      %c112_64 = arith.constant 112 : index
      %c0_65 = arith.constant 0 : index
      %100 = vector.load %arg7[%c112_64, %c0_65] : memref<256x1024xf32, #tpu.memory_space<vmem>>, vector<8x1024xf32>
      tpu.vector_store %arg7[%c112_64, %c0_65], %99 {strides = array<i32>} : memref<256x1024xf32, #tpu.memory_space<vmem>>, vector<8x1024xf32>,
      %c0_66 = arith.constant 0 : index
      %c0_67 = arith.constant 0 : index
      %c120 = arith.constant 120 : index
      %101 = vector.load %arg2[%c0_66, %c0_67, %c120] : memref<1x8x1280xbf16, #tpu.memory_space<vmem>>, vector<1x8x1024xbf16>
      %102 = vector.shape_cast %101 : vector<1x8x1024xbf16> to vector<8x1024xbf16>
      %103 = arith.extf %102 : vector<8x1024xbf16> to vector<8x1024xf32>
      %c120_68 = arith.constant 120 : index
      %c0_69 = arith.constant 0 : index
      %104 = vector.load %arg7[%c120_68, %c0_69] : memref<256x1024xf32, #tpu.memory_space<vmem>>, vector<8x1024xf32>
      tpu.vector_store %arg7[%c120_68, %c0_69], %103 {strides = array<i32>} : memref<256x1024xf32, #tpu.memory_space<vmem>>, vector<8x1024xf32>,
      %c0_70 = arith.constant 0 : index
      %c0_71 = arith.constant 0 : index
      %c121 = arith.constant 121 : index
      %105 = vector.load %arg2[%c0_70, %c0_71, %c121] : memref<1x8x1280xbf16, #tpu.memory_space<vmem>>, vector<1x8x1024xbf16>
      %106 = vector.shape_cast %105 : vector<1x8x1024xbf16> to vector<8x1024xbf16>
      %107 = arith.extf %106 : vector<8x1024xbf16> to vector<8x1024xf32>
      %c128 = arith.constant 128 : index
      %c0_72 = arith.constant 0 : index
      %108 = vector.load %arg7[%c128, %c0_72] : memref<256x1024xf32, #tpu.memory_space<vmem>>, vector<8x1024xf32>
      tpu.vector_store %arg7[%c128, %c0_72], %107 {strides = array<i32>} : memref<256x1024xf32, #tpu.memory_space<vmem>>, vector<8x1024xf32>,
      %c0_73 = arith.constant 0 : index
      %c0_74 = arith.constant 0 : index
      %c122 = arith.constant 122 : index
      %109 = vector.load %arg2[%c0_73, %c0_74, %c122] : memref<1x8x1280xbf16, #tpu.memory_space<vmem>>, vector<1x8x1024xbf16>
      %110 = vector.shape_cast %109 : vector<1x8x1024xbf16> to vector<8x1024xbf16>
      %111 = arith.extf %110 : vector<8x1024xbf16> to vector<8x1024xf32>
      %c136 = arith.constant 136 : index
      %c0_75 = arith.constant 0 : index
      %112 = vector.load %arg7[%c136, %c0_75] : memref<256x1024xf32, #tpu.memory_space<vmem>>, vector<8x1024xf32>
      tpu.vector_store %arg7[%c136, %c0_75], %111 {strides = array<i32>} : memref<256x1024xf32, #tpu.memory_space<vmem>>, vector<8x1024xf32>,
      %c0_76 = arith.constant 0 : index
      %c0_77 = arith.constant 0 : index
      %c200 = arith.constant 200 : index
      %113 = vector.load %arg2[%c0_76, %c0_77, %c200] : memref<1x8x1280xbf16, #tpu.memory_space<vmem>>, vector<1x8x1024xbf16>
      %114 = vector.shape_cast %113 : vector<1x8x1024xbf16> to vector<8x1024xbf16>
      %115 = arith.extf %114 : vector<8x1024xbf16> to vector<8x1024xf32>
      %c144 = arith.constant 144 : index
      %c0_78 = arith.constant 0 : index
      %116 = vector.load %arg7[%c144, %c0_78] : memref<256x1024xf32, #tpu.memory_space<vmem>>, vector<8x1024xf32>
      tpu.vector_store %arg7[%c144, %c0_78], %115 {strides = array<i32>} : memref<256x1024xf32, #tpu.memory_space<vmem>>, vector<8x1024xf32>,
      %c0_79 = arith.constant 0 : index
      %c0_80 = arith.constant 0 : index
      %c201 = arith.constant 201 : index
      %117 = vector.load %arg2[%c0_79, %c0_80, %c201] : memref<1x8x1280xbf16, #tpu.memory_space<vmem>>, vector<1x8x1024xbf16>
      %118 = vector.shape_cast %117 : vector<1x8x1024xbf16> to vector<8x1024xbf16>
      %119 = arith.extf %118 : vector<8x1024xbf16> to vector<8x1024xf32>
      %c152 = arith.constant 152 : index
      %c0_81 = arith.constant 0 : index
      %120 = vector.load %arg7[%c152, %c0_81] : memref<256x1024xf32, #tpu.memory_space<vmem>>, vector<8x1024xf32>
      tpu.vector_store %arg7[%c152, %c0_81], %119 {strides = array<i32>} : memref<256x1024xf32, #tpu.memory_space<vmem>>, vector<8x1024xf32>,
      %c0_82 = arith.constant 0 : index
      %c0_83 = arith.constant 0 : index
      %c202 = arith.constant 202 : index
      %121 = vector.load %arg2[%c0_82, %c0_83, %c202] : memref<1x8x1280xbf16, #tpu.memory_space<vmem>>, vector<1x8x1024xbf16>
      %122 = vector.shape_cast %121 : vector<1x8x1024xbf16> to vector<8x1024xbf16>
      %123 = arith.extf %122 : vector<8x1024xbf16> to vector<8x1024xf32>
      %c160 = arith.constant 160 : index
      %c0_84 = arith.constant 0 : index
      %124 = vector.load %arg7[%c160, %c0_84] : memref<256x1024xf32, #tpu.memory_space<vmem>>, vector<8x1024xf32>
      tpu.vector_store %arg7[%c160, %c0_84], %123 {strides = array<i32>} : memref<256x1024xf32, #tpu.memory_space<vmem>>, vector<8x1024xf32>,
      %c0_85 = arith.constant 0 : index
      %c0_86 = arith.constant 0 : index
      %c210 = arith.constant 210 : index
      %125 = vector.load %arg2[%c0_85, %c0_86, %c210] : memref<1x8x1280xbf16, #tpu.memory_space<vmem>>, vector<1x8x1024xbf16>
      %126 = vector.shape_cast %125 : vector<1x8x1024xbf16> to vector<8x1024xbf16>
      %127 = arith.extf %126 : vector<8x1024xbf16> to vector<8x1024xf32>
      %c168 = arith.constant 168 : index
      %c0_87 = arith.constant 0 : index
      %128 = vector.load %arg7[%c168, %c0_87] : memref<256x1024xf32, #tpu.memory_space<vmem>>, vector<8x1024xf32>
      tpu.vector_store %arg7[%c168, %c0_87], %127 {strides = array<i32>} : memref<256x1024xf32, #tpu.memory_space<vmem>>, vector<8x1024xf32>,
      %c0_88 = arith.constant 0 : index
      %c0_89 = arith.constant 0 : index
      %c211 = arith.constant 211 : index
      %129 = vector.load %arg2[%c0_88, %c0_89, %c211] : memref<1x8x1280xbf16, #tpu.memory_space<vmem>>, vector<1x8x1024xbf16>
      %130 = vector.shape_cast %129 : vector<1x8x1024xbf16> to vector<8x1024xbf16>
      %131 = arith.extf %130 : vector<8x1024xbf16> to vector<8x1024xf32>
      %c176 = arith.constant 176 : index
      %c0_90 = arith.constant 0 : index
      %132 = vector.load %arg7[%c176, %c0_90] : memref<256x1024xf32, #tpu.memory_space<vmem>>, vector<8x1024xf32>
      tpu.vector_store %arg7[%c176, %c0_90], %131 {strides = array<i32>} : memref<256x1024xf32, #tpu.memory_space<vmem>>, vector<8x1024xf32>,
      %c0_91 = arith.constant 0 : index
      %c0_92 = arith.constant 0 : index
      %c212 = arith.constant 212 : index
      %133 = vector.load %arg2[%c0_91, %c0_92, %c212] : memref<1x8x1280xbf16, #tpu.memory_space<vmem>>, vector<1x8x1024xbf16>
      %134 = vector.shape_cast %133 : vector<1x8x1024xbf16> to vector<8x1024xbf16>
      %135 = arith.extf %134 : vector<8x1024xbf16> to vector<8x1024xf32>
      %c184 = arith.constant 184 : index
      %c0_93 = arith.constant 0 : index
      %136 = vector.load %arg7[%c184, %c0_93] : memref<256x1024xf32, #tpu.memory_space<vmem>>, vector<8x1024xf32>
      tpu.vector_store %arg7[%c184, %c0_93], %135 {strides = array<i32>} : memref<256x1024xf32, #tpu.memory_space<vmem>>, vector<8x1024xf32>,
      %c0_94 = arith.constant 0 : index
      %c0_95 = arith.constant 0 : index
      %c220 = arith.constant 220 : index
      %137 = vector.load %arg2[%c0_94, %c0_95, %c220] : memref<1x8x1280xbf16, #tpu.memory_space<vmem>>, vector<1x8x1024xbf16>
      %138 = vector.shape_cast %137 : vector<1x8x1024xbf16> to vector<8x1024xbf16>
      %139 = arith.extf %138 : vector<8x1024xbf16> to vector<8x1024xf32>
      %c192 = arith.constant 192 : index
      %c0_96 = arith.constant 0 : index
      %140 = vector.load %arg7[%c192, %c0_96] : memref<256x1024xf32, #tpu.memory_space<vmem>>, vector<8x1024xf32>
      tpu.vector_store %arg7[%c192, %c0_96], %139 {strides = array<i32>} : memref<256x1024xf32, #tpu.memory_space<vmem>>, vector<8x1024xf32>,
      %c0_97 = arith.constant 0 : index
      %c0_98 = arith.constant 0 : index
      %c221 = arith.constant 221 : index
      %141 = vector.load %arg2[%c0_97, %c0_98, %c221] : memref<1x8x1280xbf16, #tpu.memory_space<vmem>>, vector<1x8x1024xbf16>
      %142 = vector.shape_cast %141 : vector<1x8x1024xbf16> to vector<8x1024xbf16>
      %143 = arith.extf %142 : vector<8x1024xbf16> to vector<8x1024xf32>
      %c200_99 = arith.constant 200 : index
      %c0_100 = arith.constant 0 : index
      %144 = vector.load %arg7[%c200_99, %c0_100] : memref<256x1024xf32, #tpu.memory_space<vmem>>, vector<8x1024xf32>
      tpu.vector_store %arg7[%c200_99, %c0_100], %143 {strides = array<i32>} : memref<256x1024xf32, #tpu.memory_space<vmem>>, vector<8x1024xf32>,
      %c0_101 = arith.constant 0 : index
      %c0_102 = arith.constant 0 : index
      %c222 = arith.constant 222 : index
      %145 = vector.load %arg2[%c0_101, %c0_102, %c222] : memref<1x8x1280xbf16, #tpu.memory_space<vmem>>, vector<1x8x1024xbf16>
      %146 = vector.shape_cast %145 : vector<1x8x1024xbf16> to vector<8x1024xbf16>
      %147 = arith.extf %146 : vector<8x1024xbf16> to vector<8x1024xf32>
      %c208 = arith.constant 208 : index
      %c0_103 = arith.constant 0 : index
      %148 = vector.load %arg7[%c208, %c0_103] : memref<256x1024xf32, #tpu.memory_space<vmem>>, vector<8x1024xf32>
      tpu.vector_store %arg7[%c208, %c0_103], %147 {strides = array<i32>} : memref<256x1024xf32, #tpu.memory_space<vmem>>, vector<8x1024xf32>,
      %cst_104 = arith.constant 0.000000e+00 : f32
      %149 = vector.broadcast %cst_104 : f32 to vector<40x1024xf32>
      %c216 = arith.constant 216 : index
      %c0_105 = arith.constant 0 : index
      %150 = vector.load %arg7[%c216, %c0_105] : memref<256x1024xf32, #tpu.memory_space<vmem>>, vector<40x1024xf32>
      tpu.vector_store %arg7[%c216, %c0_105], %149 {strides = array<i32>} : memref<256x1024xf32, #tpu.memory_space<vmem>>, vector<40x1024xf32>,
    } else {
    }
    %c0 = arith.constant 0 : index
    %c0_1 = arith.constant 0 : index
    %3 = vector.load %arg3[%c0, %c0_1] : memref<8x256xbf16, #tpu.memory_space<vmem>>, vector<8x256xbf16>
    %c0_2 = arith.constant 0 : index
    %c0_3 = arith.constant 0 : index
    %4 = vector.load %arg7[%c0_2, %c0_3] : memref<256x1024xf32, #tpu.memory_space<vmem>>, vector<256x1024xf32>
    %5 = arith.truncf %4 : vector<256x1024xf32> to vector<256x1024xbf16>
    %cst = arith.constant dense<0.000000e+00> : vector<8x1024xf32>
    %6 = tpu.matmul %3, %5, %cst {dimension_numbers = #tpu.dot_dimension_numbers<[1], [0], [0], [1], [0, 0, 1, 1], [], []>} : vector<8x256xbf16>, vector<256x1024xbf16>, vector<8x1024xf32> -> vector<8x1024xf32>
    %c0_4 = arith.constant 0 : index
    %c0_5 = arith.constant 0 : index
    %7 = vector.load %arg4[%c0_4, %c0_5] : memref<1x1024xf32, #tpu.memory_space<vmem>>, vector<1x1024xf32>
    %8 = vector.broadcast %7 : vector<1x1024xf32> to vector<8x1024xf32>
    %9 = arith.mulf %6, %8 : vector<8x1024xf32>
    %cst_6 = arith.constant dense<0.000000e+00> : vector<8xf32>
    %10 = vector.multi_reduction <add>, %9, %cst_6 [1] : vector<8x1024xf32> to vector<8xf32>
    %11 = vector.shape_cast %10 : vector<8xf32> to vector<8x1xf32>
    %12 = arith.mulf %9, %6 : vector<8x1024xf32>
    %cst_7 = arith.constant dense<0.000000e+00> : vector<8xf32>
    %13 = vector.multi_reduction <add>, %12, %cst_7 [1] : vector<8x1024xf32> to vector<8xf32>
    %14 = vector.shape_cast %13 : vector<8xf32> to vector<8x1xf32>
    %cst_8 = arith.constant 0.001953125 : f32
    %15 = vector.broadcast %cst_8 : f32 to vector<8x1xf32>
    %16 = arith.mulf %11, %15 : vector<8x1xf32>
    %cst_9 = arith.constant 0.001953125 : f32
    %17 = vector.broadcast %cst_9 : f32 to vector<8x1xf32>
    %18 = arith.mulf %14, %17 : vector<8x1xf32>
    %19 = arith.mulf %16, %16 : vector<8x1xf32>
    %20 = arith.subf %18, %19 : vector<8x1xf32>
    %cst_10 = arith.constant 0.000000e+00 : f32
    %21 = vector.broadcast %cst_10 : f32 to vector<8x1xf32>
    %22 = arith.maximumf %20, %21 : vector<8x1xf32>
    %23 = vector.broadcast %16 : vector<8x1xf32> to vector<8x1024xf32>
    %24 = arith.subf %6, %23 : vector<8x1024xf32>
    %cst_11 = arith.constant 9.99999974E-6 : f32
    %25 = vector.broadcast %cst_11 : f32 to vector<8x1xf32>
    %26 = arith.addf %22, %25 : vector<8x1xf32>
    %27 = math.rsqrt %26 : vector<8x1xf32>
    %28 = vector.broadcast %27 : vector<8x1xf32> to vector<8x1024xf32>
    %29 = arith.mulf %24, %28 : vector<8x1024xf32>
    %c0_12 = arith.constant 0 : index
    %c0_13 = arith.constant 0 : index
    %30 = memref.load %arg5[%c0_12, %c0_13] : memref<1x1xf32, #tpu.memory_space<smem>>
    %cst_14 = arith.constant 0.000000e+00 : f32
    %31 = vector.broadcast %cst_14 : f32 to vector<8x1024xf32>
    %32 = arith.cmpf oge, %29, %31 : vector<8x1024xf32>
    %33 = vector.broadcast %30 : f32 to vector<8x1024xf32>
    %34 = arith.mulf %33, %29 : vector<8x1024xf32>
    %35 = arith.select %32, %29, %34 : vector<8x1024xi1>, vector<8x1024xf32>
    %36 = vector.broadcast %7 : vector<1x1024xf32> to vector<8x1024xf32>
    %37 = arith.mulf %35, %36 : vector<8x1024xf32>
    %c0_15 = arith.constant 0 : index
    %c0_16 = arith.constant 0 : index
    %c0_17 = arith.constant 0 : index
    %38 = vector.load %arg6[%c0_15, %c0_16, %c0_17] : memref<1x8x1024xf32, #tpu.memory_space<vmem>>, vector<1x8x1024xf32>
    %39 = vector.shape_cast %38 : vector<1x8x1024xf32> to vector<8x1024xf32>
    %40 = vector.shape_cast %37 : vector<8x1024xf32> to vector<1x8x1024xf32>
    tpu.vector_store %arg6[%c0_15, %c0_16, %c0_17], %40 {strides = array<i32>} : memref<1x8x1024xf32, #tpu.memory_space<vmem>>, vector<1x8x1024xf32>,
    return
  }
  func.func @transform_0(%arg0: i32, %arg1: i32) -> (i32, i32, i32) {
    %c0_i32 = arith.constant 0 : i32
    %c0_i32_0 = arith.constant 0 : i32
    %c0_i32_1 = arith.constant 0 : i32
    return %arg0, %c0_i32, %c0_i32_0 : i32, i32, i32
  }
  func.func @transform_1(%arg0: i32, %arg1: i32) -> (i32, i32) {
    %c0_i32 = arith.constant 0 : i32
    %c0_i32_0 = arith.constant 0 : i32
    return %arg1, %c0_i32 : i32, i32
  }
  func.func @transform_2(%arg0: i32, %arg1: i32) -> (i32, i32) {
    %c0_i32 = arith.constant 0 : i32
    %c0_i32_0 = arith.constant 0 : i32
    %c0_i32_1 = arith.constant 0 : i32
    return %c0_i32, %c0_i32_0 : i32, i32
  }
  func.func @transform_3(%arg0: i32, %arg1: i32) -> (i32, i32) {
    %c0_i32 = arith.constant 0 : i32
    %c0_i32_0 = arith.constant 0 : i32
    %c0_i32_1 = arith.constant 0 : i32
    return %c0_i32, %c0_i32_0 : i32, i32
  }
  func.func @transform_4(%arg0: i32, %arg1: i32) -> (i32, i32, i32) {
    %c0_i32 = arith.constant 0 : i32
    %c0_i32_0 = arith.constant 0 : i32
    return %arg0, %arg1, %c0_i32 : i32, i32, i32
  }
}

</mosaic_0001>

<bundles_post_ra>
// kernel: basic_conv3d_forward.3
= control target key start
LH: loop header
LB: loop body
LE: loop exit
PB: predicated region body
PF: predicated region fallthrough
CT: control target
= control target key end

     0   :  { %s3509_s17 = smov 0   ;;  %s3511_s18 = smov 0   ;;  %s5249_s0 = inlined_call_operand.vmem [shape: bf16[2,8,1280], index: 0, kind: input, shape index: {}]   ;;  %s5250_s1 = inlined_call_operand.vmem [shape: bf16[8,256], index: 1, kind: input, shape index: {}]   ;;  %s5251_s2 = inlined_call_operand.vmem [shape: f32[1,1024], index: 2, kind: input, shape index: {}]   ;;  %s5252_s3 = inlined_call_operand.<no memory space> [shape: f32[1,1], index: 3, kind: input, shape index: {}]   ;;  %s5253_s4 = inlined_call_operand.vmem [shape: f32[2,8,1024], index: 4, kind: output, shape index: {}]  }
   0x1   :  { %9 = sst [smem:[#allocation3]] %s5252_s3  ;;  %s3513_s19 = smov 0  }
   0x2 LB: > { %s27_s3 = sadd.s32 1, %s3449_s18  ;;  %p2851_p0 = scmp.ge.s32.totalorder %s3453_s19, 1  ;;  %s3453_s19 = sphi %s3513_s19, %s15_s19   ;;  %s3449_s18 = sphi %s3511_s18, %s5587_s18   ;;  %s3445_s17 = sphi %s3509_s17, %s5586_s17  }
   0x3   : > { %p29_p1 = scmp.ge.s32.totalorder %s27_s3, 2  ;;  %p187_p2 = scmp.lt.s32.totalorder %s3453_s19, 3 }
   0x5   : > { %s5589_s3 = smov (%p29_p1, %s27_s3), 0  ;;  %p188_p3 = pnand %p2851_p0, %p187_p2 }
   0x7   : > { %191 = sbr.rel (%p188_p3) target bundleno = 800 (0x320), region = 36 }
   0xc   : > { %p222_p4 = scmp.lt.s32.totalorder %s3445_s17, 1  ;;  %s3455_s24 = smov 127   ;;  %vm372_vm0 = vcmask 1031168   ;;  %vm438_vm1 = vcmask 965632   ;;  %vm306_vm2 = vcmask 1039360   ;;  %vm504_vm3 = vcmask 957440  }
   0xd   : > { %s3456_s25 = smov 126   ;;  %s3457_s26 = smov 118   ;;  %vm570_vm4 = vcmask 949248   ;;  %vm636_vm5 = vcmask 883712   ;;  %vm702_vm6 = vcmask 875520   ;;  %vm768_vm7 = vcmask 867328  }
   0xe   : > { %s5591_s17 = smov (!%p222_p4, %s3445_s17), 1  ;;  %s3458_s27 = smov 117   ;;  %vm834_vm8 = vcmask 228352   ;;  %vm900_vm9 = vcmask 220160   ;;  %vm966_vm10 = vcmask 211968   ;;  %vm1032_vm11 = vcmask 146432  }
   0xf   : > { %s2858_s20 = smul.u32 40, %s5591_s17  ;;  %s3459_s28 = smov 116   ;;  %vm1098_vm12 = vcmask 138240   ;;  %vm1164_vm13 = vcmask 130048   ;;  %vm1230_vm14 = vcmask 64512   ;;  %vm1956_vm15 = vcmask 277504  }
  0x10   : > { %s3460_s29 = smov 108   ;;  %s3461_s30 = smov 107  }
  0x11   : > { %s3533_s23 = scalar_lea.vmem %s5249_s0, %s2858_s20  ;;  %s3462_s5 = smov 106  }
  0x12   : > { %v269_v0 = vld [vmem:[%s3533_s23 + $0x20] sm:$0xf]  ;;  %v267_v1 = vld [vmem:[%s3533_s23 + $0x10] sm:$0xff]  ;;  %v268_v8 = vld [vmem:[%s3533_s23 + $0x18] sm:$0xff]  ;;  %s3463_s6 = smov 28   ;;  %s3464_s7 = smov 27  }
  0x13   : > { %v265_v2 = vld [vmem:[%s3533_s23] sm:$0xff]  ;;  %v278_v3 = vunpack.c.l.bf16 %v269_v0  ;;  %v274_v4 = vunpack.c.l.bf16 %v267_v1  ;;  %v275_v5 = vunpack.c.h.bf16 %v267_v1  ;;  %v266_v10 = vld [vmem:[%s3533_s23 + $0x8] sm:$0xff]  ;;  %v276_v12 = vunpack.c.l.bf16 %v268_v8  ;;  %s3465_s8 = smov 26   ;;  %s3466_s9 = smov 18  }
  0x14   : > { %v270_v6 = vunpack.c.l.bf16 %v265_v2  ;;  %v271_v7 = vunpack.c.h.bf16 %v265_v2  ;;  %v277_v13 = vunpack.c.h.bf16 %v268_v8  ;;  %v272_v14 = vunpack.c.l.bf16 %v266_v10  ;;  %v335_v18 = vld [vmem:[%s3533_s23 + $0x20] sm:$0xf]  ;;  %s3467_s10 = smov 17   ;;  %s3468_s11 = smov 16  }
  0x15   : > { %304 = vrot.lane.b32.xlu2 %v278_v3, %s3455_s24  ;;  %v3539_v9 = vpack.i.bf16 %v275_v5, %v274_v4  ;;  %v273_v15 = vunpack.c.h.bf16 %v266_v10  ;;  %v344_v19 = vunpack.c.l.bf16 %v335_v18  ;;  %v401_v20 = vld [vmem:[%s3533_s23 + $0x20] sm:$0xf]  ;;  %s3469_s12 = smov 8   ;;  %s3470_s13 = smov 36  }
  0x16   : > { %v3542_v11 = vpack.i.bf16 %v271_v7, %v270_v6  ;;  %v3546_v16 = vpack.i.bf16 %v277_v13, %v276_v12  ;;  %v410_v21 = vunpack.c.l.bf16 %v401_v20  ;;  %v467_v22 = vld [vmem:[%s3533_s23 + $0x20] sm:$0xf]  ;;  %s3471_s14 = smov 34   ;;  %s3472_s15 = smov 45  }
  0x17   : > { %2920 = vrot.lane.b32.xlu1 %v3539_v9, %s3455_s24  ;;  %v3548_v17 = vpack.i.bf16 %v273_v15, %v272_v14  ;;  %v476_v23 = vunpack.c.l.bf16 %v467_v22  ;;  %v533_v24 = vld [vmem:[%s3533_s23 + $0x20] sm:$0xf]  ;;  %s3473_s16 = smov 35   ;;  %s3474_s20 = smov 44  }
  0x18   : > { %2910 = vrot.lane.b32.xlu0 %v3542_v11, %s3455_s24  ;;  %v542_v25 = vunpack.c.l.bf16 %v533_v24  ;;  %v599_v26 = vld [vmem:[%s3533_s23 + $0x20] sm:$0xf]  ;;  %s3475_s21 = smov 46   ;;  %s3476_s22 = smov 54  }
  0x19   : > { %v608_v27 = vunpack.c.l.bf16 %v599_v26  ;;  %v665_v28 = vld [vmem:[%s3533_s23 + $0x20] sm:$0xf] }
  0x1a   : > { %v674_v29 = vunpack.c.l.bf16 %v665_v28  ;;  %v731_v32 = vld [vmem:[%s3533_s23 + $0x20] sm:$0xf] }
  0x1b   : > { %v740_v33 = vunpack.c.l.bf16 %v731_v32  ;;  %v797_v34 = vld [vmem:[%s3533_s23 + $0x20] sm:$0xf] }
  0x1c   : > { %v806_v38 = vunpack.c.l.bf16 %v797_v34  ;;  %v863_v50 = vld [vmem:[%s3533_s23 + $0x20] sm:$0xf] }
  0x1d   : > { %2930 = vrot.lane.b32.xlu2 %v3542_v11, %s3456_s25  ;;  %v872_v58 = vunpack.c.l.bf16 %v863_v50 }
  0x1f   : > { %2925 = vrot.lane.b32.xlu1 %v3546_v16, %s3455_s24 }
  0x20   : > { %2915 = vrot.lane.b32.xlu0 %v3548_v17, %s3455_s24  ;;  %s3477_s24 = smov 55  }
  0x25   : > { %2945 = vrot.lane.b32.xlu2 %v3546_v16, %s3456_s25 }
  0x27   : > { %2940 = vrot.lane.b32.xlu1 %v3539_v9, %s3456_s25 }
  0x28   : > { %2935 = vrot.lane.b32.xlu0 %v3548_v17, %s3456_s25 }
  0x2d   : > { %2955 = vrot.lane.b32.xlu2 %v3548_v17, %s3457_s26 }
  0x2f   : > { %2950 = vrot.lane.b32.xlu1 %v3542_v11, %s3457_s26 }
  0x30   : > { %370 = vrot.lane.b32.xlu0 %v344_v19, %s3456_s25  ;;  %s3478_s25 = smov 56  }
  0x35   : > { %436 = vrot.lane.b32.xlu2 %v410_v21, %s3457_s26 }
  0x37   : > { %2965 = vrot.lane.b32.xlu1 %v3546_v16, %s3457_s26 }
  0x38   : > { %2960 = vrot.lane.b32.xlu0 %v3539_v9, %s3457_s26  ;;  %s3479_s26 = smov 6  }
  0x3d   : > { %2980 = vrot.lane.b32.xlu2 %v3539_v9, %s3458_s27 }
  0x3f   : > { %2975 = vrot.lane.b32.xlu1 %v3548_v17, %s3458_s27 }
  0x40   : > { %2970 = vrot.lane.b32.xlu0 %v3542_v11, %s3458_s27 }
  0x45   : > { %2990 = vrot.lane.b32.xlu2 %v3542_v11, %s3459_s28 }
  0x47   : > { %502 = vrot.lane.b32.xlu1 %v476_v23, %s3458_s27 }
  0x48   : > { %2985 = vrot.lane.b32.xlu0 %v3546_v16, %s3458_s27  ;;  %s3480_s27 = smov 7  }
  0x4d   : > { %3005 = vrot.lane.b32.xlu2 %v3546_v16, %s3459_s28 }
  0x4f   : > { %3000 = vrot.lane.b32.xlu1 %v3539_v9, %s3459_s28 }
  0x50   : > { %2995 = vrot.lane.b32.xlu0 %v3548_v17, %s3459_s28 }
  0x55   : > { %3015 = vrot.lane.b32.xlu2 %v3548_v17, %s3460_s29 }
  0x57   : > { %3010 = vrot.lane.b32.xlu1 %v3542_v11, %s3460_s29 }
  0x58   : > { %568 = vrot.lane.b32.xlu0 %v542_v25, %s3459_s28  ;;  %v929_v25 = vld [vmem:[%s3533_s23 + $0x20] sm:$0xf] }
  0x5d   : > { %634 = vrot.lane.b32.xlu2 %v608_v27, %s3460_s29 }
  0x5f   : > { %3025 = vrot.lane.b32.xlu1 %v3546_v16, %s3460_s29 }
  0x60   : > { %3020 = vrot.lane.b32.xlu0 %v3539_v9, %s3460_s29 }
  0x65   : > { %3040 = vrot.lane.b32.xlu2 %v3539_v9, %s3461_s30 }
  0x67   : > { %3035 = vrot.lane.b32.xlu1 %v3548_v17, %s3461_s30 }
  0x68   : > { %3030 = vrot.lane.b32.xlu0 %v3542_v11, %s3461_s30 }
  0x6d   : > { %3050 = vrot.lane.b32.xlu2 %v3542_v11, %s3462_s5 }
  0x6f   : > { %v305_v30 = vpop.permute.xlu2 %304  ;;  %700 = vrot.lane.b32.xlu1 %v674_v29, %s3461_s30 }
  0x70   : > { %3045 = vrot.lane.b32.xlu0 %v3546_v16, %s3461_s30 }
  0x75   : > { %3065 = vrot.lane.b32.xlu2 %v3546_v16, %s3462_s5 }
  0x77   : > { %v3584_v31 = vpop.permute.xlu2 %2930  ;;  %3060 = vrot.lane.b32.xlu1 %v3539_v9, %s3462_s5 }
  0x78   : > { %3055 = vrot.lane.b32.xlu0 %v3548_v17, %s3462_s5  ;;  %v2933_v8 = vunpack.i.h.bf16 %v3584_v31  ;;  %v2932_v23 = vunpack.i.l.bf16 %v3584_v31 }
  0x7a   : > { %v3694_v32 = vsel %vm372_vm0, %v2932_v23, %v2933_v8 }
  0x7d   : > { %3075 = vrot.lane.b32.xlu2 %v3548_v17, %s3463_s6 }
  0x7f   : > { %v3591_v35 = vpop.permute.xlu2 %2945  ;;  %3070 = vrot.lane.b32.xlu1 %v3542_v11, %s3463_s6 }
  0x80   : > { %v2948_v36 = vunpack.i.h.bf16 %v3591_v35  ;;  %v2947_v37 = vunpack.i.l.bf16 %v3591_v35  ;;  %766 = vrot.lane.b32.xlu0 %v740_v33, %s3462_s5  ;;  %s2705_s5 = sld [smem:[#allocation3]] }
  0x82   : > { %v3599_v39 = vsel %vm372_vm0, %v2947_v37, %v2948_v36 }
  0x83   : > { %5347 = vst [vmem:[#allocation4_spill] sm:$0xff] %v3599_v39 }
  0x85   : > { %832 = vrot.lane.b32.xlu2 %v806_v38, %s3463_s6 }
  0x87   : > { %v3601_v40 = vpop.permute.xlu2 %2955  ;;  %3085 = vrot.lane.b32.xlu1 %v3546_v16, %s3463_s6 }
  0x88   : > { %v2958_v41 = vunpack.i.h.bf16 %v3601_v40  ;;  %v2957_v42 = vunpack.i.l.bf16 %v3601_v40  ;;  %3080 = vrot.lane.b32.xlu0 %v3539_v9, %s3463_s6  ;;  %s2857_s6 = sshll.u32 %s5591_s17, 6 }
  0x89   : > { %v2921_v43 = vpop.permute.xlu1 %2920  ;;  %s240_s17 = scalar_lea.vmem %s5253_s4, %s2857_s6 }
  0x8a   : > { %v2923_v44 = vunpack.i.h.bf16 %v2921_v43  ;;  %v2922_v45 = vunpack.i.l.bf16 %v2921_v43  ;;  %v3607_v46 = vpop.permute.xlu0 %2910  ;;  %v3614_v47 = vsel %vm438_vm1, %v2957_v42, %v2958_v41 }
  0x8b   : > { %5348 = vst [vmem:[#allocation5_spill] sm:$0xff] %v3614_v47  ;;  %v5254_v55 = vunpack.i.h.bf16 %v3607_v46 }
  0x8c   : > { %v3617_v48 = vsel %vm306_vm2, %v2922_v45, %v2923_v44 }
  0x8d   : > { %5349 = vst [vmem:[#allocation6_spill] sm:$0xff] %v3617_v48  ;;  %3100 = vrot.lane.b32.xlu2 %v3539_v9, %s3464_s7 }
  0x8f   : > { %v3620_v49 = vpop.permute.xlu2 %436  ;;  %3095 = vrot.lane.b32.xlu1 %v3548_v17, %s3464_s7 }
  0x90   : > { %3090 = vrot.lane.b32.xlu0 %v3542_v11, %s3464_s7 }
  0x91   : > { %v2926_v51 = vpop.permute.xlu1 %2925 }
  0x92   : > { %v2928_v52 = vunpack.i.h.bf16 %v2926_v51  ;;  %v2927_v53 = vunpack.i.l.bf16 %v2926_v51  ;;  %v2916_v54 = vpop.permute.xlu0 %2915 }
  0x93   : > { %v2918_v56 = vunpack.i.h.bf16 %v2916_v54  ;;  %v2917_v57 = vunpack.i.l.bf16 %v2916_v54 }
  0x94   : > { %v3627_v59 = vsel %vm306_vm2, %v2923_v44, %v2927_v53  ;;  %v3630_v60 = vsel %vm306_vm2, %v2927_v53, %v2928_v52  ;;  %v3648_v1 = vsel %vm306_vm2, %v2928_v52, %v305_v30  ;;  %v938_v30 = vunpack.c.l.bf16 %v929_v25 }
  0x95   : > { %5350 = vst [vmem:[#allocation7_spill] sm:$0xff] %v3627_v59  ;;  %3110 = vrot.lane.b32.xlu2 %v3542_v11, %s3465_s8  ;;  %v3637_v61 = vsel %vm306_vm2, %v5254_v55, %v2917_v57  ;;  %v3640_v62 = vsel %vm306_vm2, %v2918_v56, %v2922_v45  ;;  %v3643_v63 = vsel %vm306_vm2, %v2917_v57, %v2918_v56 }
  0x96   : > { %5351 = vst [vmem:[#allocation8_spill] sm:$0xff] %v3630_v60 }
  0x97   : > { %5352 = vst [vmem:[#allocation9_spill] sm:$0xff] %v3640_v62  ;;  %v3645_v0 = vpop.permute.xlu2 %2980  ;;  %898 = vrot.lane.b32.xlu1 %v872_v58, %s3464_s7 }
  0x98   : > { %5353 = vst [vmem:[#allocation10_spill] sm:$0xff] %v3643_v63  ;;  %v2983_v2 = vunpack.i.h.bf16 %v3645_v0  ;;  %v2982_v3 = vunpack.i.l.bf16 %v3645_v0  ;;  %3105 = vrot.lane.b32.xlu0 %v3546_v16, %s3464_s7 }
  0x99   : > { %5354 = vst [vmem:[#allocation11_spill] sm:$0xff] %v3648_v1  ;;  %v2941_v4 = vpop.permute.xlu1 %2940 }
  0x9a   : > { %v2943_v5 = vunpack.i.h.bf16 %v2941_v4  ;;  %v2942_v6 = vunpack.i.l.bf16 %v2941_v4  ;;  %v2936_v7 = vpop.permute.xlu0 %2935  ;;  %v3659_v13 = vsel %vm504_vm3, %v2982_v3, %v2983_v2 }
  0x9b   : > { %v2938_v10 = vunpack.i.h.bf16 %v2936_v7  ;;  %v2937_v12 = vunpack.i.l.bf16 %v2936_v7  ;;  %5355 = vst [vmem:[#allocation12_spill] sm:$0xff] %v3659_v13 }
  0x9c   : > { %v3662_v14 = vsel %vm372_vm0, %v2942_v6, %v2943_v5  ;;  %v3665_v15 = vsel %vm372_vm0, %v2943_v5, %v2947_v37 }
  0x9d   : > { %5356 = vst [vmem:[#allocation13_spill] sm:$0xff] %v3662_v14  ;;  %3125 = vrot.lane.b32.xlu2 %v3546_v16, %s3465_s8  ;;  %v3670_v18 = vsel %vm372_vm0, %v2933_v8, %v2937_v12  ;;  %v3673_v19 = vsel %vm372_vm0, %v2938_v10, %v2942_v6  ;;  %v3676_v20 = vsel %vm372_vm0, %v2937_v12, %v2938_v10 }
  0x9e   : > { %5357 = vst [vmem:[#allocation14_spill] sm:$0xff] %v3665_v15 }
  0x9f   : > { %5358 = vst [vmem:[#allocation15_spill] sm:$0xff] %v3673_v19  ;;  %v3680_v22 = vpop.permute.xlu2 %2990  ;;  %3120 = vrot.lane.b32.xlu1 %v3539_v9, %s3465_s8 }
  0xa0   : > { %5359 = vst [vmem:[#allocation16_spill] sm:$0xff] %v3676_v20  ;;  %3115 = vrot.lane.b32.xlu0 %v3548_v17, %s3465_s8  ;;  %v2992_v8 = vunpack.i.l.bf16 %v3680_v22 }
  0xa1   : > { %v2951_v24 = vpop.permute.xlu1 %2950 }
  0xa2   : > { %v2953_v26 = vunpack.i.h.bf16 %v2951_v24  ;;  %v2952_v27 = vunpack.i.l.bf16 %v2951_v24  ;;  %v371_v28 = vpop.permute.xlu0 %370 }
  0xa3   : > { %v3691_v29 = vsel %vm372_vm0, %v2948_v36, %v371_v28  ;;  %v995_v36 = vld [vmem:[%s3533_s23 + $0x20] sm:$0xf]  ;;  %vm1824_vm0 = vcmask 293888  }
  0xa4   : > { %5360 = vst [vmem:[#allocation17_spill] sm:$0xff] %v3691_v29  ;;  %v3697_v31 = vsel %vm438_vm1, %v2952_v27, %v2953_v26  ;;  %v3702_v33 = vsel %vm438_vm1, %v2953_v26, %v2957_v42  ;;  %v1004_v44 = vunpack.c.l.bf16 %v995_v36 }
  0xa5   : > { %3135 = vrot.lane.b32.xlu2 %v3548_v17, %s3466_s9 }
  0xa7   : > { %v3711_v37 = vpop.permute.xlu2 %3005  ;;  %3130 = vrot.lane.b32.xlu1 %v3542_v11, %s3466_s9 }
  0xa8   : > { %v3008_v38 = vunpack.i.h.bf16 %v3711_v37  ;;  %v3007_v42 = vunpack.i.l.bf16 %v3711_v37  ;;  %964 = vrot.lane.b32.xlu0 %v938_v30, %s3465_s8 }
  0xa9   : > { %v2966_v43 = vpop.permute.xlu1 %2965 }
  0xaa   : > { %v2968_v45 = vunpack.i.h.bf16 %v2966_v43  ;;  %v2967_v50 = vunpack.i.l.bf16 %v2966_v43  ;;  %v2961_v51 = vpop.permute.xlu0 %2960  ;;  %v3723_v52 = vsel %vm570_vm4, %v3007_v42, %v3008_v38 }
  0xab   : > { %5361 = vst [vmem:[#allocation18_spill] sm:$0xff] %v3723_v52  ;;  %v2963_v53 = vunpack.i.h.bf16 %v2961_v51  ;;  %v2962_v54 = vunpack.i.l.bf16 %v2961_v51 }
  0xac   : > { %v3726_v56 = vsel %vm438_vm1, %v2967_v50, %v2968_v45  ;;  %v3730_v57 = vsel %vm438_vm1, %v2968_v45, %v3620_v49 }
  0xad   : > { %5362 = vst [vmem:[#allocation19_spill] sm:$0xff] %v3726_v56  ;;  %1030 = vrot.lane.b32.xlu2 %v1004_v44, %s3466_s9  ;;  %v3736_v58 = vsel %vm438_vm1, %v2958_v41, %v2962_v54  ;;  %v3739_v4 = vsel %vm438_vm1, %v2962_v54, %v2963_v53  ;;  %v3742_v5 = vsel %vm438_vm1, %v2963_v53, %v2967_v50  ;;  %v2993_v41 = vunpack.i.h.bf16 %v3680_v22  ;;  %v3796_v54 = vld [vmem:[%s3533_s23 + $0x20] sm:$0xff]  }
  0xae   : > { %5363 = vst [vmem:[#allocation20_spill] sm:$0xff] %v3730_v57  ;;  %vm1890_vm1 = vcmask 285696  }
  0xaf   : > { %5364 = vst [vmem:[#allocation21_spill] sm:$0xff] %v3736_v58  ;;  %v3754_v10 = vpop.permute.xlu2 %3015  ;;  %3145 = vrot.lane.b32.xlu1 %v3546_v16, %s3466_s9  ;;  %v3765_v36 = vsel %vm570_vm4, %v2992_v8, %v2993_v41 }
  0xb0   : > { %5365 = vst [vmem:[#allocation22_spill] sm:$0xff] %v3739_v4  ;;  %v5257_v23 = vunpack.i.h.bf16 %v3754_v10  ;;  %v3017_v24 = vunpack.i.l.bf16 %v3754_v10  ;;  %3140 = vrot.lane.b32.xlu0 %v3539_v9, %s3466_s9 }
  0xb1   : > { %5366 = vst [vmem:[#allocation23_spill] sm:$0xff] %v3742_v5  ;;  %v2976_v25 = vpop.permute.xlu1 %2975 }
  0xb2   : > { %v2978_v26 = vunpack.i.h.bf16 %v2976_v25  ;;  %v2977_v27 = vunpack.i.l.bf16 %v2976_v25  ;;  %v2971_v28 = vpop.permute.xlu0 %2970  ;;  %v3777_v44 = vsel %vm636_vm5, %v3017_v24, %v5257_v23 }
  0xb3   : > { %v2973_v22 = vunpack.i.h.bf16 %v2971_v28  ;;  %v2972_v30 = vunpack.i.l.bf16 %v2971_v28  ;;  %5368 = vst [vmem:[#allocation25_spill] sm:$0xff] %v3777_v44 }
  0xb4   : > { %v3770_v43 = vsel %vm504_vm3, %v2978_v26, %v2982_v3  ;;  %v3787_v51 = vsel %vm504_vm3, %v2977_v27, %v2978_v26 }
  0xb5   : > { %5367 = vst [vmem:[#allocation24_spill] sm:$0xff] %v3770_v43  ;;  %3160 = vrot.lane.b32.xlu2 %v3539_v9, %s3467_s10  ;;  %v3781_v45 = vsel %vm504_vm3, %v2972_v30, %v2973_v22  ;;  %v3784_v50 = vsel %vm504_vm3, %v2973_v22, %v2977_v27  ;;  %v1070_v22 = vunpack.c.l.bf16 %v3796_v54 }
  0xb6   : > { %5369 = vst [vmem:[#allocation26_spill] sm:$0xff] %v3787_v51 }
  0xb7   : > { %v3791_v53 = vpop.permute.xlu2 %634  ;;  %3155 = vrot.lane.b32.xlu1 %v3548_v17, %s3467_s10 }
  0xb8   : > { %3150 = vrot.lane.b32.xlu0 %v3542_v11, %s3467_s10 }
  0xb9   : > { %v503_v8 = vpop.permute.xlu1 %502 }
  0xba   : > { %v2986_v25 = vpop.permute.xlu0 %2985 }
  0xbb   : > { %v2988_v28 = vunpack.i.h.bf16 %v2986_v25  ;;  %v2987_v30 = vunpack.i.l.bf16 %v2986_v25 }
  0xbd   : > { %3170 = vrot.lane.b32.xlu2 %v3542_v11, %s3468_s11  ;;  %v3802_v26 = vsel %vm504_vm3, %v2988_v28, %v503_v8  ;;  %v3807_v27 = vsel %vm504_vm3, %v2983_v2, %v2987_v30  ;;  %v3810_v12 = vsel %vm504_vm3, %v2987_v30, %v2988_v28  ;;  %vm1692_vm3 = vcmask 367616  }
  0xbe   : > { %5370 = vst [vmem:[#allocation27_spill] sm:$0xff] %v3802_v26 }
  0xbf   : > { %5371 = vst [vmem:[#allocation28_spill] sm:$0xff] %v3807_v27  ;;  %v3814_v6 = vpop.permute.xlu2 %3040  ;;  %1096 = vrot.lane.b32.xlu1 %v1070_v22, %s3467_s10 }
  0xc0   : > { %5372 = vst [vmem:[#allocation29_spill] sm:$0xff] %v3810_v12  ;;  %v5255_v40 = vunpack.i.h.bf16 %v3814_v6  ;;  %v5256_v8 = vunpack.i.l.bf16 %v3814_v6  ;;  %3165 = vrot.lane.b32.xlu0 %v3546_v16, %s3467_s10 }
  0xc1   : > { %v3001_v0 = vpop.permute.xlu1 %3000 }
  0xc2   : > { %v3003_v7 = vunpack.i.h.bf16 %v3001_v0  ;;  %v3002_v2 = vunpack.i.l.bf16 %v3001_v0  ;;  %v2996_v21 = vpop.permute.xlu0 %2995  ;;  %v3824_v28 = vsel %vm702_vm6, %v5256_v8, %v5255_v40 }
  0xc3   : > { %5373 = vst [vmem:[#allocation30_spill] sm:$0xff] %v3824_v28  ;;  %v2998_v30 = vunpack.i.h.bf16 %v2996_v21  ;;  %v2997_v22 = vunpack.i.l.bf16 %v2996_v21 }
  0xc4   : > { %v3827_v25 = vsel %vm570_vm4, %v3002_v2, %v3003_v7  ;;  %v3832_v49 = vsel %vm570_vm4, %v3003_v7, %v3007_v42  ;;  %v1784_v42 = vld [vmem:[%s3533_s23 + $0xc] sm:$0xff] }
  0xc5   : > { %5374 = vst [vmem:[#allocation31_spill] sm:$0xff] %v3827_v25  ;;  %3185 = vrot.lane.b32.xlu2 %v3546_v16, %s3468_s11  ;;  %v3837_v0 = vsel %vm570_vm4, %v2993_v41, %v2997_v22  ;;  %v3840_v35 = vsel %vm570_vm4, %v2998_v30, %v3002_v2  ;;  %v3843_v21 = vsel %vm570_vm4, %v2997_v22, %v2998_v30  ;;  %v3862_v22 = vld [vmem:[%s3533_s23 + $0x20] sm:$0xff]   ;;  %v1790_v23 = vunpack.c.l.bf16 %v1784_v42 }
  0xc6   : > { %5375 = vst [vmem:[#allocation32_spill] sm:$0xff] %v3832_v49  ;;  %v1783_v16 = vld [vmem:[%s3533_s23 + $0x4] sm:$0xff]  ;;  %v1136_v3 = vunpack.c.l.bf16 %v3862_v22 }
  0xc7   : > { %5376 = vst [vmem:[#allocation33_spill] sm:$0xff] %v3840_v35  ;;  %v3855_v2 = vpop.permute.xlu2 %3050  ;;  %3180 = vrot.lane.b32.xlu1 %v3539_v9, %s3468_s11  ;;  %v1789_v8 = vunpack.c.h.bf16 %v1783_v16 }
  0xc8   : > { %5377 = vst [vmem:[#allocation34_spill] sm:$0xff] %v3843_v21  ;;  %3175 = vrot.lane.b32.xlu0 %v3548_v17, %s3468_s11 }
  0xc9   : > { %v3011_v30 = vpop.permute.xlu1 %3010 }
  0xca   : > { %v3013_v34 = vunpack.i.h.bf16 %v3011_v30  ;;  %v569_v55 = vpop.permute.xlu0 %568 }
  0xcb   : > { %v3869_v7 = vsel %vm570_vm4, %v3008_v38, %v569_v55  ;;  %vm1758_vm4 = vcmask 359424  }
  0xcc   : > { %5378 = vst [vmem:[#allocation35_spill] sm:$0xff] %v3869_v7  ;;  %v3877_v40 = vsel %vm636_vm5, %v3013_v34, %v3017_v24  ;;  %v3888_v24 = vpack.i.bf16 %v1790_v23, %v1789_v8 }
  0xcd   : > { %3195 = vrot.lane.b32.xlu2 %v3548_v17, %s3469_s12 }
  0xcf   : > { %v3881_v37 = vpop.permute.xlu2 %3065  ;;  %3190 = vrot.lane.b32.xlu1 %v3542_v11, %s3469_s12 }
  0xd0   : > { %v5262_v55 = vunpack.i.h.bf16 %v3881_v37  ;;  %v5263_v38 = vunpack.i.l.bf16 %v3881_v37  ;;  %1162 = vrot.lane.b32.xlu0 %v1136_v3, %s3468_s11  ;;  %v5400_v49 = vunpack.i.h.bf16 %v3881_v37 }
  0xd1   : > { %v3026_v41 = vpop.permute.xlu1 %3025 }
  0xd2   : > { %v3028_v1 = vunpack.i.h.bf16 %v3026_v41  ;;  %v3027_v29 = vunpack.i.l.bf16 %v3026_v41  ;;  %v3021_v57 = vpop.permute.xlu0 %3020  ;;  %v3895_v11 = vsel %vm768_vm7, %v5263_v38, %v5262_v55  ;;  %v3012_v38 = vunpack.i.l.bf16 %v3011_v30 }
  0xd3   : > { %v3023_v17 = vunpack.i.h.bf16 %v3021_v57  ;;  %v3022_v26 = vunpack.i.l.bf16 %v3021_v57  ;;  %5379 = vst [vmem:[#allocation36_spill] sm:$0xff] %v3895_v11  ;;  %v5382_v57 = vunpack.i.h.bf16 %v3754_v10  ;;  %v1923_v10 = vunpack.c.h.bf16 %v1784_v42 }
  0xd4   : > { %v3898_v7 = vsel %vm636_vm5, %v3027_v29, %v3028_v1  ;;  %v3902_v23 = vsel %vm636_vm5, %v3028_v1, %v3791_v53  ;;  %v1920_v53 = vunpack.c.l.bf16 %v1783_v16  ;;  %v3937_v16 = vsel %vm636_vm5, %v3012_v38, %v3013_v34 }
  0xd5   : > { %5380 = vst [vmem:[#allocation37_spill] sm:$0xff] %v3898_v7  ;;  %3210 = vrot.lane.b32.xlu2 %v3888_v24, %s3470_s13  ;;  %v3909_v3 = vsel %vm636_vm5, %v5382_v57, %v3022_v26  ;;  %v3912_v8 = vsel %vm636_vm5, %v3022_v26, %v3023_v17  ;;  %v3915_v41 = vsel %vm636_vm5, %v3023_v17, %v3027_v29  ;;  %v5390_v38 = vunpack.i.h.bf16 %v3814_v6 }
  0xd6   : > { %5381 = vst [vmem:[#allocation38_spill] sm:$0xff] %v3902_v23  ;;  %v3927_v12 = vpack.i.bf16 %v1923_v10, %v1920_v53  ;;  %vm1560_vm5 = vcmask 441344  }
  0xd7   : > { %5383 = vst [vmem:[#allocation39_spill] sm:$0xff] %v3909_v3  ;;  %v3919_v1 = vpop.permute.xlu2 %3075  ;;  %3205 = vrot.lane.b32.xlu1 %v3888_v24, %s3471_s14 }
  0xd8   : > { %5384 = vst [vmem:[#allocation40_spill] sm:$0xff] %v3912_v8  ;;  %v5267_v57 = vunpack.i.h.bf16 %v3919_v1  ;;  %v5268_v26 = vunpack.i.l.bf16 %v3919_v1  ;;  %3200 = vrot.lane.b32.xlu0 %v3539_v9, %s3469_s12  ;;  %v5387_v9 = vunpack.i.l.bf16 %v3814_v6 }
  0xd9   : > { %5385 = vst [vmem:[#allocation41_spill] sm:$0xff] %v3915_v41  ;;  %v3036_v29 = vpop.permute.xlu1 %3035 }
  0xda   : > { %v3038_v17 = vunpack.i.h.bf16 %v3036_v29  ;;  %v3037_v55 = vunpack.i.l.bf16 %v3036_v29  ;;  %v3031_v60 = vpop.permute.xlu0 %3030  ;;  %v3934_v42 = vsel %vm834_vm8, %v5268_v26, %v5267_v57  ;;  %v3053_v26 = vunpack.i.h.bf16 %v3855_v2 }
  0xdb   : > { %v3033_v39 = vunpack.i.h.bf16 %v3031_v60  ;;  %v3032_v56 = vunpack.i.l.bf16 %v3031_v60  ;;  %5386 = vst [vmem:[#allocation42_spill] sm:$0xff] %v3934_v42 }
  0xdc   : > { %v3942_v30 = vsel %vm702_vm6, %v3038_v17, %v5387_v9  ;;  %v3945_v29 = vsel %vm702_vm6, %v3037_v55, %v3038_v17 }
  0xdd   : > { %5388 = vst [vmem:[#allocation43_spill] sm:$0xff] %v3942_v30  ;;  %3225 = vrot.lane.b32.xlu2 %v3888_v24, %s3472_s15  ;;  %v3950_v60 = vsel %vm702_vm6, %v3032_v56, %v3033_v39  ;;  %v3953_v53 = vsel %vm702_vm6, %v3033_v39, %v3037_v55 }
  0xde   : > { %5389 = vst [vmem:[#allocation44_spill] sm:$0xff] %v3945_v29 }
  0xdf   : > { %v3963_v9 = vpop.permute.xlu2 %832  ;;  %3220 = vrot.lane.b32.xlu1 %v3927_v12, %s3471_s14 }
  0xe0   : > { %3215 = vrot.lane.b32.xlu0 %v3888_v24, %s3473_s16 }
  0xe1   : > { %v701_v39 = vpop.permute.xlu1 %700 }
  0xe2   : > { %v3046_v56 = vpop.permute.xlu0 %3045 }
  0xe3   : > { %v3048_v55 = vunpack.i.h.bf16 %v3046_v56  ;;  %v3047_v34 = vunpack.i.l.bf16 %v3046_v56 }
  0xe5   : > { %3240 = vrot.lane.b32.xlu2 %v3927_v12, %s3473_s16  ;;  %v3974_v17 = vsel %vm702_vm6, %v5390_v38, %v3047_v34  ;;  %v3977_v10 = vsel %vm702_vm6, %v3047_v34, %v3048_v55  ;;  %v3980_v57 = vsel %vm702_vm6, %v3048_v55, %v701_v39  ;;  %vm1494_vm6 = vcmask 449536  }
  0xe6   : > { %5391 = vst [vmem:[#allocation45_spill] sm:$0xff] %v3974_v17 }
  0xe7   : > { %5392 = vst [vmem:[#allocation46_spill] sm:$0xff] %v3977_v10  ;;  %v3988_v59 = vpop.permute.xlu2 %3100  ;;  %3235 = vrot.lane.b32.xlu1 %v3927_v12, %s3470_s13  ;;  %v5396_v10 = vunpack.i.l.bf16 %v3881_v37 }
  0xe8   : > { %5393 = vst [vmem:[#allocation47_spill] sm:$0xff] %v3980_v57  ;;  %v5275_v6 = vunpack.i.h.bf16 %v3988_v59  ;;  %v5276_v34 = vunpack.i.l.bf16 %v3988_v59  ;;  %3230 = vrot.lane.b32.xlu0 %v3888_v24, %s3474_s20 }
  0xe9   : > { %v3061_v38 = vpop.permute.xlu1 %3060 }
  0xea   : > { %v3063_v39 = vunpack.i.h.bf16 %v3061_v38  ;;  %v3062_v55 = vunpack.i.l.bf16 %v3061_v38  ;;  %v3056_v56 = vpop.permute.xlu0 %3055  ;;  %v4002_v57 = vsel %vm900_vm9, %v5276_v34, %v5275_v6 }
  0xeb   : > { %v3058_v52 = vunpack.i.h.bf16 %v3056_v56  ;;  %v3057_v23 = vunpack.i.l.bf16 %v3056_v56  ;;  %5394 = vst [vmem:[#allocation48_spill] sm:$0xff] %v4002_v57 }
  0xec   : > { %v4005_v7 = vsel %vm768_vm7, %v3062_v55, %v3063_v39  ;;  %v4010_v38 = vsel %vm768_vm7, %v3063_v39, %v5396_v10  ;;  %v3052_v10 = vunpack.i.l.bf16 %v3855_v2  ;;  %v5402_v2 = vunpack.i.l.bf16 %v3919_v1 }
  0xed   : > { %5395 = vst [vmem:[#allocation49_spill] sm:$0xff] %v4005_v7  ;;  %3255 = vrot.lane.b32.xlu2 %v3927_v12, %s3472_s15  ;;  %v4015_v56 = vsel %vm768_vm7, %v3053_v26, %v3057_v23  ;;  %v4018_v15 = vsel %vm768_vm7, %v3058_v52, %v3062_v55  ;;  %v4021_v6 = vsel %vm768_vm7, %v3057_v23, %v3058_v52  ;;  %v1917_v23 = vld [vmem:[%s3533_s23 + $0x14] sm:$0xff] }
  0xee   : > { %5397 = vst [vmem:[#allocation50_spill] sm:$0xff] %v4010_v38  ;;  %v4039_v41 = vsel %vm768_vm7, %v3052_v10, %v3053_v26  ;;  %v1925_v37 = vunpack.c.h.bf16 %v1917_v23 }
  0xef   : > { %5398 = vst [vmem:[#allocation51_spill] sm:$0xff] %v4018_v15  ;;  %v4025_v5 = vpop.permute.xlu2 %3110  ;;  %3250 = vrot.lane.b32.xlu1 %v3888_v24, %s3475_s21 }
  0xf0   : > { %5399 = vst [vmem:[#allocation52_spill] sm:$0xff] %v4021_v6  ;;  %3245 = vrot.lane.b32.xlu0 %v3888_v24, %s3476_s22  ;;  %v3112_v13 = vunpack.i.l.bf16 %v4025_v5 }
  0xf1   : > { %v3071_v39 = vpop.permute.xlu1 %3070 }
  0xf2   : > { %v3073_v55 = vunpack.i.h.bf16 %v3071_v39  ;;  %v3072_v27 = vunpack.i.l.bf16 %v3071_v39  ;;  %v767_v52 = vpop.permute.xlu0 %766  ;;  %v1924_v39 = vunpack.c.l.bf16 %v1917_v23 }
  0xf3   : > { %v4036_v34 = vsel %vm768_vm7, %v5400_v49, %v767_v52  ;;  %vm1428_vm7 = vcmask 457728  }
  0xf4   : > { %5401 = vst [vmem:[#allocation53_spill] sm:$0xff] %v4036_v34  ;;  %v4042_v17 = vsel %vm834_vm8, %v3072_v27, %v3073_v55  ;;  %v4047_v48 = vsel %vm834_vm8, %v3073_v55, %v5402_v2  ;;  %v4063_v23 = vpack.i.bf16 %v1925_v37, %v1924_v39  ;;  %v5406_v37 = vunpack.i.h.bf16 %v3919_v1 }
  0xf5   : > { %3270 = vrot.lane.b32.xlu2 %v3888_v24, %s3477_s24  ;;  %v5411_v1 = vunpack.i.h.bf16 %v4025_v5 }
  0xf7   : > { %v4055_v10 = vpop.permute.xlu2 %3125  ;;  %3265 = vrot.lane.b32.xlu1 %v3888_v24, %s3478_s25  ;;  %v4127_v34 = vsel %vm966_vm10, %v3112_v13, %v5411_v1 }
  0xf8   : > { %v5284_v27 = vunpack.i.h.bf16 %v4055_v10  ;;  %v5285_v55 = vunpack.i.l.bf16 %v4055_v10  ;;  %3260 = vrot.lane.b32.xlu0 %v3927_v12, %s3474_s20 }
  0xf9   : > { %v3086_v52 = vpop.permute.xlu1 %3085 }
  0xfa   : > { %v3088_v2 = vunpack.i.h.bf16 %v3086_v52  ;;  %v3087_v26 = vunpack.i.l.bf16 %v3086_v52  ;;  %v3081_v49 = vpop.permute.xlu0 %3080  ;;  %v4070_v24 = vsel %vm966_vm10, %v5285_v55, %v5284_v27  ;;  %v4093_v55 = vld [vmem:[%s3533_s23 + $0x8] sm:$0xff] }
  0xfb   : > { %5403 = vst [vmem:[#allocation54_spill] sm:$0xff] %v4070_v24  ;;  %v3083_v14 = vunpack.i.h.bf16 %v3081_v49  ;;  %v3082_v4 = vunpack.i.l.bf16 %v3081_v49 }
  0xfc   : > { %v4073_v63 = vsel %vm834_vm8, %v3087_v26, %v3088_v2  ;;  %v4077_v39 = vsel %vm834_vm8, %v3088_v2, %v3963_v9  ;;  %5409 = vst [vmem:[#allocation59_spill] sm:$0xff] %v4093_v55  ;;  %v5410_v2 = vunpack.c.l.bf16 %v4093_v55 }
  0xfd   : > { %5404 = vst [vmem:[#allocation55_spill] sm:$0xff] %v4073_v63  ;;  %3285 = vrot.lane.b32.xlu2 %v4063_v23, %s3471_s14  ;;  %v4084_v52 = vsel %vm834_vm8, %v5406_v37, %v3082_v4  ;;  %v4087_v27 = vsel %vm834_vm8, %v3082_v4, %v3083_v14  ;;  %v4090_v49 = vsel %vm834_vm8, %v3083_v14, %v3087_v26  ;;  %v4117_v37 = vld [vmem:[%s3533_s23] sm:$0xff]  ;;  %vm1362_vm8 = vcmask 48128  }
  0xfe   : > { %5405 = vst [vmem:[#allocation56_spill] sm:$0xff] %v4077_v39  ;;  %v5296_v11 = vunpack.c.h.bf16 %v4117_v37  ;;  %v5412_v39 = vunpack.i.l.bf16 %v3988_v59  ;;  %v5308_v51 = vunpack.c.l.bf16 %v4117_v37 }
  0xff   : > { %5407 = vst [vmem:[#allocation57_spill] sm:$0xff] %v4087_v27  ;;  %v4105_v14 = vpop.permute.xlu2 %3135  ;;  %3280 = vrot.lane.b32.xlu1 %v3927_v12, %s3475_s21 }
 0x100   : > { %5408 = vst [vmem:[#allocation58_spill] sm:$0xff] %v4090_v49  ;;  %3275 = vrot.lane.b32.xlu0 %v3927_v12, %s3476_s22  ;;  %v3294_v9 = vpack.i.bf16 %v5410_v2, %v5296_v11  ;;  %v5414_v47 = vunpack.i.l.bf16 %v4105_v14 }
 0x101   : > { %v3096_v4 = vpop.permute.xlu1 %3095 }
 0x102   : > { %v3098_v63 = vunpack.i.h.bf16 %v3096_v4  ;;  %v3097_v38 = vunpack.i.l.bf16 %v3096_v4  ;;  %v3091_v49 = vpop.permute.xlu0 %3090  ;;  %v5413_v4 = vunpack.i.h.bf16 %v4105_v14 }
 0x103   : > { %v3093_v26 = vunpack.i.h.bf16 %v3091_v49  ;;  %v3092_v25 = vunpack.i.l.bf16 %v3091_v49 }
 0x104   : > { %v4132_v20 = vsel %vm900_vm9, %v3098_v63, %v5412_v39  ;;  %v4139_v49 = vsel %vm1032_vm11, %v5414_v47, %v5413_v4  ;;  %v4142_v2 = vsel %vm900_vm9, %v3097_v38, %v3098_v63 }
 0x105   : > { %5415 = vst [vmem:[#allocation60_spill] sm:$0xff] %v4139_v49  ;;  %3300 = vrot.lane.b32.xlu2 %v3927_v12, %s3478_s25  ;;  %v4147_v13 = vsel %vm900_vm9, %v3092_v25, %v3093_v26  ;;  %v4150_v39 = vsel %vm900_vm9, %v3093_v26, %v3097_v38  ;;  %v4161_v25 = vld [vmem:[%s3533_s23 + $0x18] sm:$0xff]  ;;  %v5418_v26 = vunpack.i.h.bf16 %v3988_v59 }
 0x106   : > { %5416 = vst [vmem:[#allocation61_spill] sm:$0xff] %v4142_v2  ;;  %v5423_v44 = vunpack.c.h.bf16 %v4161_v25 }
 0x107   : > { %v4154_v11 = vpop.permute.xlu2 %1030  ;;  %3295 = vrot.lane.b32.xlu1 %v3294_v9, %s3479_s26 }
 0x108   : > { %3290 = vrot.lane.b32.xlu0 %v3294_v9, %s3480_s27 }
 0x109   : > { %v899_v47 = vpop.permute.xlu1 %898 }
 0x10a   : > { %v3106_v63 = vpop.permute.xlu0 %3105 }
 0x10b   : > { %v3108_v4 = vunpack.i.h.bf16 %v3106_v63  ;;  %v3107_v8 = vunpack.i.l.bf16 %v3106_v63 }
 0x10d   : > { %3315 = vrot.lane.b32.xlu2 %v4063_v23, %s3473_s16  ;;  %v4164_v38 = vsel %vm900_vm9, %v3108_v4, %v899_v47  ;;  %v4169_v1 = vsel %vm900_vm9, %v5418_v26, %v3107_v8  ;;  %v4172_v28 = vsel %vm900_vm9, %v3107_v8, %v3108_v4  ;;  %v5307_v47 = vunpack.c.h.bf16 %v4093_v55 }
 0x10e   : > { %5417 = vst [vmem:[#allocation62_spill] sm:$0xff] %v4164_v38  ;;  %v5422_v4 = vunpack.c.l.bf16 %v4161_v25  ;;  %vm1296_vm9 = vcmask 56320  }
 0x10f   : > { %5419 = vst [vmem:[#allocation63_spill] sm:$0xff] %v4169_v1  ;;  %v4176_v63 = vpop.permute.xlu2 %3160  ;;  %3310 = vrot.lane.b32.xlu1 %v4063_v23, %s3470_s13 }
 0x110   : > { %5420 = vst [vmem:[#allocation64_spill] sm:$0xff] %v4172_v28  ;;  %v5309_v59 = vunpack.i.h.bf16 %v4176_v63  ;;  %v5310_v26 = vunpack.i.l.bf16 %v4176_v63  ;;  %3305 = vrot.lane.b32.xlu0 %v3927_v12, %s3477_s24  ;;  %v3329_v28 = vpack.i.bf16 %v5307_v47, %v5308_v51  ;;  %v4203_v29 = vpack.i.bf16 %v5423_v44, %v5422_v4 }
 0x111   : > { %v3121_v9 = vpop.permute.xlu1 %3120  ;;  %v5429_v4 = vunpack.i.h.bf16 %v4055_v10 }
 0x112   : > { %v3123_v24 = vunpack.i.h.bf16 %v3121_v9  ;;  %v3122_v21 = vunpack.i.l.bf16 %v3121_v9  ;;  %v3116_v7 = vpop.permute.xlu0 %3115  ;;  %v4197_v27 = vsel %vm1098_vm12, %v5310_v26, %v5309_v59  ;;  %v5425_v9 = vunpack.i.l.bf16 %v4055_v10 }
 0x113   : > { %5421 = vst [vmem:[#allocation65_spill] sm:$0xff] %v4197_v27  ;;  %v3118_v12 = vunpack.i.h.bf16 %v3116_v7  ;;  %v3117_v8 = vunpack.i.l.bf16 %v3116_v7  ;;  %v5427_v59 = vunpack.i.h.bf16 %v4025_v5  ;;  %v5437_v27 = vunpack.i.l.bf16 %v4176_v63 }
 0x114   : > { %v4206_v47 = vsel %vm966_vm10, %v3122_v21, %v3123_v24  ;;  %v4211_v51 = vsel %vm966_vm10, %v3123_v24, %v5425_v9 }
 0x115   : > { %5424 = vst [vmem:[#allocation66_spill] sm:$0xff] %v4206_v47  ;;  %3330 = vrot.lane.b32.xlu2 %v3329_v28, %s3479_s26  ;;  %v4217_v7 = vsel %vm966_vm10, %v5427_v59, %v3117_v8  ;;  %v4220_v26 = vsel %vm966_vm10, %v3118_v12, %v3122_v21  ;;  %v4223_v44 = vsel %vm966_vm10, %v3117_v8, %v3118_v12  ;;  %v1323_v47 = vld [vmem:[%s3533_s23 + $0x10] sm:$0xff] }
 0x116   : > { %5426 = vst [vmem:[#allocation67_spill] sm:$0xff] %v4211_v51 }
 0x117   : > { %5428 = vst [vmem:[#allocation68_spill] sm:$0xff] %v4223_v44  ;;  %v4235_v21 = vpop.permute.xlu2 %3170  ;;  %3325 = vrot.lane.b32.xlu1 %v3329_v28, %s3480_s27 }
 0x118   : > { %3320 = vrot.lane.b32.xlu0 %v4203_v29, %s3469_s12 }
 0x119   : > { %v4240_v8 = vpop.permute.xlu1 %3130 }
 0x11a   : > { %v965_v12 = vpop.permute.xlu0 %964  ;;  %v3132_v19 = vunpack.i.l.bf16 %v4240_v8 }
 0x11b   : > { %v4245_v9 = vsel %vm966_vm10, %v5429_v4, %v965_v12  ;;  %v1918_v4 = vld [vmem:[%s3533_s23 + $0x1c] sm:$0xff] }
 0x11c   : > { %5430 = vst [vmem:[#allocation69_spill] sm:$0xff] %v4245_v9  ;;  %v1926_v57 = vunpack.c.l.bf16 %v1918_v4  ;;  %v1927_v2 = vunpack.c.h.bf16 %v1918_v4  ;;  %v1331_v4 = vunpack.c.h.bf16 %v1323_v47 }
 0x11d   : > { %3345 = vrot.lane.b32.xlu2 %v4063_v23, %s3476_s22 }
 0x11f   : > { %v4251_v59 = vpop.permute.xlu2 %3185  ;;  %3340 = vrot.lane.b32.xlu1 %v4063_v23, %s3474_s20 }
 0x120   : > { %v5320_v28 = vunpack.i.h.bf16 %v4251_v59  ;;  %v5321_v24 = vunpack.i.l.bf16 %v4251_v59  ;;  %3335 = vrot.lane.b32.xlu0 %v4063_v23, %s3472_s15  ;;  %v5448_v58 = vunpack.i.h.bf16 %v4251_v59 }
 0x121   : > { %v3146_v10 = vpop.permute.xlu1 %3145 }
 0x122   : > { %v4265_v12 = vsel %vm1164_vm13, %v5321_v24, %v5320_v28  ;;  %v3148_v5 = vunpack.i.h.bf16 %v3146_v10  ;;  %v3147_v38 = vunpack.i.l.bf16 %v3146_v10  ;;  %v3141_v9 = vpop.permute.xlu0 %3140  ;;  %v5434_v28 = vunpack.i.h.bf16 %v4105_v14 }
 0x123   : > { %5431 = vst [vmem:[#allocation70_spill] sm:$0xff] %v4265_v12  ;;  %v3143_v1 = vunpack.i.h.bf16 %v3141_v9  ;;  %v3142_v51 = vunpack.i.l.bf16 %v3141_v9 }
 0x124   : > { %v4269_v6 = vsel %vm1032_vm11, %v3147_v38, %v3148_v5  ;;  %v4273_v42 = vsel %vm1032_vm11, %v3148_v5, %v4154_v11  ;;  %v1330_v5 = vunpack.c.l.bf16 %v1323_v47  ;;  %v4321_v47 = vld [vmem:[%s3533_s23 + $0x20] sm:$0xff]  }
 0x125   : > { %5432 = vst [vmem:[#allocation71_spill] sm:$0xff] %v4269_v6  ;;  %3360 = vrot.lane.b32.xlu2 %v4063_v23, %s3477_s24  ;;  %v4280_v10 = vsel %vm1032_vm11, %v5434_v28, %v3142_v51  ;;  %v4283_v9 = vsel %vm1032_vm11, %v3142_v51, %v3143_v1  ;;  %v4286_v24 = vsel %vm1032_vm11, %v3143_v1, %v3147_v38 }
 0x126   : > { %5433 = vst [vmem:[#allocation72_spill] sm:$0xff] %v4273_v42  ;;  %v4298_v51 = vpack.i.bf16 %v1927_v2, %v1926_v57  ;;  %v5439_v57 = vunpack.i.h.bf16 %v4176_v63 }
 0x127   : > { %5435 = vst [vmem:[#allocation73_spill] sm:$0xff] %v4283_v9  ;;  %v4290_v11 = vpop.permute.xlu2 %3195  ;;  %3355 = vrot.lane.b32.xlu1 %v4063_v23, %s3478_s25  ;;  %v3369_v9 = vpack.i.bf16 %v1331_v4, %v1330_v5  ;;  %v1202_v4 = vunpack.c.l.bf16 %v4321_v47 }
 0x128   : > { %5436 = vst [vmem:[#allocation74_spill] sm:$0xff] %v4286_v24  ;;  %3350 = vrot.lane.b32.xlu0 %v4063_v23, %s3475_s21 }
 0x129   : > { %v4296_v28 = vpop.permute.xlu1 %3155 }
 0x12a   : > { %v3158_v1 = vunpack.i.h.bf16 %v4296_v28  ;;  %v5325_v38 = vunpack.i.l.bf16 %v4296_v28  ;;  %v4302_v12 = vpop.permute.xlu0 %3150 }
 0x12c   : > { %v4307_v44 = vsel %vm1098_vm12, %v3158_v1, %v5437_v27  ;;  %v4312_v23 = vsel %vm1098_vm12, %v5325_v38, %v3158_v1 }
 0x12d   : > { %5438 = vst [vmem:[#allocation75_spill] sm:$0xff] %v4312_v23  ;;  %3375 = vrot.lane.b32.xlu2 %v4298_v51, %s3471_s14 }
 0x12f   : > { %v4323_v5 = vpop.permute.xlu2 %3210  ;;  %3370 = vrot.lane.b32.xlu1 %v3369_v9, %s3479_s26 }
 0x130   : > { %3365 = vrot.lane.b32.xlu0 %v3369_v9, %s3480_s27 }
 0x131   : > { %v1097_v27 = vpop.permute.xlu1 %1096 }
 0x132   : > { %v3166_v1 = vpop.permute.xlu0 %3165 }
 0x133   : > { %v3168_v38 = vunpack.i.h.bf16 %v3166_v1  ;;  %v3167_v62 = vunpack.i.l.bf16 %v3166_v1 }
 0x135   : > { %1228 = vrot.lane.b32.xlu2 %v1202_v4, %s3469_s12  ;;  %v4332_v2 = vsel %vm1098_vm12, %v5439_v57, %v3167_v62  ;;  %v4335_v49 = vsel %vm1098_vm12, %v3167_v62, %v3168_v38  ;;  %v4338_v23 = vsel %vm1098_vm12, %v3168_v38, %v1097_v27  ;;  %v3197_v4 = vunpack.i.l.bf16 %v4290_v11 }
 0x136   : > { %5440 = vst [vmem:[#allocation76_spill] sm:$0xff] %v4332_v2  ;;  %v1928_v57 = vunpack.c.h.bf16 %v3796_v54  ;;  %v5443_v62 = vunpack.i.h.bf16 %v4290_v11 }
 0x137   : > { %5441 = vst [vmem:[#allocation77_spill] sm:$0xff] %v4335_v49  ;;  %v4346_v63 = vpop.permute.xlu2 %3225  ;;  %3385 = vrot.lane.b32.xlu1 %v4298_v51, %s3473_s16 }
 0x138   : > { %5442 = vst [vmem:[#allocation78_spill] sm:$0xff] %v4338_v23  ;;  %3380 = vrot.lane.b32.xlu0 %v4298_v51, %s3470_s13  ;;  %v4366_v42 = vsel %vm1230_vm14, %v3197_v4, %v5443_v62  ;;  %v5445_v23 = vunpack.i.l.bf16 %v4251_v59 }
 0x139   : > { %v4354_v38 = vpop.permute.xlu1 %3180  ;;  %5444 = vst [vmem:[#allocation79_spill] sm:$0xff] %v4366_v42 }
 0x13a   : > { %v3183_v27 = vunpack.i.h.bf16 %v4354_v38  ;;  %v5336_v55 = vunpack.i.l.bf16 %v4354_v38  ;;  %v4359_v9 = vpop.permute.xlu0 %3175 }
 0x13b   : > { %v5337_v1 = vunpack.i.h.bf16 %v4359_v9  ;;  %v3177_v6 = vunpack.i.l.bf16 %v4359_v9 }
 0x13c   : > { %v4371_v49 = vsel %vm1164_vm13, %v3183_v27, %v5445_v23  ;;  %v4376_v54 = vsel %vm1164_vm13, %v5336_v55, %v3183_v27  ;;  %v3173_v23 = vunpack.i.h.bf16 %v4235_v21  ;;  %v3172_v27 = vunpack.i.l.bf16 %v4235_v21 }
 0x13d   : > { %5446 = vst [vmem:[#allocation80_spill] sm:$0xff] %v4371_v49  ;;  %1954 = vrot.lane.b32.xlu2 %v1928_v57, %s3471_s14  ;;  %v4382_v24 = vsel %vm1164_vm13, %v3177_v6, %v5337_v1  ;;  %v1796_v55 = vunpack.c.h.bf16 %v3862_v22  ;;  %v3153_v1 = vunpack.i.h.bf16 %v4302_v12  ;;  %v3152_v49 = vunpack.i.l.bf16 %v4302_v12 }
 0x13e   : > { %5447 = vst [vmem:[#allocation81_spill] sm:$0xff] %v4382_v24  ;;  %v1165_v21 = vsel %vm1164_vm13, %v3172_v27, %v3173_v23  ;;  %v1166_v22 = vsel %vm1164_vm13, %v3173_v23, %v3177_v6  ;;  %v3133_v12 = vunpack.i.h.bf16 %v4240_v8  ;;  %v5451_v27 = vpack.c.bf16 %v4127_v34, %v4147_v13 }
 0x13f   : > { %v4386_v2 = vpop.permute.xlu2 %3240  ;;  %3395 = vrot.lane.b32.xlu1 %v4298_v51, %s3474_s20  ;;  %v1099_v15 = vsel %vm1098_vm12, %v3152_v49, %v3153_v1 }
 0x140   : > { %3390 = vrot.lane.b32.xlu0 %v4298_v51, %s3472_s15  ;;  %v1033_v6 = vsel %vm1032_vm11, %v3132_v19, %v3133_v12 }
 0x141   : > { %v3191_v57 = vpop.permute.xlu1 %3190 }
 0x142   : > { %v3193_v62 = vunpack.i.h.bf16 %v3191_v57  ;;  %v3192_v24 = vunpack.i.l.bf16 %v3191_v57  ;;  %v1163_v42 = vpop.permute.xlu0 %1162 }
 0x143   : > { %v4401_v43 = vsel %vm1164_vm13, %v5448_v58, %v1163_v42  ;;  %v5449_v58 = vunpack.i.l.bf16 %v4296_v28 }
 0x144   : > { %v1231_v35 = vsel %vm1230_vm14, %v3192_v24, %v3193_v62  ;;  %v1232_v3 = vsel %vm1230_vm14, %v3193_v62, %v3197_v4 }
 0x145   : > { %1822 = vrot.lane.b32.xlu2 %v1796_v55, %s3470_s13  ;;  %v2334_v57 = vpack.c.bf16 %v1231_v35, %v1165_v21  ;;  %v2335_v30 = vpack.c.bf16 %v1232_v3, %v1166_v22  ;;  %v1100_v42 = vsel %vm1098_vm12, %v3153_v1, %v5449_v58  ;;  %v2326_v3 = vpack.c.bf16 %v1099_v15, %v1033_v6  ;;  %v4458_v22 = vld [vmem:[%s3533_s23 + $0x20] sm:$0xff]  }
 0x146   : > { %v5450_v55 = vunpack.i.l.bf16 %v4105_v14  ;;  %v1862_v15 = vunpack.c.h.bf16 %v4321_v47  ;;  %v5452_v21 = vpack.c.bf16 %v4217_v7, %v4150_v39  ;;  %v1730_v6 = vunpack.c.h.bf16 %v4458_v22 }
 0x147   : > { %v4410_v59 = vpop.permute.xlu2 %3255  ;;  %3405 = vrot.lane.b32.xlu1 %v4298_v51, %s3475_s21  ;;  %2413 = vmatpush.bf16.msra.mxu0 %v2334_v57  ;;  %v3212_v57 = vunpack.i.l.bf16 %v4323_v5 }
 0x148   : > { %3400 = vrot.lane.b32.xlu0 %v4298_v51, %s3476_s22  ;;  %2439 = vmatpush.bf16.msra.mxu2 %v2335_v30  ;;  %v1034_v49 = vsel %vm1032_vm11, %v3133_v12, %v5450_v55  ;;  %v3213_v12 = vunpack.i.h.bf16 %v4323_v5 }
 0x149   : > { %v4420_v35 = vpop.permute.xlu1 %3205  ;;  %v2327_v1 = vpack.c.bf16 %v1100_v42, %v1034_v49  ;;  %v5453_v42 = vpack.c.bf16 %v4042_v17, %v4039_v41 }
 0x14a   : > { %v3208_v24 = vunpack.i.h.bf16 %v4420_v35  ;;  %v3207_v8 = vunpack.i.l.bf16 %v4420_v35  ;;  %v4427_v28 = vpop.permute.xlu0 %3200 }
 0x14b   : > { %v3203_v30 = vunpack.i.h.bf16 %v4427_v28  ;;  %v3202_v19 = vunpack.i.l.bf16 %v4427_v28  ;;  %2414 = vmatpush.bf16.msra.mxu0 %v2326_v3  ;;  %v5454_v3 = vpack.c.bf16 %v4047_v48, %v4015_v56  ;;  %v1589_v48 = vld [vmem:[%s3533_s23 + $0x24] sm:$0xf] }
 0x14c   : > { %2440 = vmatpush.bf16.msra.mxu2 %v2327_v1  ;;  %v1958_v14 = vsel %vm1956_vm15, %v3207_v8, %v3208_v24  ;;  %v1826_v1 = vsel %vm1824_vm0, %v3212_v57, %v3213_v12 }
 0x14d   : > { %v4440_v4 = vsel %vm1230_vm14, %v3202_v19, %v3203_v30  ;;  %3415 = vrot.lane.b32.xlu2 %v4298_v51, %s3477_s24  ;;  %v2383_v62 = vpack.c.bf16 0.0, %v1958_v14  ;;  %v3228_v14 = vunpack.i.h.bf16 %v4346_v63 }
 0x14e   : > { %v2338_v23 = vpack.c.bf16 %v4440_v4, %v4376_v54 }
 0x14f   : > { %v4446_v47 = vpop.permute.xlu2 %3270  ;;  %3410 = vrot.lane.b32.xlu1 %v4298_v51, %s3478_s25  ;;  %2415 = vmatpush.bf16.msra.mxu0 %v5451_v27  ;;  %v4465_v51 = vld [vmem:[%s3533_s23 + $0x20] sm:$0xff]   ;;  %v3242_v27 = vunpack.i.l.bf16 %v4386_v2 }
 0x150   : > { %1888 = vrot.lane.b32.xlu0 %v1862_v15, %s3473_s16  ;;  %2441 = vmatpush.bf16.msra.mxu2 %v5452_v21  ;;  %v1664_v55 = vunpack.c.h.bf16 %v4465_v51  ;;  %v5456_v21 = vpack.c.bf16 %v3953_v53, %v3877_v40  ;;  %v5457_v40 = vpack.c.bf16 %v3765_v36, %v3781_v45 }
 0x151   : > { %v4462_v58 = vpop.permute.xlu1 %3220  ;;  %2454 = vmatpush.bf16.msra.mxu3 %v2383_v62  ;;  %v3227_v62 = vunpack.i.l.bf16 %v4346_v63 }
 0x152   : > { %v3222_v34 = vunpack.i.l.bf16 %v4462_v58  ;;  %v4468_v13 = vpop.permute.xlu0 %3215 }
 0x153   : > { %v3218_v39 = vunpack.i.h.bf16 %v4468_v13  ;;  %v3217_v7 = vunpack.i.l.bf16 %v4468_v13  ;;  %2416 = vmatpush.bf16.msra.mxu0 %v5453_v42 }
 0x154   : > { %2442 = vmatpush.bf16.msra.mxu2 %v5454_v3  ;;  %v1957_v49 = vsel %vm1956_vm15, %v3222_v34, %v3207_v8  ;;  %v5455_v8 = vpack.c.bf16 %v3950_v60, %v3937_v16  ;;  %v1523_v34 = vld [vmem:[%s3533_s23 + $0x24] sm:$0xf]  ;;  %v1598_v16 = vunpack.c.l.bf16 %v1589_v48 }
 0x155   : > { %3420 = vrot.lane.b32.xlu2 %v4203_v29, %s3480_s27  ;;  %v1892_v41 = vsel %vm1890_vm1, %v3217_v7, %v3218_v39  ;;  %v2382_v17 = vpack.c.bf16 0.0, %v1957_v49  ;;  %v2912_v29 = vunpack.i.l.bf16 %v3607_v46  ;;  %v1532_v53 = vunpack.c.l.bf16 %v1523_v34 }
 0x156   : > { %v2375_v15 = vpack.c.bf16 %v1892_v41, %v1826_v1  ;;  %v5458_v49 = vpack.c.bf16 %v3837_v0, %v3784_v50  ;;  %v1891_v41 = vsel %vm1890_vm1, %v3242_v27, %v3217_v7  ;;  %v1334_v0 = vunpack.c.l.bf16 %v4465_v51 }
 0x157   : > { %v4490_v56 = vpop.permute.xlu2 %3285  ;;  %1756 = vrot.lane.b32.xlu1 %v1730_v6, %s3474_s20  ;;  %2417 = vmatpush.bf16.msra.mxu0 %v5455_v8  ;;  %v5460_v8 = vpack.c.bf16 %v3697_v31, %v3694_v32  ;;  %v5462_v51 = vunpack.c.l.bf16 %v4161_v25  ;;  %v5465_v31 = vunpack.i.l.bf16 %v4354_v38 }
 0x158   : > { %1690 = vrot.lane.b32.xlu0 %v1664_v55, %s3472_s15  ;;  %2443 = vmatpush.bf16.msra.mxu2 %v5456_v21  ;;  %v3287_v45 = vunpack.i.l.bf16 %v4490_v56  ;;  %v5463_v21 = vunpack.c.l.bf16 %v4117_v37 }
 0x159   : > { %2455 = vmatpush.bf16.msra.mxu3 %v2375_v15  ;;  %v4505_v42 = vpop.permute.xlu1 %3235  ;;  %2428 = vmatpush.bf16.msra.mxu1 %v2382_v17  ;;  %v1694_v17 = vsel %vm1692_vm3, %v3227_v62, %v3228_v14  ;;  %v5459_v15 = vunpack.i.h.bf16 %v3607_v46  ;;  %v3223_v46 = vunpack.i.h.bf16 %v4462_v58 }
 0x15a   : > { %v3237_v60 = vunpack.i.l.bf16 %v4505_v42  ;;  %v4508_v6 = vpop.permute.xlu0 %3230 }
 0x15b   : > { %v3233_v3 = vunpack.i.h.bf16 %v4508_v6  ;;  %v3232_v55 = vunpack.i.l.bf16 %v4508_v6  ;;  %2418 = vmatpush.bf16.msra.mxu0 %v5457_v40  ;;  %v307_v36 = vsel %vm306_vm2, %v2912_v29, %v5459_v15  ;;  %v5461_v29 = vunpack.i.h.bf16 %v4290_v11 }
 0x15c   : > { %2444 = vmatpush.bf16.msra.mxu2 %v5458_v49  ;;  %v1825_v1 = vsel %vm1824_vm0, %v3237_v60, %v3212_v57  ;;  %v2278_v34 = vpack.c.bf16 %v307_v36, %v5463_v21  ;;  %v5464_v60 = vpack.c.bf16 %v3702_v33, %v3670_v18  ;;  %v5466_v11 = vunpack.i.h.bf16 %v4359_v9 }
 0x15d   : > { %v2374_v48 = vpack.c.bf16 %v1891_v41, %v1825_v1  ;;  %v1760_v50 = vsel %vm1758_vm4, %v3232_v55, %v3233_v3  ;;  %1624 = vrot.lane.b32.xlu2 %v1598_v16, %s3475_s21  ;;  %v1234_v27 = vsel %vm1230_vm14, %v5461_v29, %v3202_v19  ;;  %v1457_v16 = vld [vmem:[%s3533_s23 + $0x24] sm:$0xf]  ;;  %v1960_v40 = vsel %vm1956_vm15, %v3223_v46, %v3287_v45 }
 0x15e   : > { %v2367_v57 = vpack.c.bf16 %v1760_v50, %v1694_v17  ;;  %v1168_v19 = vsel %vm1164_vm13, %v5466_v11, %v5465_v31  ;;  %vm1626_vm2 = vcmask 375808   ;;  %v5467_v18 = vunpack.c.h.bf16 %v4161_v25 }
 0x15f   : > { %v4537_v7 = vpop.permute.xlu2 %3300  ;;  %1558 = vrot.lane.b32.xlu1 %v1532_v53, %s3476_s22  ;;  %2419 = vmatpush.bf16.msra.mxu0 %v5460_v8  ;;  %v1391_v53 = vld [vmem:[%s3533_s23 + $0x24] sm:$0xf]  ;;  %v2337_v9 = vpack.c.bf16 %v1234_v27, %v1168_v19  ;;  %v5468_v15 = vunpack.c.h.bf16 %v4117_v37  ;;  %v2385_v25 = vpack.c.bf16 0.0, %v1960_v40  ;;  %v3273_v8 = vunpack.i.h.bf16 %v4446_v47 }
 0x160   : > { %1356 = vrot.lane.b32.xlu0 %v5462_v51, %s3479_s26  ;;  %2429 = vmatpush.bf16.msra.mxu1 %v2374_v48  ;;  %v3424_v33 = vpack.i.bf16 %v1334_v0, %v5467_v18  ;;  %v1466_v48 = vunpack.c.l.bf16 %v1457_v16  ;;  %v1400_v50 = vunpack.c.l.bf16 %v1391_v53  ;;  %v3272_v37 = vunpack.i.l.bf16 %v4446_v47 }
 0x161   : > { %2445 = vmatpush.bf16.msra.mxu2 %v5464_v60  ;;  %2456 = vmatpush.bf16.msra.mxu3 %v2367_v57  ;;  %v4557_v32 = vpop.permute.xlu1 %3250  ;;  %v2279_v36 = vpack.c.bf16 %v3637_v61, %v5468_v15  ;;  %v3257_v27 = vunpack.i.l.bf16 %v4410_v59  ;;  %v5469_v51 = vpack.c.bf16 %v4307_v44, %v4280_v10  ;;  %v2021_v44 = vld [vmem:[%s5250_s1] sm:$0xff]  ;;  %v1268_v19 = vunpack.c.l.bf16 %v4458_v22 }
 0x162   : > { %v3253_v49 = vunpack.i.h.bf16 %v4557_v32  ;;  %v3252_v1 = vunpack.i.l.bf16 %v4557_v32  ;;  %v4574_v38 = vpop.permute.xlu0 %3245  ;;  %v1496_v31 = vsel %vm1494_vm6, %v3272_v37, %v3273_v8  ;;  %v2407_v11 = vunpack.c.l.b16 %v2021_v44 }
 0x163   : > { %v3248_v41 = vunpack.i.h.bf16 %v4574_v38  ;;  %v3247_v17 = vunpack.i.l.bf16 %v4574_v38  ;;  %2420 = vmatpush.bf16.msra.mxu0 %v2278_v34  ;;  %v5470_v53 = vpack.c.bf16 %v4220_v26, %v4132_v20  ;;  %v1693_v18 = vsel %vm1692_vm3, %v3257_v27, %v3227_v62  ;;  %v5471_v20 = vld [vmem:[#allocation51_spill] sm:$0xff] }
 0x164   : > { %v1628_v0 = vsel %vm1626_vm2, %v3252_v1, %v3253_v49  ;;  %v4628_v22 = vpack.c.b16 %v2407_v11, %v2407_v11  ;;  %v5472_v26 = vpack.c.bf16 %v4084_v52, %v5471_v20  ;;  %v1959_v20 = vsel %vm1956_vm15, %v3208_v24, %v3223_v46 }
 0x165   : > { %2446 = vmatpush.bf16.msra.mxu2 %v2279_v36  ;;  %v1562_v57 = vsel %vm1560_vm5, %v3247_v17, %v3248_v41  ;;  %3425 = vrot.lane.b32.xlu2 %v3424_v33, %s3479_s26  ;;  %v2384_v58 = vpack.c.bf16 0.0, %v1959_v20 }
 0x166   : > { %v2359_v61 = vpack.c.bf16 %v1628_v0, %v1562_v57  ;;  %2421 = vmatmul.bf16.vlgmr.msra.gmra.mxu0 %v4628_v22  ;;  %v5473_v0 = vld [vmem:[#allocation43_spill] sm:$0xff] }
 0x167   : > { %2491 = vmatpush.bf16.msrb.mxu0 %v2337_v9  ;;  %v4590_v29 = vpop.permute.xlu2 %3315  ;;  %1492 = vrot.lane.b32.xlu1 %v1466_v48, %s3477_s24  ;;  %v5474_v57 = vld [vmem:[#allocation39_spill] sm:$0xff] }
 0x168   : > { %1426 = vrot.lane.b32.xlu0 %v1400_v50, %s3478_s25  ;;  %2457 = vmatpush.bf16.msra.mxu3 %v2359_v61  ;;  %v5475_v61 = vpack.c.bf16 %v5473_v0, %v5474_v57  ;;  %v3317_v0 = vunpack.i.l.bf16 %v4590_v29 }
 0x169   : > { %2506 = vmatpush.bf16.msrb.mxu2 %v2385_v25  ;;  %v4598_v21 = vpop.permute.xlu1 %3265 }
 0x16a   : > { %v3268_v34 = vunpack.i.h.bf16 %v4598_v21  ;;  %v3267_v16 = vunpack.i.l.bf16 %v4598_v21  ;;  %v4602_v60 = vpop.permute.xlu0 %3260  ;;  %2447 = vmatmul.bf16.vlgmr.msra.gmra.mxu2 %v4628_v22 }
 0x16b   : > { %2492 = vmatpush.bf16.msrb.mxu0 %v5469_v51  ;;  %v3262_v10 = vunpack.i.l.bf16 %v4602_v60 }
 0x16c   : > { %v1430_v40 = vsel %vm1428_vm7, %v3267_v16, %v3268_v34 }
 0x16d   : > { %v1759_v33 = vsel %vm1758_vm4, %v3262_v10, %v3232_v55  ;;  %v2351_v9 = vpack.c.bf16 %v1496_v31, %v1430_v40  ;;  %v5476_v31 = vld [vmem:[#allocation33_spill] sm:$0xff]  ;;  %v5477_v10 = vld [vmem:[#allocation24_spill] sm:$0xff] }
 0x16e   : > { %v2366_v15 = vpack.c.bf16 %v1759_v33, %v1693_v18  ;;  %v5478_v11 = vpack.c.bf16 %v5476_v31, %v5477_v10  ;;  %v2408_v33 = vunpack.c.h.b16 %v2021_v44  ;;  %v3243_v44 = vunpack.i.h.bf16 %v4386_v2 }
 0x16f   : > { %2493 = vmatpush.bf16.msrb.mxu0 %v5470_v53  ;;  %v4630_v36 = vpop.permute.xlu2 %3330  ;;  %2458 = vmatpush.bf16.msra.mxu3 %v2351_v9  ;;  %v3238_v9 = vunpack.i.h.bf16 %v4505_v42  ;;  %v3302_v2 = vunpack.i.l.bf16 %v4537_v7 }
 0x170   : > { %1294 = vrot.lane.b32.xlu0 %v1268_v19, %s3480_s27  ;;  %2430 = vmatpush.bf16.msra.mxu1 %v2366_v15  ;;  %v4686_v46 = vpack.c.b16 %v2408_v33, %v2408_v33  ;;  %v1893_v33 = vsel %vm1890_vm1, %v3218_v39, %v3243_v44 }
 0x171   : > { %v4637_v62 = vpop.permute.xlu1 %3280  ;;  %v1827_v31 = vsel %vm1824_vm0, %v3213_v12, %v3238_v9  ;;  %v1894_v12 = vsel %vm1890_vm1, %v3243_v44, %v3317_v0  ;;  %v1429_v39 = vsel %vm1428_vm7, %v3302_v2, %v3267_v16 }
 0x172   : > { %v3282_v55 = vunpack.i.l.bf16 %v4637_v62  ;;  %v4641_v48 = vpop.permute.xlu0 %3275 }
 0x173   : > { %2494 = vmatpush.bf16.msrb.mxu0 %v5472_v26  ;;  %v3277_v25 = vunpack.i.l.bf16 %v4641_v48  ;;  %v5479_v26 = vld [vmem:[#allocation21_spill] sm:$0xff] }
 0x174   : > { %v1627_v50 = vsel %vm1626_vm2, %v3282_v55, %v3252_v1  ;;  %v5480_v55 = vld [vmem:[#allocation15_spill] sm:$0xff] }
 0x175   : > { %v1561_v27 = vsel %vm1560_vm5, %v3277_v25, %v3247_v17  ;;  %v5481_v25 = vpack.c.bf16 %v5479_v26, %v5480_v55  ;;  %v2376_v26 = vpack.c.bf16 %v1893_v33, %v1827_v31  ;;  %v3283_v55 = vunpack.i.h.bf16 %v4637_v62 }
 0x176   : > { %v2358_v52 = vpack.c.bf16 %v1627_v50, %v1561_v27  ;;  %v5484_v27 = vld [vmem:[#allocation9_spill] sm:$0xff]  ;;  %v3303_v31 = vunpack.i.h.bf16 %v4537_v7 }
 0x177   : > { %2495 = vmatpush.bf16.msrb.mxu0 %v5475_v61  ;;  %v4649_v51 = vpop.permute.xlu2 %3345  ;;  %v5482_v61 = vld [vmem:[#allocation59_spill] sm:$0xff] }
 0x178   : > { %2431 = vmatpush.bf16.msra.mxu1 %v2358_v52  ;;  %v5483_v35 = vunpack.c.h.bf16 %v5482_v61  ;;  %v3263_v52 = vunpack.i.h.bf16 %v4602_v60  ;;  %v1431_v47 = vsel %vm1428_vm7, %v3268_v34, %v3303_v31  ;;  %v3347_v60 = vunpack.i.l.bf16 %v4649_v51 }
 0x179   : > { %v4654_v19 = vpop.permute.xlu1 %3295 }
 0x17a   : > { %v3298_v40 = vunpack.i.h.bf16 %v4654_v19  ;;  %v3297_v1 = vunpack.i.l.bf16 %v4654_v19  ;;  %v4658_v53 = vpop.permute.xlu0 %3290  ;;  %v2281_v24 = vpack.c.bf16 %v5484_v27, %v5483_v35  ;;  %v1761_v13 = vsel %vm1758_vm4, %v3233_v3, %v3263_v52 }
 0x17b   : > { %2496 = vmatpush.bf16.msrb.mxu0 %v5478_v11  ;;  %v3293_v17 = vunpack.i.h.bf16 %v4658_v53  ;;  %v3292_v18 = vunpack.i.l.bf16 %v4658_v53  ;;  %v3258_v11 = vunpack.i.h.bf16 %v4410_v59  ;;  %v3288_v3 = vunpack.i.h.bf16 %v4490_v56  ;;  %v5489_v53 = vld [vmem:[#allocation75_spill] sm:$0xff]  ;;  %v5495_v59 = vld [vmem:[#allocation65_spill] sm:$0xff] }
 0x17c   : > { %v1364_v15 = vsel %vm1362_vm8, %v3297_v1, %v3298_v40 }
 0x17d   : > { %v1298_v42 = vsel %vm1296_vm9, %v3292_v18, %v3293_v17  ;;  %v1695_v6 = vsel %vm1692_vm3, %v3228_v14, %v3258_v11  ;;  %v1629_v14 = vsel %vm1626_vm2, %v3253_v49, %v3283_v55 }
 0x17e   : > { %v2343_v50 = vpack.c.bf16 %v1364_v15, %v1298_v42  ;;  %v2368_v16 = vpack.c.bf16 %v1761_v13, %v1695_v6  ;;  %v3333_v13 = vunpack.i.h.bf16 %v4630_v36 }
 0x17f   : > { %2497 = vmatpush.bf16.msrb.mxu0 %v5481_v25  ;;  %v4681_v57 = vpop.permute.xlu2 %3360  ;;  %v3278_v25 = vunpack.i.h.bf16 %v4641_v48  ;;  %v5504_v48 = vld [vmem:[#allocation44_spill] sm:$0xff] }
 0x180   : > { %2459 = vmatpush.bf16.msra.mxu3 %v2343_v50  ;;  %v1365_v21 = vsel %vm1362_vm8, %v3298_v40, %v3333_v13 }
 0x181   : > { %v4693_v10 = vpop.permute.xlu1 %3310  ;;  %v1563_v63 = vsel %vm1560_vm5, %v3248_v41, %v3278_v25 }
 0x182   : > { %v3312_v15 = vunpack.i.l.bf16 %v4693_v10  ;;  %v4697_v20 = vpop.permute.xlu0 %3305 }
 0x183   : > { %2498 = vmatpush.bf16.msrb.mxu0 %v2281_v24  ;;  %v3307_v5 = vunpack.i.l.bf16 %v4697_v20  ;;  %2460 = vmatmul.bf16.vlgmr.msra.gmra.mxu3 %v4686_v46  ;;  %v3308_v27 = vunpack.i.h.bf16 %v4697_v20 }
 0x184   : > { %2480 = vmatpush.bf16.msrb.mxu3 %v2384_v58  ;;  %v1828_v42 = vsel %vm1824_vm0, %v3238_v9, %v3312_v15  ;;  %v3332_v9 = vunpack.i.l.bf16 %v4630_v36 }
 0x185   : > { %v1495_v44 = vsel %vm1494_vm6, %v3307_v5, %v3272_v37  ;;  %v2377_v50 = vpack.c.bf16 %v1894_v12, %v1828_v42  ;;  %v2360_v5 = vpack.c.bf16 %v1629_v14, %v1563_v63  ;;  %v1497_v12 = vsel %vm1494_vm6, %v3273_v8, %v3308_v27 }
 0x186   : > { %2499 = vmatmul.bf16.vlgmr.msrb.gmra.mxu0 %v4628_v22  ;;  %v2350_v58 = vpack.c.bf16 %v1495_v44, %v1429_v39  ;;  %v1363_v7 = vsel %vm1362_vm8, %v3332_v9, %v3297_v1  ;;  %v5485_v39 = vld [vmem:[#allocation80_spill] sm:$0xff]  ;;  %v2352_v8 = vpack.c.bf16 %v1497_v12, %v1431_v47  ;;  %v5486_v44 = vld [vmem:[#allocation79_spill] sm:$0xff]  ;;  %v3362_v12 = vunpack.i.l.bf16 %v4681_v57  ;;  %v5501_v47 = vld [vmem:[#allocation66_spill] sm:$0xff] }
 0x187   : > { %v4731_v35 = vpop.permute.xlu2 %3375  ;;  %2507 = vmatpush.bf16.msrb.mxu2 %v2377_v50  ;;  %v5487_v50 = vld [vmem:[#allocation81_spill] sm:$0xff] }
 0x188   : > { %2481 = vmatpush.bf16.msrb.mxu3 %v2376_v26  ;;  %v3377_v37 = vunpack.i.l.bf16 %v4731_v35  ;;  %2432 = vmatpush.bf16.msra.mxu1 %v2350_v58  ;;  %v5488_v28 = vpack.c.bf16 %v5486_v44, %v5487_v50  ;;  %v1498_v62 = vsel %vm1494_vm6, %v3308_v27, %v3362_v12 }
 0x189   : > { %v4745_v24 = vpop.permute.xlu1 %3325 }
 0x18a   : > { %v1962_v2 = vsel %vm1956_vm15, %v3288_v3, %v3377_v37  ;;  %v3327_v38 = vunpack.i.l.bf16 %v4745_v24  ;;  %v4754_v41 = vpop.permute.xlu0 %3320  ;;  %v3328_v49 = vunpack.i.h.bf16 %v4745_v24  ;;  %v5492_v24 = vld [vmem:[#allocation68_spill] sm:$0xff] }
 0x18b   : > { %v2387_v33 = vpack.c.bf16 0.0, %v1962_v2  ;;  %v3322_v32 = vunpack.i.l.bf16 %v4754_v41  ;;  %v5493_v2 = vld [vmem:[#allocation61_spill] sm:$0xff] }
 0x18c   : > { %2482 = vmatpush.bf16.msrb.mxu3 %v2368_v16  ;;  %v1297_v26 = vsel %vm1296_vm9, %v3327_v38, %v3292_v18  ;;  %v5494_v38 = vpack.c.bf16 %v5492_v24, %v5493_v2  ;;  %v5513_v2 = vld [vmem:[#allocation30_spill] sm:$0xff] }
 0x18d   : > { %v4772_v42 = vsel %vm1230_vm14, %v3203_v30, %v3322_v32  ;;  %2558 = vmatpush.bf16.msra.mxu0 %v2387_v33  ;;  %v2342_v18 = vpack.c.bf16 %v1363_v7, %v1297_v26  ;;  %v1299_v30 = vsel %vm1296_vm9, %v3293_v17, %v3328_v49  ;;  %v5490_v17 = vld [vmem:[#allocation60_spill] sm:$0xff] }
 0x18e   : > { %v2339_v1 = vpack.c.bf16 %v4772_v42, %v5485_v39  ;;  %v2344_v9 = vpack.c.bf16 %v1365_v21, %v1299_v30  ;;  %v5491_v63 = vpack.c.bf16 %v5489_v53, %v5490_v17  ;;  %v5499_v26 = vld [vmem:[#allocation52_spill] sm:$0xff]  ;;  %v1564_v42 = vsel %vm1560_vm5, %v3278_v25, %v3347_v60  ;;  %v5505_v25 = vld [vmem:[#allocation25_spill] sm:$0xff] }
 0x18f   : > { %2433 = vmatpush.bf16.msra.mxu1 %v2342_v18  ;;  %v4796_v16 = vpop.permute.xlu2 %1228  ;;  %v5506_v30 = vpack.c.bf16 %v5504_v48, %v5505_v25  ;;  %v5507_v53 = vld [vmem:[#allocation57_spill] sm:$0xff]  ;;  %v5523_v48 = vld [vmem:[#allocation10_spill] sm:$0xff] }
 0x190   : > { %2483 = vmatpush.bf16.msrb.mxu3 %v2360_v5  ;;  %v5508_v17 = vld [vmem:[#allocation49_spill] sm:$0xff] }
 0x191   : > { %v4786_v58 = vpop.permute.xlu1 %3340 }
 0x192   : > { %v3342_v36 = vunpack.i.l.bf16 %v4786_v58  ;;  %v4789_v6 = vpop.permute.xlu0 %3335  ;;  %2434 = vmatmul.bf16.vlgmr.msra.gmra.mxu1 %v4686_v46 }
 0x193   : > { %2465 = vmatpush.bf16.msrb.mxu1 %v5488_v28  ;;  %v3337_v34 = vunpack.i.l.bf16 %v4789_v6 }
 0x194   : > { %2484 = vmatpush.bf16.msrb.mxu3 %v2352_v8  ;;  %v1762_v14 = vsel %vm1758_vm4, %v3263_v52, %v3342_v36  ;;  %v5502_v8 = vld [vmem:[#allocation48_spill] sm:$0xff] }
 0x195   : > { %v1696_v19 = vsel %vm1692_vm3, %v3258_v11, %v3337_v34  ;;  %v5496_v11 = vld [vmem:[#allocation73_spill] sm:$0xff]  ;;  %v5503_v44 = vpack.c.bf16 %v5501_v47, %v5502_v8  ;;  %v3378_v8 = vunpack.i.h.bf16 %v4731_v35  ;;  %v5547_v35 = vld [vmem:[#allocation7_spill] sm:$0xff] }
 0x196   : > { %v2369_v40 = vpack.c.bf16 %v1762_v14, %v1696_v19  ;;  %v5497_v5 = vpack.c.bf16 %v5495_v59, %v5496_v11  ;;  %v5510_v19 = vld [vmem:[#allocation34_spill] sm:$0xff] }
 0x197   : > { %2466 = vmatpush.bf16.msrb.mxu1 %v5491_v63  ;;  %v4842_v39 = vpop.permute.xlu2 %1954 }
 0x198   : > { %2485 = vmatpush.bf16.msrb.mxu3 %v2344_v9  ;;  %2508 = vmatpush.bf16.msrb.mxu2 %v2369_v40  ;;  %v5511_v40 = vld [vmem:[#allocation26_spill] sm:$0xff] }
 0x199   : > { %v4818_v52 = vpop.permute.xlu1 %3355  ;;  %v5512_v24 = vpack.c.bf16 %v5510_v19, %v5511_v40  ;;  %v5524_v19 = vld [vmem:[#allocation76_spill] sm:$0xff]  ;;  %v5525_v40 = vld [vmem:[#allocation74_spill] sm:$0xff] }
 0x19a   : > { %v4821_v33 = vpop.permute.xlu0 %3350  ;;  %v3357_v54 = vunpack.i.l.bf16 %v4818_v52 }
 0x19b   : > { %2467 = vmatpush.bf16.msrb.mxu1 %v5494_v38  ;;  %2486 = vmatmul.bf16.vlgmr.msrb.gmra.mxu3 %v4686_v46  ;;  %v3352_v4 = vunpack.i.l.bf16 %v4821_v33  ;;  %v5514_v38 = vld [vmem:[#allocation40_spill] sm:$0xff] }
 0x19c   : > { %2517 = vmatpush.bf16.msra.mxu3 %v2338_v23  ;;  %v5498_v23 = vld [vmem:[#allocation42_spill] sm:$0xff]  ;;  %v1432_v28 = vsel %vm1428_vm7, %v3303_v31, %v3357_v54  ;;  %v5509_v31 = vpack.c.bf16 %v5507_v53, %v5508_v17  ;;  %v5515_v59 = vpack.c.bf16 %v5513_v2, %v5514_v38  ;;  %v3343_v17 = vunpack.i.h.bf16 %v4786_v58  ;;  %v5528_v2 = vld [vmem:[#allocation13_spill] sm:$0xff] }
 0x19d   : > { %v5500_v7 = vpack.c.bf16 %v5498_v23, %v5499_v26  ;;  %v1630_v18 = vsel %vm1626_vm2, %v3283_v55, %v3352_v4  ;;  %v2353_v63 = vpack.c.bf16 %v1498_v62, %v1432_v28  ;;  %v1961_v23 = vsel %vm1956_vm15, %v3287_v45, %v3288_v3  ;;  %v5519_v45 = vld [vmem:[#allocation31_spill] sm:$0xff]  ;;  %v5520_v3 = vld [vmem:[#allocation12_spill] sm:$0xff] }
 0x19e   : > { %v2361_v50 = vpack.c.bf16 %v1630_v18, %v1564_v42  ;;  %v3313_v26 = vunpack.i.h.bf16 %v4693_v10  ;;  %v4892_v18 = vld [vmem:[%s3533_s23 + $0x10] sm:$0xff]  ;;  %v5522_v28 = vunpack.c.l.bf16 %v5482_v61 }
 0x19f   : > { %2468 = vmatpush.bf16.msrb.mxu1 %v5500_v7  ;;  %v5516_v7 = vld [vmem:[#allocation5_spill] sm:$0xff]  ;;  %v5527_v10 = vld [vmem:[#allocation22_spill] sm:$0xff] }
 0x1a0   : > { %2518 = vmatpush.bf16.msra.mxu3 %v5497_v5  ;;  %2509 = vmatpush.bf16.msrb.mxu2 %v2361_v50  ;;  %v3318_v5 = vunpack.i.h.bf16 %v4590_v29  ;;  %v5521_v50 = vpack.c.bf16 %v5519_v45, %v5520_v3  ;;  %v2280_v25 = vpack.c.bf16 %v5523_v48, %v5522_v28  ;;  %v5532_v45 = vld [vmem:[#allocation63_spill] sm:$0xff] }
 0x1a1   : > { %v4853_v21 = vpop.permute.xlu1 %3370 }
 0x1a2   : > { %v3372_v55 = vunpack.i.l.bf16 %v4853_v21  ;;  %v4861_v9 = vpop.permute.xlu0 %3365  ;;  %v1895_v53 = vsel %vm1890_vm1, %v3317_v0, %v3318_v5  ;;  %v1963_v0 = vsel %vm1956_vm15, %v3377_v37, %v3378_v8 }
 0x1a3   : > { %2469 = vmatpush.bf16.msrb.mxu1 %v5506_v30  ;;  %v3367_v14 = vunpack.i.l.bf16 %v4861_v9  ;;  %v2386_v30 = vpack.c.bf16 0.0, %v1961_v23 }
 0x1a4   : > { %2519 = vmatpush.bf16.msra.mxu3 %v5503_v44  ;;  %2510 = vmatpush.bf16.msrb.mxu2 %v2353_v63  ;;  %v1366_v20 = vsel %vm1362_vm8, %v3333_v13, %v3372_v55  ;;  %v4886_v13 = vpop.permute.xlu2 %1822  ;;  %v1829_v63 = vsel %vm1824_vm0, %v3312_v15, %v3313_v26  ;;  %v5529_v15 = vpack.c.bf16 %v5527_v10, %v5528_v2  ;;  %v3373_v2 = vunpack.i.h.bf16 %v4853_v21 }
 0x1a5   : > { %v1300_v27 = vsel %vm1296_vm9, %v3328_v49, %v3367_v14  ;;  %v5517_v49 = vld [vmem:[#allocation16_spill] sm:$0xff] }
 0x1a6   : > { %v2345_v11 = vpack.c.bf16 %v1366_v20, %v1300_v27  ;;  %v5518_v42 = vpack.c.bf16 %v5516_v7, %v5517_v49  ;;  %v3348_v7 = vunpack.i.h.bf16 %v4649_v51  ;;  %v2388_v49 = vpack.c.bf16 0.0, %v1963_v0 }
 0x1a7   : > { %2470 = vmatpush.bf16.msrb.mxu1 %v5512_v24  ;;  %v5526_v24 = vpack.c.bf16 %v5524_v19, %v5525_v40  ;;  %v5534_v19 = vld [vmem:[#allocation58_spill] sm:$0xff] }
 0x1a8   : > { %2520 = vmatpush.bf16.msra.mxu3 %v5509_v31  ;;  %2511 = vmatpush.bf16.msrb.mxu2 %v2345_v11  ;;  %v3338_v31 = vunpack.i.h.bf16 %v4789_v6  ;;  %v3353_v11 = vunpack.i.h.bf16 %v4821_v33  ;;  %v5535_v40 = vld [vmem:[#allocation50_spill] sm:$0xff]  ;;  %v1565_v10 = vsel %vm1560_vm5, %v3347_v60, %v3348_v7 }
 0x1a9   : > { %v4894_v47 = vpop.permute.xlu1 %3385 }
 0x1aa   : > { %v3387_v56 = vunpack.i.l.bf16 %v4894_v47  ;;  %v4898_v44 = vpop.permute.xlu0 %3380  ;;  %v3388_v20 = vunpack.i.h.bf16 %v4894_v47  ;;  %v1697_v37 = vsel %vm1692_vm3, %v3337_v34, %v3338_v31 }
 0x1ab   : > { %2471 = vmatpush.bf16.msrb.mxu1 %v5518_v42  ;;  %v3382_v62 = vunpack.i.l.bf16 %v4898_v44  ;;  %2512 = vmatmul.bf16.vlgmr.msrb.gmra.mxu2 %v4686_v46  ;;  %v3383_v27 = vunpack.i.h.bf16 %v4898_v44  ;;  %v5531_v42 = vld [vmem:[#allocation67_spill] sm:$0xff] }
 0x1ac   : > { %2521 = vmatpush.bf16.msra.mxu3 %v5515_v59  ;;  %2543 = vmatpush.bf16.msra.mxu2 %v2339_v1  ;;  %v253_v1 = vunpack.c.l.bf16 %v4892_v18  ;;  %v1896_v61 = vsel %vm1890_vm1, %v3318_v5, %v3387_v56  ;;  %v2378_v59 = vpack.c.bf16 %v1895_v53, %v1829_v63  ;;  %v5530_v5 = vld [vmem:[#allocation6_spill] sm:$0xff]  ;;  %v5533_v3 = vpack.c.bf16 %v5531_v42, %v5532_v45  ;;  %v4947_v28 = vpop.permute.xlu2 %3415 }
 0x1ad   : > { %v1830_v29 = vsel %vm1824_vm0, %v3313_v26, %v3382_v62  ;;  %v1763_v26 = vsel %vm1758_vm4, %v3342_v36, %v3343_v17  ;;  %v1831_v58 = vsel %vm1824_vm0, %v3382_v62, %v3383_v27  ;;  %v1897_v36 = vsel %vm1890_vm1, %v3387_v56, %v3388_v20 }
 0x1ae   : > { %v2379_v38 = vpack.c.bf16 %v1896_v61, %v1830_v29  ;;  %v2282_v23 = vpack.c.bf16 %v5530_v5, %v253_v1  ;;  %v2370_v1 = vpack.c.bf16 %v1763_v26, %v1697_v37  ;;  %v3363_v53 = vunpack.i.h.bf16 %v4681_v57 }
 0x1af   : > { %2472 = vmatpush.bf16.msrb.mxu1 %v2280_v25  ;;  %v3358_v61 = vunpack.i.h.bf16 %v4818_v52  ;;  %v1631_v62 = vsel %vm1626_vm2, %v3352_v4, %v3353_v11  ;;  %v2380_v56 = vpack.c.bf16 %v1897_v36, %v1831_v58  ;;  %v5549_v52 = vld [vmem:[#allocation71_spill] sm:$0xff]  ;;  %v1832_v57 = vsel %vm1824_vm0, %v3383_v27, %v4886_v13 }
 0x1b0   : > { %2522 = vmatpush.bf16.msra.mxu3 %v5521_v50  ;;  %2544 = vmatpush.bf16.msra.mxu2 %v5526_v24  ;;  %v5536_v24 = vpack.c.bf16 %v5534_v19, %v5535_v40  ;;  %v2362_v4 = vpack.c.bf16 %v1631_v62, %v1565_v10  ;;  %v1499_v60 = vsel %vm1494_vm6, %v3362_v12, %v3363_v53  ;;  %v3418_v40 = vunpack.i.h.bf16 %v4947_v28 }
 0x1b1   : > { %2559 = vmatpush.bf16.msra.mxu0 %v2379_v38  ;;  %v4945_v50 = vpop.permute.xlu1 %3395  ;;  %v1433_v51 = vsel %vm1428_vm7, %v3357_v54, %v3358_v61  ;;  %v5537_v38 = vld [vmem:[#allocation45_spill] sm:$0xff]  ;;  %v3417_v10 = vunpack.i.l.bf16 %v4947_v28 }
 0x1b2   : > { %2473 = vmatmul.bf16.vlgmr.msrb.gmra.mxu1 %v4628_v22  ;;  %v3398_v6 = vunpack.i.h.bf16 %v4945_v50  ;;  %v3397_v34 = vunpack.i.l.bf16 %v4945_v50  ;;  %v4951_v48 = vpop.permute.xlu0 %3390  ;;  %v2354_v45 = vpack.c.bf16 %v1499_v60, %v1433_v51  ;;  %v5570_v28 = vld [vmem:[#allocation69_spill] sm:$0xff] }
 0x1b3   : > { %2532 = vmatpush.bf16.msra.mxu1 %v2386_v30  ;;  %v3393_v25 = vunpack.i.h.bf16 %v4951_v48  ;;  %v3392_v30 = vunpack.i.l.bf16 %v4951_v48 }
 0x1b4   : > { %2523 = vmatpush.bf16.msra.mxu3 %v5529_v15  ;;  %2545 = vmatpush.bf16.msra.mxu2 %v5533_v3  ;;  %v1764_v63 = vsel %vm1758_vm4, %v3343_v17, %v3397_v34  ;;  %v1765_v33 = vsel %vm1758_vm4, %v3397_v34, %v3398_v6  ;;  %v3323_v15 = vunpack.i.h.bf16 %v4754_v41  ;;  %v5005_v3 = vpop.permute.xlu2 %3420 }
 0x1b5   : > { %v1698_v29 = vsel %vm1692_vm3, %v3338_v31, %v3392_v30  ;;  %v1699_v17 = vsel %vm1692_vm3, %v3392_v30, %v3393_v25  ;;  %v3368_v31 = vunpack.i.h.bf16 %v4861_v9  ;;  %v1367_v30 = vsel %vm1362_vm8, %v3372_v55, %v3373_v2  ;;  %v248_v9 = vld [vmem:[%s3533_s23 + $0x18] sm:$0xff] }
 0x1b6   : > { %v2371_v0 = vpack.c.bf16 %v1764_v63, %v1698_v29  ;;  %v2372_v37 = vpack.c.bf16 %v1765_v33, %v1699_v17  ;;  %v5541_v63 = vld [vmem:[#allocation28_spill] sm:$0xff]  ;;  %v254_v29 = vunpack.c.h.bf16 %v4892_v18  ;;  %v5544_v17 = vld [vmem:[#allocation23_spill] sm:$0xff]  ;;  %v5545_v33 = vld [vmem:[#allocation14_spill] sm:$0xff]  ;;  %v1238_v48 = vsel %vm1230_vm14, %v3323_v15, %v4796_v16 }
 0x1b7   : > { %2533 = vmatpush.bf16.msra.mxu1 %v2378_v59  ;;  %v5538_v59 = vld [vmem:[#allocation41_spill] sm:$0xff]  ;;  %v1301_v36 = vsel %vm1296_vm9, %v3367_v14, %v3368_v31 }
 0x1b8   : > { %2524 = vmatpush.bf16.msra.mxu3 %v2282_v23  ;;  %2546 = vmatpush.bf16.msra.mxu2 %v5536_v24  ;;  %v5539_v5 = vpack.c.bf16 %v5537_v38, %v5538_v59  ;;  %v1501_v59 = vsel %vm1494_vm6, %v3417_v10, %v3418_v40 }
 0x1b9   : > { %2560 = vmatpush.bf16.msra.mxu0 %v2371_v0  ;;  %v4997_v23 = vpop.permute.xlu1 %3405  ;;  %v5543_v0 = vld [vmem:[#allocation70_spill] sm:$0xff] }
 0x1ba   : > { %v3408_v26 = vunpack.i.h.bf16 %v4997_v23  ;;  %v3407_v54 = vunpack.i.l.bf16 %v4997_v23 }
 0x1bb   : > { %2534 = vmatpush.bf16.msra.mxu1 %v2370_v1  ;;  %2525 = vmatmul.bf16.vlgmr.msra.gmra.mxu3 %v4628_v22  ;;  %v5540_v1 = vld [vmem:[#allocation32_spill] sm:$0xff] }
 0x1bc   : > { %2584 = vmatpush.bf16.msrb.mxu3 %v2388_v49  ;;  %2547 = vmatpush.bf16.msra.mxu2 %v5539_v5  ;;  %v5001_v49 = vpop.permute.xlu0 %3400  ;;  %v1632_v34 = vsel %vm1626_vm2, %v3353_v11, %v3407_v54  ;;  %v1633_v58 = vsel %vm1626_vm2, %v3407_v54, %v3408_v26  ;;  %v1237_v11 = vsel %vm1230_vm14, %v3322_v32, %v3323_v15 }
 0x1bd   : > { %v3403_v42 = vunpack.i.h.bf16 %v5001_v49  ;;  %v3402_v12 = vunpack.i.l.bf16 %v5001_v49  ;;  %v5542_v62 = vpack.c.bf16 %v5540_v1, %v5541_v63  ;;  %v2340_v32 = vpack.c.bf16 %v1237_v11, %v5543_v0  ;;  %v5551_v11 = vld [vmem:[#allocation54_spill] sm:$0xff]  ;;  %v5552_v1 = vld [vmem:[#allocation64_spill] sm:$0xff] }
 0x1be   : > { %v2283_v5 = vpack.c.bf16 %v5547_v35, %v254_v29  ;;  %v1500_v54 = vsel %vm1494_vm6, %v3363_v53, %v3417_v10  ;;  %v5553_v63 = vpack.c.bf16 %v5551_v11, %v5552_v1  ;;  %v2341_v49 = vpack.c.bf16 %v1238_v48, %v4401_v43  ;;  %v5566_v35 = vld [vmem:[#allocation78_spill] sm:$0xff] }
 0x1bf   : > { %2535 = vmatpush.bf16.msra.mxu1 %v2362_v4  ;;  %v1566_v19 = vsel %vm1560_vm5, %v3348_v7, %v3402_v12  ;;  %v1567_v14 = vsel %vm1560_vm5, %v3402_v12, %v3403_v42  ;;  %v1964_v7 = vsel %vm1956_vm15, %v3378_v8, %v4842_v39  ;;  %v5546_v4 = vpack.c.bf16 %v5544_v17, %v5545_v33  ;;  %v1625_v8 = vpop.permute.xlu2 %1624  ;;  %v5561_v17 = vld [vmem:[#allocation29_spill] sm:$0xff] }
 0x1c0   : > { %2585 = vmatpush.bf16.msrb.mxu3 %v2380_v56  ;;  %2548 = vmatpush.bf16.msra.mxu2 %v5542_v62  ;;  %v2363_v55 = vpack.c.bf16 %v1632_v34, %v1566_v19  ;;  %v2364_v24 = vpack.c.bf16 %v1633_v58, %v1567_v14  ;;  %v2346_v56 = vpack.c.bf16 %v1367_v30, %v1301_v36  ;;  %v2389_v39 = vpack.c.bf16 0.0, %v1964_v7  ;;  %v5548_v36 = vld [vmem:[#allocation77_spill] sm:$0xff]  ;;  %v5554_v19 = vld [vmem:[#allocation55_spill] sm:$0xff]  ;;  %v5555_v14 = vld [vmem:[#allocation36_spill] sm:$0xff] }
 0x1c1   : > { %v5044_v51 = vpop.permute.xlu1 %3410  ;;  %v5550_v30 = vpack.c.bf16 %v5548_v36, %v5549_v52  ;;  %v3423_v62 = vunpack.i.h.bf16 %v5005_v3  ;;  %v5556_v50 = vpack.c.bf16 %v5554_v19, %v5555_v14  ;;  %v5574_v36 = vld [vmem:[#allocation53_spill] sm:$0xff]  ;;  %v256_v1 = vunpack.c.h.bf16 %v248_v9 }
 0x1c2   : > { %2561 = vmatpush.bf16.msra.mxu0 %v2363_v55  ;;  %v3413_v18 = vunpack.i.h.bf16 %v5044_v51  ;;  %v3412_v60 = vunpack.i.l.bf16 %v5044_v51 }
 0x1c3   : > { %2536 = vmatpush.bf16.msra.mxu1 %v2354_v45 }
 0x1c4   : > { %2586 = vmatpush.bf16.msrb.mxu3 %v2372_v37  ;;  %2549 = vmatpush.bf16.msra.mxu2 %v5546_v4  ;;  %v1889_v38 = vpop.permute.xlu0 %1888  ;;  %v1434_v37 = vsel %vm1428_vm7, %v3358_v61, %v3412_v60  ;;  %v1435_v12 = vsel %vm1428_vm7, %v3412_v60, %v3413_v18  ;;  %v5563_v60 = vld [vmem:[#allocation19_spill] sm:$0xff] }
 0x1c5   : > { %v1898_v45 = vsel %vm1890_vm1, %v3388_v20, %v1889_v38  ;;  %v2355_v34 = vpack.c.bf16 %v1500_v54, %v1434_v37  ;;  %v2356_v58 = vpack.c.bf16 %v1501_v59, %v1435_v12  ;;  %v5564_v38 = vld [vmem:[#allocation4_spill] sm:$0xff] }
 0x1c6   : > { %v2381_v53 = vpack.c.bf16 %v1898_v45, %v1832_v57  ;;  %v5565_v59 = vpack.c.bf16 %v5563_v60, %v5564_v38  ;;  %v5569_v54 = vld [vmem:[#allocation8_spill] sm:$0xff]  ;;  %v5576_v57 = vld [vmem:[#allocation47_spill] sm:$0xff] }
 0x1c7   : > { %2537 = vmatpush.bf16.msra.mxu1 %v2346_v56  ;;  %2562 = vmatpush.bf16.msra.mxu0 %v2355_v34  ;;  %v3426_v27 = vpop.permute.xlu2 %3425 }
 0x1c8   : > { %2587 = vmatpush.bf16.msrb.mxu3 %v2364_v24  ;;  %2550 = vmatpush.bf16.msra.mxu2 %v2283_v5  ;;  %v3427_v55 = vunpack.i.l.bf16 %v3426_v27  ;;  %v5567_v5 = vld [vmem:[#allocation72_spill] sm:$0xff]  ;;  %v3428_v37 = vunpack.i.h.bf16 %v3426_v27  ;;  %v5585_v27 = vld [vmem:[#allocation11_spill] sm:$0xff] }
 0x1c9   : > { %v1757_v47 = vpop.permute.xlu1 %1756 }
 0x1ca   : > { %2538 = vmatmul.bf16.vlgmr.msra.gmra.mxu1 %v4686_v46  ;;  %v1766_v20 = vsel %vm1758_vm4, %v3398_v6, %v1757_v47  ;;  %v3422_v6 = vunpack.i.l.bf16 %v5005_v3  ;;  %v5557_v3 = vld [vmem:[#allocation46_spill] sm:$0xff]  ;;  %v1370_v51 = vsel %vm1362_vm8, %v3427_v55, %v3428_v37 }
 0x1cb   : > { %2569 = vmatpush.bf16.msrb.mxu1 %v2340_v32  ;;  %2551 = vmatmul.bf16.vlgmr.msra.gmra.mxu2 %v4628_v22  ;;  %v5558_v32 = vld [vmem:[#allocation37_spill] sm:$0xff] }
 0x1cc   : > { %2610 = vmatpush.bf16.msrb.mxu2 %v2389_v39  ;;  %2588 = vmatpush.bf16.msrb.mxu3 %v2356_v58  ;;  %v1691_v61 = vpop.permute.xlu0 %1690  ;;  %v1303_v56 = vsel %vm1296_vm9, %v3422_v6, %v3423_v62  ;;  %v5559_v10 = vpack.c.bf16 %v5557_v3, %v5558_v32  ;;  %v1302_v41 = vsel %vm1296_vm9, %v3368_v31, %v3422_v6  ;;  %v5573_v58 = vld [vmem:[#allocation56_spill] sm:$0xff] }
 0x1cd   : > { %v1700_v13 = vsel %vm1692_vm3, %v3393_v25, %v1691_v61  ;;  %v1634_v25 = vsel %vm1626_vm2, %v3408_v26, %v1625_v8  ;;  %v5568_v39 = vpack.c.bf16 %v5566_v35, %v5567_v5  ;;  %v5575_v52 = vpack.c.bf16 %v5573_v58, %v5574_v36  ;;  %v5580_v61 = vld [vmem:[#allocation27_spill] sm:$0xff] }
 0x1ce   : > { %v2373_v44 = vpack.c.bf16 %v1766_v20, %v1700_v13  ;;  %v5579_v20 = vld [vmem:[#allocation35_spill] sm:$0xff]  ;;  %v5583_v13 = vld [vmem:[#allocation17_spill] sm:$0xff] }
 0x1cf   : > { %2570 = vmatpush.bf16.msrb.mxu1 %v5550_v30  ;;  %v5581_v11 = vpack.c.bf16 %v5579_v20, %v5580_v61 }
 0x1d0   : > { %2611 = vmatpush.bf16.msrb.mxu2 %v2381_v53  ;;  %v5577_v53 = vld [vmem:[#allocation38_spill] sm:$0xff] }
 0x1d1   : > { %v1559_v24 = vpop.permute.xlu1 %1558  ;;  %v5578_v47 = vpack.c.bf16 %v5576_v57, %v5577_v53 }
 0x1d2   : > { %v1568_v29 = vsel %vm1560_vm5, %v3403_v42, %v1559_v24  ;;  %v5560_v42 = vld [vmem:[#allocation18_spill] sm:$0xff] }
 0x1d3   : > { %2571 = vmatpush.bf16.msrb.mxu1 %v5553_v63  ;;  %v2365_v7 = vpack.c.bf16 %v1634_v25, %v1568_v29  ;;  %v5562_v33 = vpack.c.bf16 %v5560_v42, %v5561_v17  ;;  %v5582_v63 = vld [vmem:[#allocation20_spill] sm:$0xff] }
 0x1d4   : > { %2612 = vmatpush.bf16.msrb.mxu2 %v2373_v44  ;;  %v1357_v0 = vpop.permute.xlu0 %1356  ;;  %v5584_v44 = vpack.c.bf16 %v5582_v63, %v5583_v13 }
 0x1d5   : > { %v1368_v16 = vsel %vm1362_vm8, %v3373_v2, %v1357_v0  ;;  %v1369_v15 = vsel %vm1362_vm8, %v1357_v0, %v3427_v55  ;;  %v255_v2 = vunpack.c.l.bf16 %v248_v9 }
 0x1d6   : > { %v2347_v23 = vpack.c.bf16 %v1368_v16, %v1302_v41  ;;  %v2348_v26 = vpack.c.bf16 %v1369_v15, %v1303_v56 }
 0x1d7   : > { %2572 = vmatpush.bf16.msrb.mxu1 %v5556_v50  ;;  %v2284_v12 = vpack.c.bf16 %v5569_v54, %v255_v2 }
 0x1d8   : > { %2613 = vmatpush.bf16.msrb.mxu2 %v2365_v7  ;;  %2563 = vmatpush.bf16.msra.mxu0 %v2347_v23 }
 0x1d9   : > { %2589 = vmatpush.bf16.msrb.mxu3 %v2348_v26  ;;  %v1493_v21 = vpop.permute.xlu1 %1492 }
 0x1da   : > { %v1502_v31 = vsel %vm1494_vm6, %v3418_v40, %v1493_v21  ;;  %v5571_v40 = vld [vmem:[#allocation62_spill] sm:$0xff] }
 0x1db   : > { %2573 = vmatpush.bf16.msrb.mxu1 %v5559_v10  ;;  %2564 = vmatmul.bf16.vlgmr.msra.gmra.mxu0 %v4686_v46  ;;  %v5572_v45 = vpack.c.bf16 %v5570_v28, %v5571_v40 }
 0x1dc   : > { %2595 = vmatpush.bf16.msrb.mxu0 %v2341_v49  ;;  %2590 = vmatmul.bf16.vlgmr.msrb.gmra.mxu3 %v4686_v46  ;;  %v1427_v43 = vpop.permute.xlu0 %1426 }
 0x1dd   : > { %v1436_v4 = vsel %vm1428_vm7, %v3413_v18, %v1427_v43 }
 0x1de   : > { %v2357_v8 = vpack.c.bf16 %v1502_v31, %v1436_v4 }
 0x1df   : > { %2574 = vmatpush.bf16.msrb.mxu1 %v5562_v33  ;;  %v5156_v33 = vld [vmem:[%s5251_s2] sm:$0xff] }
 0x1e0   : > { %2596 = vmatpush.bf16.msrb.mxu0 %v5568_v39  ;;  %2614 = vmatpush.bf16.msrb.mxu2 %v2357_v8  ;;  %v2623_v9 = vperm.slane %v5156_v33, 0  ;;  %v2624_v21 = vperm.slane %v5156_v33, 1  ;;  %v2625_v38 = vperm.slane %v5156_v33, 2  ;;  %v2626_v37 = vperm.slane %v5156_v33, 3 }
 0x1e1   : > { %v2629_v20 = vperm.slane %v5156_v33, 6 }
 0x1e3   : > { %2575 = vmatpush.bf16.msrb.mxu1 %v5565_v59  ;;  %v2422_v19 = vpop.f32.mrf.mxu0 }
 0x1e4   : > { %2597 = vmatpush.bf16.msrb.mxu0 %v5572_v45  ;;  %v1295_v18 = vpop.permute.xlu0 %1294 }
 0x1e5   : > { %v1304_v34 = vsel %vm1296_vm9, %v3423_v62, %v1295_v18  ;;  %v2285_v62 = vpack.c.bf16 %v5585_v27, %v256_v1 }
 0x1e6   : > { %v2349_v30 = vpack.c.bf16 %v1370_v51, %v1304_v34  ;;  %v2627_v34 = vperm.slane %v5156_v33, 4 }
 0x1e7   : > { %2576 = vmatpush.bf16.msrb.mxu1 %v2284_v12 }
 0x1e8   : > { %2598 = vmatpush.bf16.msrb.mxu0 %v5575_v52  ;;  %2615 = vmatpush.bf16.msrb.mxu2 %v2349_v30  ;;  %v2628_v52 = vperm.slane %v5156_v33, 5 }
 0x1ea   : > { %2577 = vmatmul.bf16.vlgmr.msrb.gmra.mxu1 %v4628_v22 }
 0x1eb   : > { %2616 = vmatmul.bf16.vlgmr.msrb.gmra.mxu2 %v4686_v46  ;;  %v2424_v50 = vpop.f32.mrf.mxu0 }
 0x1ec   : > { %2599 = vmatpush.bf16.msrb.mxu0 %v5578_v47 }
 0x1ed   : > { %v2448_v14 = vpop.f32.mrf.mxu2 }
 0x1f0   : > { %2600 = vmatpush.bf16.msrb.mxu0 %v5581_v11 }
 0x1f4   : > { %2601 = vmatpush.bf16.msrb.mxu0 %v5584_v44 }
 0x1f5   : > { %v2450_v6 = vpop.f32.mrf.mxu2 }
 0x1f8   : > { %2602 = vmatpush.bf16.msrb.mxu0 %v2285_v62 }
 0x1fb   : > { %2603 = vmatmul.bf16.vlgmr.msrb.gmra.mxu0 %v4628_v22 }
 0x203   : > { %v2500_v25 = vpop.f32.mrf.mxu0 }
 0x206   : > { %v2461_v55 = vpop.f32.mrf.mxu3 }
 0x207   : > { %v5149_v46 = vadd.f32 %v2461_v55, %v2448_v14 }
 0x209   : > { %v2640_v4 = vmul.f32 %v2624_v21, %v5149_v46 }
 0x20b   : > { %v2502_v3 = vpop.f32.mrf.mxu0  ;;  %v2657_v5 = vmul.f32 %v2640_v4, %v5149_v46 }
 0x20e   : > { %v2463_v24 = vpop.f32.mrf.mxu3 }
 0x20f   : > { %v2435_v56 = vpop.f32.mrf.mxu1 }
 0x210   : > { %v5151_v48 = vadd.f32 %v2435_v56, %v2422_v19  ;;  %v2630_v19 = vperm.slane %v5156_v33, 7 }
 0x212   : > { %v2639_v43 = vmul.f32 %v2623_v9, %v5151_v48 }
 0x214   : > { %v2656_v35 = vmul.f32 %v2639_v43, %v5151_v48  ;;  %v2647_v12 = vadd.f32 %v2640_v4, %v2639_v43 }
 0x216   : > { %v2664_v28 = vadd.f32 %v2657_v5, %v2656_v35  ;;  %v2714_v35 = vstv %s2705_s5 }
 0x217   : > { %v2437_v29 = vpop.f32.mrf.mxu1 }
 0x21e   : > { %v2487_v0 = vpop.f32.mrf.mxu3 }
 0x226   : > { %v2489_v32 = vpop.f32.mrf.mxu3 }
 0x22e   : > { %v2513_v7 = vpop.f32.mrf.mxu2 }
 0x22f   : > { %v2474_v10 = vpop.f32.mrf.mxu1  ;;  %v5174_v8 = vadd.f32 %v2513_v7, %v2500_v25 }
 0x230   : > { %v5166_v60 = vadd.f32 %v2487_v0, %v2474_v10 }
 0x231   : > { %v2642_v51 = vmul.f32 %v2626_v37, %v5174_v8 }
 0x232   : > { %v2641_v39 = vmul.f32 %v2625_v38, %v5166_v60 }
 0x233   : > { %v2659_v57 = vmul.f32 %v2642_v51, %v5174_v8 }
 0x234   : > { %v2658_v40 = vmul.f32 %v2641_v39, %v5166_v60  ;;  %v2648_v58 = vadd.f32 %v2647_v12, %v2641_v39 }
 0x236   : > { %v2515_v22 = vpop.f32.mrf.mxu2  ;;  %v2665_v30 = vadd.f32 %v2664_v28, %v2658_v40  ;;  %v2649_v11 = vadd.f32 %v2648_v58, %v2642_v51 }
 0x237   : > { %v2476_v41 = vpop.f32.mrf.mxu1 }
 0x238   : > { %v2666_v63 = vadd.f32 %v2665_v30, %v2659_v57 }
 0x23e   : > { %v2526_v16 = vpop.f32.mrf.mxu3 }
 0x246   : > { %v2528_v23 = vpop.f32.mrf.mxu3 }
 0x247   : > { %v2539_v15 = vpop.f32.mrf.mxu1 }
 0x248   : > { %v5181_v18 = vadd.f32 %v2539_v15, %v2526_v16 }
 0x24a   : > { %v2643_v53 = vmul.f32 %v2627_v34, %v5181_v18 }
 0x24c   : > { %v2660_v13 = vmul.f32 %v2643_v53, %v5181_v18  ;;  %v2650_v27 = vadd.f32 %v2649_v11, %v2643_v53 }
 0x24e   : > { %v2552_v49 = vpop.f32.mrf.mxu2  ;;  %v2667_v50 = vadd.f32 %v2666_v63, %v2660_v13 }
 0x24f   : > { %v2541_v26 = vpop.f32.mrf.mxu1 }
 0x256   : > { %v2554_v42 = vpop.f32.mrf.mxu2 }
 0x258   : > { %v2565_v17 = vpop.f32.mrf.mxu0 }
 0x259   : > { %v5184_v36 = vadd.f32 %v2565_v17, %v2552_v49 }
 0x25b   : > { %v2644_v1 = vmul.f32 %v2628_v52, %v5184_v36 }
 0x25d   : > { %v2661_v62 = vmul.f32 %v2644_v1, %v5184_v36  ;;  %v2651_v56 = vadd.f32 %v2650_v27, %v2644_v1 }
 0x25f   : > { %v2591_v2 = vpop.f32.mrf.mxu3  ;;  %v2668_v0 = vadd.f32 %v2667_v50, %v2661_v62 }
 0x260   : > { %v2567_v31 = vpop.f32.mrf.mxu0 }
 0x267   : > { %v2578_v59 = vpop.f32.mrf.mxu1  ;;  %v2593_v54 = vpop.f32.mrf.mxu3 }
 0x268   : > { %v5191_v47 = vadd.f32 %v2591_v2, %v2578_v59 }
 0x26a   : > { %v2645_v44 = vmul.f32 %v2629_v20, %v5191_v47 }
 0x26c   : > { %v2662_v6 = vmul.f32 %v2645_v44, %v5191_v47  ;;  %v2652_v29 = vadd.f32 %v2651_v56, %v2645_v44 }
 0x26e   : > { %v2617_v61 = vpop.f32.mrf.mxu2  ;;  %v2669_v10 = vadd.f32 %v2668_v0, %v2662_v6 }
 0x26f   : > { %v2580_v45 = vpop.f32.mrf.mxu1 }
 0x276   : > { %v2619_v24 = vpop.f32.mrf.mxu2 }
 0x278   : > { %v2604_v14 = vpop.f32.mrf.mxu0 }
 0x279   : > { %v2618_v55 = vadd.f32 %v2617_v61, %v2604_v14 }
 0x27b   : > { %v2646_v25 = vmul.f32 %v2630_v19, %v2618_v55 }
 0x27d   : > { %v2653_v3 = vadd.f32 %v2652_v29, %v2646_v25  ;;  %v2663_v32 = vmul.f32 %v2646_v25, %v2618_v55 }
 0x27f   : > { %2654 = vadd.xlane.f32.xlu1 %v2653_v3  ;;  %v2670_v7 = vadd.f32 %v2669_v10, %v2663_v32 }
 0x280   : > { %v2606_v41 = vpop.f32.mrf.mxu0 }
 0x281   : > { %2671 = vadd.xlane.f32.xlu2 %v2670_v7 }
 0x2f2   : > { %v2655_v22 = vpop.xlane.xlu1 %2654 }
 0x2f3   : > { %v2673_v16 = vmul.f32 0.001953125, %v2655_v22 }
 0x2f4   : > { %v2672_v15 = vpop.xlane.xlu2 %2671 }
 0x2f5   : > { %v2674_v23 = vmul.f32 0.001953125, %v2672_v15  ;;  %v2675_v26 = vmul.f32 %v2673_v16, %v2673_v16  ;;  %v2678_v5 = vsub.f32 %v5151_v48, %v2673_v16  ;;  %v2679_v54 = vsub.f32 %v5149_v46, %v2673_v16 }
 0x2f6   : > { %v2680_v12 = vsub.f32 %v5166_v60, %v2673_v16  ;;  %v2681_v28 = vsub.f32 %v5174_v8, %v2673_v16  ;;  %v2682_v40 = vsub.f32 %v5181_v18, %v2673_v16  ;;  %v2683_v45 = vsub.f32 %v5184_v36, %v2673_v16 }
 0x2f7   : > { %v2676_v49 = vsub.f32 %v2674_v23, %v2675_v26  ;;  %v2684_v51 = vsub.f32 %v5191_v47, %v2673_v16  ;;  %v2685_v58 = vsub.f32 %v2618_v55, %v2673_v16 }
 0x2f9   : > { %v2677_v42 = vmax.f32 %v2676_v49, 0.0 }
 0x2fb   : > { %v2686_v17 = vadd.f32 1e-05, %v2677_v42 }
 0x2fd   : > { %3429 = vrsqrt.f32 %v2686_v17  ;;  %vm2693_vm11 = vweird.f32 %v2686_v17 }
 0x303   : > { %v3430_v2 = vpop.eup %3429 }
 0x304   : > { %v2688_v31 = vmul.f32 %v3430_v2, %v2686_v17  ;;  %vm2694_vm10 = vweird.f32 %v3430_v2 }
 0x305   : > { %vm2695_vm12 = vmor %vm2693_vm11, %vm2694_vm10 }
 0x306   : > { %v2689_v43 = vmul.f32 %v3430_v2, %v2688_v31 }
 0x308   : > { %v2690_v4 = vmul.f32 0.5, %v2689_v43 }
 0x30a   : > { %v2691_v59 = vsub.f32 1.5, %v2690_v4 }
 0x30c   : > { %v2692_v39 = vmul.f32 %v3430_v2, %v2691_v59 }
 0x30e   : > { %v2696_v30 = vsel %vm2695_vm12, %v3430_v2, %v2692_v39 }
 0x30f   : > { %v2697_v57 = vmul.f32 %v2696_v30, %v2678_v5  ;;  %v2698_v48 = vmul.f32 %v2696_v30, %v2679_v54  ;;  %v2699_v53 = vmul.f32 %v2696_v30, %v2680_v12  ;;  %v2700_v61 = vmul.f32 %v2696_v30, %v2681_v28 }
 0x310   : > { %v2701_v11 = vmul.f32 %v2696_v30, %v2682_v40  ;;  %v2702_v46 = vmul.f32 %v2696_v30, %v2683_v45  ;;  %v2703_v1 = vmul.f32 %v2696_v30, %v2684_v51  ;;  %v2704_v60 = vmul.f32 %v2696_v30, %v2685_v58 }
 0x311   : > { %vm2706_vm13 = vcmp.ge.f32.partialorder %v2697_v57, 0.0  ;;  %vm2707_vm14 = vcmp.ge.f32.partialorder %v2698_v48, 0.0  ;;  %vm2708_vm15 = vcmp.ge.f32.partialorder %v2699_v53, 0.0  ;;  %vm2709_vm0 = vcmp.ge.f32.partialorder %v2700_v61, 0.0 }
 0x312   : > { %vm2710_vm1 = vcmp.ge.f32.partialorder %v2701_v11, 0.0  ;;  %vm2711_vm3 = vcmp.ge.f32.partialorder %v2702_v46, 0.0  ;;  %vm2712_vm4 = vcmp.ge.f32.partialorder %v2703_v1, 0.0  ;;  %v2715_v8 = vmul.f32 %v2714_v35, %v2697_v57 }
 0x313   : > { %v2716_v18 = vmul.f32 %v2714_v35, %v2698_v48  ;;  %v2717_v36 = vmul.f32 %v2714_v35, %v2699_v53  ;;  %v2718_v47 = vmul.f32 %v2714_v35, %v2700_v61  ;;  %v2719_v63 = vmul.f32 %v2714_v35, %v2701_v11 }
 0x314   : > { %v2720_v13 = vmul.f32 %v2714_v35, %v2702_v46  ;;  %v2721_v44 = vmul.f32 %v2714_v35, %v2703_v1  ;;  %v2722_v27 = vmul.f32 %v2714_v35, %v2704_v60  ;;  %v2723_v62 = vsel %vm2706_vm13, %v2697_v57, %v2715_v8 }
 0x315   : > { %v2724_v14 = vsel %vm2707_vm14, %v2698_v48, %v2716_v18  ;;  %v2725_v50 = vsel %vm2708_vm15, %v2699_v53, %v2717_v36  ;;  %v2726_v6 = vsel %vm2709_vm0, %v2700_v61, %v2718_v47  ;;  %vm2713_vm2 = vcmp.ge.f32.partialorder %v2704_v60, 0.0 }
 0x316   : > { %v2727_v55 = vsel %vm2710_vm1, %v2701_v11, %v2719_v63  ;;  %v2728_v24 = vsel %vm2711_vm3, %v2702_v46, %v2720_v13  ;;  %v2731_v56 = vmul.f32 %v2723_v62, %v2623_v9  ;;  %v2732_v25 = vmul.f32 %v2724_v14, %v2624_v21 }
 0x317   : > { %v2733_v29 = vmul.f32 %v2725_v50, %v2625_v38  ;;  %v2729_v0 = vsel %vm2712_vm4, %v2703_v1, %v2721_v44  ;;  %v2734_v3 = vmul.f32 %v2726_v6, %v2626_v37  ;;  %v2730_v32 = vsel %vm2713_vm2, %v2704_v60, %v2722_v27 }
 0x318   : > { %v2735_v10 = vmul.f32 %v2727_v55, %v2627_v34  ;;  %2739 = vst [vmem:[%s240_s17] sm:$0xff] %v2731_v56  ;;  %v2736_v7 = vmul.f32 %v2728_v24, %v2628_v52  ;;  %v2737_v9 = vmul.f32 %v2729_v0, %v2629_v20  ;;  %v2738_v21 = vmul.f32 %v2730_v32, %v2630_v19 }
 0x319   : > { %2740 = vst [vmem:[%s240_s17 + $0x8] sm:$0xff] %v2732_v25 }
 0x31a   : > { %2741 = vst [vmem:[%s240_s17 + $0x10] sm:$0xff] %v2733_v29 }
 0x31b   : > { %2742 = vst [vmem:[%s240_s17 + $0x18] sm:$0xff] %v2734_v3 }
 0x31c   : > { %2743 = vst [vmem:[%s240_s17 + $0x20] sm:$0xff] %v2735_v10 }
 0x31d   : > { %2744 = vst [vmem:[%s240_s17 + $0x28] sm:$0xff] %v2736_v7 }
 0x31e   : > { %2745 = vst [vmem:[%s240_s17 + $0x30] sm:$0xff] %v2737_v9 }
 0x31f   : > { %2746 = vst [vmem:[%s240_s17 + $0x38] sm:$0xff] %v2738_v21 }
 0x320 PF: > { %s15_s19 = sadd.s32 1, %s3453_s19   ;;  %s5586_s17 = smov %s3449_s18 }
 0x321   : > { %p12_p5 = scmp.ge.s32.totalorder %s15_s19, 4   ;;  %s5587_s18 = smov %s5589_s3 }
 0x323   :  { %14 = sbr.rel (!%p12_p5) target bundleno = 2 (0x2), region = 73 }

// kernel: basic_conv3d_forward.2
= control target key start
LH: loop header
LB: loop body
LE: loop exit
PB: predicated region body
PF: predicated region fallthrough
CT: control target
= control target key end

     0   :  { %s4043_s17 = smov 0   ;;  %s4045_s18 = smov 0   ;;  %s5861_s0 = inlined_call_operand.vmem [shape: bf16[2,4,1536], index: 0, kind: input, shape index: {}]   ;;  %s5862_s1 = inlined_call_operand.vmem [shape: bf16[8,128], index: 1, kind: input, shape index: {}]   ;;  %s5863_s2 = inlined_call_operand.vmem [shape: f32[1,1280], index: 2, kind: input, shape index: {}]   ;;  %s5864_s3 = inlined_call_operand.<no memory space> [shape: f32[1,1], index: 3, kind: input, shape index: {}]   ;;  %s5865_s4 = inlined_call_operand.vmem [shape: bf16[2,8,1280], index: 4, kind: output, shape index: {}]  }
   0x1   :  { %9 = sst [smem:[#allocation3]] %s5864_s3  ;;  %s4047_s19 = smov 0  }
   0x2 LB: > { %s27_s3 = sadd.s32 1, %s3981_s18  ;;  %p3253_p0 = scmp.ge.s32.totalorder %s3985_s19, 1  ;;  %s3985_s19 = sphi %s4047_s19, %s15_s19   ;;  %s3981_s18 = sphi %s4045_s18, %s5903_s18   ;;  %s3977_s17 = sphi %s4043_s17, %s5902_s17  }
   0x3   : > { %p29_p1 = scmp.ge.s32.totalorder %s27_s3, 2  ;;  %p186_p2 = scmp.lt.s32.totalorder %s3985_s19, 3 }
   0x5   : > { %s5905_s3 = smov (%p29_p1, %s27_s3), 0  ;;  %p187_p3 = pnand %p3253_p0, %p186_p2 }
   0x6   : > { %p220_p4 = scmp.lt.s32.totalorder (!%p187_p3), %s3977_s17, 1  ;;  %s3987_s24 = smov (!%p187_p3), 127  }
   0x7   : > { %190 = sbr.rel (%p187_p3) target bundleno = 1076 (0x434), region = 36  ;;  %s3988_s25 = smov (!%p187_p3), 126  }
   0x8   : > { %s3989_s26 = smov (!%p187_p3), 118   ;;  %s3990_s27 = smov (!%p187_p3), 117  }
   0x9   : > { %s3991_s28 = smov (!%p187_p3), 116   ;;  %s3992_s29 = smov (!%p187_p3), 108  }
   0xa   : > { %s3993_s30 = smov (!%p187_p3), 107   ;;  %s3994_s5 = smov (!%p187_p3), 106  }
   0xb   : > { %s3995_s6 = smov (!%p187_p3), 28   ;;  %s3996_s7 = smov (!%p187_p3), 27  }
   0xc   : > { %s5907_s17 = smov (!%p220_p4, %s3977_s17), 1  ;;  %vm439_vm0 = vcmask 1031168   ;;  %vm351_vm1 = vcmask 1039360   ;;  %vm528_vm2 = vcmask 965632   ;;  %vm616_vm3 = vcmask 957440   ;;  %s3997_s8 = smov 26  }
   0xd   : > { %s3258_s20 = smul.u32 24, %s5907_s17  ;;  %vm705_vm4 = vcmask 949248   ;;  %s3998_s9 = smov 18   ;;  %vm793_vm5 = vcmask 883712   ;;  %vm882_vm6 = vcmask 875520   ;;  %vm970_vm7 = vcmask 867328  }
   0xe   : > { %s3999_s10 = smov 17   ;;  %s4000_s11 = smov 16   ;;  %vm1059_vm8 = vcmask 228352   ;;  %vm1147_vm9 = vcmask 220160   ;;  %vm1236_vm10 = vcmask 211968   ;;  %vm1324_vm11 = vcmask 146432  }
   0xf   : > { %s4067_s23 = scalar_lea.vmem %s5861_s0, %s3258_s20  ;;  %s4001_s12 = smov 8   ;;  %vm1413_vm12 = vcmask 138240   ;;  %vm1501_vm13 = vcmask 130048   ;;  %vm1590_vm14 = vcmask 64512   ;;  %vm1678_vm15 = vcmask 56320  }
  0x10   : > { %v242_v0 = vld [vmem:[%s4067_s23] sm:$0xff]  ;;  %v243_v1 = vld [vmem:[%s4067_s23 + $0x8] sm:$0xff]  ;;  %v295_v9 = vld [vmem:[%s4067_s23 + $0x10] sm:$0x3f]  ;;  %s4002_s13 = smov 7   ;;  %s4003_s14 = smov 6  }
  0x11   : > { %v4071_v2 = vunpack.c.h.bf16 %v242_v0  ;;  %v4073_v3 = vunpack.c.l.bf16 %v242_v0  ;;  %v4075_v4 = vunpack.c.l.bf16 %v243_v1  ;;  %v4077_v5 = vunpack.c.h.bf16 %v243_v1  ;;  %v244_v11 = vld [vmem:[%s4067_s23 + $0x10] sm:$0xf]  ;;  %s4004_s15 = smov 36   ;;  %s4005_s16 = smov 35  }
  0x12   : > { %v301_v14 = vunpack.c.h.bf16 %v295_v9  ;;  %v249_v15 = vunpack.c.l.bf16 %v244_v11  ;;  %v300_v30 = vunpack.c.l.bf16 %v295_v9  ;;  %v384_v34 = vld [vmem:[%s4067_s23 + $0x10] sm:$0x3f]  ;;  %s4006_s20 = smov 46   ;;  %s4007_s21 = smov 34  }
  0x13   : > { %257 = vst [vmem:[#allocation1 + $0x10] ss:$2 sm:$0xff] %v4071_v2  ;;  %v390_v40 = vunpack.c.h.bf16 %v384_v34  ;;  %v389_v52 = vunpack.c.l.bf16 %v384_v34  ;;  %v472_v56 = vld [vmem:[%s4067_s23 + $0x10] sm:$0x3f]  ;;  %s4008_s22 = smov 45  }
  0x14   : > { %255 = vst [vmem:[#allocation1] ss:$2 sm:$0xff] %v4073_v3  ;;  %v478_v63 = vunpack.c.h.bf16 %v472_v56 }
  0x15   : > { %259 = vst [vmem:[#allocation1 + $0x20] ss:$2 sm:$0xff] %v4075_v4 }
  0x16   : > { %261 = vst [vmem:[#allocation1 + $0x30] ss:$2 sm:$0xff] %v4077_v5 }
  0x1a   : > { %v264_v6 = vld.sshfl [vmem:[#allocation1 + $0x10] sm:$0xff pattern:$0x75316420]  ;;  %v265_v7 = vld.sshfl [vmem:[#allocation1 + $0x18] sm:$0xff pattern:$0x75316420] }
  0x1b   : > { %311 = vst [vmem:[#allocation1 + $0x11] ss:$2 sm:$0xff] %v4071_v2  ;;  %v262_v8 = vld.sshfl [vmem:[#allocation1] sm:$0xff pattern:$0x75316420] }
  0x1c   : > { %v263_v10 = vld.sshfl [vmem:[#allocation1 + $0x8] sm:$0xff pattern:$0x75316420]  ;;  %283 = vst [vmem:[#allocation2 + $0x2b0] sm:$0xf] %v262_v8 }
  0x1d   : > { %284 = vst [vmem:[#allocation2 + $0x3b0] sm:$0xf] %v263_v10  ;;  %v266_v12 = vld.sshfl [vmem:[#allocation1 + $0x20] sm:$0xff pattern:$0x75316420] }
  0x1e   : > { %285 = vst [vmem:[#allocation2 + $0x4d8] sm:$0xf] %v264_v6  ;;  %v267_v13 = vld.sshfl [vmem:[#allocation1 + $0x28] sm:$0xff pattern:$0x75316420] }
  0x1f   : > { %286 = vst [vmem:[#allocation2 + $0x18] sm:$0xf] %v265_v7  ;;  %v268_v16 = vld.sshfl [vmem:[#allocation1 + $0x30] sm:$0xff pattern:$0x75316420] }
  0x20   : > { %313 = vst [vmem:[#allocation1 + $0x21] ss:$2 sm:$0xff] %v4075_v4  ;;  %v269_v20 = vld.sshfl [vmem:[#allocation1 + $0x38] sm:$0xff pattern:$0x75316420] }
  0x21   : > { %287 = vst [vmem:[#allocation2 + $0x450] sm:$0xf] %v266_v12 }
  0x22   : > { %v318_v17 = vld.sshfl [vmem:[#allocation1 + $0x10] sm:$0xff pattern:$0x75316420]  ;;  %v319_v18 = vld.sshfl [vmem:[#allocation1 + $0x18] sm:$0xff pattern:$0x75316420] }
  0x23   : > { %v3311_v19 = vpack.i.bf16 %v319_v18, %v318_v17  ;;  %288 = vst [vmem:[#allocation2 + $0x328] sm:$0xf] %v267_v13  ;;  %v477_v13 = vunpack.c.l.bf16 %v472_v56 }
  0x24   : > { %325 = vst [vmem:[#allocation1 + $0x11] ss:$2 sm:$0xff] %v301_v14 }
  0x25   : > { %3312 = vrot.lane.b32.xlu0 %v3311_v19, %s3987_s24  ;;  %270 = vst [vmem:[#allocation1] ss:$2 sm:$0xff] %v249_v15 }
  0x26   : > { %315 = vst [vmem:[#allocation1 + $0x31] ss:$2 sm:$0xff] %v4077_v5 }
  0x27   : > { %v320_v21 = vld.sshfl [vmem:[#allocation1 + $0x20] sm:$0xff pattern:$0x75316420]  ;;  %v321_v22 = vld.sshfl [vmem:[#allocation1 + $0x28] sm:$0xff pattern:$0x75316420] }
  0x28   : > { %v3316_v23 = vpack.i.bf16 %v321_v22, %v320_v21  ;;  %289 = vst [vmem:[#allocation2 + $0x440] sm:$0xf] %v268_v16  ;;  %v561_v21 = vld [vmem:[%s4067_s23 + $0x10] sm:$0x3f] }
  0x29   : > { %290 = vst [vmem:[#allocation2 + $0x378] sm:$0xf] %v269_v20  ;;  %v566_v34 = vunpack.c.l.bf16 %v561_v21 }
  0x2a   : > { %3317 = vrot.lane.b32.xlu1 %v3316_v23, %s3987_s24  ;;  %401 = vst [vmem:[#allocation1 + $0x20] ss:$2 sm:$0xff] %v4075_v4 }
  0x2b   : > { %v328_v24 = vld.sshfl [vmem:[#allocation1 + $0x10] sm:$0xff pattern:$0x75316420] }
  0x2c   : > { %349 = vrot.lane.b32.xlu2 %v328_v24, %s3987_s24  ;;  %v271_v25 = vld.sshfl [vmem:[#allocation1] sm:$0xff pattern:$0x75316420]  ;;  %v272_v26 = vld.sshfl [vmem:[#allocation1 + $0x8] sm:$0xff pattern:$0x75316420] }
  0x2d   : > { %309 = vst [vmem:[#allocation1 + $0x1] ss:$2 sm:$0xff] %v4073_v3  ;;  %v322_v27 = vld.sshfl [vmem:[#allocation1 + $0x30] sm:$0xff pattern:$0x75316420] }
  0x2e   : > { %291 = vst [vmem:[#allocation2 + $0x108] sm:$0xf] %v271_v25  ;;  %v323_v28 = vld.sshfl [vmem:[#allocation1 + $0x38] sm:$0xff pattern:$0x75316420] }
  0x2f   : > { %292 = vst [vmem:[#allocation2 + $0x488] sm:$0xf] %v272_v26  ;;  %v3321_v29 = vpack.i.bf16 %v323_v28, %v322_v27  ;;  %v567_v27 = vunpack.c.h.bf16 %v561_v21 }
  0x30   : > { %403 = vst [vmem:[#allocation1 + $0x30] ss:$2 sm:$0xff] %v4077_v5 }
  0x31   : > { %v408_v31 = vld.sshfl [vmem:[#allocation1 + $0x20] sm:$0xff pattern:$0x75316420]  ;;  %v409_v32 = vld.sshfl [vmem:[#allocation1 + $0x28] sm:$0xff pattern:$0x75316420] }
  0x32   : > { %3322 = vrot.lane.b32.xlu1 %v3321_v29, %s3987_s24  ;;  %v3331_v33 = vpack.i.bf16 %v409_v32, %v408_v31  ;;  %399 = vst [vmem:[#allocation1 + $0x10] ss:$2 sm:$0xff] %v4071_v2 }
  0x33   : > { %490 = vst [vmem:[#allocation1 + $0x21] ss:$2 sm:$0xff] %v4075_v4 }
  0x34   : > { %v316_v35 = vld.sshfl [vmem:[#allocation1] sm:$0xff pattern:$0x75316420]  ;;  %v317_v36 = vld.sshfl [vmem:[#allocation1 + $0x8] sm:$0xff pattern:$0x75316420]  ;;  %3332 = vrot.lane.b32.xlu2 %v3331_v33, %s3988_s25 }
  0x35   : > { %v3326_v37 = vpack.i.bf16 %v317_v36, %v316_v35  ;;  %324 = vst [vmem:[#allocation1 + $0x1] ss:$2 sm:$0xff] %v300_v30 }
  0x37   : > { %3327 = vrot.lane.b32.xlu0 %v3326_v37, %s3987_s24  ;;  %v410_v38 = vld.sshfl [vmem:[#allocation1 + $0x30] sm:$0xff pattern:$0x75316420]  ;;  %v411_v39 = vld.sshfl [vmem:[#allocation1 + $0x38] sm:$0xff pattern:$0x75316420] }
  0x38   : > { %492 = vst [vmem:[#allocation1 + $0x31] ss:$2 sm:$0xff] %v4077_v5  ;;  %v3336_v44 = vpack.i.bf16 %v411_v39, %v410_v38 }
  0x39   : > { %v406_v41 = vld.sshfl [vmem:[#allocation1 + $0x10] sm:$0xff pattern:$0x75316420]  ;;  %v407_v42 = vld.sshfl [vmem:[#allocation1 + $0x18] sm:$0xff pattern:$0x75316420] }
  0x3a   : > { %v3346_v43 = vpack.i.bf16 %v407_v42, %v406_v41  ;;  %v497_v45 = vld.sshfl [vmem:[#allocation1 + $0x20] sm:$0xff pattern:$0x75316420]  ;;  %413 = vst [vmem:[#allocation1 + $0x10] ss:$2 sm:$0xff] %v390_v40 }
  0x3b   : > { %v498_v49 = vld.sshfl [vmem:[#allocation1 + $0x28] sm:$0xff pattern:$0x75316420] }
  0x3c   : > { %3347 = vrot.lane.b32.xlu1 %v3346_v43, %s3988_s25  ;;  %v326_v46 = vld.sshfl [vmem:[#allocation1] sm:$0xff pattern:$0x75316420]  ;;  %v327_v47 = vld.sshfl [vmem:[#allocation1 + $0x8] sm:$0xff pattern:$0x75316420]  ;;  %v3351_v55 = vpack.i.bf16 %v498_v49, %v497_v45 }
  0x3d   : > { %v3341_v48 = vpack.i.bf16 %v327_v47, %v326_v46  ;;  %397 = vst [vmem:[#allocation1] ss:$2 sm:$0xff] %v4073_v3 }
  0x3e   : > { %578 = vst [vmem:[#allocation1 + $0x20] ss:$2 sm:$0xff] %v4075_v4 }
  0x3f   : > { %3337 = vrot.lane.b32.xlu0 %v3336_v44, %s3988_s25  ;;  %v499_v50 = vld.sshfl [vmem:[#allocation1 + $0x30] sm:$0xff pattern:$0x75316420]  ;;  %v500_v51 = vld.sshfl [vmem:[#allocation1 + $0x38] sm:$0xff pattern:$0x75316420]  ;;  %3342 = vrot.lane.b32.xlu2 %v3341_v48, %s3987_s24 }
  0x40   : > { %580 = vst [vmem:[#allocation1 + $0x30] ss:$2 sm:$0xff] %v4077_v5  ;;  %v3356_v54 = vpack.i.bf16 %v500_v51, %v499_v50  ;;  %v649_v44 = vld [vmem:[%s4067_s23 + $0x10] sm:$0x3f]  ;;  %s4009_s24 = smov 54  }
  0x41   : > { %v416_v53 = vld.sshfl [vmem:[#allocation1 + $0x10] sm:$0xff pattern:$0x75316420]  ;;  %v655_v48 = vunpack.c.h.bf16 %v649_v44 }
  0x42   : > { %488 = vst [vmem:[#allocation1 + $0x11] ss:$2 sm:$0xff] %v4071_v2 }
  0x44   : > { %v404_v57 = vld.sshfl [vmem:[#allocation1] sm:$0xff pattern:$0x75316420]  ;;  %v405_v58 = vld.sshfl [vmem:[#allocation1 + $0x8] sm:$0xff pattern:$0x75316420] }
  0x45   : > { %412 = vst [vmem:[#allocation1] ss:$2 sm:$0xff] %v389_v52  ;;  %v585_v59 = vld.sshfl [vmem:[#allocation1 + $0x20] sm:$0xff pattern:$0x75316420]  ;;  %v3361_v6 = vpack.i.bf16 %v405_v58, %v404_v57  ;;  %v654_v57 = vunpack.c.l.bf16 %v649_v44 }
  0x46   : > { %v586_v60 = vld.sshfl [vmem:[#allocation1 + $0x28] sm:$0xff pattern:$0x75316420] }
  0x47   : > { %3357 = vrot.lane.b32.xlu0 %v3356_v54, %s3989_s26  ;;  %3352 = vrot.lane.b32.xlu2 %v3351_v55, %s3989_s26  ;;  %v587_v61 = vld.sshfl [vmem:[#allocation1 + $0x30] sm:$0xff pattern:$0x75316420]  ;;  %v588_v62 = vld.sshfl [vmem:[#allocation1 + $0x38] sm:$0xff pattern:$0x75316420]  ;;  %v3366_v18 = vpack.i.bf16 %v586_v60, %v585_v59 }
  0x48   : > { %669 = vst [vmem:[#allocation1 + $0x31] ss:$2 sm:$0xff] %v4077_v5  ;;  %v3371_v16 = vpack.i.bf16 %v588_v62, %v587_v61 }
  0x49   : > { %667 = vst [vmem:[#allocation1 + $0x21] ss:$2 sm:$0xff] %v4075_v4  ;;  %v495_v0 = vld.sshfl [vmem:[#allocation1 + $0x10] sm:$0xff pattern:$0x75316420] }
  0x4a   : > { %v496_v1 = vld.sshfl [vmem:[#allocation1 + $0x18] sm:$0xff pattern:$0x75316420] }
  0x4b   : > { %502 = vst [vmem:[#allocation1 + $0x11] ss:$2 sm:$0xff] %v478_v63  ;;  %v3381_v17 = vpack.i.bf16 %v496_v1, %v495_v0  ;;  %v738_v0 = vld [vmem:[%s4067_s23 + $0x10] sm:$0x3f] }
  0x4c   : > { %v414_v7 = vld.sshfl [vmem:[#allocation1] sm:$0xff pattern:$0x75316420]  ;;  %v415_v8 = vld.sshfl [vmem:[#allocation1 + $0x8] sm:$0xff pattern:$0x75316420] }
  0x4d   : > { %v3376_v9 = vpack.i.bf16 %v415_v8, %v414_v7  ;;  %486 = vst [vmem:[#allocation1 + $0x1] ss:$2 sm:$0xff] %v4073_v3 }
  0x4f   : > { %3362 = vrot.lane.b32.xlu0 %v3361_v6, %s3988_s25  ;;  %3377 = vrot.lane.b32.xlu1 %v3376_v9, %s3988_s25  ;;  %v676_v10 = vld.sshfl [vmem:[#allocation1 + $0x30] sm:$0xff pattern:$0x75316420]  ;;  %v677_v11 = vld.sshfl [vmem:[#allocation1 + $0x38] sm:$0xff pattern:$0x75316420] }
  0x50   : > { %437 = vrot.lane.b32.xlu2 %v416_v53, %s3988_s25  ;;  %v674_v12 = vld.sshfl [vmem:[#allocation1 + $0x20] sm:$0xff pattern:$0x75316420]  ;;  %v675_v14 = vld.sshfl [vmem:[#allocation1 + $0x28] sm:$0xff pattern:$0x75316420]  ;;  %v3391_v28 = vpack.i.bf16 %v677_v11, %v676_v10  ;;  %v744_v10 = vunpack.c.h.bf16 %v738_v0 }
  0x51   : > { %757 = vst [vmem:[#allocation1 + $0x30] ss:$2 sm:$0xff] %v4077_v5  ;;  %v3386_v32 = vpack.i.bf16 %v675_v14, %v674_v12  ;;  %s4010_s25 = smov 56  }
  0x52   : > { %v505_v15 = vld.sshfl [vmem:[#allocation1 + $0x10] sm:$0xff pattern:$0x75316420]  ;;  %755 = vst [vmem:[#allocation1 + $0x20] ss:$2 sm:$0xff] %v4075_v4 }
  0x53   : > { %576 = vst [vmem:[#allocation1 + $0x10] ss:$2 sm:$0xff] %v4071_v2 }
  0x54   : > { %v493_v19 = vld.sshfl [vmem:[#allocation1] sm:$0xff pattern:$0x75316420]  ;;  %v494_v20 = vld.sshfl [vmem:[#allocation1 + $0x8] sm:$0xff pattern:$0x75316420] }
  0x55   : > { %501 = vst [vmem:[#allocation1 + $0x1] ss:$2 sm:$0xff] %v477_v13  ;;  %v3396_v37 = vpack.i.bf16 %v494_v20, %v493_v19 }
  0x57   : > { %3372 = vrot.lane.b32.xlu0 %v3371_v16, %s3990_s27  ;;  %3382 = vrot.lane.b32.xlu1 %v3381_v17, %s3989_s26  ;;  %v743_v16 = vunpack.c.l.bf16 %v738_v0 }
  0x58   : > { %3367 = vrot.lane.b32.xlu2 %v3366_v18, %s3990_s27  ;;  %v764_v22 = vld.sshfl [vmem:[#allocation1 + $0x30] sm:$0xff pattern:$0x75316420]  ;;  %v765_v23 = vld.sshfl [vmem:[#allocation1 + $0x38] sm:$0xff pattern:$0x75316420] }
  0x59   : > { %v762_v25 = vld.sshfl [vmem:[#allocation1 + $0x20] sm:$0xff pattern:$0x75316420]  ;;  %v763_v26 = vld.sshfl [vmem:[#allocation1 + $0x28] sm:$0xff pattern:$0x75316420]  ;;  %v3406_v47 = vpack.i.bf16 %v765_v23, %v764_v22 }
  0x5a   : > { %v583_v24 = vld.sshfl [vmem:[#allocation1 + $0x10] sm:$0xff pattern:$0x75316420]  ;;  %v584_v29 = vld.sshfl [vmem:[#allocation1 + $0x18] sm:$0xff pattern:$0x75316420]  ;;  %v3401_v51 = vpack.i.bf16 %v763_v26, %v762_v25 }
  0x5b   : > { %846 = vst [vmem:[#allocation1 + $0x31] ss:$2 sm:$0xff] %v4077_v5  ;;  %v3416_v38 = vpack.i.bf16 %v584_v29, %v583_v24 }
  0x5c   : > { %v503_v30 = vld.sshfl [vmem:[#allocation1] sm:$0xff pattern:$0x75316420]  ;;  %v504_v31 = vld.sshfl [vmem:[#allocation1 + $0x8] sm:$0xff pattern:$0x75316420] }
  0x5d   : > { %v3411_v33 = vpack.i.bf16 %v504_v31, %v503_v30  ;;  %574 = vst [vmem:[#allocation1] ss:$2 sm:$0xff] %v4073_v3 }
  0x5e   : > { %590 = vst [vmem:[#allocation1 + $0x10] ss:$2 sm:$0xff] %v567_v27 }
  0x5f   : > { %3392 = vrot.lane.b32.xlu0 %v3391_v28, %s3991_s28  ;;  %3412 = vrot.lane.b32.xlu1 %v3411_v33, %s3989_s26  ;;  %844 = vst [vmem:[#allocation1 + $0x21] ss:$2 sm:$0xff] %v4075_v4  ;;  %v826_v28 = vld [vmem:[%s4067_s23 + $0x10] sm:$0x3f] }
  0x60   : > { %3387 = vrot.lane.b32.xlu2 %v3386_v32, %s3991_s28  ;;  %v832_v32 = vunpack.c.h.bf16 %v826_v28 }
  0x62   : > { %v853_v35 = vld.sshfl [vmem:[#allocation1 + $0x30] sm:$0xff pattern:$0x75316420]  ;;  %v854_v36 = vld.sshfl [vmem:[#allocation1 + $0x38] sm:$0xff pattern:$0x75316420] }
  0x63   : > { %934 = vst [vmem:[#allocation1 + $0x30] ss:$2 sm:$0xff] %v4077_v5  ;;  %v3426_v58 = vpack.i.bf16 %v854_v36, %v853_v35 }
  0x64   : > { %v581_v39 = vld.sshfl [vmem:[#allocation1] sm:$0xff pattern:$0x75316420]  ;;  %v582_v40 = vld.sshfl [vmem:[#allocation1 + $0x8] sm:$0xff pattern:$0x75316420] }
  0x65   : > { %589 = vst [vmem:[#allocation1] ss:$2 sm:$0xff] %v566_v34  ;;  %v593_v41 = vld.sshfl [vmem:[#allocation1 + $0x10] sm:$0xff pattern:$0x75316420]  ;;  %v3431_v9 = vpack.i.bf16 %v582_v40, %v581_v39  ;;  %v4211_v40 = vld [vmem:[%s4067_s23 + $0x8] sm:$0xff] }
  0x66   : > { %665 = vst [vmem:[#allocation1 + $0x11] ss:$2 sm:$0xff] %v4071_v2  ;;  %v851_v42 = vld.sshfl [vmem:[#allocation1 + $0x20] sm:$0xff pattern:$0x75316420] }
  0x67   : > { %3397 = vrot.lane.b32.xlu0 %v3396_v37, %s3989_s26  ;;  %3417 = vrot.lane.b32.xlu1 %v3416_v38, %s3990_s27  ;;  %v852_v43 = vld.sshfl [vmem:[#allocation1 + $0x28] sm:$0xff pattern:$0x75316420] }
  0x68   : > { %526 = vrot.lane.b32.xlu2 %v505_v15, %s3989_s26  ;;  %932 = vst [vmem:[#allocation1 + $0x20] ss:$2 sm:$0xff] %v4075_v4  ;;  %v3421_v62 = vpack.i.bf16 %v852_v43, %v851_v42  ;;  %v831_v42 = vunpack.c.l.bf16 %v826_v28  ;;  %v4219_v43 = vunpack.c.l.bf16 %v4211_v40  ;;  %s4011_s26 = smov 55  }
  0x6a   : > { %v4137_v45 = vld.sshfl [vmem:[#allocation1 + $0x30] sm:$0xff pattern:$0x75316420]  ;;  %v4139_v46 = vld.sshfl [vmem:[#allocation1 + $0x38] sm:$0xff pattern:$0x75316420] }
  0x6b   : > { %1023 = vst [vmem:[#allocation1 + $0x31] ss:$2 sm:$0xff] %v4077_v5  ;;  %v3441_v19 = vpack.i.bf16 %v4139_v46, %v4137_v45 }
  0x6c   : > { %v591_v49 = vld.sshfl [vmem:[#allocation1] sm:$0xff pattern:$0x75316420]  ;;  %v592_v50 = vld.sshfl [vmem:[#allocation1 + $0x8] sm:$0xff pattern:$0x75316420] }
  0x6d   : > { %v3446_v52 = vpack.i.bf16 %v592_v50, %v591_v49  ;;  %663 = vst [vmem:[#allocation1 + $0x1] ss:$2 sm:$0xff] %v4073_v3  ;;  %v672_v53 = vld.sshfl [vmem:[#allocation1 + $0x10] sm:$0xff pattern:$0x75316420] }
  0x6e   : > { %v673_v54 = vld.sshfl [vmem:[#allocation1 + $0x18] sm:$0xff pattern:$0x75316420] }
  0x6f   : > { %3407 = vrot.lane.b32.xlu0 %v3406_v47, %s3992_s29  ;;  %3447 = vrot.lane.b32.xlu1 %v3446_v52, %s3990_s27  ;;  %679 = vst [vmem:[#allocation1 + $0x11] ss:$2 sm:$0xff] %v655_v48  ;;  %v939_v55 = vld.sshfl [vmem:[#allocation1 + $0x20] sm:$0xff pattern:$0x75316420]  ;;  %v3451_v59 = vpack.i.bf16 %v673_v54, %v672_v53 }
  0x70   : > { %3402 = vrot.lane.b32.xlu2 %v3401_v51, %s3992_s29  ;;  %v940_v56 = vld.sshfl [vmem:[#allocation1 + $0x28] sm:$0xff pattern:$0x75316420] }
  0x71   : > { %1021 = vst [vmem:[#allocation1 + $0x21] ss:$2 sm:$0xff] %v4075_v4  ;;  %v3436_v23 = vpack.i.bf16 %v940_v56, %v939_v55 }
  0x72   : > { %v4152_v1 = vld.sshfl [vmem:[#allocation1 + $0x30] sm:$0xff pattern:$0x75316420]  ;;  %v4157_v6 = vld.sshfl [vmem:[#allocation1 + $0x38] sm:$0xff pattern:$0x75316420] }
  0x73   : > { %1111 = vst [vmem:[#allocation1 + $0x30] ss:$2 sm:$0xff] %v4077_v5  ;;  %v3466_v44 = vpack.i.bf16 %v4157_v6, %v4152_v1 }
  0x74   : > { %v4147_v60 = vld.sshfl [vmem:[#allocation1] sm:$0xff pattern:$0x75316420]  ;;  %v671_v61 = vld.sshfl [vmem:[#allocation1 + $0x8] sm:$0xff pattern:$0x75316420] }
  0x75   : > { %678 = vst [vmem:[#allocation1 + $0x1] ss:$2 sm:$0xff] %v654_v57  ;;  %v3456_v31 = vpack.i.bf16 %v671_v61, %v4147_v60 }
  0x76   : > { %v4149_v63 = vld.sshfl [vmem:[#allocation1 + $0x10] sm:$0xff pattern:$0x75316420] }
  0x77   : > { %3427 = vrot.lane.b32.xlu0 %v3426_v58, %s3993_s30  ;;  %3452 = vrot.lane.b32.xlu1 %v3451_v59, %s3991_s28  ;;  %753 = vst [vmem:[#allocation1 + $0x10] ss:$2 sm:$0xff] %v4071_v2 }
  0x78   : > { %3422 = vrot.lane.b32.xlu2 %v3421_v62, %s3993_s30  ;;  %v4160_v7 = vld.sshfl [vmem:[#allocation1 + $0x20] sm:$0xff pattern:$0x75316420]  ;;  %v4162_v8 = vld.sshfl [vmem:[#allocation1 + $0x28] sm:$0xff pattern:$0x75316420] }
  0x79   : > { %1109 = vst [vmem:[#allocation1 + $0x20] ss:$2 sm:$0xff] %v4075_v4  ;;  %v3461_v50 = vpack.i.bf16 %v4162_v8, %v4160_v7  ;;  %v915_v62 = vld [vmem:[%s4067_s23 + $0x10] sm:$0x3f] }
  0x7a   : > { %v4185_v26 = vld.sshfl [vmem:[#allocation1 + $0x30] sm:$0xff pattern:$0x75316420]  ;;  %v4190_v27 = vld.sshfl [vmem:[#allocation1 + $0x38] sm:$0xff pattern:$0x75316420] }
  0x7b   : > { %1200 = vst [vmem:[#allocation1 + $0x31] ss:$2 sm:$0xff] %v4077_v5 }
  0x7c   : > { %v680_v11 = vld.sshfl [vmem:[#allocation1] sm:$0xff pattern:$0x75316420]  ;;  %v681_v12 = vld.sshfl [vmem:[#allocation1 + $0x8] sm:$0xff pattern:$0x75316420] }
  0x7d   : > { %v3471_v13 = vpack.i.bf16 %v681_v12, %v680_v11  ;;  %751 = vst [vmem:[#allocation1] ss:$2 sm:$0xff] %v4073_v3  ;;  %v921_v11 = vunpack.c.h.bf16 %v915_v62 }
  0x7e   : > { %v760_v14 = vld.sshfl [vmem:[#allocation1 + $0x10] sm:$0xff pattern:$0x75316420]  ;;  %v761_v15 = vld.sshfl [vmem:[#allocation1 + $0x18] sm:$0xff pattern:$0x75316420] }
  0x7f   : > { %3432 = vrot.lane.b32.xlu0 %v3431_v9, %s3990_s27  ;;  %3472 = vrot.lane.b32.xlu1 %v3471_v13, %s3991_s28  ;;  %767 = vst [vmem:[#allocation1 + $0x10] ss:$2 sm:$0xff] %v744_v10  ;;  %v3476_v20 = vpack.i.bf16 %v761_v15, %v760_v14 }
  0x80   : > { %614 = vrot.lane.b32.xlu2 %v593_v41, %s3990_s27  ;;  %v4170_v17 = vld.sshfl [vmem:[#allocation1 + $0x20] sm:$0xff pattern:$0x75316420]  ;;  %v4172_v18 = vld.sshfl [vmem:[#allocation1 + $0x28] sm:$0xff pattern:$0x75316420] }
  0x81   : > { %1198 = vst [vmem:[#allocation1 + $0x21] ss:$2 sm:$0xff] %v4075_v4  ;;  %s4012_s27 = smov 44  }
  0x82   : > { %v4244_v55 = vld.sshfl [vmem:[#allocation1 + $0x30] sm:$0xff pattern:$0x75316420]  ;;  %v4246_v56 = vld.sshfl [vmem:[#allocation1 + $0x38] sm:$0xff pattern:$0x75316420] }
  0x83   : > { %1288 = vst [vmem:[#allocation1 + $0x30] ss:$2 sm:$0xff] %v4077_v5 }
  0x84   : > { %v4177_v21 = vld.sshfl [vmem:[#allocation1] sm:$0xff pattern:$0x75316420]  ;;  %v4179_v22 = vld.sshfl [vmem:[#allocation1 + $0x8] sm:$0xff pattern:$0x75316420] }
  0x85   : > { %766 = vst [vmem:[#allocation1] ss:$2 sm:$0xff] %v743_v16  ;;  %v3481_v61 = vpack.i.bf16 %v4179_v22, %v4177_v21  ;;  %v920_v22 = vunpack.c.l.bf16 %v915_v62 }
  0x86   : > { %v4181_v24 = vpop.permute.xlu2 %349  ;;  %v4183_v25 = vld.sshfl [vmem:[#allocation1 + $0x10] sm:$0xff pattern:$0x75316420] }
  0x87   : > { %3442 = vrot.lane.b32.xlu0 %v3441_v19, %s3994_s5  ;;  %3477 = vrot.lane.b32.xlu1 %v3476_v20, %s3992_s29  ;;  %842 = vst [vmem:[#allocation1 + $0x11] ss:$2 sm:$0xff] %v4071_v2 }
  0x88   : > { %3437 = vrot.lane.b32.xlu2 %v3436_v23, %s3994_s5  ;;  %v4195_v29 = vld.sshfl [vmem:[#allocation1 + $0x20] sm:$0xff pattern:$0x75316420]  ;;  %v4197_v30 = vld.sshfl [vmem:[#allocation1 + $0x28] sm:$0xff pattern:$0x75316420]  ;;  %v3491_v23 = vpack.i.bf16 %v4190_v27, %v4185_v26 }
  0x89   : > { %1286 = vst [vmem:[#allocation1 + $0x20] ss:$2 sm:$0xff] %v4075_v4 }
  0x8c   : > { %v768_v33 = vld.sshfl [vmem:[#allocation1] sm:$0xff pattern:$0x75316420]  ;;  %v769_v34 = vld.sshfl [vmem:[#allocation1 + $0x8] sm:$0xff pattern:$0x75316420] }
  0x8d   : > { %v3496_v35 = vpack.i.bf16 %v769_v34, %v768_v33  ;;  %840 = vst [vmem:[#allocation1 + $0x1] ss:$2 sm:$0xff] %v4073_v3 }
  0x8e   : > { %v849_v36 = vld.sshfl [vmem:[#allocation1 + $0x10] sm:$0xff pattern:$0x75316420]  ;;  %v850_v37 = vld.sshfl [vmem:[#allocation1 + $0x18] sm:$0xff pattern:$0x75316420]  ;;  %v4202_v38 = vpop.permute.xlu2 %3332 }
  0x8f   : > { %3457 = vrot.lane.b32.xlu0 %v3456_v31, %s3991_s28  ;;  %3497 = vrot.lane.b32.xlu1 %v3496_v35, %s3992_s29  ;;  %v3335_v4 = vunpack.i.h.bf16 %v4202_v38  ;;  %v3334_v39 = vunpack.i.l.bf16 %v4202_v38  ;;  %856 = vst [vmem:[#allocation1 + $0x11] ss:$2 sm:$0xff] %v832_v32  ;;  %v3501_v45 = vpack.i.bf16 %v850_v37, %v849_v36  ;;  %v3486_v32 = vpack.i.bf16 %v4172_v18, %v4170_v17 }
  0x90   : > { %703 = vrot.lane.b32.xlu2 %v4149_v63, %s3991_s28  ;;  %v4223_v46 = vld.sshfl [vmem:[#allocation1 + $0x20] sm:$0xff pattern:$0x75316420]  ;;  %v4225_v47 = vld.sshfl [vmem:[#allocation1 + $0x28] sm:$0xff pattern:$0x75316420] }
  0x91   : > { %v444_v41 = vsel %vm439_vm0, %v3334_v39, %v3335_v4  ;;  %1375 = vst [vmem:[#allocation1 + $0x21] ss:$2 sm:$0xff] %v4219_v43 }
  0x92   : > { %464 = vst [vmem:[#allocation2 + $0x398] sm:$0xf] %v444_v41 }
  0x94   : > { %v4227_v48 = vld.sshfl [vmem:[#allocation1] sm:$0xff pattern:$0x75316420]  ;;  %v4229_v49 = vld.sshfl [vmem:[#allocation1 + $0x8] sm:$0xff pattern:$0x75316420] }
  0x95   : > { %855 = vst [vmem:[#allocation1 + $0x1] ss:$2 sm:$0xff] %v831_v42 }
  0x96   : > { %v4233_v51 = vld.sshfl [vmem:[#allocation1 + $0x10] sm:$0xff pattern:$0x75316420] }
  0x97   : > { %3467 = vrot.lane.b32.xlu0 %v3466_v44, %s3995_s6  ;;  %3502 = vrot.lane.b32.xlu1 %v3501_v45, %s3993_s30  ;;  %v4238_v52 = vpop.permute.xlu0 %3312  ;;  %930 = vst [vmem:[#allocation1 + $0x10] ss:$2 sm:$0xff] %v4071_v2  ;;  %v3506_v44 = vpack.i.bf16 %v4229_v49, %v4227_v48 }
  0x98   : > { %3462 = vrot.lane.b32.xlu2 %v3461_v50, %s3995_s6  ;;  %v3315_v53 = vunpack.i.h.bf16 %v4238_v52  ;;  %v3314_v54 = vunpack.i.l.bf16 %v4238_v52  ;;  %v4259_v12 = vld.sshfl [vmem:[#allocation1 + $0x20] sm:$0xff pattern:$0x75316420]  ;;  %v4267_v16 = vld.sshfl [vmem:[#allocation1 + $0x28] sm:$0xff pattern:$0x75316420] }
  0x99   : > { %v3343_v57 = vpop.permute.xlu2 %3342  ;;  %1463 = vst [vmem:[#allocation1 + $0x20] ss:$2 sm:$0xff] %v4219_v43 }
  0x9a   : > { %v354_v58 = vsel %vm351_vm1, %v3314_v54, %v3315_v53  ;;  %v3345_v59 = vunpack.i.h.bf16 %v3343_v57  ;;  %v3344_v60 = vunpack.i.l.bf16 %v3343_v57 }
  0x9b   : > { %374 = vst [vmem:[#allocation2 + $0x4d8] sm:$0xf0] %v354_v58 }
  0x9c   : > { %v857_v63 = vld.sshfl [vmem:[#allocation1] sm:$0xff pattern:$0x75316420]  ;;  %v858_v0 = vld.sshfl [vmem:[#allocation1 + $0x8] sm:$0xff pattern:$0x75316420]  ;;  %v361_v1 = vsel %vm351_vm1, %v3345_v59, %v4181_v24  ;;  %v360_v6 = vsel %vm351_vm1, %v3344_v60, %v3345_v59  ;;  %v3318_v7 = vpop.permute.xlu1 %3317 }
  0x9d   : > { %v3521_v5 = vpack.i.bf16 %v858_v0, %v857_v63  ;;  %928 = vst [vmem:[#allocation1] ss:$2 sm:$0xff] %v4073_v3  ;;  %v3320_v8 = vunpack.i.h.bf16 %v3318_v7  ;;  %v3319_v9 = vunpack.i.l.bf16 %v3318_v7 }
  0x9e   : > { %381 = vst [vmem:[#allocation2 + $0x488] sm:$0xf0] %v361_v1  ;;  %v937_v10 = vld.sshfl [vmem:[#allocation1 + $0x10] sm:$0xff pattern:$0x75316420] }
  0x9f   : > { %3482 = vrot.lane.b32.xlu0 %v3481_v61, %s3992_s29  ;;  %3522 = vrot.lane.b32.xlu1 %v3521_v5, %s3993_s30  ;;  %380 = vst [vmem:[#allocation2 + $0x108] sm:$0xf0] %v360_v6  ;;  %v938_v13 = vld.sshfl [vmem:[#allocation1 + $0x18] sm:$0xff pattern:$0x75316420]  ;;  %v355_v14 = vsel %vm351_vm1, %v3315_v53, %v3319_v9  ;;  %v356_v15 = vsel %vm351_vm1, %v3319_v9, %v3320_v8 }
  0xa0   : > { %791 = vrot.lane.b32.xlu2 %v4183_v25, %s3992_s29  ;;  %375 = vst [vmem:[#allocation2 + $0x18] sm:$0xf0] %v355_v14  ;;  %v3526_v24 = vpack.i.bf16 %v938_v13, %v937_v10  ;;  %v4304_v53 = vld.sshfl [vmem:[#allocation1 + $0x20] sm:$0xff pattern:$0x75316420]  ;;  %v3516_v6 = vpack.i.bf16 %v4246_v56, %v4244_v55  ;;  %v3511_v55 = vpack.i.bf16 %v4197_v30, %v4195_v29 }
  0xa1   : > { %376 = vst [vmem:[#allocation2 + $0x450] sm:$0xf0] %v356_v15  ;;  %v4269_v19 = vpop.permute.xlu2 %3352  ;;  %v4306_v57 = vld.sshfl [vmem:[#allocation1 + $0x28] sm:$0xff pattern:$0x75316420] }
  0xa2   : > { %v3355_v20 = vunpack.i.h.bf16 %v4269_v19  ;;  %v3354_v21 = vunpack.i.l.bf16 %v4269_v19  ;;  %944 = vst [vmem:[#allocation1 + $0x10] ss:$2 sm:$0xff] %v921_v11  ;;  %v1295_v29 = vld.sshfl [vmem:[#allocation1 + $0x30] sm:$0xff pattern:$0x75316420] }
  0xa3   : > { %1552 = vst [vmem:[#allocation1 + $0x21] ss:$2 sm:$0xff] %v4219_v43  ;;  %v1296_v15 = vld.sshfl [vmem:[#allocation1 + $0x38] sm:$0xff pattern:$0x75316420] }
  0xa4   : > { %v4276_v25 = vld.sshfl [vmem:[#allocation1] sm:$0xff pattern:$0x75316420]  ;;  %v4278_v28 = vld.sshfl [vmem:[#allocation1 + $0x8] sm:$0xff pattern:$0x75316420]  ;;  %v533_v31 = vsel %vm528_vm2, %v3354_v21, %v3355_v20  ;;  %v3323_v33 = vpop.permute.xlu1 %3322 }
  0xa5   : > { %553 = vst [vmem:[#allocation2 + $0x398] sm:$0xf0] %v533_v31  ;;  %v3325_v34 = vunpack.i.h.bf16 %v3323_v33  ;;  %v3324_v26 = vunpack.i.l.bf16 %v3323_v33  ;;  %v3531_v33 = vpack.i.bf16 %v4278_v28, %v4276_v25 }
  0xa6   : > { %943 = vst [vmem:[#allocation1] ss:$2 sm:$0xff] %v920_v22  ;;  %v4358_v22 = vunpack.c.h.bf16 %v4211_v40 }
  0xa7   : > { %3492 = vrot.lane.b32.xlu0 %v3491_v23, %s3996_s7  ;;  %3527 = vrot.lane.b32.xlu1 %v3526_v24, %s3994_s5  ;;  %v357_v27 = vsel %vm351_vm1, %v3320_v8, %v3324_v26  ;;  %v358_v35 = vsel %vm351_vm1, %v3324_v26, %v3325_v34  ;;  %v359_v36 = vsel %vm351_vm1, %v3325_v34, %v3344_v60 }
  0xa8   : > { %3487 = vrot.lane.b32.xlu2 %v3486_v32, %s3996_s7  ;;  %377 = vst [vmem:[#allocation2 + $0x328] sm:$0xf0] %v357_v27 }
  0xa9   : > { %v3328_v17 = vpop.permute.xlu0 %3327  ;;  %378 = vst [vmem:[#allocation2 + $0x440] sm:$0xf0] %v358_v35  ;;  %v4293_v18 = vld.sshfl [vmem:[#allocation1 + $0x10] sm:$0xff pattern:$0x75316420] }
  0xaa   : > { %v3330_v37 = vunpack.i.h.bf16 %v3328_v17  ;;  %v3329_v41 = vunpack.i.l.bf16 %v3328_v17  ;;  %379 = vst [vmem:[#allocation2 + $0x378] sm:$0xf0] %v359_v36  ;;  %v4295_v42 = vpop.permute.xlu2 %437  ;;  %v4364_v32 = vld.sshfl [vmem:[#allocation1 + $0x20] sm:$0xff pattern:$0x75316420] }
  0xab   : > { %1019 = vst [vmem:[#allocation1 + $0x11] ss:$2 sm:$0xff] %v4071_v2  ;;  %v4371_v40 = vld.sshfl [vmem:[#allocation1 + $0x28] sm:$0xff pattern:$0x75316420] }
  0xac   : > { %v353_v45 = vsel %vm351_vm1, %v3330_v37, %v3314_v54  ;;  %v352_v50 = vsel %vm351_vm1, %v3329_v41, %v3330_v37  ;;  %1377 = vst [vmem:[#allocation1 + $0x31] ss:$2 sm:$0xff] %v4358_v22  ;;  %vm2475_vm1 = vcmask 285696  }
  0xad   : > { %373 = vst [vmem:[#allocation2 + $0x3b0] sm:$0xf0] %v353_v45  ;;  %v945_v58 = vld.sshfl [vmem:[#allocation1] sm:$0xff pattern:$0x75316420] }
  0xae   : > { %372 = vst [vmem:[#allocation2 + $0x2b0] sm:$0xf0] %v352_v50  ;;  %v946_v59 = vld.sshfl [vmem:[#allocation1 + $0x8] sm:$0xff pattern:$0x75316420]  ;;  %v4308_v60 = vpop.permute.xlu1 %3347 }
  0xaf   : > { %3507 = vrot.lane.b32.xlu0 %v3506_v44, %s3993_s30  ;;  %v3546_v48 = vpack.i.bf16 %v946_v59, %v945_v58  ;;  %1017 = vst [vmem:[#allocation1 + $0x1] ss:$2 sm:$0xff] %v4073_v3  ;;  %v3350_v49 = vunpack.i.h.bf16 %v4308_v60  ;;  %v3349_v52 = vunpack.i.l.bf16 %v4308_v60 }
  0xb0   : > { %880 = vrot.lane.b32.xlu2 %v4233_v51, %s3993_s30  ;;  %v1003_v51 = vld [vmem:[%s4067_s23 + $0x10] sm:$0x3f]  ;;  %1640 = vst [vmem:[#allocation1 + $0x20] ss:$2 sm:$0xff] %v4219_v43 }
  0xb1   : > { %3547 = vrot.lane.b32.xlu1 %v3546_v48, %s3994_s5  ;;  %v4318_v54 = vpop.permute.xlu0 %3337  ;;  %v443_v61 = vsel %vm439_vm0, %v3350_v49, %v3334_v39  ;;  %v442_v62 = vsel %vm439_vm0, %v3349_v52, %v3350_v49  ;;  %v1008_v11 = vunpack.c.l.bf16 %v1003_v51  ;;  %v1009_v14 = vunpack.c.h.bf16 %v1003_v51 }
  0xb2   : > { %v3340_v63 = vunpack.i.h.bf16 %v4318_v54  ;;  %v3339_v0 = vunpack.i.l.bf16 %v4318_v54  ;;  %v4328_v1 = vpop.permute.xlu2 %3367  ;;  %v1026_v7 = vld.sshfl [vmem:[#allocation1 + $0x10] sm:$0xff pattern:$0x75316420]  ;;  %463 = vst [vmem:[#allocation2 + $0x2a8] sm:$0xf] %v443_v61  ;;  %v3541_v48 = vpack.i.bf16 %v1296_v15, %v1295_v29 }
  0xb3   : > { %v3370_v5 = vunpack.i.h.bf16 %v4328_v1  ;;  %v3369_v39 = vunpack.i.l.bf16 %v4328_v1  ;;  %v1027_v10 = vld.sshfl [vmem:[#allocation1 + $0x18] sm:$0xff pattern:$0x75316420]  ;;  %462 = vst [vmem:[#allocation2 + $0x308] sm:$0xf] %v442_v62 }
  0xb4   : > { %v445_v8 = vsel %vm439_vm0, %v3335_v4, %v3339_v0  ;;  %v446_v9 = vsel %vm439_vm0, %v3339_v0, %v3340_v63  ;;  %v3551_v56 = vpack.i.bf16 %v1027_v10, %v1026_v7  ;;  %1033 = vst [vmem:[#allocation1 + $0x11] ss:$2 sm:$0xff] %v1009_v14  ;;  %v4393_v49 = vld.sshfl [vmem:[#allocation1 + $0x30] sm:$0xff pattern:$0x75316420] }
  0xb5   : > { %465 = vst [vmem:[#allocation2 + $0x60] sm:$0xf] %v445_v8  ;;  %v621_v38 = vsel %vm616_vm3, %v3369_v39, %v3370_v5  ;;  %v1092_v0 = vld [vmem:[%s4067_s23 + $0x10] sm:$0x3f] }
  0xb6   : > { %v4348_v4 = vld.sshfl [vmem:[#allocation1] sm:$0xff pattern:$0x75316420]  ;;  %v4350_v13 = vld.sshfl [vmem:[#allocation1 + $0x8] sm:$0xff pattern:$0x75316420] }
  0xb7   : > { %466 = vst [vmem:[#allocation2 + $0xd8] sm:$0xf] %v446_v9  ;;  %3517 = vrot.lane.b32.xlu0 %v3516_v6, %s3997_s8 }
  0xb8   : > { %641 = vst [vmem:[#allocation2 + $0x458] sm:$0xf] %v621_v38  ;;  %3512 = vrot.lane.b32.xlu2 %v3511_v55, %s3997_s8 }
  0xb9   : > { %3552 = vrot.lane.b32.xlu1 %v3551_v56, %s3995_s6  ;;  %v4355_v30 = vpop.permute.xlu0 %3357  ;;  %1032 = vst [vmem:[#allocation1 + $0x1] ss:$2 sm:$0xff] %v1008_v11  ;;  %v3556_v11 = vpack.i.bf16 %v4350_v13, %v4348_v4  ;;  %v1178_v13 = vld [vmem:[%s4067_s23] sm:$0xff] }
  0xba   : > { %v3360_v23 = vunpack.i.h.bf16 %v4355_v30  ;;  %v3359_v24 = vunpack.i.l.bf16 %v4355_v30  ;;  %v4362_v31 = vpop.permute.xlu2 %3387 }
  0xbb   : > { %v3390_v34 = vunpack.i.h.bf16 %v4362_v31  ;;  %v3389_v26 = vunpack.i.l.bf16 %v4362_v31  ;;  %v1036_v41 = vld.sshfl [vmem:[#allocation1 + $0x10] sm:$0xff pattern:$0x75316420] }
  0xbc   : > { %v534_v27 = vsel %vm528_vm2, %v3355_v20, %v3359_v24  ;;  %v535_v35 = vsel %vm528_vm2, %v3359_v24, %v3360_v23  ;;  %1107 = vst [vmem:[#allocation1 + $0x10] ss:$2 sm:$0xff] %v4071_v2  ;;  %v3536_v2 = vpack.i.bf16 %v4225_v47, %v4223_v46  ;;  %v1098_v46 = vunpack.c.h.bf16 %v1092_v0 }
  0xbd   : > { %554 = vst [vmem:[#allocation2 + $0x60] sm:$0xf0] %v534_v27  ;;  %v710_v25 = vsel %vm705_vm4, %v3389_v26, %v3390_v34 }
  0xbe   : > { %555 = vst [vmem:[#allocation2 + $0xd8] sm:$0xf0] %v535_v35 }
  0xbf   : > { %3532 = vrot.lane.b32.xlu0 %v3531_v33, %s3994_s5  ;;  %730 = vst [vmem:[#allocation2 + $0x458] sm:$0xf0] %v710_v25 }
  0xc0   : > { %v1034_v28 = vld.sshfl [vmem:[#allocation1] sm:$0xff pattern:$0x75316420]  ;;  %v1035_v20 = vld.sshfl [vmem:[#allocation1 + $0x8] sm:$0xff pattern:$0x75316420]  ;;  %968 = vrot.lane.b32.xlu2 %v4293_v18, %s3994_s5 }
  0xc1   : > { %v3571_v36 = vpack.i.bf16 %v1035_v20, %v1034_v28  ;;  %1105 = vst [vmem:[#allocation1] ss:$2 sm:$0xff] %v4073_v3  ;;  %v3363_v17 = vpop.permute.xlu0 %3362  ;;  %v3378_v37 = vpop.permute.xlu1 %3377  ;;  %v4395_v18 = vld.sshfl [vmem:[#allocation1 + $0x38] sm:$0xff pattern:$0x75316420] }
  0xc2   : > { %v3365_v44 = vunpack.i.h.bf16 %v3363_v17  ;;  %v3364_v45 = vunpack.i.l.bf16 %v3363_v17  ;;  %v3380_v50 = vunpack.i.h.bf16 %v3378_v37  ;;  %v3379_v58 = vunpack.i.l.bf16 %v3378_v37  ;;  %v4390_v59 = vpop.permute.xlu2 %526  ;;  %1465 = vst [vmem:[#allocation1 + $0x30] ss:$2 sm:$0xff] %v4358_v22 }
  0xc3   : > { %3572 = vrot.lane.b32.xlu1 %v3571_v36, %s3995_s6  ;;  %v1114_v47 = vld.sshfl [vmem:[#allocation1 + $0x10] sm:$0xff pattern:$0x75316420] }
  0xc4   : > { %v441_v3 = vsel %vm439_vm0, %v3365_v44, %v3349_v52  ;;  %v440_v61 = vsel %vm439_vm0, %v3364_v45, %v3365_v44  ;;  %v449_v62 = vsel %vm439_vm0, %v3380_v50, %v4295_v42  ;;  %v447_v51 = vsel %vm439_vm0, %v3340_v63, %v3379_v58  ;;  %v1115_v63 = vld.sshfl [vmem:[#allocation1 + $0x18] sm:$0xff pattern:$0x75316420] }
  0xc5   : > { %461 = vst [vmem:[#allocation2 + $0x4f0] sm:$0xf] %v441_v3  ;;  %v448_v60 = vsel %vm439_vm0, %v3379_v58, %v3380_v50  ;;  %v1097_v52 = vunpack.c.l.bf16 %v1092_v0  ;;  %v3576_v38 = vpack.i.bf16 %v1115_v63, %v1114_v47  ;;  %vm1767_vm0 = vcmask 48128  }
  0xc6   : > { %460 = vst [vmem:[#allocation2 + $0x310] sm:$0xf] %v440_v61  ;;  %v3561_v61 = vpack.i.bf16 %v4267_v16, %v4259_v12 }
  0xc7   : > { %469 = vst [vmem:[#allocation2 + $0x220] sm:$0xf] %v449_v62  ;;  %3542 = vrot.lane.b32.xlu0 %v3541_v48, %s3998_s9 }
  0xc8   : > { %v4412_v42 = vld.sshfl [vmem:[#allocation1] sm:$0xff pattern:$0x75316420]  ;;  %v4414_v6 = vld.sshfl [vmem:[#allocation1 + $0x8] sm:$0xff pattern:$0x75316420]  ;;  %3537 = vrot.lane.b32.xlu2 %v3536_v2, %s3998_s9 }
  0xc9   : > { %467 = vst [vmem:[#allocation2 + $0x388] sm:$0xf] %v447_v51  ;;  %v4417_v7 = vpop.permute.xlu0 %3372  ;;  %v4419_v54 = vpop.permute.xlu1 %3382  ;;  %v1180_v51 = vld [vmem:[%s4067_s23 + $0x10] sm:$0x3f]  ;;  %v3581_v47 = vpack.i.bf16 %v4414_v6, %v4412_v42 }
  0xca   : > { %468 = vst [vmem:[#allocation2 + $0x160] sm:$0xf] %v448_v60  ;;  %v3375_v8 = vunpack.i.h.bf16 %v4417_v7  ;;  %v3374_v9 = vunpack.i.l.bf16 %v4417_v7  ;;  %v3385_v10 = vunpack.i.h.bf16 %v4419_v54  ;;  %v3384_v55 = vunpack.i.l.bf16 %v4419_v54  ;;  %v4425_v56 = vpop.permute.xlu2 %3402  ;;  %v1472_v1 = vld.sshfl [vmem:[#allocation1 + $0x30] sm:$0xff pattern:$0x75316420] }
  0xcb   : > { %1120 = vst [vmem:[#allocation1] ss:$2 sm:$0xff] %v1097_v52  ;;  %v3404_v14 = vunpack.i.l.bf16 %v4425_v56  ;;  %v3405_v33 = vunpack.i.h.bf16 %v4425_v56  ;;  %3577 = vrot.lane.b32.xlu1 %v3576_v38, %s3996_s7  ;;  %v1185_v42 = vunpack.c.l.bf16 %v1180_v51  ;;  %v1186_v54 = vunpack.c.h.bf16 %v1180_v51 }
  0xcc   : > { %v622_v29 = vsel %vm616_vm3, %v3370_v5, %v3374_v9  ;;  %v623_v15 = vsel %vm616_vm3, %v3374_v9, %v3375_v8  ;;  %v532_v24 = vsel %vm528_vm2, %v3385_v10, %v3354_v21  ;;  %1121 = vst [vmem:[#allocation1 + $0x10] ss:$2 sm:$0xff] %v1098_v46  ;;  %v531_v4 = vsel %vm528_vm2, %v3384_v55, %v3385_v10 }
  0xcd   : > { %642 = vst [vmem:[#allocation2 + $0x4a0] sm:$0xf] %v622_v29  ;;  %v798_v19 = vsel %vm793_vm5, %v3404_v14, %v3405_v33  ;;  %v4451_v21 = vunpack.c.l.bf16 %v1178_v13  ;;  %v4454_v5 = vunpack.c.h.bf16 %v1178_v13 }
  0xce   : > { %643 = vst [vmem:[#allocation2 + $0x390] sm:$0xf] %v623_v15 }
  0xcf   : > { %552 = vst [vmem:[#allocation2 + $0x2a8] sm:$0xf0] %v532_v24  ;;  %3557 = vrot.lane.b32.xlu0 %v3556_v11, %s3995_s6 }
  0xd0   : > { %551 = vst [vmem:[#allocation2 + $0x308] sm:$0xf0] %v531_v4  ;;  %1057 = vrot.lane.b32.xlu2 %v1036_v41, %s3995_s6  ;;  %v3566_v41 = vpack.i.bf16 %v4395_v18, %v4393_v49  ;;  %v4518_v4 = vld.sshfl [vmem:[#allocation1 + $0x28] sm:$0xff pattern:$0x75316420] }
  0xd1   : > { %818 = vst [vmem:[#allocation2 + $0xb0] sm:$0xf] %v798_v19  ;;  %v4456_v27 = vpop.permute.xlu0 %3392  ;;  %v3413_v35 = vpop.permute.xlu1 %3412 }
  0xd2   : > { %v1122_v25 = vld.sshfl [vmem:[#allocation1] sm:$0xff pattern:$0x75316420]  ;;  %v1123_v28 = vld.sshfl [vmem:[#allocation1 + $0x8] sm:$0xff pattern:$0x75316420]  ;;  %v3395_v20 = vunpack.i.h.bf16 %v4456_v27  ;;  %v3394_v36 = vunpack.i.l.bf16 %v4456_v27  ;;  %v3415_v17 = vunpack.i.h.bf16 %v3413_v35  ;;  %v3414_v37 = vunpack.i.l.bf16 %v3413_v35  ;;  %v4460_v44 = vpop.permute.xlu2 %3422 }
  0xd3   : > { %v3596_v45 = vpack.i.bf16 %v1123_v28, %v1122_v25  ;;  %1194 = vst [vmem:[#allocation1 + $0x1] ss:$2 sm:$0xff] %v4451_v21  ;;  %v1124_v50 = vld.sshfl [vmem:[#allocation1 + $0x10] sm:$0xff pattern:$0x75316420] }
  0xd4   : > { %v711_v58 = vsel %vm705_vm4, %v3390_v34, %v3394_v36  ;;  %v712_v48 = vsel %vm705_vm4, %v3394_v36, %v3395_v20  ;;  %v538_v3 = vsel %vm528_vm2, %v3415_v17, %v4390_v59  ;;  %1196 = vst [vmem:[#allocation1 + $0x11] ss:$2 sm:$0xff] %v4454_v5  ;;  %v536_v49 = vsel %vm528_vm2, %v3360_v23, %v3414_v37 }
  0xd5   : > { %3597 = vrot.lane.b32.xlu1 %v3596_v45, %s3996_s7  ;;  %731 = vst [vmem:[#allocation2 + $0x4a0] sm:$0xf0] %v711_v58  ;;  %v3424_v34 = vunpack.i.l.bf16 %v4460_v44  ;;  %v537_v18 = vsel %vm528_vm2, %v3414_v37, %v3415_v17  ;;  %v3425_v59 = vunpack.i.h.bf16 %v4460_v44 }
  0xd6   : > { %732 = vst [vmem:[#allocation2 + $0x390] sm:$0xf0] %v712_v48 }
  0xd7   : > { %558 = vst [vmem:[#allocation2 + $0x220] sm:$0xf0] %v538_v3  ;;  %3567 = vrot.lane.b32.xlu0 %v3566_v41, %s3999_s10  ;;  %v887_v12 = vsel %vm882_vm6, %v3424_v34, %v3425_v59  ;;  %v3586_v41 = vpack.i.bf16 %v4306_v57, %v4304_v53 }
  0xd8   : > { %556 = vst [vmem:[#allocation2 + $0x388] sm:$0xf0] %v536_v49  ;;  %3562 = vrot.lane.b32.xlu2 %v3561_v61, %s3999_s10 }
  0xd9   : > { %557 = vst [vmem:[#allocation2 + $0x160] sm:$0xf0] %v537_v18  ;;  %v3398_v16 = vpop.permute.xlu0 %3397  ;;  %v4490_v30 = vpop.permute.xlu1 %3417 }
  0xda   : > { %v3400_v23 = vunpack.i.h.bf16 %v3398_v16  ;;  %v3399_v62 = vunpack.i.l.bf16 %v3398_v16  ;;  %v3420_v2 = vunpack.i.h.bf16 %v4490_v30  ;;  %v3419_v0 = vunpack.i.l.bf16 %v4490_v30  ;;  %v615_v60 = vpop.permute.xlu2 %614  ;;  %907 = vst [vmem:[#allocation2 + $0xb0] sm:$0xf0] %v887_v12  ;;  %v4504_v11 = vld.sshfl [vmem:[#allocation1] sm:$0xff pattern:$0x75316420] }
  0xdb   : > { %v1203_v52 = vld.sshfl [vmem:[#allocation1 + $0x10] sm:$0xff pattern:$0x75316420]  ;;  %v1204_v46 = vld.sshfl [vmem:[#allocation1 + $0x18] sm:$0xff pattern:$0x75316420] }
  0xdc   : > { %v3601_v63 = vpack.i.bf16 %v1204_v46, %v1203_v52  ;;  %v530_v9 = vsel %vm528_vm2, %v3400_v23, %v3384_v55  ;;  %v529_v10 = vsel %vm528_vm2, %v3399_v62, %v3400_v23  ;;  %v620_v38 = vsel %vm616_vm3, %v3420_v2, %v3369_v39  ;;  %v4509_v6 = vld.sshfl [vmem:[#allocation1 + $0x8] sm:$0xff pattern:$0x75316420]  ;;  %v4513_v55 = vld.sshfl [vmem:[#allocation1 + $0x20] sm:$0xff pattern:$0x75316420] }
  0xdd   : > { %550 = vst [vmem:[#allocation2 + $0x4f0] sm:$0xf0] %v530_v9  ;;  %v619_v29 = vsel %vm616_vm3, %v3419_v0, %v3420_v2  ;;  %v1473_v39 = vld.sshfl [vmem:[#allocation1 + $0x38] sm:$0xff pattern:$0x75316420]  ;;  %v3606_v62 = vpack.i.bf16 %v4509_v6, %v4504_v11  ;;  %vm2563_vm2 = vcmask 277504  }
  0xde   : > { %3602 = vrot.lane.b32.xlu1 %v3601_v63, %s3997_s8  ;;  %549 = vst [vmem:[#allocation2 + $0x310] sm:$0xf0] %v529_v10  ;;  %v3591_v36 = vpack.i.bf16 %v1473_v39, %v1472_v1  ;;  %v1269_v52 = vld [vmem:[%s4067_s23 + $0x10] sm:$0x3f] }
  0xdf   : > { %640 = vst [vmem:[#allocation2 + $0x380] sm:$0xf] %v620_v38  ;;  %3582 = vrot.lane.b32.xlu0 %v3581_v47, %s3996_s7  ;;  %v1274_v63 = vunpack.c.l.bf16 %v1269_v52 }
  0xe0   : > { %639 = vst [vmem:[#allocation2 + $0x4f8] sm:$0xf] %v619_v29  ;;  %1145 = vrot.lane.b32.xlu2 %v1124_v50, %s3996_s7  ;;  %s3097_s7 = sld [smem:[#allocation3]] }
  0xe1   : > { %1209 = vst [vmem:[#allocation1 + $0x1] ss:$2 sm:$0xff] %v1185_v42  ;;  %v4516_v15 = vpop.permute.xlu0 %3407  ;;  %v3448_v24 = vpop.permute.xlu1 %3447 }
  0xe2   : > { %v3410_v13 = vunpack.i.h.bf16 %v4516_v15  ;;  %v3409_v19 = vunpack.i.l.bf16 %v4516_v15  ;;  %v3450_v35 = vunpack.i.h.bf16 %v3448_v24  ;;  %1210 = vst [vmem:[#allocation1 + $0x11] ss:$2 sm:$0xff] %v1186_v54  ;;  %v4522_v25 = vpop.permute.xlu2 %3437  ;;  %v3449_v28 = vunpack.i.l.bf16 %v3448_v24 }
  0xe3   : > { %1554 = vst [vmem:[#allocation1 + $0x31] ss:$2 sm:$0xff] %v4358_v22  ;;  %v3439_v50 = vunpack.i.l.bf16 %v4522_v25  ;;  %v3440_v53 = vunpack.i.h.bf16 %v4522_v25  ;;  %v3611_v24 = vpack.i.bf16 %v4371_v40, %v4364_v32  ;;  %v1275_v40 = vunpack.c.h.bf16 %v1269_v52 }
  0xe4   : > { %v799_v17 = vsel %vm793_vm5, %v3405_v33, %v3409_v19  ;;  %v800_v37 = vsel %vm793_vm5, %v3409_v19, %v3410_v13  ;;  %v626_v45 = vsel %vm616_vm3, %v3450_v35, %v615_v60  ;;  %1729 = vst [vmem:[#allocation1 + $0x21] ss:$2 sm:$0xff] %v4219_v43  ;;  %v624_v33 = vsel %vm616_vm3, %v3375_v8, %v3449_v28 }
  0xe5   : > { %819 = vst [vmem:[#allocation2 + $0x320] sm:$0xf] %v799_v17  ;;  %v625_v3 = vsel %vm616_vm3, %v3449_v28, %v3450_v35  ;;  %v975_v8 = vsel %vm970_vm7, %v3439_v50, %v3440_v53 }
  0xe6   : > { %820 = vst [vmem:[#allocation2 + $0x188] sm:$0xf] %v800_v37 }
  0xe7   : > { %646 = vst [vmem:[#allocation2 + $0x480] sm:$0xf] %v626_v45  ;;  %3592 = vrot.lane.b32.xlu0 %v3591_v36, %s4000_s11 }
  0xe8   : > { %v1211_v58 = vld.sshfl [vmem:[#allocation1] sm:$0xff pattern:$0x75316420]  ;;  %v1212_v48 = vld.sshfl [vmem:[#allocation1 + $0x8] sm:$0xff pattern:$0x75316420]  ;;  %3587 = vrot.lane.b32.xlu2 %v3586_v41, %s4000_s11 }
  0xe9   : > { %v3621_v43 = vpack.i.bf16 %v1212_v48, %v1211_v58  ;;  %1282 = vst [vmem:[#allocation1] ss:$2 sm:$0xff] %v4451_v21  ;;  %v1213_v57 = vld.sshfl [vmem:[#allocation1 + $0x10] sm:$0xff pattern:$0x75316420]  ;;  %v4544_v61 = vpop.permute.xlu0 %3427  ;;  %v4546_v7 = vpop.permute.xlu1 %3452 }
  0xea   : > { %644 = vst [vmem:[#allocation2 + $0xb8] sm:$0xf] %v624_v33  ;;  %v3430_v49 = vunpack.i.h.bf16 %v4544_v61  ;;  %v3429_v18 = vunpack.i.l.bf16 %v4544_v61  ;;  %v3455_v12 = vunpack.i.h.bf16 %v4546_v7  ;;  %v704_v16 = vpop.permute.xlu2 %703  ;;  %v3454_v23 = vunpack.i.l.bf16 %v4546_v7  ;;  %v1561_v47 = vld.sshfl [vmem:[#allocation1 + $0x30] sm:$0xff pattern:$0x75316420] }
  0xeb   : > { %3622 = vrot.lane.b32.xlu1 %v3621_v43, %s3997_s8  ;;  %645 = vst [vmem:[#allocation2 + $0x270] sm:$0xf] %v625_v3  ;;  %v1562_v9 = vld.sshfl [vmem:[#allocation1 + $0x38] sm:$0xff pattern:$0x75316420] }
  0xec   : > { %1284 = vst [vmem:[#allocation1 + $0x10] ss:$2 sm:$0xff] %v4454_v5  ;;  %v888_v2 = vsel %vm882_vm6, %v3425_v59, %v3429_v18  ;;  %v889_v51 = vsel %vm882_vm6, %v3429_v18, %v3430_v49  ;;  %v709_v60 = vsel %vm705_vm4, %v3455_v12, %v3389_v26  ;;  %v708_v46 = vsel %vm705_vm4, %v3454_v23, %v3455_v12 }
  0xed   : > { %995 = vst [vmem:[#allocation2 + $0x48] sm:$0xf] %v975_v8  ;;  %v3616_v1 = vpack.i.bf16 %v1562_v9, %v1561_v47 }
  0xee   : > { %908 = vst [vmem:[#allocation2 + $0x320] sm:$0xf0] %v888_v2 }
  0xef   : > { %909 = vst [vmem:[#allocation2 + $0x188] sm:$0xf0] %v889_v51  ;;  %3607 = vrot.lane.b32.xlu0 %v3606_v62, %s3997_s8 }
  0xf0   : > { %v1289_v59 = vld.sshfl [vmem:[#allocation1] sm:$0xff pattern:$0x75316420]  ;;  %1234 = vrot.lane.b32.xlu2 %v1213_v57, %s3997_s8  ;;  %v1290_v10 = vld.sshfl [vmem:[#allocation1 + $0x8] sm:$0xff pattern:$0x75316420] }
  0xf1   : > { %729 = vst [vmem:[#allocation2 + $0x380] sm:$0xf0] %v709_v60  ;;  %v3433_v38 = vpop.permute.xlu0 %3432  ;;  %v3473_v31 = vpop.permute.xlu1 %3472  ;;  %v3631_v43 = vpack.i.bf16 %v1290_v10, %v1289_v59  ;;  %s3259_s8 = smul.u32 40, %s5907_s17 }
  0xf2   : > { %728 = vst [vmem:[#allocation2 + $0x4f8] sm:$0xf0] %v708_v46  ;;  %v3435_v26 = vunpack.i.h.bf16 %v3433_v38  ;;  %v3434_v11 = vunpack.i.l.bf16 %v3433_v38  ;;  %v3475_v29 = vunpack.i.h.bf16 %v3473_v31  ;;  %v3474_v42 = vunpack.i.l.bf16 %v3473_v31  ;;  %v4576_v39 = vpop.permute.xlu2 %3462 }
  0xf3   : > { %v1291_v6 = vld.sshfl [vmem:[#allocation1 + $0x10] sm:$0xff pattern:$0x75316420]  ;;  %v1292_v54 = vld.sshfl [vmem:[#allocation1 + $0x18] sm:$0xff pattern:$0x75316420]  ;;  %v3464_v37 = vunpack.i.l.bf16 %v4576_v39  ;;  %v3465_v30 = vunpack.i.h.bf16 %v4576_v39 }
  0xf4   : > { %v3626_v19 = vpack.i.bf16 %v1292_v54, %v1291_v6  ;;  %1297 = vst [vmem:[#allocation1] ss:$2 sm:$0xff] %v1274_v63  ;;  %v618_v35 = vsel %vm616_vm3, %v3435_v26, %v3419_v0  ;;  %v617_v28 = vsel %vm616_vm3, %v3434_v11, %v3435_v26  ;;  %v715_v36 = vsel %vm705_vm4, %v3475_v29, %v704_v16 }
  0xf5   : > { %638 = vst [vmem:[#allocation2 + $0x360] sm:$0xf] %v618_v35  ;;  %v713_v17 = vsel %vm705_vm4, %v3395_v20, %v3474_v42  ;;  %v714_v32 = vsel %vm705_vm4, %v3474_v42, %v3475_v29  ;;  %v1064_v27 = vsel %vm1059_vm8, %v3464_v37, %v3465_v30  ;;  %v3636_v26 = vpack.i.bf16 %v4518_v4, %v4513_v55 }
  0xf6   : > { %3627 = vrot.lane.b32.xlu1 %v3626_v19, %s3998_s9  ;;  %637 = vst [vmem:[#allocation2 + $0xa0] sm:$0xf] %v617_v28  ;;  %vm2032_vm3 = vcmask 441344  }
  0xf7   : > { %735 = vst [vmem:[#allocation2 + $0x480] sm:$0xf0] %v715_v36  ;;  %3617 = vrot.lane.b32.xlu0 %v3616_v1, %s4001_s12 }
  0xf8   : > { %733 = vst [vmem:[#allocation2 + $0xb8] sm:$0xf0] %v713_v17  ;;  %3612 = vrot.lane.b32.xlu2 %v3611_v24, %s4001_s12 }
  0xf9   : > { %734 = vst [vmem:[#allocation2 + $0x270] sm:$0xf0] %v714_v32  ;;  %v4599_v20 = vpop.permute.xlu0 %3442  ;;  %v4601_v0 = vpop.permute.xlu1 %3477 }
  0xfa   : > { %1298 = vst [vmem:[#allocation1 + $0x10] ss:$2 sm:$0xff] %v1275_v40  ;;  %v3445_v45 = vunpack.i.h.bf16 %v4599_v20  ;;  %v3444_v41 = vunpack.i.l.bf16 %v4599_v20  ;;  %v3480_v33 = vunpack.i.h.bf16 %v4601_v0  ;;  %v3479_v58 = vunpack.i.l.bf16 %v4601_v0  ;;  %v792_v16 = vpop.permute.xlu2 %791 }
  0xfb   : > { %v1299_v48 = vld.sshfl [vmem:[#allocation1] sm:$0xff pattern:$0x75316420]  ;;  %v1300_v3 = vld.sshfl [vmem:[#allocation1 + $0x8] sm:$0xff pattern:$0x75316420] }
  0xfc   : > { %v3646_v57 = vpack.i.bf16 %v1300_v3, %v1299_v48  ;;  %1371 = vst [vmem:[#allocation1 + $0x1] ss:$2 sm:$0xff] %v4451_v21  ;;  %v976_v8 = vsel %vm970_vm7, %v3440_v53, %v3444_v41  ;;  %v977_v18 = vsel %vm970_vm7, %v3444_v41, %v3445_v45  ;;  %v797_v12 = vsel %vm793_vm5, %v3480_v33, %v3404_v14  ;;  %v1357_v53 = vld [vmem:[%s4067_s23 + $0x10] sm:$0x3f] }
  0xfd   : > { %1084 = vst [vmem:[#allocation2 + $0x48] sm:$0xf0] %v1064_v27  ;;  %v796_v62 = vsel %vm793_vm5, %v3479_v58, %v3480_v33  ;;  %v1362_v2 = vunpack.c.l.bf16 %v1357_v53  ;;  %v1363_v6 = vunpack.c.h.bf16 %v1357_v53  ;;  %v1799_v41 = vld [vmem:[%s4067_s23 + $0xa] sm:$0xff]  ;;  %v4676_v48 = vld.sshfl [vmem:[#allocation1 + $0x20] sm:$0xff pattern:$0x75316420] }
  0xfe   : > { %3647 = vrot.lane.b32.xlu1 %v3646_v57, %s3998_s9  ;;  %996 = vst [vmem:[#allocation2 + $0x300] sm:$0xf] %v976_v8  ;;  %v4674_v33 = vunpack.c.l.bf16 %v1799_v41  ;;  %v4678_v3 = vld.sshfl [vmem:[#allocation1 + $0x28] sm:$0xff pattern:$0x75316420] }
  0xff   : > { %997 = vst [vmem:[#allocation2 + $0x4a8] sm:$0xf] %v977_v18  ;;  %3632 = vrot.lane.b32.xlu0 %v3631_v43, %s3998_s9  ;;  %v1446_v53 = vld [vmem:[%s4067_s23 + $0x10] sm:$0x3f]  ;;  %v3661_v61 = vpack.i.bf16 %v4678_v3, %v4676_v48 }
 0x100   : > { %817 = vst [vmem:[#allocation2 + $0x3f8] sm:$0xf] %v797_v12 }
 0x101   : > { %v1301_v51 = vld.sshfl [vmem:[#allocation1 + $0x10] sm:$0xff pattern:$0x75316420]  ;;  %816 = vst [vmem:[#allocation2 + $0x38] sm:$0xf] %v796_v62  ;;  %v3458_v60 = vpop.permute.xlu0 %3457  ;;  %v3498_v56 = vpop.permute.xlu1 %3497 }
 0x102   : > { %1373 = vst [vmem:[#allocation1 + $0x11] ss:$2 sm:$0xff] %v4454_v5  ;;  %v3460_v14 = vunpack.i.h.bf16 %v3458_v60  ;;  %v3459_v52 = vunpack.i.l.bf16 %v3458_v60  ;;  %v3500_v46 = vunpack.i.h.bf16 %v3498_v56  ;;  %v3499_v47 = vunpack.i.l.bf16 %v3498_v56  ;;  %1322 = vrot.lane.b32.xlu2 %v1301_v51, %s3998_s9  ;;  %v4640_v29 = vpop.permute.xlu2 %3487 }
 0x103   : > { %v4625_v59 = vld.sshfl [vmem:[#allocation1] sm:$0xff pattern:$0x75316420]  ;;  %v4627_v63 = vld.sshfl [vmem:[#allocation1 + $0x8] sm:$0xff pattern:$0x75316420]  ;;  %v3489_v7 = vunpack.i.l.bf16 %v4640_v29  ;;  %v3490_v55 = vunpack.i.h.bf16 %v4640_v29 }
 0x104   : > { %1386 = vst [vmem:[#allocation1 + $0x1] ss:$2 sm:$0xff] %v1362_v2  ;;  %v707_v9 = vsel %vm705_vm4, %v3460_v14, %v3454_v23  ;;  %v706_v10 = vsel %vm705_vm4, %v3459_v52, %v3460_v14  ;;  %v803_v38 = vsel %vm793_vm5, %v3500_v46, %v792_v16  ;;  %v801_v31 = vsel %vm793_vm5, %v3410_v13, %v3499_v47 }
 0x105   : > { %727 = vst [vmem:[#allocation2 + $0x360] sm:$0xf0] %v707_v9  ;;  %v802_v11 = vsel %vm793_vm5, %v3499_v47, %v3500_v46  ;;  %v1152_v28 = vsel %vm1147_vm9, %v3489_v7, %v3490_v55  ;;  %v1452_v2 = vunpack.c.h.bf16 %v1446_v53  ;;  %v1451_v52 = vunpack.c.l.bf16 %v1446_v53 }
 0x106   : > { %726 = vst [vmem:[#allocation2 + $0xa0] sm:$0xf0] %v706_v10  ;;  %vm2386_vm4 = vcmask 293888  }
 0x107   : > { %823 = vst [vmem:[#allocation2 + $0x20] sm:$0xf] %v803_v38 }
 0x108   : > { %821 = vst [vmem:[#allocation2 + $0x210] sm:$0xf] %v801_v31 }
 0x109   : > { %v1380_v23 = vld.sshfl [vmem:[#allocation1 + $0x10] sm:$0xff pattern:$0x75316420]  ;;  %v1381_v42 = vld.sshfl [vmem:[#allocation1 + $0x18] sm:$0xff pattern:$0x75316420]  ;;  %v4643_v54 = vpop.permute.xlu0 %3467  ;;  %v4645_v15 = vpop.permute.xlu1 %3502 }
 0x10a   : > { %v3651_v13 = vpack.i.bf16 %v1381_v42, %v1380_v23  ;;  %822 = vst [vmem:[#allocation2 + $0x78] sm:$0xf] %v802_v11  ;;  %v3470_v4 = vunpack.i.h.bf16 %v4643_v54  ;;  %v3469_v1 = vunpack.i.l.bf16 %v4643_v54  ;;  %3637 = vrot.lane.b32.xlu2 %v3636_v26, %s4002_s13  ;;  %v3505_v35 = vunpack.i.h.bf16 %v4645_v15  ;;  %v881_v23 = vpop.permute.xlu2 %880 }
 0x10b   : > { %v1388_v24 = vld.sshfl [vmem:[#allocation1] sm:$0xff pattern:$0x75316420]  ;;  %v1389_v19 = vld.sshfl [vmem:[#allocation1 + $0x8] sm:$0xff pattern:$0x75316420]  ;;  %v3504_v32 = vunpack.i.l.bf16 %v4645_v15 }
 0x10c   : > { %3652 = vrot.lane.b32.xlu1 %v3651_v13, %s3999_s10  ;;  %1459 = vst [vmem:[#allocation1] ss:$2 sm:$0xff] %v4451_v21  ;;  %v1065_v36 = vsel %vm1059_vm8, %v3465_v30, %v3469_v1  ;;  %v1066_v17 = vsel %vm1059_vm8, %v3469_v1, %v3470_v4  ;;  %v886_v40 = vsel %vm882_vm6, %v3505_v35, %v3424_v34  ;;  %v4725_v1 = vunpack.c.h.bf16 %v1799_v41 }
 0x10d   : > { %1642 = vst [vmem:[#allocation1 + $0x30] ss:$2 sm:$0xff] %v4358_v22  ;;  %v3671_v27 = vpack.i.bf16 %v1389_v19, %v1388_v24  ;;  %v885_v30 = vsel %vm882_vm6, %v3504_v32, %v3505_v35 }
 0x10e   : > { %1387 = vst [vmem:[#allocation1 + $0x11] ss:$2 sm:$0xff] %v1363_v6 }
 0x10f   : > { %1172 = vst [vmem:[#allocation2 + $0x260] sm:$0xf] %v1152_v28 }
 0x110   : > { %1085 = vst [vmem:[#allocation2 + $0x300] sm:$0xf0] %v1065_v36 }
 0x111   : > { %1086 = vst [vmem:[#allocation2 + $0x4a8] sm:$0xf0] %v1066_v17  ;;  %v3483_v42 = vpop.permute.xlu0 %3482  ;;  %v3523_v19 = vpop.permute.xlu1 %3522 }
 0x112   : > { %906 = vst [vmem:[#allocation2 + $0x3f8] sm:$0xf0] %v886_v40  ;;  %v3484_v24 = vunpack.i.l.bf16 %v3483_v42  ;;  %v3525_v36 = vunpack.i.h.bf16 %v3523_v19  ;;  %v3524_v17 = vunpack.i.l.bf16 %v3523_v19 }
 0x113   : > { %905 = vst [vmem:[#allocation2 + $0x38] sm:$0xf0] %v885_v30  ;;  %v4701_v56 = vld.sshfl [vmem:[#allocation1] sm:$0xff pattern:$0x75316420] }
 0x114   : > { %3672 = vrot.lane.b32.xlu1 %v3671_v27, %s3999_s10  ;;  %v1649_v44 = vld.sshfl [vmem:[#allocation1 + $0x30] sm:$0xff pattern:$0x75316420]  ;;  %v1650_v43 = vld.sshfl [vmem:[#allocation1 + $0x38] sm:$0xff pattern:$0x75316420]  ;;  %v890_v0 = vsel %vm882_vm6, %v3430_v49, %v3524_v17 }
 0x115   : > { %v3641_v34 = vpack.i.bf16 %v1650_v43, %v1649_v44  ;;  %v1390_v57 = vld.sshfl [vmem:[#allocation1 + $0x10] sm:$0xff pattern:$0x75316420]  ;;  %1817 = vst [vmem:[#allocation1 + $0x20] ss:$2 sm:$0xff] %v4674_v33 }
 0x116   : > { %1461 = vst [vmem:[#allocation1 + $0x10] ss:$2 sm:$0xff] %v4454_v5  ;;  %1411 = vrot.lane.b32.xlu2 %v1390_v57, %s3999_s10  ;;  %v4703_v14 = vld.sshfl [vmem:[#allocation1 + $0x8] sm:$0xff pattern:$0x75316420] }
 0x117   : > { %3642 = vrot.lane.b32.xlu0 %v3641_v34, %s4002_s13  ;;  %1731 = vst [vmem:[#allocation1 + $0x31] ss:$2 sm:$0xff] %v4358_v22  ;;  %v3656_v22 = vpack.i.bf16 %v4627_v63, %v4625_v59  ;;  %v1534_v59 = vld [vmem:[%s4067_s23 + $0x10] sm:$0x3f]  ;;  %v3681_v49 = vpack.i.bf16 %v4703_v14, %v4701_v56 }
 0x118   : > { %1474 = vst [vmem:[#allocation1] ss:$2 sm:$0xff] %v1451_v52  ;;  %v1540_v11 = vunpack.c.h.bf16 %v1534_v59  ;;  %v1539_v43 = vunpack.c.l.bf16 %v1534_v59 }
 0x119   : > { %910 = vst [vmem:[#allocation2 + $0x210] sm:$0xf0] %v890_v0  ;;  %v4765_v52 = vpop.permute.xlu1 %3527 }
 0x11c   : > { %v4686_v16 = vld.sshfl [vmem:[#allocation1 + $0x20] sm:$0xff pattern:$0x75316420]  ;;  %v4688_v62 = vld.sshfl [vmem:[#allocation1 + $0x28] sm:$0xff pattern:$0x75316420] }
 0x11d   : > { %v1468_v8 = vld.sshfl [vmem:[#allocation1 + $0x10] sm:$0xff pattern:$0x75316420]  ;;  %v1469_v18 = vld.sshfl [vmem:[#allocation1 + $0x18] sm:$0xff pattern:$0x75316420] }
 0x11e   : > { %v3676_v12 = vpack.i.bf16 %v1469_v18, %v1468_v8  ;;  %1906 = vst [vmem:[#allocation1 + $0x21] ss:$2 sm:$0xff] %v4674_v33  ;;  %v1738_v6 = vld.sshfl [vmem:[#allocation1 + $0x30] sm:$0xff pattern:$0x75316420]  ;;  %v4752_v8 = vpop.permute.xlu2 %3512  ;;  %v4754_v18 = vpop.permute.xlu0 %3492  ;;  %3662 = vrot.lane.b32.xlu2 %v3661_v61, %s4003_s14 }
 0x11f   : > { %3657 = vrot.lane.b32.xlu0 %v3656_v22, %s3999_s10  ;;  %1475 = vst [vmem:[#allocation1 + $0x10] ss:$2 sm:$0xff] %v1452_v2  ;;  %v4719_v38 = vld.sshfl [vmem:[#allocation1] sm:$0xff pattern:$0x75316420]  ;;  %v3514_v53 = vunpack.i.l.bf16 %v4752_v8  ;;  %v3495_v2 = vunpack.i.h.bf16 %v4754_v18  ;;  %v3494_v22 = vunpack.i.l.bf16 %v4754_v18  ;;  %s237_s10 = scalar_lea.vmem %s5865_s4, %s3259_s8 }
 0x120   : > { %3677 = vrot.lane.b32.xlu1 %v3676_v12, %s4000_s11  ;;  %v4721_v31 = vld.sshfl [vmem:[#allocation1 + $0x8] sm:$0xff pattern:$0x75316420]  ;;  %v1739_v13 = vld.sshfl [vmem:[#allocation1 + $0x38] sm:$0xff pattern:$0x75316420]  ;;  %v3515_v12 = vunpack.i.h.bf16 %v4752_v8 }
 0x121   : > { %v3666_v35 = vpack.i.bf16 %v1739_v13, %v1738_v6  ;;  %1548 = vst [vmem:[#allocation1 + $0x1] ss:$2 sm:$0xff] %v4451_v21  ;;  %v892_v21 = vsel %vm882_vm6, %v3525_v36, %v881_v23  ;;  %v1153_v14 = vsel %vm1147_vm9, %v3490_v55, %v3494_v22  ;;  %v1154_v23 = vsel %vm1147_vm9, %v3494_v22, %v3495_v2 }
 0x122   : > { %1819 = vst [vmem:[#allocation1 + $0x30] ss:$2 sm:$0xff] %v4725_v1  ;;  %v1241_v56 = vsel %vm1236_vm10, %v3514_v53, %v3515_v12 }
 0x123   : > { %912 = vst [vmem:[#allocation2 + $0x20] sm:$0xf0] %v892_v21 }
 0x124   : > { %1261 = vst [vmem:[#allocation2 + $0x260] sm:$0xf0] %v1241_v56 }
 0x125   : > { %v4693_v51 = vld.sshfl [vmem:[#allocation1 + $0x20] sm:$0xff pattern:$0x75316420]  ;;  %v4695_v60 = vld.sshfl [vmem:[#allocation1 + $0x28] sm:$0xff pattern:$0x75316420] }
 0x126   : > { %1994 = vst [vmem:[#allocation1 + $0x20] ss:$2 sm:$0xff] %v4674_v33  ;;  %v4710_v9 = vld.sshfl [vmem:[#allocation1 + $0x10] sm:$0xff pattern:$0x75316420] }
 0x127   : > { %1550 = vst [vmem:[#allocation1 + $0x11] ss:$2 sm:$0xff] %v4454_v5  ;;  %v3485_v5 = vunpack.i.h.bf16 %v3483_v42  ;;  %3667 = vrot.lane.b32.xlu0 %v3666_v35, %s4003_s14  ;;  %v3529_v42 = vunpack.i.l.bf16 %v4765_v52  ;;  %1499 = vrot.lane.b32.xlu2 %v4710_v9, %s4000_s11 }
 0x128   : > { %v4746_v44 = vld.sshfl [vmem:[#allocation1] sm:$0xff pattern:$0x75316420]  ;;  %v4767_v59 = vld.sshfl [vmem:[#allocation1 + $0x8] sm:$0xff pattern:$0x75316420] }
 0x129   : > { %v795_v40 = vsel %vm793_vm5, %v3485_v5, %v3479_v58  ;;  %v794_v27 = vsel %vm793_vm5, %v3484_v24, %v3485_v5  ;;  %v891_v58 = vsel %vm882_vm6, %v3524_v17, %v3525_v36  ;;  %v4748_v34 = vld.sshfl [vmem:[#allocation1 + $0x30] sm:$0xff pattern:$0x75316420]  ;;  %v4750_v57 = vld.sshfl [vmem:[#allocation1 + $0x38] sm:$0xff pattern:$0x75316420]  ;;  %v969_v5 = vpop.permute.xlu2 %968  ;;  %v3508_v24 = vpop.permute.xlu0 %3507 }
 0x12a   : > { %815 = vst [vmem:[#allocation2 + $0x2a0] sm:$0xf] %v795_v40  ;;  %v3510_v19 = vunpack.i.h.bf16 %v3508_v24  ;;  %v3509_v35 = vunpack.i.l.bf16 %v3508_v24  ;;  %v3548_v36 = vpop.permute.xlu1 %3547  ;;  %vm2209_vm5 = vcmask 367616  }
 0x12b   : > { %814 = vst [vmem:[#allocation2 + $0x1a8] sm:$0xf] %v794_v27  ;;  %v3550_v27 = vunpack.i.h.bf16 %v3548_v36 }
 0x12c   : > { %911 = vst [vmem:[#allocation2 + $0x78] sm:$0xf0] %v891_v58  ;;  %v884_v40 = vsel %vm882_vm6, %v3510_v19, %v3504_v32  ;;  %v883_v21 = vsel %vm882_vm6, %v3509_v35, %v3510_v19  ;;  %v3549_v58 = vunpack.i.l.bf16 %v3548_v36  ;;  %vm2298_vm6 = vcmask 359424  }
 0x12d   : > { %v4705_v46 = vld.sshfl [vmem:[#allocation1 + $0x20] sm:$0xff pattern:$0x75316420]  ;;  %v4707_v47 = vld.sshfl [vmem:[#allocation1 + $0x28] sm:$0xff pattern:$0x75316420]  ;;  %v980_v9 = vsel %vm970_vm7, %v3550_v27, %v969_v5 }
 0x12e   : > { %2083 = vst [vmem:[#allocation1 + $0x21] ss:$2 sm:$0xff] %v4674_v33  ;;  %v4723_v26 = vld.sshfl [vmem:[#allocation1 + $0x10] sm:$0xff pattern:$0x75316420] }
 0x12f   : > { %v4727_v28 = vld.sshfl [vmem:[#allocation1 + $0x18] sm:$0xff pattern:$0x75316420]  ;;  %1908 = vst [vmem:[#allocation1 + $0x31] ss:$2 sm:$0xff] %v4725_v1  ;;  %3682 = vrot.lane.b32.xlu0 %v3681_v49, %s4000_s11  ;;  %v978_v49 = vsel %vm970_vm7, %v3445_v45, %v3549_v58 }
 0x130   : > { %1564 = vst [vmem:[#allocation1 + $0x11] ss:$2 sm:$0xff] %v1540_v11  ;;  %v3530_v11 = vunpack.i.h.bf16 %v4765_v52  ;;  %v3706_v54 = vpack.i.bf16 %v4727_v28, %v4723_v26 }
 0x131   : > { %1563 = vst [vmem:[#allocation1 + $0x1] ss:$2 sm:$0xff] %v1539_v43  ;;  %v4813_v32 = vpop.permute.xlu2 %3537  ;;  %v4815_v61 = vpop.permute.xlu0 %3517 }
 0x132   : > { %1173 = vst [vmem:[#allocation2 + $0x2c0] sm:$0xf] %v1153_v14  ;;  %v974_v6 = vsel %vm970_vm7, %v3530_v11, %v3439_v50  ;;  %v973_v17 = vsel %vm970_vm7, %v3529_v42, %v3530_v11  ;;  %v3540_v22 = vunpack.i.h.bf16 %v4813_v32  ;;  %v3539_v56 = vunpack.i.l.bf16 %v4813_v32  ;;  %v4824_v11 = vpop.permute.xlu1 %3552 }
 0x133   : > { %1174 = vst [vmem:[#allocation2 + $0x140] sm:$0xf] %v1154_v23  ;;  %v3519_v14 = vunpack.i.l.bf16 %v4815_v61  ;;  %v979_v23 = vsel %vm970_vm7, %v3549_v58, %v3550_v27  ;;  %v3520_v45 = vunpack.i.h.bf16 %v4815_v61  ;;  %v3555_v36 = vunpack.i.h.bf16 %v4824_v11 }
 0x134   : > { %994 = vst [vmem:[#allocation2 + $0x8] sm:$0xf] %v974_v6  ;;  %v3711_v6 = vpack.i.bf16 %v4767_v59, %v4746_v44  ;;  %v1329_v20 = vsel %vm1324_vm11, %v3539_v56, %v3540_v22  ;;  %v3554_v44 = vunpack.i.l.bf16 %v4824_v11 }
 0x135   : > { %v4714_v63 = vld.sshfl [vmem:[#allocation1 + $0x20] sm:$0xff pattern:$0x75316420]  ;;  %v4716_v10 = vld.sshfl [vmem:[#allocation1 + $0x28] sm:$0xff pattern:$0x75316420]  ;;  %v1242_v35 = vsel %vm1236_vm10, %v3515_v12, %v3519_v14  ;;  %v1243_v59 = vsel %vm1236_vm10, %v3519_v14, %v3520_v45  ;;  %v1063_v12 = vsel %vm1059_vm8, %v3555_v36, %v3464_v37 }
 0x136   : > { %2171 = vst [vmem:[#allocation1 + $0x20] ss:$2 sm:$0xff] %v4674_v33  ;;  %v4792_v13 = vld.sshfl [vmem:[#allocation1 + $0x30] sm:$0xff pattern:$0x75316420]  ;;  %v1062_v27 = vsel %vm1059_vm8, %v3554_v44, %v3555_v36  ;;  %v3721_v39 = vpack.i.bf16 %v4716_v10, %v4714_v63  ;;  %v4869_v63 = vld [vmem:[%s4067_s23] sm:$0xff]  ;;  %v3716_v10 = vpack.i.bf16 %v4707_v47, %v4705_v46 }
 0x137   : > { %v4794_v55 = vld.sshfl [vmem:[#allocation1 + $0x38] sm:$0xff pattern:$0x75316420]  ;;  %993 = vst [vmem:[#allocation2 + $0x3b8] sm:$0xf] %v973_v17  ;;  %v1624_v36 = vunpack.c.l.bf16 %v4869_v63 }
 0x138   : > { %1996 = vst [vmem:[#allocation1 + $0x30] ss:$2 sm:$0xff] %v4725_v1 }
 0x139   : > { %904 = vst [vmem:[#allocation2 + $0x2a0] sm:$0xf0] %v884_v40  ;;  %v3533_v40 = vpop.permute.xlu0 %3532 }
 0x13a   : > { %903 = vst [vmem:[#allocation2 + $0x1a8] sm:$0xf0] %v883_v21  ;;  %v3535_v21 = vunpack.i.h.bf16 %v3533_v40  ;;  %v3573_v58 = vpop.permute.xlu1 %3572 }
 0x13b   : > { %1000 = vst [vmem:[#allocation2 + $0x1f0] sm:$0xf] %v980_v9  ;;  %v3701_v9 = vpack.i.bf16 %v4721_v31, %v4719_v38  ;;  %v3574_v14 = vunpack.i.l.bf16 %v3573_v58  ;;  %v3756_v31 = vpack.i.bf16 %v4695_v60, %v4693_v51 }
 0x13c   : > { %998 = vst [vmem:[#allocation2 + $0x218] sm:$0xf] %v978_v49  ;;  %v3575_v49 = vunpack.i.h.bf16 %v3573_v58  ;;  %v972_v37 = vsel %vm970_vm7, %v3535_v21, %v3529_v42 }
 0x13d   : > { %v4736_v41 = vld.sshfl [vmem:[#allocation1 + $0x20] sm:$0xff pattern:$0x75316420]  ;;  %v4738_v30 = vld.sshfl [vmem:[#allocation1 + $0x28] sm:$0xff pattern:$0x75316420] }
 0x13e   : > { %2260 = vst [vmem:[#allocation1 + $0x21] ss:$2 sm:$0xff] %v4674_v33  ;;  %v1068_v52 = vsel %vm1059_vm8, %v3574_v14, %v3575_v49 }
 0x13f   : > { %v4809_v43 = vld.sshfl [vmem:[#allocation1 + $0x30] sm:$0xff pattern:$0x75316420]  ;;  %v4811_v15 = vld.sshfl [vmem:[#allocation1 + $0x38] sm:$0xff pattern:$0x75316420] }
 0x140   : > { %2085 = vst [vmem:[#allocation1 + $0x31] ss:$2 sm:$0xff] %v4725_v1 }
 0x141   : > { %999 = vst [vmem:[#allocation2 + $0x168] sm:$0xf] %v979_v23 }
 0x142   : > { %1349 = vst [vmem:[#allocation2 + $0x318] sm:$0xf] %v1329_v20 }
 0x143   : > { %1262 = vst [vmem:[#allocation2 + $0x2c0] sm:$0xf0] %v1242_v35  ;;  %v4886_v35 = vpop.permute.xlu1 %3577 }
 0x144   : > { %1263 = vst [vmem:[#allocation2 + $0x140] sm:$0xf0] %v1243_v59  ;;  %v3579_v28 = vunpack.i.l.bf16 %v4886_v35 }
 0x145   : > { %v4771_v48 = vld.sshfl [vmem:[#allocation1 + $0x20] sm:$0xff pattern:$0x75316420]  ;;  %v4773_v3 = vld.sshfl [vmem:[#allocation1 + $0x28] sm:$0xff pattern:$0x75316420] }
 0x146   : > { %2348 = vst [vmem:[#allocation1 + $0x20] ss:$2 sm:$0xff] %v4674_v33 }
 0x147   : > { %v4845_v17 = vld.sshfl [vmem:[#allocation1 + $0x30] sm:$0xff pattern:$0x75316420]  ;;  %1083 = vst [vmem:[#allocation2 + $0x8] sm:$0xf0] %v1063_v12 }
 0x148   : > { %1082 = vst [vmem:[#allocation2 + $0x3b8] sm:$0xf0] %v1062_v27 }
 0x149   : > { %992 = vst [vmem:[#allocation2 + $0x280] sm:$0xf] %v972_v37 }
 0x14a   : > { %1088 = vst [vmem:[#allocation2 + $0x168] sm:$0xf0] %v1068_v52 }
 0x14d   : > { %v2355_v25 = vld.sshfl [vmem:[#allocation1 + $0x20] sm:$0xff pattern:$0x75316420]  ;;  %v2356_v50 = vld.sshfl [vmem:[#allocation1 + $0x28] sm:$0xff pattern:$0x75316420] }
 0x14e   : > { %2437 = vst [vmem:[#allocation1 + $0x21] ss:$2 sm:$0xff] %v4674_v33  ;;  %v3686_v0 = vpack.i.bf16 %v2356_v50, %v2355_v25  ;;  %v4847_v25 = vld.sshfl [vmem:[#allocation1 + $0x38] sm:$0xff pattern:$0x75316420]  ;;  %v1058_v50 = vpop.permute.xlu2 %1057 }
 0x14f   : > { %2173 = vst [vmem:[#allocation1 + $0x30] ss:$2 sm:$0xff] %v4725_v1  ;;  %v1069_v38 = vsel %vm1059_vm8, %v3575_v49, %v1058_v50  ;;  %v4895_v50 = vld.sshfl [vmem:[#allocation1 + $0x8] sm:$0xff pattern:$0x75316420] }
 0x150   : > { %3687 = vrot.lane.b32.xlu0 %v3686_v0, %s4004_s15  ;;  %v3534_v0 = vunpack.i.l.bf16 %v3533_v40  ;;  %1089 = vst [vmem:[#allocation2 + $0x1f0] sm:$0xf0] %v1069_v38  ;;  %v3580_v40 = vunpack.i.h.bf16 %v4886_v35  ;;  %v3598_v38 = vpop.permute.xlu1 %3597 }
 0x151   : > { %v3600_v52 = vunpack.i.h.bf16 %v3598_v38  ;;  %v3599_v29 = vunpack.i.l.bf16 %v3598_v38 }
 0x152   : > { %v971_v23 = vsel %vm970_vm7, %v3534_v0, %v3535_v21  ;;  %v1151_v49 = vsel %vm1147_vm9, %v3580_v40, %v3489_v7  ;;  %vm2121_vm7 = vcmask 375808  }
 0x153   : > { %991 = vst [vmem:[#allocation2 + $0x3c8] sm:$0xf] %v971_v23 }
 0x154   : > { %1171 = vst [vmem:[#allocation2 + $0x258] sm:$0xf] %v1151_v49 }
 0x155   : > { %v2444_v5 = vld.sshfl [vmem:[#allocation1 + $0x20] sm:$0xff pattern:$0x75316420]  ;;  %v2445_v24 = vld.sshfl [vmem:[#allocation1 + $0x28] sm:$0xff pattern:$0x75316420] }
 0x156   : > { %v3691_v19 = vpack.i.bf16 %v2445_v24, %v2444_v5  ;;  %2525 = vst [vmem:[#allocation1 + $0x20] ss:$2 sm:$0xff] %v4674_v33  ;;  %v1067_v33 = vsel %vm1059_vm8, %v3470_v4, %v3574_v14  ;;  %v4879_v42 = vpop.permute.xlu2 %3562  ;;  %v1567_v5 = vld.sshfl [vmem:[#allocation1 + $0x10] sm:$0xff pattern:$0x75316420]  ;;  %v1625_v24 = vunpack.c.h.bf16 %v4869_v63 }
 0x157   : > { %v3564_v20 = vunpack.i.l.bf16 %v4879_v42  ;;  %v4890_v4 = vld.sshfl [vmem:[#allocation1] sm:$0xff pattern:$0x75316420]  ;;  %1087 = vst [vmem:[#allocation2 + $0x218] sm:$0xf0] %v1067_v33  ;;  %v3565_v59 = vunpack.i.h.bf16 %v4879_v42  ;;  %v3726_v33 = vpack.i.bf16 %v4738_v30, %v4736_v41  ;;  %v1155_v41 = vsel %vm1147_vm9, %v3495_v2, %v3599_v29 }
 0x158   : > { %3692 = vrot.lane.b32.xlu1 %v3691_v19, %s4005_s16  ;;  %3712 = vrot.lane.b32.xlu0 %v3711_v6, %s4001_s12  ;;  %v4881_v6 = vpop.permute.xlu0 %3542  ;;  %1638 = vst [vmem:[#allocation1 + $0x10] ss:$2 sm:$0xff] %v1625_v24  ;;  %v3746_v30 = vpack.i.bf16 %v4773_v3, %v4771_v48 }
 0x159   : > { %v3544_v19 = vunpack.i.l.bf16 %v4881_v6  ;;  %v3545_v12 = vunpack.i.h.bf16 %v4881_v6  ;;  %v1418_v26 = vsel %vm1413_vm12, %v3564_v20, %v3565_v59  ;;  %1636 = vst [vmem:[#allocation1] ss:$2 sm:$0xff] %v1624_v36 }
 0x15a   : > { %1438 = vst [vmem:[#allocation2 + $0x318] sm:$0xf0] %v1418_v26 }
 0x15b   : > { %v1330_v58 = vsel %vm1324_vm11, %v3540_v22, %v3544_v19  ;;  %v1150_v22 = vsel %vm1147_vm9, %v3579_v28, %v3580_v40  ;;  %1175 = vst [vmem:[#allocation2 + $0xf8] sm:$0xf] %v1155_v41 }
 0x15c   : > { %1350 = vst [vmem:[#allocation2 + $0x3a0] sm:$0xf] %v1330_v58 }
 0x15d   : > { %v2532_v27 = vld.sshfl [vmem:[#allocation1 + $0x20] sm:$0xff pattern:$0x75316420]  ;;  %v2533_v21 = vld.sshfl [vmem:[#allocation1 + $0x28] sm:$0xff pattern:$0x75316420] }
 0x15e   : > { %v3696_v0 = vpack.i.bf16 %v2533_v21, %v2532_v27  ;;  %1170 = vst [vmem:[#allocation2 + $0x2e8] sm:$0xf] %v1150_v22 }
 0x15f   : > { %v1645_v11 = vld.sshfl [vmem:[#allocation1 + $0x10] sm:$0xff pattern:$0x75316420]  ;;  %v1646_v58 = vld.sshfl [vmem:[#allocation1 + $0x18] sm:$0xff pattern:$0x75316420] }
 0x160   : > { %3702 = vrot.lane.b32.xlu1 %v3701_v9, %s4000_s11  ;;  %3722 = vrot.lane.b32.xlu0 %v3721_v39, %s4006_s20  ;;  %v1331_v9 = vsel %vm1324_vm11, %v3544_v19, %v3545_v12  ;;  %v1146_v39 = vpop.permute.xlu2 %1145  ;;  %v3558_v37 = vpop.permute.xlu0 %3557  ;;  %v1643_v40 = vld.sshfl [vmem:[#allocation1] sm:$0xff pattern:$0x75316420]  ;;  %v1644_v27 = vld.sshfl [vmem:[#allocation1 + $0x8] sm:$0xff pattern:$0x75316420] }
 0x161   : > { %3697 = vrot.lane.b32.xlu2 %v3696_v0, %s4007_s21  ;;  %1351 = vst [vmem:[#allocation2 + $0x80] sm:$0xf] %v1331_v9  ;;  %v3560_v14 = vunpack.i.h.bf16 %v3558_v37  ;;  %v3559_v23 = vunpack.i.l.bf16 %v3558_v37  ;;  %v1157_v21 = vsel %vm1147_vm9, %v3600_v52, %v1146_v39  ;;  %v3741_v26 = vpack.i.bf16 %v1644_v27, %v1643_v40  ;;  %v4947_v37 = vpop.permute.xlu1 %3602 }
 0x162   : > { %1177 = vst [vmem:[#allocation2 + $0x4c0] sm:$0xf] %v1157_v21  ;;  %v3604_v38 = vunpack.i.l.bf16 %v4947_v37  ;;  %v3736_v40 = vpack.i.bf16 %v1646_v58, %v1645_v11 }
 0x163   : > { %v1061_v7 = vsel %vm1059_vm8, %v3560_v14, %v3554_v44  ;;  %v1060_v19 = vsel %vm1059_vm8, %v3559_v23, %v3560_v14  ;;  %v1156_v44 = vsel %vm1147_vm9, %v3599_v29, %v3600_v52  ;;  %v3731_v14 = vpack.i.bf16 %v4895_v50, %v4890_v4 }
 0x164   : > { %1081 = vst [vmem:[#allocation2 + $0x280] sm:$0xf0] %v1061_v7  ;;  %v3605_v23 = vunpack.i.h.bf16 %v4947_v37  ;;  %v3751_v4 = vpack.i.bf16 %v4688_v62, %v4686_v16  ;;  %v4969_v7 = vld.sshfl [vmem:[#allocation1 + $0x30] sm:$0xff pattern:$0x75316420]  ;;  %vm1944_vm8 = vcmask 449536  }
 0x165   : > { %1080 = vst [vmem:[#allocation2 + $0x3c8] sm:$0xf0] %v1060_v19  ;;  %v4975_v19 = vld.sshfl [vmem:[#allocation1 + $0x38] sm:$0xff pattern:$0x75316420] }
 0x166   : > { %1176 = vst [vmem:[#allocation2 + $0x70] sm:$0xf] %v1156_v44  ;;  %v1240_v29 = vsel %vm1236_vm10, %v3605_v23, %v3514_v53 }
 0x167   : > { %1260 = vst [vmem:[#allocation2 + $0x258] sm:$0xf0] %v1240_v29 }
 0x168   : > { %3707 = vrot.lane.b32.xlu1 %v3706_v54, %s4001_s12  ;;  %v1623_v54 = vld [vmem:[%s4067_s23 + $0x10] sm:$0x3f]  ;;  %3742 = vrot.lane.b32.xlu0 %v3741_v26, %s4002_s13  ;;  %v4939_v49 = vpop.permute.xlu2 %3587  ;;  %v4941_v18 = vpop.permute.xlu0 %3567  ;;  %2262 = vst [vmem:[#allocation1 + $0x31] ss:$2 sm:$0xff] %v4725_v1 }
 0x169   : > { %1588 = vrot.lane.b32.xlu2 %v1567_v5, %s4001_s12  ;;  %v1629_v0 = vunpack.c.h.bf16 %v1623_v54  ;;  %v1628_v9 = vunpack.c.l.bf16 %v1623_v54  ;;  %v3590_v2 = vunpack.i.h.bf16 %v4939_v49  ;;  %v3589_v22 = vunpack.i.l.bf16 %v4939_v49  ;;  %v3623_v54 = vpop.permute.xlu1 %3622 }
 0x16a   : > { %v3570_v5 = vunpack.i.h.bf16 %v4941_v18  ;;  %v3569_v39 = vunpack.i.l.bf16 %v4941_v18  ;;  %v3625_v21 = vunpack.i.h.bf16 %v3623_v54  ;;  %v3624_v26 = vunpack.i.l.bf16 %v3623_v54 }
 0x16b   : > { %1652 = vst [vmem:[#allocation1 + $0x10] ss:$2 sm:$0xff] %v1629_v0 }
 0x16c   : > { %v1419_v52 = vsel %vm1413_vm12, %v3565_v59, %v3569_v39  ;;  %1651 = vst [vmem:[#allocation1] ss:$2 sm:$0xff] %v1628_v9  ;;  %v1420_v50 = vsel %vm1413_vm12, %v3569_v39, %v3570_v5  ;;  %v1239_v59 = vsel %vm1236_vm10, %v3604_v38, %v3605_v23  ;;  %v1244_v44 = vsel %vm1236_vm10, %v3520_v45, %v3624_v26 }
 0x16d   : > { %1439 = vst [vmem:[#allocation2 + $0x3a0] sm:$0xf0] %v1419_v52  ;;  %v1245_v35 = vsel %vm1236_vm10, %v3624_v26, %v3625_v21 }
 0x16e   : > { %1440 = vst [vmem:[#allocation2 + $0x80] sm:$0xf0] %v1420_v50 }
 0x16f   : > { %1259 = vst [vmem:[#allocation2 + $0x2e8] sm:$0xf0] %v1239_v59  ;;  %v5012_v61 = vld.sshfl [vmem:[#allocation1 + $0x38] sm:$0xff pattern:$0x75316420] }
 0x170   : > { %3727 = vrot.lane.b32.xlu1 %v3726_v33, %s4008_s22  ;;  %v1506_v33 = vsel %vm1501_vm13, %v3589_v22, %v3590_v2  ;;  %3752 = vrot.lane.b32.xlu0 %v3751_v4, %s4010_s25  ;;  %v1235_v16 = vpop.permute.xlu2 %1234  ;;  %v3583_v62 = vpop.permute.xlu0 %3582  ;;  %1264 = vst [vmem:[#allocation2 + $0xf8] sm:$0xf0] %v1244_v44  ;;  %v3806_v44 = vpack.i.bf16 %v4847_v25, %v4845_v17 }
 0x171   : > { %1526 = vst [vmem:[#allocation2 + $0x200] sm:$0xf] %v1506_v33  ;;  %3717 = vrot.lane.b32.xlu2 %v3716_v10, %s4009_s24  ;;  %v3585_v8 = vunpack.i.h.bf16 %v3583_v62  ;;  %v3584_v53 = vunpack.i.l.bf16 %v3583_v62  ;;  %v1246_v11 = vsel %vm1236_vm10, %v3625_v21, %v1235_v16  ;;  %v5010_v58 = vpop.permute.xlu1 %3627 }
 0x172   : > { %v1655_v27 = vld.sshfl [vmem:[#allocation1 + $0x10] sm:$0xff pattern:$0x75316420]  ;;  %1266 = vst [vmem:[#allocation2 + $0x4c0] sm:$0xf0] %v1246_v11  ;;  %v3630_v29 = vunpack.i.h.bf16 %v5010_v58 }
 0x173   : > { %v4983_v46 = vld.sshfl [vmem:[#allocation1] sm:$0xff pattern:$0x75316420]  ;;  %v4985_v47 = vld.sshfl [vmem:[#allocation1 + $0x8] sm:$0xff pattern:$0x75316420]  ;;  %v1149_v10 = vsel %vm1147_vm9, %v3585_v8, %v3579_v28  ;;  %v1148_v41 = vsel %vm1147_vm9, %v3584_v53, %v3585_v8  ;;  %v3629_v8 = vunpack.i.l.bf16 %v5010_v58  ;;  %v3821_v58 = vpack.i.bf16 %v4975_v19, %v4969_v7 }
 0x174   : > { %1727 = vst [vmem:[#allocation1 + $0x11] ss:$2 sm:$0xff] %v1625_v24  ;;  %v1711_v24 = vld [vmem:[%s4067_s23 + $0x10] sm:$0x3f]  ;;  %v1798_v53 = vld [vmem:[%s4067_s23 + $0x2] sm:$0xff]  ;;  %v1328_v60 = vsel %vm1324_vm11, %v3630_v29, %v3539_v56  ;;  %v3766_v48 = vpack.i.bf16 %v4985_v47, %v4983_v46  ;;  %vm1855_vm9 = vcmask 457728  }
 0x175   : > { %1725 = vst [vmem:[#allocation1 + $0x1] ss:$2 sm:$0xff] %v1624_v36  ;;  %v5007_v36 = vld.sshfl [vmem:[#allocation1 + $0x30] sm:$0xff pattern:$0x75316420]  ;;  %v1717_v45 = vunpack.c.h.bf16 %v1711_v24  ;;  %v1716_v23 = vunpack.c.l.bf16 %v1711_v24  ;;  %v5050_v3 = vunpack.c.h.bf16 %v1798_v53  ;;  %v5055_v56 = vunpack.c.l.bf16 %v1798_v53 }
 0x176   : > { %1169 = vst [vmem:[#allocation2 + $0x1f8] sm:$0xf] %v1149_v10 }
 0x177   : > { %1168 = vst [vmem:[#allocation2 + $0x10] sm:$0xf] %v1148_v41 }
 0x178   : > { %3732 = vrot.lane.b32.xlu1 %v3731_v14, %s4001_s12  ;;  %v5003_v28 = vpop.permute.xlu2 %3612  ;;  %v5005_v63 = vpop.permute.xlu0 %3592  ;;  %1265 = vst [vmem:[#allocation2 + $0x70] sm:$0xf0] %v1245_v35 }
 0x179   : > { %1676 = vrot.lane.b32.xlu2 %v1655_v27, %s4002_s13  ;;  %v3614_v0 = vunpack.i.l.bf16 %v5003_v28  ;;  %v3594_v9 = vunpack.i.l.bf16 %v5005_v63  ;;  %v3615_v33 = vunpack.i.h.bf16 %v5003_v28  ;;  %v3595_v52 = vunpack.i.h.bf16 %v5005_v63  ;;  %2350 = vst [vmem:[#allocation1 + $0x30] ss:$2 sm:$0xff] %v4725_v1  ;;  %v3648_v54 = vpop.permute.xlu1 %3647 }
 0x17a   : > { %1348 = vst [vmem:[#allocation2 + $0x1e0] sm:$0xf] %v1328_v60  ;;  %v3650_v26 = vunpack.i.h.bf16 %v3648_v54  ;;  %v3649_v46 = vunpack.i.l.bf16 %v3648_v54  ;;  %v1800_v54 = vld [vmem:[%s4067_s23 + $0x12] sm:$0x3f] }
 0x17b   : > { %v5015_v39 = vld.sshfl [vmem:[#allocation1 + $0x10] sm:$0xff pattern:$0x75316420]  ;;  %v5017_v14 = vld.sshfl [vmem:[#allocation1 + $0x18] sm:$0xff pattern:$0x75316420]  ;;  %v1595_v16 = vsel %vm1590_vm14, %v3614_v0, %v3615_v33  ;;  %v1507_v62 = vsel %vm1501_vm13, %v3590_v2, %v3594_v9  ;;  %v1508_v51 = vsel %vm1501_vm13, %v3594_v9, %v3595_v52 }
 0x17c   : > { %v1732_v4 = vld.sshfl [vmem:[#allocation1] sm:$0xff pattern:$0x75316420]  ;;  %v1733_v50 = vld.sshfl [vmem:[#allocation1 + $0x8] sm:$0xff pattern:$0x75316420]  ;;  %v1332_v37 = vsel %vm1324_vm11, %v3545_v12, %v3649_v46 }
 0x17d   : > { %v3776_v59 = vpack.i.bf16 %v1733_v50, %v1732_v4  ;;  %1741 = vst [vmem:[#allocation1 + $0x11] ss:$2 sm:$0xff] %v1717_v45  ;;  %v3771_v4 = vpack.i.bf16 %v5017_v14, %v5015_v39  ;;  %v1333_v39 = vsel %vm1324_vm11, %v3649_v46, %v3650_v26 }
 0x17e   : > { %1740 = vst [vmem:[#allocation1 + $0x1] ss:$2 sm:$0xff] %v1716_v23 }
 0x17f   : > { %3777 = vrot.lane.b32.xlu0 %v3776_v59, %s4003_s14  ;;  %1615 = vst [vmem:[#allocation2 + $0x200] sm:$0xf0] %v1595_v16 }
 0x180   : > { %3737 = vrot.lane.b32.xlu1 %v3736_v40, %s4002_s13  ;;  %v3608_v2 = vpop.permute.xlu0 %3607  ;;  %1527 = vst [vmem:[#allocation2 + $0x50] sm:$0xf] %v1507_v62  ;;  %v2357_v32 = vld.sshfl [vmem:[#allocation1 + $0x30] sm:$0xff pattern:$0x75316420] }
 0x181   : > { %3747 = vrot.lane.b32.xlu2 %v3746_v30, %s4012_s27  ;;  %1528 = vst [vmem:[#allocation2 + $0x1b0] sm:$0xf] %v1508_v51  ;;  %v1327_v30 = vsel %vm1324_vm11, %v3629_v8, %v3630_v29  ;;  %v3610_v40 = vunpack.i.h.bf16 %v3608_v2  ;;  %v3609_v27 = vunpack.i.l.bf16 %v3608_v2  ;;  %v2358_v21 = vld.sshfl [vmem:[#allocation1 + $0x38] sm:$0xff pattern:$0x75316420]  ;;  %v3801_v29 = vpack.i.bf16 %v4811_v15, %v4809_v43 }
 0x182   : > { %v3761_v10 = vpack.i.bf16 %v2358_v21, %v2357_v32  ;;  %1347 = vst [vmem:[#allocation2 + $0x250] sm:$0xf] %v1327_v30  ;;  %v3826_v21 = vpack.i.bf16 %v5012_v61, %v5007_v36 }
 0x183   : > { %v1238_v11 = vsel %vm1236_vm10, %v3610_v40, %v3604_v38  ;;  %2439 = vst [vmem:[#allocation1 + $0x31] ss:$2 sm:$0xff] %v4725_v1  ;;  %v1237_v24 = vsel %vm1236_vm10, %v3609_v27, %v3610_v40  ;;  %v5078_v38 = vpop.permute.xlu1 %3652 }
 0x184   : > { %v5057_v41 = vld.sshfl [vmem:[#allocation1 + $0x10] sm:$0xff pattern:$0x75316420]  ;;  %1258 = vst [vmem:[#allocation2 + $0x1f8] sm:$0xf0] %v1238_v11  ;;  %v3655_v14 = vunpack.i.h.bf16 %v5078_v38  ;;  %v3654_v60 = vunpack.i.l.bf16 %v5078_v38 }
 0x185   : > { %1815 = vst [vmem:[#allocation1 + $0x10] ss:$2 sm:$0xff] %v5050_v3  ;;  %v1742_v47 = vld.sshfl [vmem:[#allocation1] sm:$0xff pattern:$0x75316420] }
 0x186   : > { %v1743_v35 = vld.sshfl [vmem:[#allocation1 + $0x8] sm:$0xff pattern:$0x75316420]  ;;  %1257 = vst [vmem:[#allocation2 + $0x10] sm:$0xf0] %v1237_v24 }
 0x187   : > { %1813 = vst [vmem:[#allocation1] ss:$2 sm:$0xff] %v5055_v56 }
 0x188   : > { %3757 = vrot.lane.b32.xlu1 %v3756_v31, %s4011_s26  ;;  %v1323_v31 = vpop.permute.xlu2 %1322  ;;  %v5073_v23 = vpop.permute.xlu0 %3617  ;;  %1352 = vst [vmem:[#allocation2 + $0x400] sm:$0xf] %v1332_v37 }
 0x189   : > { %3762 = vrot.lane.b32.xlu2 %v3761_v10, %s4004_s15  ;;  %v1334_v45 = vsel %vm1324_vm11, %v3650_v26, %v1323_v31  ;;  %v3619_v59 = vunpack.i.l.bf16 %v5073_v23  ;;  %v3620_v12 = vunpack.i.h.bf16 %v5073_v23  ;;  %1353 = vst [vmem:[#allocation2 + $0x228] sm:$0xf] %v1333_v39  ;;  %v1806_v26 = vunpack.c.h.bf16 %v1800_v54 }
 0x18a   : > { %1354 = vst [vmem:[#allocation2 + $0x348] sm:$0xf] %v1334_v45  ;;  %v2446_v43 = vld.sshfl [vmem:[#allocation1 + $0x30] sm:$0xff pattern:$0x75316420] }
 0x18b   : > { %v2447_v15 = vld.sshfl [vmem:[#allocation1 + $0x38] sm:$0xff pattern:$0x75316420]  ;;  %v1596_v31 = vsel %vm1590_vm14, %v3615_v33, %v3619_v59  ;;  %v1597_v2 = vsel %vm1590_vm14, %v3619_v59, %v3620_v12  ;;  %v1416_v33 = vsel %vm1413_vm12, %v3654_v60, %v3655_v14  ;;  %v3673_v32 = vpop.permute.xlu1 %3672 }
 0x18c   : > { %v1822_v16 = vld.sshfl [vmem:[#allocation1 + $0x10] sm:$0xff pattern:$0x75316420]  ;;  %v1823_v62 = vld.sshfl [vmem:[#allocation1 + $0x18] sm:$0xff pattern:$0x75316420]  ;;  %v3791_v46 = vpack.i.bf16 %v2447_v15, %v2446_v43  ;;  %v3675_v11 = vunpack.i.h.bf16 %v3673_v32 }
 0x18d   : > { %v3786_v53 = vpack.i.bf16 %v1823_v62, %v1822_v16  ;;  %2527 = vst [vmem:[#allocation1 + $0x30] ss:$2 sm:$0xff] %v4725_v1  ;;  %v3781_v1 = vpack.i.bf16 %v1743_v35, %v1742_v47  ;;  %v3674_v47 = vunpack.i.l.bf16 %v3673_v32  ;;  %v1977_v32 = vld [vmem:[%s4067_s23 + $0x12] sm:$0x3f] }
 0x18e   : > { %1616 = vst [vmem:[#allocation2 + $0x50] sm:$0xf0] %v1596_v31  ;;  %v1820_v42 = vld.sshfl [vmem:[#allocation1] sm:$0xff pattern:$0x75316420] }
 0x18f   : > { %3787 = vrot.lane.b32.xlu0 %v3786_v53, %s4010_s25  ;;  %1617 = vst [vmem:[#allocation2 + $0x1b0] sm:$0xf0] %v1597_v2  ;;  %v1821_v24 = vld.sshfl [vmem:[#allocation1 + $0x8] sm:$0xff pattern:$0x75316420] }
 0x190   : > { %3767 = vrot.lane.b32.xlu1 %v3766_v48, %s4002_s13  ;;  %v5071_v9 = vpop.permute.xlu2 %3637  ;;  %v1417_v48 = vsel %vm1413_vm12, %v3655_v14, %v3564_v20  ;;  %v3633_v40 = vpop.permute.xlu0 %3632  ;;  %v1805_v20 = vunpack.c.l.bf16 %v1800_v54  ;;  %1436 = vst [vmem:[#allocation2 + $0x250] sm:$0xf0] %v1416_v33  ;;  %v1888_v53 = vld [vmem:[%s4067_s23 + $0x12] sm:$0x3f] }
 0x191   : > { %v3639_v50 = vunpack.i.l.bf16 %v5071_v9  ;;  %v3640_v6 = vunpack.i.h.bf16 %v5071_v9  ;;  %3802 = vrot.lane.b32.xlu2 %v3801_v29, %s4009_s24  ;;  %v3635_v27 = vunpack.i.h.bf16 %v3633_v40  ;;  %v3634_v10 = vunpack.i.l.bf16 %v3633_v40  ;;  %1437 = vst [vmem:[#allocation2 + $0x1e0] sm:$0xf0] %v1417_v48 }
 0x192   : > { %1829 = vst [vmem:[#allocation1 + $0x10] ss:$2 sm:$0xff] %v1806_v26  ;;  %v1422_v29 = vsel %vm1413_vm12, %v3674_v47, %v3675_v11  ;;  %v1894_v25 = vunpack.c.h.bf16 %v1888_v53 }
 0x193   : > { %v1683_v51 = vsel %vm1678_vm15, %v3639_v50, %v3640_v6  ;;  %v1326_v45 = vsel %vm1324_vm11, %v3635_v27, %v3629_v8  ;;  %v1325_v36 = vsel %vm1324_vm11, %v3634_v10, %v3635_v27  ;;  %1828 = vst [vmem:[#allocation1] ss:$2 sm:$0xff] %v1805_v20  ;;  %v5137_v7 = vpop.permute.xlu1 %3677  ;;  %v1983_v10 = vunpack.c.h.bf16 %v1977_v32 }
 0x194   : > { %1703 = vst [vmem:[#allocation2 + $0x88] sm:$0xf] %v1683_v51  ;;  %v2534_v35 = vld.sshfl [vmem:[#allocation1 + $0x30] sm:$0xff pattern:$0x75316420]  ;;  %v3680_v19 = vunpack.i.h.bf16 %v5137_v7  ;;  %v3679_v15 = vunpack.i.l.bf16 %v5137_v7 }
 0x195   : > { %v2535_v37 = vld.sshfl [vmem:[#allocation1 + $0x38] sm:$0xff pattern:$0x75316420]  ;;  %1346 = vst [vmem:[#allocation2 + $0x350] sm:$0xf] %v1326_v45 }
 0x196   : > { %v3796_v8 = vpack.i.bf16 %v2535_v37, %v2534_v35  ;;  %1345 = vst [vmem:[#allocation2 + $0x40] sm:$0xf] %v1325_v36  ;;  %v1505_v48 = vsel %vm1501_vm13, %v3680_v19, %v3589_v22  ;;  %v1504_v17 = vsel %vm1501_vm13, %v3679_v15, %v3680_v19 }
 0x197   : > { %3792 = vrot.lane.b32.xlu0 %v3791_v46, %s4005_s16  ;;  %1442 = vst [vmem:[#allocation2 + $0x228] sm:$0xf0] %v1422_v29  ;;  %v1982_v46 = vunpack.c.l.bf16 %v1977_v32  ;;  %v2065_v29 = vld [vmem:[%s4067_s23 + $0x12] sm:$0x3f] }
 0x198   : > { %3772 = vrot.lane.b32.xlu1 %v3771_v4, %s4003_s14  ;;  %v1412_v30 = vpop.permute.xlu2 %1411  ;;  %v1421_v4 = vsel %vm1413_vm12, %v3570_v5, %v3674_v47  ;;  %v5131_v16 = vpop.permute.xlu0 %3642  ;;  %1525 = vst [vmem:[#allocation2 + $0x1d8] sm:$0xf] %v1505_v48 }
 0x199   : > { %3827 = vrot.lane.b32.xlu2 %v3826_v21, %s4012_s27  ;;  %v1423_v61 = vsel %vm1413_vm12, %v3675_v11, %v1412_v30  ;;  %1441 = vst [vmem:[#allocation2 + $0x400] sm:$0xf0] %v1421_v4  ;;  %v3645_v5 = vunpack.i.h.bf16 %v5131_v16  ;;  %v3644_v39 = vunpack.i.l.bf16 %v5131_v16  ;;  %v5141_v14 = vld.sshfl [vmem:[#allocation1 + $0x10] sm:$0xff pattern:$0x75316420]  ;;  %v3811_v30 = vpack.i.bf16 %v1821_v24, %v1820_v42 }
 0x19a   : > { %1443 = vst [vmem:[#allocation2 + $0x348] sm:$0xf0] %v1423_v61  ;;  %v5151_v51 = vld.sshfl [vmem:[#allocation1] sm:$0xff pattern:$0x75316420] }
 0x19b   : > { %1904 = vst [vmem:[#allocation1 + $0x11] ss:$2 sm:$0xff] %v5050_v3  ;;  %v1684_v31 = vsel %vm1678_vm15, %v3640_v6, %v3644_v39  ;;  %v5160_v2 = vld.sshfl [vmem:[#allocation1 + $0x8] sm:$0xff pattern:$0x75316420]  ;;  %v1685_v54 = vsel %vm1678_vm15, %v3644_v39, %v3645_v5 }
 0x19c   : > { %1902 = vst [vmem:[#allocation1 + $0x1] ss:$2 sm:$0xff] %v5055_v56 }
 0x19d   : > { %1704 = vst [vmem:[#allocation2 + $0x448] sm:$0xf] %v1684_v31 }
 0x19e   : > { %1705 = vst [vmem:[#allocation2] sm:$0xf] %v1685_v54 }
 0x19f   : > { %3807 = vrot.lane.b32.xlu0 %v3806_v44, %s4006_s20  ;;  %v1893_v44 = vunpack.c.l.bf16 %v1888_v53  ;;  %1524 = vst [vmem:[#allocation2 + $0x4b0] sm:$0xf] %v1504_v17 }
 0x1a0   : > { %3782 = vrot.lane.b32.xlu1 %v3781_v1, %s4003_s14  ;;  %v5129_v59 = vpop.permute.xlu2 %3662  ;;  %v3658_v37 = vpop.permute.xlu0 %3657 }
 0x1a1   : > { %v3665_v62 = vunpack.i.h.bf16 %v5129_v59  ;;  %v3664_v18 = vunpack.i.l.bf16 %v5129_v59  ;;  %v3660_v36 = vunpack.i.h.bf16 %v3658_v37  ;;  %v3659_v61 = vunpack.i.l.bf16 %v3658_v37 }
 0x1a2   : > { %v1911_v6 = vld.sshfl [vmem:[#allocation1 + $0x10] sm:$0xff pattern:$0x75316420]  ;;  %v1912_v40 = vld.sshfl [vmem:[#allocation1 + $0x18] sm:$0xff pattern:$0x75316420] }
 0x1a3   : > { %v1772_v43 = vsel %vm1767_vm0, %v3664_v18, %v3665_v62  ;;  %1918 = vst [vmem:[#allocation1 + $0x11] ss:$2 sm:$0xff] %v1894_v25  ;;  %v1909_v49 = vld.sshfl [vmem:[#allocation1] sm:$0xff pattern:$0x75316420]  ;;  %v3816_v33 = vpack.i.bf16 %v1912_v40, %v1911_v6  ;;  %v1415_v4 = vsel %vm1413_vm12, %v3660_v36, %v3654_v60  ;;  %v2070_v40 = vunpack.c.l.bf16 %v2065_v29 }
 0x1a4   : > { %1792 = vst [vmem:[#allocation2 + $0x88] sm:$0xf0] %v1772_v43  ;;  %v1910_v1 = vld.sshfl [vmem:[#allocation1 + $0x8] sm:$0xff pattern:$0x75316420] }
 0x1a5   : > { %v3831_v22 = vpack.i.bf16 %v1910_v1, %v1909_v49  ;;  %1917 = vst [vmem:[#allocation1 + $0x1] ss:$2 sm:$0xff] %v1893_v44 }
 0x1a6   : > { %1435 = vst [vmem:[#allocation2 + $0x350] sm:$0xf0] %v1415_v4 }
 0x1a7   : > { %3832 = vrot.lane.b32.xlu2 %v3831_v22, %s4011_s26 }
 0x1a8   : > { %3797 = vrot.lane.b32.xlu1 %v3796_v8, %s4007_s21  ;;  %v1500_v45 = vpop.permute.xlu2 %1499  ;;  %v5206_v31 = vpop.permute.xlu0 %3667 }
 0x1a9   : > { %v3669_v25 = vunpack.i.l.bf16 %v5206_v31  ;;  %v5883_v6 = vunpack.i.h.bf16 %v5206_v31 }
 0x1aa   : > { %v5175_v27 = vld.sshfl [vmem:[#allocation1 + $0x10] sm:$0xff pattern:$0x75316420] }
 0x1ab   : > { %1992 = vst [vmem:[#allocation1 + $0x10] ss:$2 sm:$0xff] %v5050_v3 }
 0x1ac   : > { %v5179_v21 = vld.sshfl [vmem:[#allocation1] sm:$0xff pattern:$0x75316420]  ;;  %v5181_v26 = vld.sshfl [vmem:[#allocation1 + $0x8] sm:$0xff pattern:$0x75316420] }
 0x1ad   : > { %1990 = vst [vmem:[#allocation1] ss:$2 sm:$0xff] %v5055_v56 }
 0x1b0   : > { %3812 = vrot.lane.b32.xlu1 %v3811_v30, %s4010_s25  ;;  %v2071_v30 = vunpack.c.h.bf16 %v2065_v29  ;;  %v2154_v29 = vld [vmem:[%s4067_s23 + $0x12] sm:$0x3f] }
 0x1b2   : > { %v1999_v42 = vld.sshfl [vmem:[#allocation1 + $0x10] sm:$0xff pattern:$0x75316420]  ;;  %v2000_v20 = vld.sshfl [vmem:[#allocation1 + $0x18] sm:$0xff pattern:$0x75316420] }
 0x1b3   : > { %v3836_v11 = vpack.i.bf16 %v2000_v20, %v1999_v42  ;;  %2006 = vst [vmem:[#allocation1 + $0x10] ss:$2 sm:$0xff] %v1983_v10 }
 0x1b4   : > { %v1997_v24 = vld.sshfl [vmem:[#allocation1] sm:$0xff pattern:$0x75316420]  ;;  %v1998_v47 = vld.sshfl [vmem:[#allocation1 + $0x8] sm:$0xff pattern:$0x75316420] }
 0x1b5   : > { %3837 = vrot.lane.b32.xlu0 %v3836_v11, %s4009_s24  ;;  %v3841_v35 = vpack.i.bf16 %v1998_v47, %v1997_v24  ;;  %2005 = vst [vmem:[#allocation1] ss:$2 sm:$0xff] %v1982_v46  ;;  %v1774_v46 = vsel %vm1767_vm0, %v3669_v25, %v5883_v6 }
 0x1b6   : > { %1794 = vst [vmem:[#allocation2] sm:$0xf0] %v1774_v46  ;;  %v2159_v46 = vunpack.c.l.bf16 %v2154_v29 }
 0x1b7   : > { %3842 = vrot.lane.b32.xlu2 %v3841_v35, %s4009_s24  ;;  %v3683_v35 = vpop.permute.xlu0 %3682 }
 0x1b8   : > { %3817 = vrot.lane.b32.xlu1 %v3816_v33, %s4011_s26  ;;  %v1773_v33 = vsel %vm1767_vm0, %v3665_v62, %v3669_v25  ;;  %v3684_v4 = vunpack.i.l.bf16 %v3683_v35 }
 0x1b9   : > { %1793 = vst [vmem:[#allocation2 + $0x448] sm:$0xf0] %v1773_v33 }
 0x1ba   : > { %v5191_v8 = vld.sshfl [vmem:[#allocation1 + $0x10] sm:$0xff pattern:$0x75316420] }
 0x1bb   : > { %2081 = vst [vmem:[#allocation1 + $0x11] ss:$2 sm:$0xff] %v5050_v3  ;;  %v5204_v43 = vpop.permute.xlu2 %3697 }
 0x1bc   : > { %v5197_v19 = vld.sshfl [vmem:[#allocation1] sm:$0xff pattern:$0x75316420]  ;;  %v5199_v53 = vld.sshfl [vmem:[#allocation1 + $0x8] sm:$0xff pattern:$0x75316420]  ;;  %v5876_v54 = vunpack.i.h.bf16 %v5204_v43  ;;  %v5866_v48 = vunpack.i.l.bf16 %v5204_v43 }
 0x1bd   : > { %2079 = vst [vmem:[#allocation1 + $0x1] ss:$2 sm:$0xff] %v5055_v56 }
 0x1be   : > { %v2568_v44 = vsel %vm2563_vm2, %v5866_v48, %v5876_v54 }
 0x1bf   : > { %2588 = vst [vmem:[#allocation2 + $0x248] sm:$0xf] %v2568_v44 }
 0x1c0   : > { %3822 = vrot.lane.b32.xlu1 %v3821_v58, %s4008_s22  ;;  %v1414_v58 = vsel %vm1413_vm12, %v3659_v61, %v3660_v36  ;;  %v3685_v61 = vunpack.i.h.bf16 %v3683_v35 }
 0x1c1   : > { %1434 = vst [vmem:[#allocation2 + $0x40] sm:$0xf0] %v1414_v58 }
 0x1c2   : > { %v2088_v49 = vld.sshfl [vmem:[#allocation1 + $0x10] sm:$0xff pattern:$0x75316420]  ;;  %v2089_v1 = vld.sshfl [vmem:[#allocation1 + $0x18] sm:$0xff pattern:$0x75316420] }
 0x1c3   : > { %v3846_v22 = vpack.i.bf16 %v2089_v1, %v2088_v49  ;;  %2095 = vst [vmem:[#allocation1 + $0x11] ss:$2 sm:$0xff] %v2071_v30  ;;  %v5229_v47 = vpop.permute.xlu2 %1588  ;;  %v5252_v49 = vpop.permute.xlu0 %3687  ;;  %v2160_v1 = vunpack.c.h.bf16 %v2154_v29 }
 0x1c4   : > { %v2086_v32 = vld.sshfl [vmem:[#allocation1] sm:$0xff pattern:$0x75316420]  ;;  %v2087_v10 = vld.sshfl [vmem:[#allocation1 + $0x8] sm:$0xff pattern:$0x75316420] }
 0x1c5   : > { %v3851_v20 = vpack.i.bf16 %v2087_v10, %v2086_v32  ;;  %2094 = vst [vmem:[#allocation1 + $0x1] ss:$2 sm:$0xff] %v2070_v40  ;;  %v3690_v32 = vunpack.i.h.bf16 %v5252_v49  ;;  %v5869_v10 = vunpack.i.l.bf16 %v5252_v49 }
 0x1c7   : > { %3852 = vrot.lane.b32.xlu0 %v3851_v20, %s4006_s20  ;;  %v2391_v35 = vsel %vm2386_vm4, %v5869_v10, %v3690_v32 }
 0x1c8   : > { %3847 = vrot.lane.b32.xlu1 %v3846_v22, %s4006_s20  ;;  %2411 = vst [vmem:[#allocation2 + $0x4b8] sm:$0xf] %v2391_v35 }
 0x1ca   : > { %v5195_v39 = vpop.permute.xlu1 %3692  ;;  %v5237_v58 = vld.sshfl [vmem:[#allocation1 + $0x10] sm:$0xff pattern:$0x75316420] }
 0x1cb   : > { %v5881_v38 = vunpack.i.h.bf16 %v5195_v39  ;;  %v5867_v60 = vunpack.i.l.bf16 %v5195_v39  ;;  %2169 = vst [vmem:[#allocation1 + $0x10] ss:$2 sm:$0xff] %v5050_v3  ;;  %v5250_v40 = vpop.permute.xlu2 %3717 }
 0x1cc   : > { %v5244_v30 = vld.sshfl [vmem:[#allocation1] sm:$0xff pattern:$0x75316420]  ;;  %v5246_v63 = vld.sshfl [vmem:[#allocation1 + $0x8] sm:$0xff pattern:$0x75316420]  ;;  %v3720_v22 = vunpack.i.h.bf16 %v5250_v40  ;;  %v5873_v33 = vunpack.i.l.bf16 %v5250_v40 }
 0x1cd   : > { %v2480_v17 = vsel %vm2475_vm1, %v5867_v60, %v5881_v38  ;;  %2167 = vst [vmem:[#allocation1] ss:$2 sm:$0xff] %v5055_v56 }
 0x1ce   : > { %2500 = vst [vmem:[#allocation2 + $0x4b8] sm:$0xf0] %v2480_v17 }
 0x1d2   : > { %v3703_v42 = vpop.permute.xlu1 %3702  ;;  %v2177_v20 = vld.sshfl [vmem:[#allocation1 + $0x18] sm:$0xff pattern:$0x75316420] }
 0x1d3   : > { %v3705_v11 = vunpack.i.h.bf16 %v3703_v42  ;;  %v3704_v24 = vunpack.i.l.bf16 %v3703_v42  ;;  %v2176_v42 = vld.sshfl [vmem:[#allocation1 + $0x10] sm:$0xff pattern:$0x75316420] }
 0x1d4   : > { %v3856_v28 = vpack.i.bf16 %v2177_v20, %v2176_v42  ;;  %2183 = vst [vmem:[#allocation1 + $0x10] ss:$2 sm:$0xff] %v2160_v1 }
 0x1d5   : > { %v1511_v62 = vsel %vm1501_vm13, %v3705_v11, %v1500_v45  ;;  %v1509_v37 = vsel %vm1501_vm13, %v3595_v52, %v3704_v24  ;;  %v1510_v36 = vsel %vm1501_vm13, %v3704_v24, %v3705_v11  ;;  %v1503_v45 = vsel %vm1501_vm13, %v3685_v61, %v3679_v15  ;;  %v2174_v11 = vld.sshfl [vmem:[#allocation1] sm:$0xff pattern:$0x75316420]  ;;  %v2175_v24 = vld.sshfl [vmem:[#allocation1 + $0x8] sm:$0xff pattern:$0x75316420] }
 0x1d6   : > { %1531 = vst [vmem:[#allocation2 + $0x190] sm:$0xf] %v1511_v62  ;;  %v1502_v52 = vsel %vm1501_vm13, %v3684_v4, %v3685_v61  ;;  %3857 = vrot.lane.b32.xlu2 %v3856_v28, %s4008_s22  ;;  %v5277_v61 = vpop.permute.xlu2 %1676  ;;  %v3713_v4 = vpop.permute.xlu0 %3712  ;;  %v3861_v29 = vpack.i.bf16 %v2175_v24, %v2174_v11 }
 0x1d7   : > { %1529 = vst [vmem:[#allocation2 + $0x150] sm:$0xf] %v1509_v37 }
 0x1d8   : > { %1530 = vst [vmem:[#allocation2 + $0x4e8] sm:$0xf] %v1510_v36  ;;  %3862 = vrot.lane.b32.xlu1 %v3861_v29, %s4008_s22 }
 0x1d9   : > { %1523 = vst [vmem:[#allocation2 + $0x460] sm:$0xf] %v1503_v45  ;;  %v3715_v45 = vunpack.i.h.bf16 %v3713_v4 }
 0x1da   : > { %v3708_v17 = vpop.permute.xlu1 %3707  ;;  %1522 = vst [vmem:[#allocation2 + $0x288] sm:$0xf] %v1502_v52  ;;  %v3714_v52 = vunpack.i.l.bf16 %v3713_v4 }
 0x1db   : > { %v3710_v25 = vunpack.i.h.bf16 %v3708_v17  ;;  %v3709_v44 = vunpack.i.l.bf16 %v3708_v17  ;;  %2182 = vst [vmem:[#allocation1] ss:$2 sm:$0xff] %v2159_v46 }
 0x1dc   : > { %v1591_v1 = vsel %vm1590_vm14, %v3714_v52, %v3715_v45 }
 0x1dd   : > { %v1594_v7 = vsel %vm1590_vm14, %v3710_v25, %v3614_v0  ;;  %v1593_v15 = vsel %vm1590_vm14, %v3709_v44, %v3710_v25  ;;  %v2037_v0 = vsel %vm2032_vm3, %v5873_v33, %v3720_v22  ;;  %v1592_v25 = vsel %vm1590_vm14, %v3715_v45, %v3709_v44  ;;  %1611 = vst [vmem:[#allocation2 + $0x288] sm:$0xf0] %v1591_v1 }
 0x1de   : > { %1614 = vst [vmem:[#allocation2 + $0x1d8] sm:$0xf0] %v1594_v7  ;;  %v5287_v7 = vld.sshfl [vmem:[#allocation1 + $0x10] sm:$0xff pattern:$0x75316420]  ;;  %v5296_v11 = vpop.permute.xlu2 %3747  ;;  %v5298_v44 = vpop.permute.xlu0 %3722 }
 0x1df   : > { %1613 = vst [vmem:[#allocation2 + $0x4b0] sm:$0xf0] %v1593_v15  ;;  %v2242_v15 = vld [vmem:[%s4067_s23 + $0x12] sm:$0x3f]  ;;  %v3750_v45 = vunpack.i.h.bf16 %v5296_v11  ;;  %v5868_v52 = vunpack.i.l.bf16 %v5296_v11 }
 0x1e0   : > { %2057 = vst [vmem:[#allocation2 + $0x3d8] sm:$0xf] %v2037_v0  ;;  %v2248_v24 = vunpack.c.h.bf16 %v2242_v15  ;;  %v2247_v29 = vunpack.c.l.bf16 %v2242_v15 }
 0x1e1   : > { %1612 = vst [vmem:[#allocation2 + $0x460] sm:$0xf0] %v1592_v25  ;;  %v5871_v25 = vunpack.i.l.bf16 %v5298_v44 }
 0x1e2   : > { %v5272_v62 = vpop.permute.xlu1 %3727  ;;  %2258 = vst [vmem:[#allocation1 + $0x11] ss:$2 sm:$0xff] %v5050_v3  ;;  %v5291_v46 = vld.sshfl [vmem:[#allocation1] sm:$0xff pattern:$0x75316420] }
 0x1e3   : > { %v5874_v37 = vunpack.i.h.bf16 %v5272_v62  ;;  %v5872_v36 = vunpack.i.l.bf16 %v5272_v62  ;;  %v5293_v42 = vld.sshfl [vmem:[#allocation1 + $0x8] sm:$0xff pattern:$0x75316420] }
 0x1e4   : > { %2256 = vst [vmem:[#allocation1 + $0x1] ss:$2 sm:$0xff] %v5055_v56 }
 0x1e5   : > { %v2214_v17 = vsel %vm2209_vm5, %v5872_v36, %v5874_v37 }
 0x1e6   : > { %2234 = vst [vmem:[#allocation2 + $0x118] sm:$0xf] %v2214_v17  ;;  %v5875_v17 = vunpack.i.h.bf16 %v5298_v44 }
 0x1e9   : > { %v2265_v1 = vld.sshfl [vmem:[#allocation1 + $0x10] sm:$0xff pattern:$0x75316420] }
 0x1ea   : > { %v3733_v20 = vpop.permute.xlu1 %3732 }
 0x1eb   : > { %v3735_v28 = vunpack.i.h.bf16 %v3733_v20  ;;  %v3734_v0 = vunpack.i.l.bf16 %v3733_v20  ;;  %v2266_v20 = vld.sshfl [vmem:[#allocation1 + $0x18] sm:$0xff pattern:$0x75316420]  ;;  %v2264_v15 = vld.sshfl [vmem:[#allocation1 + $0x8] sm:$0xff pattern:$0x75316420] }
 0x1ec   : > { %2272 = vst [vmem:[#allocation1 + $0x11] ss:$2 sm:$0xff] %v2248_v24  ;;  %v2126_v24 = vsel %vm2121_vm7, %v5871_v25, %v5875_v17 }
 0x1ed   : > { %v1600_v35 = vsel %vm1590_vm14, %v3735_v28, %v5229_v47  ;;  %v1598_v4 = vsel %vm1590_vm14, %v3620_v12, %v3734_v0  ;;  %v3866_v47 = vpack.i.bf16 %v2266_v20, %v2265_v1  ;;  %v1599_v23 = vsel %vm1590_vm14, %v3734_v0, %v3735_v28  ;;  %v2263_v12 = vld.sshfl [vmem:[#allocation1] sm:$0xff pattern:$0x75316420]  ;;  %v5321_v1 = vpop.permute.xlu2 %3762  ;;  %v3743_v20 = vpop.permute.xlu0 %3742  ;;  %2146 = vst [vmem:[#allocation2 + $0x3d8] sm:$0xf0] %v2126_v24 }
 0x1ee   : > { %1620 = vst [vmem:[#allocation2 + $0x190] sm:$0xf0] %v1600_v35  ;;  %v2303_v35 = vsel %vm2298_vm6, %v5868_v52, %v3750_v45  ;;  %v3871_v48 = vpack.i.bf16 %v2264_v15, %v2263_v12  ;;  %v3764_v12 = vunpack.i.l.bf16 %v5321_v1  ;;  %v5870_v15 = vunpack.i.h.bf16 %v5321_v1 }
 0x1ef   : > { %1618 = vst [vmem:[#allocation2 + $0x150] sm:$0xf0] %v1598_v4  ;;  %3867 = vrot.lane.b32.xlu0 %v3866_v47, %s4012_s27  ;;  %v3745_v60 = vunpack.i.h.bf16 %v3743_v20 }
 0x1f0   : > { %2271 = vst [vmem:[#allocation1 + $0x1] ss:$2 sm:$0xff] %v2247_v29  ;;  %3872 = vrot.lane.b32.xlu2 %v3871_v48, %s4012_s27  ;;  %v2331_v48 = vld [vmem:[%s4067_s23 + $0x12] sm:$0x3f]  ;;  %v2392_v9 = vsel %vm2386_vm4, %v3690_v32, %v3764_v12 }
 0x1f1   : > { %1619 = vst [vmem:[#allocation2 + $0x4e8] sm:$0xf0] %v1599_v23  ;;  %v2337_v10 = vunpack.c.h.bf16 %v2331_v48  ;;  %v2336_v36 = vunpack.c.l.bf16 %v2331_v48 }
 0x1f2   : > { %v3738_v4 = vpop.permute.xlu1 %3737  ;;  %2323 = vst [vmem:[#allocation2 + $0x118] sm:$0xf0] %v2303_v35  ;;  %v2393_v35 = vsel %vm2386_vm4, %v3764_v12, %v5870_v15  ;;  %v3744_v15 = vunpack.i.l.bf16 %v3743_v20 }
 0x1f3   : > { %v3740_v28 = vunpack.i.h.bf16 %v3738_v4  ;;  %v3739_v0 = vunpack.i.l.bf16 %v3738_v4  ;;  %v5330_v4 = vld.sshfl [vmem:[#allocation1 + $0x10] sm:$0xff pattern:$0x75316420]  ;;  %2412 = vst [vmem:[#allocation2 + $0x178] sm:$0xf] %v2392_v9 }
 0x1f4   : > { %2346 = vst [vmem:[#allocation1 + $0x10] ss:$2 sm:$0xff] %v5050_v3  ;;  %v1679_v54 = vsel %vm1678_vm15, %v3744_v15, %v3745_v60 }
 0x1f5   : > { %v1682_v29 = vsel %vm1678_vm15, %v3740_v28, %v3639_v50  ;;  %v1681_v47 = vsel %vm1678_vm15, %v3739_v0, %v3740_v28  ;;  %v1680_v32 = vsel %vm1678_vm15, %v3745_v60, %v3739_v0  ;;  %v5352_v52 = vpop.permute.xlu2 %3802  ;;  %2413 = vst [vmem:[#allocation2 + $0x1e8] sm:$0xf] %v2393_v35 }
 0x1f6   : > { %1702 = vst [vmem:[#allocation2 + $0x158] sm:$0xf] %v1682_v29  ;;  %v3804_v25 = vunpack.i.l.bf16 %v5352_v52  ;;  %v5880_v9 = vunpack.i.h.bf16 %v5352_v52 }
 0x1f7   : > { %1701 = vst [vmem:[#allocation2 + $0x358] sm:$0xf] %v1681_v47  ;;  %v5337_v50 = vld.sshfl [vmem:[#allocation1] sm:$0xff pattern:$0x75316420]  ;;  %v5349_v47 = vpop.permute.xlu0 %3752 }
 0x1f8   : > { %v5339_v23 = vld.sshfl [vmem:[#allocation1 + $0x8] sm:$0xff pattern:$0x75316420]  ;;  %1700 = vst [vmem:[#allocation2 + $0x338] sm:$0xf] %v1680_v32  ;;  %v5879_v37 = vunpack.i.h.bf16 %v5349_v47  ;;  %v3754_v35 = vunpack.i.l.bf16 %v5349_v47  ;;  %v2038_v48 = vsel %vm2032_vm3, %v3720_v22, %v3804_v25 }
 0x1f9   : > { %2344 = vst [vmem:[#allocation1] ss:$2 sm:$0xff] %v5055_v56 }
 0x1fa   : > { %v5344_v24 = vpop.permute.xlu1 %3757  ;;  %1699 = vst [vmem:[#allocation2 + $0x418] sm:$0xf] %v1679_v54  ;;  %v1860_v60 = vsel %vm1855_vm9, %v3754_v35, %v5879_v37 }
 0x1fb   : > { %v5877_v28 = vunpack.i.h.bf16 %v5344_v24  ;;  %v5878_v29 = vunpack.i.l.bf16 %v5344_v24  ;;  %v2353_v33 = vld.sshfl [vmem:[#allocation1 + $0x10] sm:$0xff pattern:$0x75316420]  ;;  %v2354_v0 = vld.sshfl [vmem:[#allocation1 + $0x18] sm:$0xff pattern:$0x75316420] }
 0x1fc   : > { %v3876_v17 = vpack.i.bf16 %v2354_v0, %v2353_v33  ;;  %2360 = vst [vmem:[#allocation1 + $0x10] ss:$2 sm:$0xff] %v2337_v10 }
 0x1fd   : > { %v1949_v12 = vsel %vm1944_vm8, %v5878_v29, %v5877_v28  ;;  %2058 = vst [vmem:[#allocation2 + $0x408] sm:$0xf] %v2038_v48 }
 0x1fe   : > { %1969 = vst [vmem:[#allocation2 + $0x3e0] sm:$0xf0] %v1949_v12  ;;  %3877 = vrot.lane.b32.xlu2 %v3876_v17, %s4004_s15  ;;  %v2039_v12 = vsel %vm2032_vm3, %v3804_v25, %v5880_v9 }
 0x1ff   : > { %v3778_v33 = vpop.permute.xlu0 %3777  ;;  %2059 = vst [vmem:[#allocation2 + $0xe8] sm:$0xf] %v2039_v12 }
 0x200   : > { %v2351_v28 = vld.sshfl [vmem:[#allocation1] sm:$0xff pattern:$0x75316420]  ;;  %v2352_v20 = vld.sshfl [vmem:[#allocation1 + $0x8] sm:$0xff pattern:$0x75316420]  ;;  %v3780_v37 = vunpack.i.h.bf16 %v3778_v33 }
 0x201   : > { %2359 = vst [vmem:[#allocation1] ss:$2 sm:$0xff] %v2336_v36  ;;  %v5378_v36 = vpop.permute.xlu2 %3827  ;;  %v3881_v17 = vpack.i.bf16 %v2352_v20, %v2351_v28 }
 0x202   : > { %v3768_v32 = vpop.permute.xlu1 %3767  ;;  %1880 = vst [vmem:[#allocation2 + $0x3e0] sm:$0xf] %v1860_v60  ;;  %v3829_v25 = vunpack.i.l.bf16 %v5378_v36  ;;  %v5882_v54 = vunpack.i.h.bf16 %v5378_v36 }
 0x203   : > { %v3770_v29 = vunpack.i.h.bf16 %v3768_v32  ;;  %v3769_v10 = vunpack.i.l.bf16 %v3768_v32  ;;  %v5381_v15 = vld.sshfl [vmem:[#allocation1 + $0x10] sm:$0xff pattern:$0x75316420] }
 0x204   : > { %2435 = vst [vmem:[#allocation1 + $0x11] ss:$2 sm:$0xff] %v5050_v3  ;;  %v2304_v20 = vsel %vm2298_vm6, %v3750_v45, %v3829_v25  ;;  %v2305_v16 = vsel %vm2298_vm6, %v3829_v25, %v5882_v54 }
 0x205   : > { %v1688_v22 = vsel %vm1678_vm15, %v3770_v29, %v5277_v61  ;;  %v1686_v0 = vsel %vm1678_vm15, %v3645_v5, %v3769_v10  ;;  %v2419_v61 = vld [vmem:[%s4067_s23 + $0x12] sm:$0x3f]  ;;  %v1687_v12 = vsel %vm1678_vm15, %v3769_v10, %v3770_v29  ;;  %2324 = vst [vmem:[#allocation2 + $0x490] sm:$0xf0] %v2304_v20  ;;  %v3926_v10 = vpack.i.bf16 %v5199_v53, %v5197_v19 }
 0x206   : > { %1708 = vst [vmem:[#allocation2 + $0x478] sm:$0xf] %v1688_v22  ;;  %3882 = vrot.lane.b32.xlu2 %v3881_v17, %s4004_s15  ;;  %v2425_v5 = vunpack.c.h.bf16 %v2419_v61  ;;  %v2424_v17 = vunpack.c.l.bf16 %v2419_v61 }
 0x207   : > { %1706 = vst [vmem:[#allocation2 + $0x2d0] sm:$0xf] %v1686_v0  ;;  %v5398_v22 = vpop.permute.xlu0 %3787  ;;  %v3779_v0 = vunpack.i.l.bf16 %v3778_v33  ;;  %v3941_v33 = vpack.i.bf16 %v5339_v23, %v5337_v50  ;;  %v5884_v50 = vunpack.i.h.bf16 %v5206_v31 }
 0x208   : > { %v2361_v48 = vld.sshfl [vmem:[#allocation1] sm:$0xff pattern:$0x75316420]  ;;  %v2362_v32 = vld.sshfl [vmem:[#allocation1 + $0x8] sm:$0xff pattern:$0x75316420]  ;;  %v3789_v53 = vunpack.i.l.bf16 %v5398_v22 }
 0x209   : > { %2433 = vst [vmem:[#allocation1 + $0x1] ss:$2 sm:$0xff] %v5055_v56  ;;  %v1768_v59 = vsel %vm1767_vm0, %v3779_v0, %v3780_v37  ;;  %v3891_v61 = vpack.i.bf16 %v2362_v32, %v2361_v48  ;;  %v5885_v0 = vunpack.i.h.bf16 %v5195_v39 }
 0x20a   : > { %v3773_v28 = vpop.permute.xlu1 %3772  ;;  %1707 = vst [vmem:[#allocation2 + $0x278] sm:$0xf] %v1687_v12  ;;  %v3790_v12 = vunpack.i.h.bf16 %v5398_v22 }
 0x20b   : > { %v3775_v60 = vunpack.i.h.bf16 %v3773_v28  ;;  %v3774_v29 = vunpack.i.l.bf16 %v3773_v28  ;;  %2325 = vst [vmem:[#allocation2 + $0x4c8] sm:$0xf0] %v2305_v16  ;;  %v2442_v9 = vld.sshfl [vmem:[#allocation1 + $0x10] sm:$0xff pattern:$0x75316420] }
 0x20c   : > { %v2443_v45 = vld.sshfl [vmem:[#allocation1 + $0x18] sm:$0xff pattern:$0x75316420]  ;;  %1788 = vst [vmem:[#allocation2 + $0x418] sm:$0xf0] %v1768_v59 }
 0x20d   : > { %v3886_v38 = vpack.i.bf16 %v2443_v45, %v2442_v9  ;;  %2449 = vst [vmem:[#allocation1 + $0x11] ss:$2 sm:$0xff] %v2425_v5  ;;  %v1771_v25 = vsel %vm1767_vm0, %v3775_v60, %v3664_v18  ;;  %v1770_v28 = vsel %vm1767_vm0, %v3774_v29, %v3775_v60  ;;  %v1769_v19 = vsel %vm1767_vm0, %v3780_v37, %v3774_v29  ;;  %v5417_v9 = vpop.permute.xlu2 %3832 }
 0x20e   : > { %3927 = vrot.lane.b32.xlu2 %v3926_v10, %s4009_s24  ;;  %1791 = vst [vmem:[#allocation2 + $0x158] sm:$0xf0] %v1771_v25  ;;  %v1859_v18 = vsel %vm1855_vm9, %v3790_v12, %v3754_v35  ;;  %v3834_v35 = vunpack.i.l.bf16 %v5417_v9  ;;  %v1858_v60 = vsel %vm1855_vm9, %v3789_v53, %v3790_v12  ;;  %v3835_v48 = vunpack.i.h.bf16 %v5417_v9 }
 0x20f   : > { %3887 = vrot.lane.b32.xlu0 %v3886_v38, %s4005_s16  ;;  %1790 = vst [vmem:[#allocation2 + $0x358] sm:$0xf0] %v1770_v28  ;;  %v5423_v37 = vpop.permute.xlu0 %3792 }
 0x210   : > { %v2440_v54 = vld.sshfl [vmem:[#allocation1] sm:$0xff pattern:$0x75316420]  ;;  %v2441_v20 = vld.sshfl [vmem:[#allocation1 + $0x8] sm:$0xff pattern:$0x75316420]  ;;  %v3794_v32 = vunpack.i.l.bf16 %v5423_v37  ;;  %v1945_v31 = vsel %vm1944_vm8, %v3834_v35, %v3835_v48  ;;  %v3795_v45 = vunpack.i.h.bf16 %v5423_v37 }
 0x211   : > { %2448 = vst [vmem:[#allocation1 + $0x1] ss:$2 sm:$0xff] %v2424_v17  ;;  %v2508_v17 = vld [vmem:[%s4067_s23 + $0x12] sm:$0x3f]  ;;  %v3896_v12 = vpack.i.bf16 %v2441_v20, %v2440_v54 }
 0x212   : > { %v5407_v6 = vpop.permute.xlu1 %3782  ;;  %1789 = vst [vmem:[#allocation2 + $0x338] sm:$0xf0] %v1769_v19  ;;  %v2481_v25 = vsel %vm2475_vm1, %v5885_v0, %v3794_v32  ;;  %v2513_v28 = vunpack.c.l.bf16 %v2508_v17  ;;  %v2482_v35 = vsel %vm2475_vm1, %v3794_v32, %v3795_v45 }
 0x213   : > { %v3784_v38 = vunpack.i.l.bf16 %v5407_v6  ;;  %v3785_v16 = vunpack.i.h.bf16 %v5407_v6  ;;  %1879 = vst [vmem:[#allocation2 + $0x2c8] sm:$0xf] %v1859_v18  ;;  %v2625_v6 = vld [vmem:[#allocation2 + $0x2b0] sm:$0xff] }
 0x214   : > { %v5425_v5 = vld.sshfl [vmem:[#allocation1 + $0x10] sm:$0xff pattern:$0x75316420]  ;;  %1878 = vst [vmem:[#allocation2 + $0x438] sm:$0xf] %v1858_v60  ;;  %v3936_v60 = vpack.i.bf16 %v5293_v42, %v5291_v46 }
 0x215   : > { %2523 = vst [vmem:[#allocation1 + $0x10] ss:$2 sm:$0xff] %v5050_v3  ;;  %v1775_v23 = vsel %vm1767_vm0, %v5884_v50, %v3784_v38  ;;  %v1776_v3 = vsel %vm1767_vm0, %v3784_v38, %v3785_v16  ;;  %v5455_v59 = vpop.permute.xlu2 %3842  ;;  %v5886_v50 = vunpack.i.h.bf16 %v5204_v43 }
 0x216   : > { %3942 = vrot.lane.b32.xlu2 %v3941_v33, %s4012_s27  ;;  %1795 = vst [vmem:[#allocation2 + $0x2d0] sm:$0xf0] %v1775_v23  ;;  %v3844_v33 = vunpack.i.l.bf16 %v5455_v59 }
 0x217   : > { %3892 = vrot.lane.b32.xlu0 %v3891_v61, %s4004_s15  ;;  %1796 = vst [vmem:[#allocation2 + $0x278] sm:$0xf0] %v1776_v3  ;;  %v3845_v3 = vunpack.i.h.bf16 %v5455_v59 }
 0x218   : > { %v5430_v22 = vld.sshfl [vmem:[#allocation1] sm:$0xff pattern:$0x75316420]  ;;  %v2451_v29 = vld.sshfl [vmem:[#allocation1 + $0x8] sm:$0xff pattern:$0x75316420] }
 0x219   : > { %2521 = vst [vmem:[#allocation1] ss:$2 sm:$0xff] %v5055_v56 }
 0x21a   : > { %v5437_v10 = vpop.permute.xlu1 %3797  ;;  %1965 = vst [vmem:[#allocation2 + $0x90] sm:$0xf0] %v1945_v31 }
 0x21b   : > { %v3799_v56 = vunpack.i.l.bf16 %v5437_v10  ;;  %v3800_v19 = vunpack.i.h.bf16 %v5437_v10  ;;  %2501 = vst [vmem:[#allocation2 + $0x178] sm:$0xf0] %v2481_v25 }
 0x21c   : > { %v2530_v18 = vld.sshfl [vmem:[#allocation1 + $0x10] sm:$0xff pattern:$0x75316420]  ;;  %v2531_v38 = vld.sshfl [vmem:[#allocation1 + $0x18] sm:$0xff pattern:$0x75316420] }
 0x21d   : > { %v3906_v61 = vpack.i.bf16 %v2531_v38, %v2530_v18  ;;  %v2569_v23 = vsel %vm2563_vm2, %v5886_v50, %v3799_v56  ;;  %v2570_v32 = vsel %vm2563_vm2, %v3799_v56, %v3800_v19  ;;  %v5472_v18 = vpop.permute.xlu0 %3807  ;;  %2502 = vst [vmem:[#allocation2 + $0x1e8] sm:$0xf0] %v2482_v35  ;;  %v2033_v38 = vsel %vm2032_vm3, %v3844_v33, %v3845_v3 }
 0x21e   : > { %2384 = vrot.lane.b32.xlu2 %v5381_v15, %s4004_s15  ;;  %2589 = vst [vmem:[#allocation2 + $0x4d0] sm:$0xf] %v2569_v23  ;;  %v3901_v50 = vpack.i.bf16 %v4750_v57, %v4748_v34  ;;  %v3911_v15 = vpack.i.bf16 %v2451_v29, %v5430_v22  ;;  %v5887_v35 = vunpack.i.h.bf16 %v5298_v44  ;;  %v2514_v23 = vunpack.c.h.bf16 %v2508_v17 }
 0x21f   : > { %3907 = vrot.lane.b32.xlu1 %v3906_v61, %s4007_s21  ;;  %3897 = vrot.lane.b32.xlu0 %v3896_v12, %s4005_s16  ;;  %v3809_v61 = vunpack.i.l.bf16 %v5472_v18  ;;  %2590 = vst [vmem:[#allocation2 + $0x498] sm:$0xf] %v2570_v32  ;;  %v5888_v29 = vunpack.i.l.bf16 %v5344_v24 }
 0x220   : > { %v2528_v54 = vld.sshfl [vmem:[#allocation1] sm:$0xff pattern:$0x75316420]  ;;  %v2529_v20 = vld.sshfl [vmem:[#allocation1 + $0x8] sm:$0xff pattern:$0x75316420] }
 0x221   : > { %2536 = vst [vmem:[#allocation1] ss:$2 sm:$0xff] %v2513_v28  ;;  %v3810_v28 = vunpack.i.h.bf16 %v5472_v18  ;;  %v2127_v33 = vsel %vm2121_vm7, %v5887_v35, %v3809_v61  ;;  %v5889_v35 = vunpack.i.h.bf16 %v5272_v62 }
 0x222   : > { %v3813_v31 = vpop.permute.xlu1 %3812  ;;  %2053 = vst [vmem:[#allocation2 + $0x368] sm:$0xf] %v2033_v38 }
 0x223   : > { %v3815_v0 = vunpack.i.h.bf16 %v3813_v31  ;;  %v3814_v25 = vunpack.i.l.bf16 %v3813_v31  ;;  %2147 = vst [vmem:[#allocation2 + $0x408] sm:$0xf0] %v2127_v33  ;;  %v3946_v33 = vpack.i.bf16 %v5160_v2, %v5151_v51  ;;  %v5891_v2 = vunpack.i.l.bf16 %v5272_v62 }
 0x224   : > { %2537 = vst [vmem:[#allocation1 + $0x10] ss:$2 sm:$0xff] %v2514_v23  ;;  %v5890_v23 = vunpack.i.l.bf16 %v5250_v40 }
 0x225   : > { %v1857_v12 = vsel %vm1855_vm9, %v3815_v0, %v3789_v53  ;;  %v1856_v56 = vsel %vm1855_vm9, %v3814_v25, %v3815_v0  ;;  %v2128_v53 = vsel %vm2121_vm7, %v3809_v61, %v3810_v28  ;;  %v3931_v61 = vpack.i.bf16 %v5246_v63, %v5244_v30 }
 0x226   : > { %1877 = vst [vmem:[#allocation2 + $0x138] sm:$0xf] %v1857_v12  ;;  %v3916_v12 = vpack.i.bf16 %v2529_v20, %v2528_v54 }
 0x227   : > { %1876 = vst [vmem:[#allocation2 + $0x90] sm:$0xf] %v1856_v56  ;;  %3902 = vrot.lane.b32.xlu0 %v3901_v50, %s4010_s25  ;;  %3912 = vrot.lane.b32.xlu1 %v3911_v15, %s4005_s16  ;;  %v4013_v50 = vmov 0.0   ;;  %v3838_v15 = vpop.permute.xlu0 %3837 }
 0x228   : > { %v2538_v31 = vld.sshfl [vmem:[#allocation1] sm:$0xff pattern:$0x75316420]  ;;  %v2539_v32 = vld.sshfl [vmem:[#allocation1 + $0x8] sm:$0xff pattern:$0x75316420]  ;;  %v3840_v54 = vunpack.i.h.bf16 %v3838_v15  ;;  %v3839_v20 = vunpack.i.l.bf16 %v3838_v15 }
 0x229   : > { %v3956_v34 = vpack.i.bf16 %v2539_v32, %v2538_v31  ;;  %2148 = vst [vmem:[#allocation2 + $0xe8] sm:$0xf0] %v2128_v53  ;;  %v3921_v53 = vpack.i.bf16 %v4794_v55, %v4792_v13 }
 0x22a   : > { %v3818_v0 = vpop.permute.xlu1 %3817  ;;  %2594 = vst [vmem:[#allocation2 + $0x198] sm:$0xf0] %v4013_v50  ;;  %v2036_v31 = vsel %vm2032_vm3, %v3840_v54, %v5890_v23  ;;  %v2034_v32 = vsel %vm2032_vm3, %v3845_v3, %v3839_v20  ;;  %v5894_v23 = vunpack.i.l.bf16 %v5296_v11 }
 0x22b   : > { %v3820_v57 = vunpack.i.h.bf16 %v3818_v0  ;;  %v3819_v22 = vunpack.i.l.bf16 %v3818_v0  ;;  %3957 = vrot.lane.b32.xlu2 %v3956_v34, %s4007_s21  ;;  %2595 = vst [vmem:[#allocation2 + $0x1b8] sm:$0xf0] %v4013_v50  ;;  %v3951_v0 = vpack.i.bf16 %v5181_v26, %v5179_v21  ;;  %v2540_v26 = vld.sshfl [vmem:[#allocation1 + $0x10] sm:$0xff pattern:$0x75316420] }
 0x22c   : > { %2596 = vst [vmem:[#allocation2 + $0xf0] sm:$0xf0] %v4013_v50 }
 0x22d   : > { %v1948_v25 = vsel %vm1944_vm8, %v3820_v57, %v5888_v29  ;;  %v1946_v17 = vsel %vm1944_vm8, %v3835_v48, %v3819_v22  ;;  %v1947_v38 = vsel %vm1944_vm8, %v3819_v22, %v3820_v57  ;;  %2597 = vst [vmem:[#allocation2 + $0x238] sm:$0xf0] %v4013_v50  ;;  %v5892_v57 = vunpack.i.l.bf16 %v5298_v44 }
 0x22e   : > { %1968 = vst [vmem:[#allocation2 + $0x2c8] sm:$0xf0] %v1948_v25 }
 0x22f   : > { %1966 = vst [vmem:[#allocation2 + $0x138] sm:$0xf0] %v1946_v17  ;;  %3932 = vrot.lane.b32.xlu0 %v3931_v61, %s4006_s20  ;;  %3917 = vrot.lane.b32.xlu1 %v3916_v12, %s4007_s21 }
 0x230   : > { %1967 = vst [vmem:[#allocation2 + $0x438] sm:$0xf0] %v1947_v38  ;;  %v3858_v13 = vpop.permute.xlu2 %3857 }
 0x231   : > { %2056 = vst [vmem:[#allocation2 + $0x1c8] sm:$0xf] %v2036_v31  ;;  %v3860_v55 = vunpack.i.h.bf16 %v3858_v13  ;;  %v3859_v51 = vunpack.i.l.bf16 %v3858_v13 }
 0x232   : > { %v5504_v56 = vpop.permute.xlu1 %3822  ;;  %2054 = vst [vmem:[#allocation2 + $0x2e0] sm:$0xf] %v2034_v32 }
 0x233   : > { %v3825_v9 = vunpack.i.h.bf16 %v5504_v56  ;;  %v3824_v48 = vunpack.i.l.bf16 %v5504_v56  ;;  %2030 = vrot.lane.b32.xlu2 %v5191_v8, %s4009_s24  ;;  %v2035_v8 = vsel %vm2032_vm3, %v3839_v20, %v3840_v54  ;;  %2598 = vst [vmem:[#allocation2 + $0x248] sm:$0xf0] %v4013_v50  ;;  %v2213_v40 = vsel %vm2209_vm5, %v3860_v55, %v5891_v2  ;;  %v2696_v56 = vld [vmem:[#allocation2 + $0x460] sm:$0xff] }
 0x234   : > { %2055 = vst [vmem:[#allocation2 + $0x3a8] sm:$0xf] %v2035_v8  ;;  %v2212_v59 = vsel %vm2209_vm5, %v3859_v51, %v3860_v55 }
 0x235   : > { %v2215_v30 = vsel %vm2209_vm5, %v5889_v35, %v3824_v48  ;;  %v2216_v63 = vsel %vm2209_vm5, %v3824_v48, %v3825_v9  ;;  %2599 = vst [vmem:[#allocation2 + $0x4d0] sm:$0xf0] %v4013_v50 }
 0x236   : > { %2235 = vst [vmem:[#allocation2 + $0x490] sm:$0xf] %v2215_v30 }
 0x237   : > { %2236 = vst [vmem:[#allocation2 + $0x4c8] sm:$0xf] %v2216_v63  ;;  %3947 = vrot.lane.b32.xlu0 %v3946_v33, %s4010_s25  ;;  %3922 = vrot.lane.b32.xlu1 %v3921_v53, %s4011_s26 }
 0x238   : > { %2600 = vst [vmem:[#allocation2 + $0x498] sm:$0xf0] %v4013_v50 }
 0x239   : > { %2601 = vst [vmem:[#allocation2 + $0x240] sm:$0xf0] %v4013_v50  ;;  %v3853_v34 = vpop.permute.xlu0 %3852 }
 0x23a   : > { %2602 = vst [vmem:[#allocation2 + $0x100] sm:$0xf0] %v4013_v50  ;;  %v3855_v29 = vunpack.i.h.bf16 %v3853_v34  ;;  %v3854_v46 = vunpack.i.l.bf16 %v3853_v34 }
 0x23b   : > { %2296 = vrot.lane.b32.xlu2 %v5330_v4, %s4012_s27  ;;  %2233 = vst [vmem:[#allocation2 + $0x330] sm:$0xf] %v2213_v40  ;;  %v3848_v4 = vpop.permute.xlu1 %3847 }
 0x23c   : > { %2232 = vst [vmem:[#allocation2 + $0x290] sm:$0xf] %v2212_v59  ;;  %v3850_v62 = vunpack.i.h.bf16 %v3848_v4  ;;  %v3849_v3 = vunpack.i.l.bf16 %v3848_v4 }
 0x23d   : > { %2603 = vst [vmem:[#allocation2 + $0x2d8] sm:$0xf0] %v4013_v50 }
 0x23e   : > { %v2124_v22 = vsel %vm2121_vm7, %v3849_v3, %v3850_v62  ;;  %v2123_v42 = vsel %vm2121_vm7, %v3855_v29, %v3849_v3  ;;  %v5896_v3 = vunpack.i.h.bf16 %v5378_v36 }
 0x23f   : > { %2473 = vrot.lane.b32.xlu0 %v5425_v5, %s4005_s16  ;;  %3937 = vrot.lane.b32.xlu1 %v3936_v60, %s4008_s22  ;;  %v2125_v5 = vsel %vm2121_vm7, %v3850_v62, %v5892_v57  ;;  %2144 = vst [vmem:[#allocation2 + $0x3a8] sm:$0xf0] %v2124_v22  ;;  %v4014_v57 = vmov 0.0|0.0  }
 0x240   : > { %2145 = vst [vmem:[#allocation2 + $0x1c8] sm:$0xf0] %v2125_v5  ;;  %2891 = vmatpush.bf16.msra.mxu2 %v4014_v57  ;;  %2904 = vmatpush.bf16.msra.mxu3 %v4014_v57 }
 0x241   : > { %2143 = vst [vmem:[#allocation2 + $0x2e0] sm:$0xf0] %v2123_v42  ;;  %2865 = vmatpush.bf16.msra.mxu0 %v4014_v57  ;;  %2878 = vmatpush.bf16.msra.mxu1 %v4014_v57 }
 0x243   : > { %1942 = vrot.lane.b32.xlu2 %v5175_v27, %s4011_s26  ;;  %v2122_v27 = vsel %vm2121_vm7, %v3854_v46, %v3855_v29  ;;  %v5897_v46 = vunpack.i.l.bf16 %v5195_v39 }
 0x244   : > { %2142 = vst [vmem:[#allocation2 + $0x368] sm:$0xf0] %v2122_v27 }
 0x247   : > { %2119 = vrot.lane.b32.xlu0 %v5237_v58, %s4006_s20  ;;  %3952 = vrot.lane.b32.xlu1 %v3951_v0, %s4011_s26 }
 0x24a   : > { %v3873_v21 = vpop.permute.xlu2 %3872  ;;  %v3863_v17 = vpop.permute.xlu1 %3862 }
 0x24b   : > { %v3875_v44 = vunpack.i.h.bf16 %v3873_v21  ;;  %v3874_v60 = vunpack.i.l.bf16 %v3873_v21  ;;  %v3865_v58 = vunpack.i.h.bf16 %v3863_v17  ;;  %v3864_v38 = vunpack.i.l.bf16 %v3863_v17 }
 0x24d   : > { %v2299_v25 = vsel %vm2298_vm6, %v3874_v60, %v3875_v44  ;;  %v2211_v12 = vsel %vm2209_vm5, %v3865_v58, %v3859_v51  ;;  %v2210_v48 = vsel %vm2209_vm5, %v3864_v38, %v3865_v58  ;;  %v5895_v51 = vunpack.i.h.bf16 %v5352_v52 }
 0x24e   : > { %2319 = vst [vmem:[#allocation2 + $0x420] sm:$0xf0] %v2299_v25  ;;  %v5898_v38 = vunpack.i.h.bf16 %v5321_v1 }
 0x24f   : > { %1765 = vrot.lane.b32.xlu0 %v5057_v41, %s4003_s14  ;;  %2561 = vrot.lane.b32.xlu1 %v2540_v26, %s4007_s21  ;;  %2231 = vst [vmem:[#allocation2 + $0x28] sm:$0xf] %v2211_v12  ;;  %v5893_v41 = vunpack.i.l.bf16 %v5252_v49 }
 0x250   : > { %2230 = vst [vmem:[#allocation2 + $0x420] sm:$0xf] %v2210_v48 }
 0x257   : > { %2207 = vrot.lane.b32.xlu1 %v5287_v7, %s4008_s22 }
 0x258   : > { %v3878_v61 = vpop.permute.xlu2 %3877 }
 0x259   : > { %v3880_v50 = vunpack.i.h.bf16 %v3878_v61  ;;  %v3879_v15 = vunpack.i.l.bf16 %v3878_v61 }
 0x25b   : > { %v2390_v35 = vsel %vm2386_vm4, %v3880_v50, %v5893_v41  ;;  %v2389_v30 = vsel %vm2386_vm4, %v3879_v15, %v3880_v50 }
 0x25c   : > { %2410 = vst [vmem:[#allocation2 + $0x180] sm:$0xf] %v2390_v35  ;;  %v5899_v35 = vunpack.i.l.bf16 %v5204_v43 }
 0x25d   : > { %2409 = vst [vmem:[#allocation2 + $0x268] sm:$0xf] %v2389_v30 }
 0x25f   : > { %1853 = vrot.lane.b32.xlu1 %v5141_v14, %s4010_s25 }
 0x260   : > { %v3883_v63 = vpop.permute.xlu2 %3882 }
 0x261   : > { %v3868_v7 = vpop.permute.xlu0 %3867  ;;  %v3885_v33 = vunpack.i.h.bf16 %v3883_v63  ;;  %v3884_v53 = vunpack.i.l.bf16 %v3883_v63 }
 0x262   : > { %v3870_v54 = vunpack.i.h.bf16 %v3868_v7  ;;  %v3869_v20 = vunpack.i.l.bf16 %v3868_v7 }
 0x263   : > { %v2388_v8 = vsel %vm2386_vm4, %v3885_v33, %v3879_v15  ;;  %v2387_v14 = vsel %vm2386_vm4, %v3884_v53, %v3885_v33 }
 0x264   : > { %v2302_v31 = vsel %vm2298_vm6, %v3870_v54, %v5894_v23  ;;  %v2300_v49 = vsel %vm2298_vm6, %v3875_v44, %v3869_v20  ;;  %v2301_v32 = vsel %vm2298_vm6, %v3869_v20, %v3870_v54  ;;  %2408 = vst [vmem:[#allocation2 + $0x428] sm:$0xf] %v2388_v8 }
 0x265   : > { %2322 = vst [vmem:[#allocation2 + $0x330] sm:$0xf0] %v2302_v31 }
 0x266   : > { %2320 = vst [vmem:[#allocation2 + $0x28] sm:$0xf0] %v2300_v49  ;;  %v5900_v49 = vunpack.i.h.bf16 %v5349_v47 }
 0x267   : > { %2321 = vst [vmem:[#allocation2 + $0x290] sm:$0xf0] %v2301_v32 }
 0x268   : > { %2407 = vst [vmem:[#allocation2 + $0xa8] sm:$0xf] %v2387_v14  ;;  %v5577_v13 = vpop.permute.xlu2 %3927 }
 0x269   : > { %v3930_v55 = vunpack.i.h.bf16 %v5577_v13  ;;  %v3929_v11 = vunpack.i.l.bf16 %v5577_v13  ;;  %v2717_v13 = vld [vmem:[#allocation2 + $0x438] sm:$0xff] }
 0x26b   : > { %v2040_v2 = vsel %vm2032_vm3, %v5895_v51, %v3929_v11  ;;  %v2041_v40 = vsel %vm2032_vm3, %v3929_v11, %v3930_v55 }
 0x26c   : > { %2060 = vst [vmem:[#allocation2 + $0x98] sm:$0xf] %v2040_v2 }
 0x26d   : > { %2061 = vst [vmem:[#allocation2 + $0x410] sm:$0xf] %v2041_v40 }
 0x270   : > { %v5587_v59 = vpop.permute.xlu2 %3942 }
 0x271   : > { %v3945_v4 = vunpack.i.h.bf16 %v5587_v59  ;;  %v3944_v62 = vunpack.i.l.bf16 %v5587_v59 }
 0x273   : > { %v2306_v0 = vsel %vm2298_vm6, %v5896_v3, %v3944_v62  ;;  %v2307_v52 = vsel %vm2298_vm6, %v3944_v62, %v3945_v4  ;;  %v2727_v3 = vld [vmem:[#allocation2 + $0x3a8] sm:$0xff] }
 0x274   : > { %2326 = vst [vmem:[#allocation2 + $0x120] sm:$0xf0] %v2306_v0  ;;  %v2737_v0 = vld [vmem:[#allocation2 + $0x290] sm:$0xff] }
 0x275   : > { %2327 = vst [vmem:[#allocation2 + $0x1d0] sm:$0xf0] %v2307_v52  ;;  %v2738_v52 = vld [vmem:[#allocation2 + $0x330] sm:$0xff] }
 0x278   : > { %v2385_v34 = vpop.permute.xlu2 %2384 }
 0x281   : > { %v3888_v5 = vpop.permute.xlu0 %3887 }
 0x282   : > { %v3890_v36 = vunpack.i.h.bf16 %v3888_v5  ;;  %v3889_v22 = vunpack.i.l.bf16 %v3888_v5 }
 0x284   : > { %v2479_v42 = vsel %vm2475_vm1, %v3890_v36, %v5897_v46  ;;  %v2478_v27 = vsel %vm2475_vm1, %v3889_v22, %v3890_v36 }
 0x285   : > { %v5601_v29 = vpop.permute.xlu2 %3957  ;;  %2499 = vst [vmem:[#allocation2 + $0x180] sm:$0xf0] %v2479_v42 }
 0x286   : > { %v3960_v21 = vunpack.i.h.bf16 %v5601_v29  ;;  %v3959_v26 = vunpack.i.l.bf16 %v5601_v29  ;;  %2498 = vst [vmem:[#allocation2 + $0x268] sm:$0xf0] %v2478_v27 }
 0x288   : > { %v2571_v44 = vsel %vm2563_vm2, %v3800_v19, %v3959_v26  ;;  %v2572_v60 = vsel %vm2563_vm2, %v3959_v26, %v3960_v21 }
 0x289   : > { %2591 = vst [vmem:[#allocation2 + $0x240] sm:$0xf] %v2571_v44  ;;  %v3893_v39 = vpop.permute.xlu0 %3892 }
 0x28a   : > { %2592 = vst [vmem:[#allocation2 + $0x100] sm:$0xf] %v2572_v60  ;;  %v3895_v25 = vunpack.i.h.bf16 %v3893_v39  ;;  %v3894_v17 = vunpack.i.l.bf16 %v3893_v39  ;;  %v2718_v60 = vld [vmem:[#allocation2 + $0x2c8] sm:$0xff] }
 0x28c   : > { %v2396_v58 = vsel %vm2386_vm4, %v3895_v25, %v2385_v34  ;;  %v2394_v61 = vsel %vm2386_vm4, %v5898_v38, %v3894_v17  ;;  %v2395_v12 = vsel %vm2386_vm4, %v3894_v17, %v3895_v25  ;;  %v2748_v11 = vld [vmem:[#allocation2 + $0x180] sm:$0xff]  ;;  %v2708_v17 = vld [vmem:[#allocation2 + $0x158] sm:$0xff] }
 0x28d   : > { %2416 = vst [vmem:[#allocation2 + $0x170] sm:$0xf] %v2396_v58  ;;  %v2747_v31 = vld [vmem:[#allocation2 + $0x268] sm:$0xff]  ;;  %v2031_v34 = vpop.permute.xlu2 %2030  ;;  %v2707_v38 = vld [vmem:[#allocation2 + $0x358] sm:$0xff] }
 0x28e   : > { %2414 = vst [vmem:[#allocation2 + $0x2f0] sm:$0xf] %v2394_v61  ;;  %v2042_v37 = vsel %vm2032_vm3, %v3930_v55, %v2031_v34  ;;  %v2828_v61 = vpack.c.bf16 %v2718_v60, %v2708_v17 }
 0x28f   : > { %2415 = vst [vmem:[#allocation2 + $0x3f0] sm:$0xf] %v2395_v12  ;;  %v2827_v12 = vpack.c.bf16 %v2717_v13, %v2707_v38  ;;  %v2637_v38 = vld [vmem:[#allocation2 + $0x308] sm:$0xff] }
 0x290   : > { %2062 = vst [vmem:[#allocation2 + $0xc8] sm:$0xf] %v2042_v37  ;;  %v2726_v37 = vld [vmem:[#allocation2 + $0x2e0] sm:$0xff] }
 0x291   : > { %v3908_v10 = vpop.permute.xlu1 %3907  ;;  %v3898_v19 = vpop.permute.xlu0 %3897 }
 0x292   : > { %v3910_v48 = vunpack.i.h.bf16 %v3908_v10  ;;  %v3909_v50 = vunpack.i.l.bf16 %v3908_v10  ;;  %v3900_v15 = vunpack.i.h.bf16 %v3898_v19  ;;  %v3899_v41 = vunpack.i.l.bf16 %v3898_v19  ;;  %v2697_v10 = vld [vmem:[#allocation2 + $0x4b0] sm:$0xff]  ;;  %v2698_v19 = vld [vmem:[#allocation2 + $0x1d8] sm:$0xff] }
 0x294   : > { %v2567_v30 = vsel %vm2563_vm2, %v3910_v48, %v5899_v35  ;;  %v2566_v7 = vsel %vm2563_vm2, %v3909_v50, %v3910_v48  ;;  %v2477_v1 = vsel %vm2475_vm1, %v3900_v15, %v3889_v22  ;;  %v2476_v63 = vsel %vm2475_vm1, %v3899_v41, %v3900_v15  ;;  %v2687_v48 = vld [vmem:[#allocation2 + $0x250] sm:$0xff] }
 0x295   : > { %2587 = vst [vmem:[#allocation2 + $0x238] sm:$0xf] %v2567_v30  ;;  %v2837_v22 = vpack.c.bf16 %v2737_v0, %v2727_v3  ;;  %v2297_v18 = vpop.permute.xlu2 %2296  ;;  %v2817_v35 = vpack.c.bf16 %v2697_v10, %v2687_v48  ;;  %v2647_v0 = vld [vmem:[#allocation2 + $0x4f8] sm:$0xff] }
 0x296   : > { %2586 = vst [vmem:[#allocation2 + $0xf0] sm:$0xf] %v2566_v7  ;;  %v2705_v10 = vld [vmem:[#allocation2 + $0x418] sm:$0xff] }
 0x297   : > { %2497 = vst [vmem:[#allocation2 + $0x428] sm:$0xf0] %v2477_v1 }
 0x298   : > { %2496 = vst [vmem:[#allocation2 + $0xa8] sm:$0xf0] %v2476_v63 }
 0x299   : > { %v5626_v54 = vpop.permute.xlu0 %3902  ;;  %v5628_v20 = vpop.permute.xlu1 %3912 }
 0x29a   : > { %v3905_v33 = vunpack.i.h.bf16 %v5626_v54  ;;  %v3904_v43 = vunpack.i.l.bf16 %v5626_v54  ;;  %v3915_v53 = vunpack.i.h.bf16 %v5628_v20  ;;  %v3914_v23 = vunpack.i.l.bf16 %v5628_v20  ;;  %v2648_v54 = vld [vmem:[#allocation2 + $0x380] sm:$0xff] }
 0x29c   : > { %v1861_v32 = vsel %vm1855_vm9, %v5900_v49, %v3904_v43  ;;  %v1862_v8 = vsel %vm1855_vm9, %v3904_v43, %v3905_v33  ;;  %v2483_v14 = vsel %vm2475_vm1, %v3795_v45, %v3914_v23  ;;  %v2758_v51 = vld [vmem:[#allocation2 + $0x238] sm:$0xff]  ;;  %v2484_v2 = vsel %vm2475_vm1, %v3914_v23, %v3915_v53  ;;  %v2728_v45 = vld [vmem:[#allocation2 + $0x1c8] sm:$0xff] }
 0x29d   : > { %1881 = vst [vmem:[#allocation2 + $0x130] sm:$0xf] %v1861_v32  ;;  %v2757_v40 = vld [vmem:[#allocation2 + $0xf0] sm:$0xff]  ;;  %v2848_v62 = vpack.c.bf16 %v2758_v51, %v2748_v11  ;;  %v2838_v46 = vpack.c.bf16 %v2738_v52, %v2728_v45  ;;  %v2667_v43 = vld [vmem:[#allocation2 + $0x3b8] sm:$0xff]  ;;  %v2677_v23 = vld [vmem:[#allocation2 + $0x2e8] sm:$0xff]  ;;  %v5901_v32 = vunpack.i.h.bf16 %v5344_v24 }
 0x29e   : > { %1882 = vst [vmem:[#allocation2 + $0x298] sm:$0xf] %v1862_v8  ;;  %v2847_v47 = vpack.c.bf16 %v2757_v40, %v2747_v31  ;;  %v2657_v52 = vld [vmem:[#allocation2 + $0x38] sm:$0xff]  ;;  %v2736_v45 = vld [vmem:[#allocation2 + $0x28] sm:$0xff] }
 0x29f   : > { %2503 = vst [vmem:[#allocation2 + $0x2f0] sm:$0xf0] %v2483_v14  ;;  %2905 = vmatpush.bf16.msra.mxu3 %v2848_v62  ;;  %v2668_v14 = vld [vmem:[#allocation2 + $0x8] sm:$0xff]  ;;  %v2807_v62 = vpack.c.bf16 %v2677_v23, %v2667_v43  ;;  %v2836_v17 = vpack.c.bf16 %v2736_v45, %v2726_v37  ;;  %v2675_v37 = vld [vmem:[#allocation2 + $0x10] sm:$0xff] }
 0x2a0   : > { %2504 = vst [vmem:[#allocation2 + $0x3f0] sm:$0xf0] %v2484_v2  ;;  %2892 = vmatpush.bf16.msra.mxu2 %v2847_v47  ;;  %v2745_v51 = vld [vmem:[#allocation2 + $0xa8] sm:$0xff]  ;;  %v2658_v47 = vld [vmem:[#allocation2 + $0x3f8] sm:$0xff] }
 0x2a1   : > { %v5649_v5 = vpop.permute.xlu0 %3932  ;;  %v3918_v36 = vpop.permute.xlu1 %3917 }
 0x2a2   : > { %v3935_v42 = vunpack.i.h.bf16 %v5649_v5  ;;  %v3934_v27 = vunpack.i.l.bf16 %v5649_v5  ;;  %v3920_v26 = vunpack.i.h.bf16 %v3918_v36  ;;  %v3919_v44 = vunpack.i.l.bf16 %v3918_v36 }
 0x2a3   : > { %2906 = vmatpush.bf16.msra.mxu3 %v2838_v46  ;;  %v2725_v46 = vld [vmem:[#allocation2 + $0x368] sm:$0xff] }
 0x2a4   : > { %v2129_v55 = vsel %vm2121_vm7, %v3810_v28, %v3934_v27  ;;  %v2130_v39 = vsel %vm2121_vm7, %v3934_v27, %v3935_v42  ;;  %v2565_v25 = vsel %vm2563_vm2, %v3920_v26, %v3909_v50  ;;  %2893 = vmatpush.bf16.msra.mxu2 %v2837_v22  ;;  %v2564_v58 = vsel %vm2563_vm2, %v3919_v44, %v3920_v26  ;;  %v2688_v50 = vld [vmem:[#allocation2 + $0x1e0] sm:$0xff] }
 0x2a5   : > { %2149 = vst [vmem:[#allocation2 + $0x98] sm:$0xf0] %v2129_v55  ;;  %v2308_v28 = vsel %vm2298_vm6, %v3945_v4, %v2297_v18  ;;  %v2818_v30 = vpack.c.bf16 %v2698_v19, %v2688_v50  ;;  %v2678_v4 = vld [vmem:[#allocation2 + $0x258] sm:$0xff]  ;;  %v2735_v27 = vld [vmem:[#allocation2 + $0x420] sm:$0xff]  ;;  %v2798_v26 = vpack.c.bf16 %v2658_v47, %v2648_v54  ;;  %v2797_v55 = vpack.c.bf16 %v2657_v52, %v2647_v0  ;;  %v2715_v19 = vld [vmem:[#allocation2 + $0x90] sm:$0xff] }
 0x2a6   : > { %2150 = vst [vmem:[#allocation2 + $0x410] sm:$0xf0] %v2130_v39  ;;  %v2808_v2 = vpack.c.bf16 %v2678_v4, %v2668_v14  ;;  %v2628_v39 = vld [vmem:[#allocation2 + $0x18] sm:$0xff] }
 0x2a7   : > { %2585 = vst [vmem:[#allocation2 + $0x1b8] sm:$0xf] %v2565_v25  ;;  %2907 = vmatpush.bf16.msra.mxu3 %v2828_v61  ;;  %v2638_v25 = vld [vmem:[#allocation2 + $0x2a8] sm:$0xff]  ;;  %v5701_v4 = vld [vmem:[%s5862_s1] sm:$0xf] }
 0x2a8   : > { %2584 = vst [vmem:[#allocation2 + $0x198] sm:$0xf] %v2564_v58  ;;  %2894 = vmatpush.bf16.msra.mxu2 %v2827_v12  ;;  %v2627_v58 = vld [vmem:[#allocation2 + $0x4d8] sm:$0xff]  ;;  %v2788_v18 = vpack.c.bf16 %v2638_v25, %v2628_v39  ;;  %v2655_v39 = vld [vmem:[#allocation2 + $0x1a8] sm:$0xff] }
 0x2a9   : > { %v5664_v15 = vpop.permute.xlu0 %3947  ;;  %v5666_v41 = vpop.permute.xlu1 %3922  ;;  %2328 = vst [vmem:[#allocation2 + $0x208] sm:$0xf0] %v2308_v28  ;;  %v2716_v12 = vld [vmem:[#allocation2 + $0x138] sm:$0xff]  ;;  %v2787_v48 = vpack.c.bf16 %v2637_v38, %v2627_v58  ;;  %v2646_v58 = vld [vmem:[#allocation2 + $0x360] sm:$0xff] }
 0x2aa   : > { %v3950_v7 = vunpack.i.h.bf16 %v5664_v15  ;;  %v3949_v1 = vunpack.i.l.bf16 %v5664_v15  ;;  %v3925_v63 = vunpack.i.h.bf16 %v5666_v41  ;;  %v3924_v59 = vunpack.i.l.bf16 %v5666_v41  ;;  %v2706_v28 = vld [vmem:[#allocation2 + $0x338] sm:$0xff]  ;;  %v2666_v41 = vld [vmem:[#allocation2 + $0x280] sm:$0xff] }
 0x2ab   : > { %2908 = vmatpush.bf16.msra.mxu3 %v2818_v30  ;;  %v2826_v50 = vpack.c.bf16 %v2716_v12, %v2706_v28  ;;  %v2751_v30 = vld [vmem:[#allocation2 + $0x1e8] sm:$0xff]  ;;  %v2711_v38 = vld [vmem:[#allocation2] sm:$0xff]  ;;  %v2636_v12 = vld [vmem:[#allocation2 + $0x4f0] sm:$0xff] }
 0x2ac   : > { %v1863_v31 = vsel %vm1855_vm9, %v3905_v33, %v3949_v1  ;;  %v1864_v49 = vsel %vm1855_vm9, %v3949_v1, %v3950_v7  ;;  %v1950_v8 = vsel %vm1944_vm8, %v5901_v32, %v3924_v59  ;;  %2895 = vmatpush.bf16.msra.mxu2 %v2817_v35  ;;  %v1951_v11 = vsel %vm1944_vm8, %v3924_v59, %v3925_v63  ;;  %v2746_v33 = vld [vmem:[#allocation2 + $0x428] sm:$0xff]  ;;  %v2761_v1 = vld [vmem:[#allocation2 + $0x498] sm:$0xff]  ;;  %v1943_v59 = vpop.permute.xlu2 %1942  ;;  %v2762_v32 = vld [vmem:[#allocation2 + $0x240] sm:$0xff] }
 0x2ad   : > { %1883 = vst [vmem:[#allocation2 + $0x2f8] sm:$0xf] %v1863_v31  ;;  %v2825_v35 = vpack.c.bf16 %v2715_v19, %v2705_v10  ;;  %v2685_v31 = vld [vmem:[#allocation2 + $0x40] sm:$0xff] }
 0x2ae   : > { %1884 = vst [vmem:[#allocation2 + $0x68] sm:$0xf] %v1864_v49  ;;  %v2756_v40 = vld [vmem:[#allocation2 + $0x1b8] sm:$0xff]  ;;  %v2695_v49 = vld [vmem:[#allocation2 + $0x288] sm:$0xff]  ;;  %v2691_v10 = vld [vmem:[#allocation2 + $0x80] sm:$0xff] }
 0x2af   : > { %1970 = vst [vmem:[#allocation2 + $0x130] sm:$0xf0] %v1950_v8  ;;  %v2755_v3 = vld [vmem:[#allocation2 + $0x198] sm:$0xff]  ;;  %v2846_v24 = vpack.c.bf16 %v2756_v40, %v2746_v33  ;;  %2909 = vmatpush.bf16.msra.mxu3 %v2808_v2  ;;  %v2851_v33 = vpack.c.bf16 %v2761_v1, %v2751_v30  ;;  %v2671_v30 = vld [vmem:[#allocation2 + $0x4a8] sm:$0xff]  ;;  %v2681_v1 = vld [vmem:[#allocation2 + $0x140] sm:$0xff] }
 0x2b0   : > { %1971 = vst [vmem:[#allocation2 + $0x298] sm:$0xf0] %v1951_v11  ;;  %v2845_v34 = vpack.c.bf16 %v2755_v3, %v2745_v51  ;;  %2896 = vmatpush.bf16.msra.mxu2 %v2807_v62  ;;  %v2686_v51 = vld [vmem:[#allocation2 + $0x350] sm:$0xff]  ;;  %v2676_v40 = vld [vmem:[#allocation2 + $0x1f8] sm:$0xff]  ;;  %v2731_v62 = vld [vmem:[#allocation2 + $0xe8] sm:$0xff] }
 0x2b1   : > { %2879 = vmatpush.bf16.msra.mxu1 %v2846_v24  ;;  %v2474_v36 = vpop.permute.xlu0 %2473  ;;  %v5684_v22 = vpop.permute.xlu1 %3937  ;;  %v2816_v54 = vpack.c.bf16 %v2696_v56, %v2686_v51  ;;  %v2741_v3 = vld [vmem:[#allocation2 + $0x4c8] sm:$0xff]  ;;  %v2732_v24 = vld [vmem:[#allocation2 + $0x98] sm:$0xff] }
 0x2b2   : > { %2866 = vmatpush.bf16.msra.mxu0 %v2845_v34  ;;  %v2485_v44 = vsel %vm2475_vm1, %v3915_v53, %v2474_v36  ;;  %v3940_v60 = vunpack.i.h.bf16 %v5684_v22  ;;  %v3939_v13 = vunpack.i.l.bf16 %v5684_v22  ;;  %v2835_v53 = vpack.c.bf16 %v2735_v27, %v2725_v46  ;;  %v2665_v34 = vld [vmem:[#allocation2 + $0x3c8] sm:$0xff]  ;;  %v2656_v27 = vld [vmem:[#allocation2 + $0x2a0] sm:$0xff]  ;;  %v2740_v22 = vld [vmem:[#allocation2 + $0x490] sm:$0xff] }
 0x2b3   : > { %2505 = vst [vmem:[#allocation2 + $0x170] sm:$0xf0] %v2485_v44  ;;  %2910 = vmatpush.bf16.msra.mxu3 %v2798_v26  ;;  %v2806_v36 = vpack.c.bf16 %v2676_v40, %v2666_v41  ;;  %v2805_v46 = vpack.c.bf16 %v2675_v37, %v2665_v34  ;;  %v2641_v34 = vld [vmem:[#allocation2 + $0xd8] sm:$0xff] }
 0x2b4   : > { %v2217_v61 = vsel %vm2209_vm5, %v3825_v9, %v3939_v13  ;;  %v2218_v20 = vsel %vm2209_vm5, %v3939_v13, %v3940_v60  ;;  %2897 = vmatpush.bf16.msra.mxu2 %v2797_v55  ;;  %v2752_v9 = vld [vmem:[#allocation2 + $0x2f0] sm:$0xff]  ;;  %v2645_v55 = vld [vmem:[#allocation2 + $0xa0] sm:$0xff] }
 0x2b5   : > { %2237 = vst [vmem:[#allocation2 + $0x120] sm:$0xf] %v2217_v61  ;;  %2880 = vmatpush.bf16.msra.mxu1 %v2836_v17  ;;  %v2852_v2 = vpack.c.bf16 %v2762_v32, %v2752_v9  ;;  %v2796_v61 = vpack.c.bf16 %v2656_v27, %v2646_v58  ;;  %v2795_v19 = vpack.c.bf16 %v2655_v39, %v2645_v55  ;;  %v2749_v32 = vld [vmem:[#allocation2 + $0x4b8] sm:$0xff]  ;;  %v2709_v27 = vld [vmem:[#allocation2 + $0x88] sm:$0xff]  ;;  %v2690_v58 = vld [vmem:[#allocation2 + $0x3a0] sm:$0xff] }
 0x2b6   : > { %2238 = vst [vmem:[#allocation2 + $0x1d0] sm:$0xf] %v2218_v20  ;;  %2867 = vmatpush.bf16.msra.mxu0 %v2835_v53  ;;  %v2626_v53 = vld [vmem:[#allocation2 + $0x3b0] sm:$0xff] }
 0x2b7   : > { %2911 = vmatpush.bf16.msra.mxu3 %v2788_v18  ;;  %v2721_v26 = vld [vmem:[#allocation2 + $0x298] sm:$0xff]  ;;  %v2712_v18 = vld [vmem:[#allocation2 + $0x2d0] sm:$0xff] }
 0x2b8   : > { %2898 = vmatpush.bf16.msra.mxu2 %v2787_v48  ;;  %v2831_v20 = vpack.c.bf16 %v2721_v26, %v2711_v38  ;;  %v2701_v48 = vld [vmem:[#allocation2 + $0x1b0] sm:$0xff]  ;;  %v2719_v26 = vld [vmem:[#allocation2 + $0x3e0] sm:$0xff] }
 0x2b9   : > { %2881 = vmatpush.bf16.msra.mxu1 %v2826_v50  ;;  %v2120_v43 = vpop.permute.xlu0 %2119  ;;  %v3953_v23 = vpop.permute.xlu1 %3952  ;;  %v2786_v50 = vpack.c.bf16 %v2636_v12, %v2626_v53  ;;  %v2821_v56 = vpack.c.bf16 %v2701_v48, %v2691_v10  ;;  %v2700_v38 = vld [vmem:[#allocation2 + $0x50] sm:$0xff]  ;;  %v2670_v53 = vld [vmem:[#allocation2 + $0x300] sm:$0xff]  ;;  %v2669_v10 = vld [vmem:[#allocation2 + $0x48] sm:$0xff] }
 0x2ba   : > { %2868 = vmatpush.bf16.msra.mxu0 %v2825_v35  ;;  %v2131_v8 = vsel %vm2121_vm7, %v3935_v42, %v2120_v43  ;;  %v3955_v14 = vunpack.i.h.bf16 %v3953_v23  ;;  %v3954_v11 = vunpack.i.l.bf16 %v3953_v23  ;;  %2912 = vmatmul.bf16.vlgmr.msra.gmra.mxu3 %v5701_v4  ;;  %v2815_v42 = vpack.c.bf16 %v2695_v49, %v2685_v31  ;;  %v2692_v35 = vld [vmem:[#allocation2 + $0x400] sm:$0xff]  ;;  %v2750_v23 = vld [vmem:[#allocation2 + $0x178] sm:$0xff]  ;;  %v2760_v31 = vld [vmem:[#allocation2 + $0x4d0] sm:$0xff] }
 0x2bb   : > { %2956 = vmatpush.bf16.msrb.mxu3 %v4014_v57  ;;  %2151 = vst [vmem:[#allocation2 + $0xc8] sm:$0xf0] %v2131_v8  ;;  %2899 = vmatmul.bf16.vlgmr.msra.gmra.mxu2 %v5701_v4  ;;  %v2759_v8 = vld [vmem:[#allocation2 + $0x248] sm:$0xff]  ;;  %v2850_v51 = vpack.c.bf16 %v2760_v31, %v2750_v23  ;;  %v2820_v15 = vpack.c.bf16 %v2700_v38, %v2690_v58  ;;  %v2680_v12 = vld [vmem:[#allocation2 + $0x2c0] sm:$0xff]  ;;  %v2753_v23 = vld [vmem:[#allocation2 + $0x3f0] sm:$0xff] }
 0x2bc   : > { %2943 = vmatpush.bf16.msrb.mxu2 %v4014_v57  ;;  %v1952_v47 = vsel %vm1944_vm8, %v3925_v63, %v3954_v11  ;;  %v1953_v5 = vsel %vm1944_vm8, %v3954_v11, %v3955_v14  ;;  %v2742_v0 = vld [vmem:[#allocation2 + $0x120] sm:$0xff]  ;;  %v1954_v52 = vsel %vm1944_vm8, %v3955_v14, %v1943_v59  ;;  %v2841_v63 = vpack.c.bf16 %v2741_v3, %v2731_v62  ;;  %v2682_v14 = vld [vmem:[#allocation2 + $0xf8] sm:$0xff] }
 0x2bd   : > { %1972 = vst [vmem:[#allocation2 + $0x2f8] sm:$0xf0] %v1952_v47  ;;  %2882 = vmatpush.bf16.msra.mxu1 %v2816_v54  ;;  %v2842_v45 = vpack.c.bf16 %v2742_v0, %v2732_v24  ;;  %v2811_v11 = vpack.c.bf16 %v2681_v1, %v2671_v30  ;;  %v2651_v54 = vld [vmem:[#allocation2 + $0x390] sm:$0xff]  ;;  %v2849_v40 = vpack.c.bf16 %v2759_v8, %v2749_v32  ;;  %v2739_v47 = vld [vmem:[#allocation2 + $0x118] sm:$0xff]  ;;  %v2650_v48 = vld [vmem:[#allocation2 + $0x4a0] sm:$0xff] }
 0x2be   : > { %1973 = vst [vmem:[#allocation2 + $0x68] sm:$0xf0] %v1953_v5  ;;  %2869 = vmatpush.bf16.msra.mxu0 %v2815_v42  ;;  %v2662_v5 = vld [vmem:[#allocation2 + $0x210] sm:$0xff]  ;;  %v2730_v42 = vld [vmem:[#allocation2 + $0x408] sm:$0xff]  ;;  %v2652_v0 = vld [vmem:[#allocation2 + $0xb8] sm:$0xff] }
 0x2bf   : > { %2957 = vmatpush.bf16.msrb.mxu3 %v2852_v2  ;;  %1974 = vst [vmem:[#allocation2 + $0x3c0] sm:$0xf0] %v1954_v52  ;;  %v2672_v2 = vld [vmem:[#allocation2 + $0x218] sm:$0xff]  ;;  %v2840_v24 = vpack.c.bf16 %v2740_v22, %v2730_v42  ;;  %v2631_v52 = vld [vmem:[#allocation2 + $0x440] sm:$0xff]  ;;  %v2802_v41 = vpack.c.bf16 %v2662_v5, %v2652_v0  ;;  %v2704_v5 = vld [vmem:[#allocation2 + $0x190] sm:$0xff] }
 0x2c0   : > { %2944 = vmatpush.bf16.msrb.mxu2 %v2851_v33  ;;  %v2661_v33 = vld [vmem:[#allocation2 + $0x188] sm:$0xff]  ;;  %v2812_v62 = vpack.c.bf16 %v2682_v14, %v2672_v2  ;;  %v2791_v55 = vpack.c.bf16 %v2641_v34, %v2631_v52  ;;  %v2639_v30 = vld [vmem:[#allocation2 + $0x398] sm:$0xff]  ;;  %v2763_v31 = vld [vmem:[#allocation2 + $0x100] sm:$0xff] }
 0x2c1   : > { %2883 = vmatpush.bf16.msra.mxu1 %v2806_v36  ;;  %v1766_v44 = vpop.permute.xlu0 %1765  ;;  %v2562_v13 = vpop.permute.xlu1 %2561  ;;  %v2801_v3 = vpack.c.bf16 %v2661_v33, %v2651_v54  ;;  %v2720_v36 = vld [vmem:[#allocation2 + $0x130] sm:$0xff]  ;;  %v2853_v8 = vpack.c.bf16 %v2763_v31, %v2753_v23  ;;  %v2713_v22 = vld [vmem:[#allocation2 + $0x278] sm:$0xff]  ;;  %v2703_v42 = vld [vmem:[#allocation2 + $0x4e8] sm:$0xff] }
 0x2c2   : > { %2870 = vmatpush.bf16.msra.mxu0 %v2805_v46  ;;  %v1777_v25 = vsel %vm1767_vm0, %v3785_v16, %v1766_v44  ;;  %v2573_v17 = vsel %vm2563_vm2, %v3960_v21, %v2562_v13  ;;  %v2635_v16 = vld [vmem:[#allocation2 + $0x310] sm:$0xff]  ;;  %v2642_v44 = vld [vmem:[#allocation2 + $0x388] sm:$0xff]  ;;  %v2643_v58 = vld [vmem:[#allocation2 + $0x160] sm:$0xff] }
 0x2c3   : > { %2958 = vmatpush.bf16.msrb.mxu3 %v2842_v45  ;;  %1797 = vst [vmem:[#allocation2 + $0x478] sm:$0xf0] %v1777_v25  ;;  %v2702_v21 = vld [vmem:[#allocation2 + $0x150] sm:$0xff]  ;;  %v2785_v9 = vpack.c.bf16 %v2635_v16, %v2625_v6  ;;  %v2710_v13 = vld [vmem:[#allocation2 + $0x448] sm:$0xff]  ;;  %v2829_v25 = vpack.c.bf16 %v2719_v26, %v2709_v27  ;;  %v2660_v6 = vld [vmem:[#allocation2 + $0x320] sm:$0xff] }
 0x2c4   : > { %2945 = vmatpush.bf16.msrb.mxu2 %v2841_v63  ;;  %2593 = vst [vmem:[#allocation2 + $0x2d8] sm:$0xf] %v2573_v17  ;;  %v2722_v28 = vld [vmem:[#allocation2 + $0x2f8] sm:$0xff]  ;;  %v2822_v43 = vpack.c.bf16 %v2702_v21, %v2692_v35  ;;  %v2830_v39 = vpack.c.bf16 %v2720_v36, %v2710_v13  ;;  %v2800_v21 = vpack.c.bf16 %v2660_v6, %v2650_v48  ;;  %v2629_v35 = vld [vmem:[#allocation2 + $0x450] sm:$0xff]  ;;  %v2734_v2 = vld [vmem:[#allocation2 + $0xc8] sm:$0xff] }
 0x2c5   : > { %2884 = vmatpush.bf16.msra.mxu1 %v2796_v61  ;;  %v2832_v29 = vpack.c.bf16 %v2722_v28, %v2712_v18  ;;  %v2632_v63 = vld [vmem:[#allocation2 + $0x378] sm:$0xff]  ;;  %v2810_v18 = vpack.c.bf16 %v2680_v12, %v2670_v53  ;;  %v2674_v34 = vld [vmem:[#allocation2 + $0x1f0] sm:$0xff]  ;;  %v2664_v27 = vld [vmem:[#allocation2 + $0x20] sm:$0xff] }
 0x2c6   : > { %2871 = vmatpush.bf16.msra.mxu0 %v2795_v19  ;;  %v2792_v17 = vpack.c.bf16 %v2642_v44, %v2632_v63  ;;  %v2689_v61 = vld [vmem:[#allocation2 + $0x318] sm:$0xff]  ;;  %v2679_v19 = vld [vmem:[#allocation2 + $0x260] sm:$0xff]  ;;  %v2653_v26 = vld [vmem:[#allocation2 + $0x270] sm:$0xff] }
 0x2c7   : > { %2959 = vmatpush.bf16.msrb.mxu3 %v2832_v29  ;;  %v2809_v28 = vpack.c.bf16 %v2679_v19, %v2669_v10  ;;  %v2649_v16 = vld [vmem:[#allocation2 + $0x458] sm:$0xff]  ;;  %v2659_v29 = vld [vmem:[#allocation2 + $0xb0] sm:$0xff] }
 0x2c8   : > { %2946 = vmatpush.bf16.msrb.mxu2 %v2831_v20  ;;  %v2699_v20 = vld [vmem:[#allocation2 + $0x200] sm:$0xff]  ;;  %v2663_v44 = vld [vmem:[#allocation2 + $0x78] sm:$0xff] }
 0x2c9   : > { %2885 = vmatpush.bf16.msra.mxu1 %v2786_v50  ;;  %v2208_v59 = vpop.permute.xlu1 %2207  ;;  %v2799_v50 = vpack.c.bf16 %v2659_v29, %v2649_v16 }
 0x2ca   : > { %2872 = vmatpush.bf16.msra.mxu0 %v2785_v9  ;;  %v2219_v49 = vsel %vm2209_vm5, %v3940_v60, %v2208_v59  ;;  %v2729_v60 = vld [vmem:[#allocation2 + $0x3d8] sm:$0xff]  ;;  %v2640_v9 = vld [vmem:[#allocation2 + $0x60] sm:$0xff]  ;;  %v2789_v59 = vpack.c.bf16 %v2639_v30, %v2629_v35 }
 0x2cb   : > { %2239 = vst [vmem:[#allocation2 + $0x208] sm:$0xf] %v2219_v49  ;;  %2960 = vmatpush.bf16.msrb.mxu3 %v2822_v43  ;;  %v2839_v37 = vpack.c.bf16 %v2739_v47, %v2729_v60  ;;  %v2764_v43 = vld [vmem:[#allocation2 + $0x2d8] sm:$0xff]  ;;  %v2754_v49 = vld [vmem:[#allocation2 + $0x170] sm:$0xff] }
 0x2cc   : > { %2947 = vmatpush.bf16.msrb.mxu2 %v2821_v56  ;;  %2886 = vmatmul.bf16.vlgmr.msra.gmra.mxu1 %v5701_v4  ;;  %v2630_v56 = vld [vmem:[#allocation2 + $0x328] sm:$0xff]  ;;  %v2854_v32 = vpack.c.bf16 %v2764_v43, %v2754_v49 }
 0x2cd   : > { %2930 = vmatpush.bf16.msrb.mxu1 %v4014_v57  ;;  %2873 = vmatmul.bf16.vlgmr.msra.gmra.mxu0 %v5701_v4  ;;  %v2790_v1 = vpack.c.bf16 %v2640_v9, %v2630_v56 }
 0x2ce   : > { %2917 = vmatpush.bf16.msrb.mxu0 %v4014_v57 }
 0x2cf   : > { %2961 = vmatpush.bf16.msrb.mxu3 %v2812_v62  ;;  %v2723_v62 = vld [vmem:[#allocation2 + $0x68] sm:$0xff] }
 0x2d0   : > { %2948 = vmatpush.bf16.msrb.mxu2 %v2811_v11  ;;  %v2733_v11 = vld [vmem:[#allocation2 + $0x410] sm:$0xff]  ;;  %v2833_v47 = vpack.c.bf16 %v2723_v62, %v2713_v22 }
 0x2d1   : > { %2931 = vmatpush.bf16.msrb.mxu1 %v2850_v51  ;;  %v1854_v45 = vpop.permute.xlu1 %1853  ;;  %v2743_v51 = vld [vmem:[#allocation2 + $0x1d0] sm:$0xff] }
 0x2d2   : > { %2918 = vmatpush.bf16.msrb.mxu0 %v2849_v40  ;;  %v1865_v46 = vsel %vm1855_vm9, %v3950_v7, %v1854_v45  ;;  %v2819_v7 = vpack.c.bf16 %v2699_v20, %v2689_v61  ;;  %v2744_v14 = vld [vmem:[#allocation2 + $0x208] sm:$0xff]  ;;  %v2843_v33 = vpack.c.bf16 %v2743_v51, %v2733_v11 }
 0x2d3   : > { %1885 = vst [vmem:[#allocation2 + $0x3c0] sm:$0xf] %v1865_v46  ;;  %2962 = vmatpush.bf16.msrb.mxu3 %v2802_v41  ;;  %v2844_v54 = vpack.c.bf16 %v2744_v14, %v2734_v2  ;;  %v2673_v45 = vld [vmem:[#allocation2 + $0x168] sm:$0xff]  ;;  %v2683_v41 = vld [vmem:[#allocation2 + $0x70] sm:$0xff]  ;;  %v2654_v46 = vld [vmem:[#allocation2 + $0x480] sm:$0xff] }
 0x2d4   : > { %2949 = vmatpush.bf16.msrb.mxu2 %v2801_v3  ;;  %v2694_v3 = vld [vmem:[#allocation2 + $0x348] sm:$0xff]  ;;  %v2813_v63 = vpack.c.bf16 %v2683_v41, %v2673_v45  ;;  %v2804_v13 = vpack.c.bf16 %v2664_v27, %v2654_v46 }
 0x2d5   : > { %2932 = vmatpush.bf16.msrb.mxu1 %v2840_v24  ;;  %v2693_v24 = vld [vmem:[#allocation2 + $0x228] sm:$0xff]  ;;  %v2824_v0 = vpack.c.bf16 %v2704_v5, %v2694_v3 }
 0x2d6   : > { %2919 = vmatpush.bf16.msrb.mxu0 %v2839_v37  ;;  %v2823_v52 = vpack.c.bf16 %v2703_v42, %v2693_v24  ;;  %v2684_v37 = vld [vmem:[#allocation2 + $0x4c0] sm:$0xff] }
 0x2d7   : > { %2963 = vmatpush.bf16.msrb.mxu3 %v2792_v17  ;;  %v2814_v36 = vpack.c.bf16 %v2684_v37, %v2674_v34  ;;  %v2633_v17 = vld [vmem:[#allocation2 + $0x108] sm:$0xff]  ;;  %v5797_v37 = vld [vmem:[%s5863_s2 + $0x8] sm:$0x3] }
 0x2d8   : > { %2950 = vmatpush.bf16.msrb.mxu2 %v2791_v55  ;;  %v2803_v55 = vpack.c.bf16 %v2663_v44, %v2653_v26  ;;  %v2793_v61 = vpack.c.bf16 %v2643_v58, %v2633_v17  ;;  %v3007_v46 = vperm.slane %v5797_v37, 0  ;;  %v3008_v27 = vperm.slane %v5797_v37, 1 }
 0x2d9   : > { %2933 = vmatpush.bf16.msrb.mxu1 %v2830_v39  ;;  %v2634_v39 = vld [vmem:[#allocation2 + $0x488] sm:$0xff] }
 0x2da   : > { %2920 = vmatpush.bf16.msrb.mxu0 %v2829_v25  ;;  %2964 = vmatmul.bf16.vlgmr.msrb.gmra.mxu3 %v5701_v4  ;;  %v2724_v40 = vld [vmem:[#allocation2 + $0x3c0] sm:$0xff] }
 0x2db   : > { %2951 = vmatmul.bf16.vlgmr.msrb.gmra.mxu2 %v5701_v4  ;;  %v2644_v25 = vld [vmem:[#allocation2 + $0x220] sm:$0xff] }
 0x2dc   : > { %v2794_v38 = vpack.c.bf16 %v2644_v25, %v2634_v39 }
 0x2dd   : > { %2934 = vmatpush.bf16.msrb.mxu1 %v2820_v15 }
 0x2de   : > { %2921 = vmatpush.bf16.msrb.mxu0 %v2819_v7 }
 0x2e1   : > { %2935 = vmatpush.bf16.msrb.mxu1 %v2810_v18 }
 0x2e2   : > { %2922 = vmatpush.bf16.msrb.mxu0 %v2809_v28 }
 0x2e5   : > { %2936 = vmatpush.bf16.msrb.mxu1 %v2800_v21 }
 0x2e6   : > { %2923 = vmatpush.bf16.msrb.mxu0 %v2799_v50 }
 0x2e9   : > { %2937 = vmatpush.bf16.msrb.mxu1 %v2790_v1 }
 0x2ea   : > { %2924 = vmatpush.bf16.msrb.mxu0 %v2789_v59 }
 0x2ec   : > { %2938 = vmatmul.bf16.vlgmr.msrb.gmra.mxu1 %v5701_v4 }
 0x2ed   : > { %2982 = vmatpush.bf16.msra.mxu1 %v4014_v57  ;;  %2925 = vmatmul.bf16.vlgmr.msrb.gmra.mxu0 %v5701_v4 }
 0x2ee   : > { %2969 = vmatpush.bf16.msra.mxu0 %v4014_v57  ;;  %v2714_v57 = vld [vmem:[#allocation2 + $0x478] sm:$0xff] }
 0x2ef   : > { %v2834_v60 = vpack.c.bf16 %v2724_v40, %v2714_v57 }
 0x2f1   : > { %2983 = vmatpush.bf16.msra.mxu1 %v2854_v32 }
 0x2f2   : > { %2970 = vmatpush.bf16.msra.mxu0 %v2853_v8 }
 0x2f5   : > { %2984 = vmatpush.bf16.msra.mxu1 %v2844_v54 }
 0x2f6   : > { %2971 = vmatpush.bf16.msra.mxu0 %v2843_v33 }
 0x2f9   : > { %2985 = vmatpush.bf16.msra.mxu1 %v2834_v60 }
 0x2fa   : > { %2972 = vmatpush.bf16.msra.mxu0 %v2833_v47 }
 0x2fd   : > { %2986 = vmatpush.bf16.msra.mxu1 %v2824_v0 }
 0x2fe   : > { %2973 = vmatpush.bf16.msra.mxu0 %v2823_v52 }
 0x301   : > { %2987 = vmatpush.bf16.msra.mxu1 %v2814_v36 }
 0x302   : > { %2974 = vmatpush.bf16.msra.mxu0 %v2813_v63 }
 0x305   : > { %2988 = vmatpush.bf16.msra.mxu1 %v2804_v13 }
 0x306   : > { %2975 = vmatpush.bf16.msra.mxu0 %v2803_v55 }
 0x309   : > { %2989 = vmatpush.bf16.msra.mxu1 %v2794_v38 }
 0x30a   : > { %2976 = vmatpush.bf16.msra.mxu0 %v2793_v61 }
 0x30c   : > { %2990 = vmatmul.bf16.vlgmr.msra.gmra.mxu1 %v5701_v4 }
 0x30d   : > { %2977 = vmatmul.bf16.vlgmr.msra.gmra.mxu0 %v5701_v4  ;;  %v5753_v4 = vld [vmem:[%s5863_s2] sm:$0xff] }
 0x30e   : > { %v2999_v6 = vperm.slane %v5753_v4, 0  ;;  %v3000_v16 = vperm.slane %v5753_v4, 1  ;;  %v3001_v35 = vperm.slane %v5753_v4, 2  ;;  %v3002_v23 = vperm.slane %v5753_v4, 3 }
 0x30f   : > { %v3003_v11 = vperm.slane %v5753_v4, 4  ;;  %v3004_v62 = vperm.slane %v5753_v4, 5  ;;  %v3005_v5 = vperm.slane %v5753_v4, 6  ;;  %v3006_v52 = vperm.slane %v5753_v4, 7 }
 0x33d   : > { %v5738_v20 = vpop.f32.mrf.mxu3 }
 0x33e   : > { %v5740_v15 = vpop.f32.mrf.mxu2  ;;  %v3022_v14 = vmul.f32 %v3002_v23, %v5738_v20 }
 0x33f   : > { %v3021_v43 = vmul.f32 %v3001_v35, %v5740_v15 }
 0x340   : > { %v3043_v33 = vmul.f32 %v3022_v14, %v5738_v20 }
 0x341   : > { %v3042_v8 = vmul.f32 %v3021_v43, %v5740_v15 }
 0x345   : > { %v2915_v7 = vpop.f32.mrf.mxu3 }
 0x346   : > { %v2902_v53 = vpop.f32.mrf.mxu2 }
 0x349   : > { %v5742_v12 = vpop.f32.mrf.mxu1 }
 0x34a   : > { %v5744_v10 = vpop.f32.mrf.mxu0  ;;  %v3020_v9 = vmul.f32 %v3000_v16, %v5742_v12 }
 0x34b   : > { %v3019_v56 = vmul.f32 %v2999_v6, %v5744_v10 }
 0x34c   : > { %v3041_v59 = vmul.f32 %v3020_v9, %v5742_v12 }
 0x34d   : > { %v3040_v1 = vmul.f32 %v3019_v56, %v5744_v10  ;;  %v3029_v31 = vadd.f32 %v3020_v9, %v3019_v56 }
 0x34f   : > { %v3050_v32 = vadd.f32 %v3041_v59, %v3040_v1  ;;  %v3030_v2 = vadd.f32 %v3029_v31, %v3021_v43 }
 0x351   : > { %v2889_v19 = vpop.f32.mrf.mxu1  ;;  %v3051_v54 = vadd.f32 %v3050_v32, %v3042_v8  ;;  %v3031_v57 = vadd.f32 %v3030_v2, %v3022_v14 }
 0x352   : > { %v2876_v18 = vpop.f32.mrf.mxu0 }
 0x353   : > { %v3052_v22 = vadd.f32 %v3051_v54, %v3043_v33  ;;  %v3108_v33 = vstv %s3097_s7 }
 0x35d   : > { %v5748_v48 = vpop.f32.mrf.mxu3 }
 0x35e   : > { %v5746_v28 = vpop.f32.mrf.mxu2  ;;  %v3026_v36 = vmul.f32 %v3006_v52, %v5748_v48 }
 0x35f   : > { %v3025_v0 = vmul.f32 %v3005_v5, %v5746_v28 }
 0x360   : > { %v3047_v44 = vmul.f32 %v3026_v36, %v5748_v48 }
 0x361   : > { %v3046_v41 = vmul.f32 %v3025_v0, %v5746_v28 }
 0x365   : > { %v2967_v21 = vpop.f32.mrf.mxu3 }
 0x366   : > { %v2954_v29 = vpop.f32.mrf.mxu2 }
 0x369   : > { %v5757_v50 = vpop.f32.mrf.mxu1 }
 0x36a   : > { %v5766_v30 = vpop.f32.mrf.mxu0  ;;  %v3024_v47 = vmul.f32 %v3004_v62, %v5757_v50 }
 0x36b   : > { %v3023_v40 = vmul.f32 %v3003_v11, %v5766_v30 }
 0x36c   : > { %v3045_v24 = vmul.f32 %v3024_v47, %v5757_v50 }
 0x36d   : > { %v3044_v60 = vmul.f32 %v3023_v40, %v5766_v30  ;;  %v3032_v42 = vadd.f32 %v3031_v57, %v3023_v40 }
 0x36f   : > { %v3053_v3 = vadd.f32 %v3052_v22, %v3044_v60  ;;  %v3033_v34 = vadd.f32 %v3032_v42, %v3024_v47 }
 0x371   : > { %v2941_v49 = vpop.f32.mrf.mxu1  ;;  %v3054_v45 = vadd.f32 %v3053_v3, %v3045_v24  ;;  %v3034_v63 = vadd.f32 %v3033_v34, %v3025_v0 }
 0x372   : > { %v2928_v51 = vpop.f32.mrf.mxu0 }
 0x373   : > { %v3055_v26 = vadd.f32 %v3054_v45, %v3046_v41  ;;  %v3035_v39 = vadd.f32 %v3034_v63, %v3026_v36 }
 0x375   : > { %v3056_v58 = vadd.f32 %v3055_v26, %v3047_v44 }
 0x389   : > { %v2991_v13 = vpop.f32.mrf.mxu1 }
 0x38a   : > { %v2978_v55 = vpop.f32.mrf.mxu0  ;;  %v3028_v17 = vmul.f32 %v3008_v27, %v2991_v13 }
 0x38b   : > { %v3027_v25 = vmul.f32 %v3007_v46, %v2978_v55 }
 0x38c   : > { %v3049_v53 = vmul.f32 %v3028_v17, %v2991_v13 }
 0x38d   : > { %v3036_v38 = vadd.f32 %v3035_v39, %v3027_v25  ;;  %v3048_v61 = vmul.f32 %v3027_v25, %v2978_v55 }
 0x38f   : > { %v3057_v7 = vadd.f32 %v3056_v58, %v3048_v61  ;;  %v3037_v19 = vadd.f32 %v3036_v38, %v3028_v17 }
 0x391   : > { %3038 = vadd.xlane.f32.xlu0 %v3037_v19  ;;  %v2993_v18 = vpop.f32.mrf.mxu1  ;;  %v3058_v29 = vadd.f32 %v3057_v7, %v3049_v53 }
 0x392   : > { %v2980_v21 = vpop.f32.mrf.mxu0 }
 0x393   : > { %3059 = vadd.xlane.f32.xlu1 %v3058_v29 }
 0x404   : > { %v3039_v56 = vpop.xlane.xlu0 %3038 }
 0x405   : > { %v3061_v9 = vmul.f32 0.001953125, %v3039_v56 }
 0x406   : > { %v3060_v1 = vpop.xlane.xlu1 %3059 }
 0x407   : > { %v3062_v59 = vmul.f32 0.001953125, %v3060_v1  ;;  %v3063_v43 = vmul.f32 %v3061_v9, %v3061_v9  ;;  %v3066_v40 = vsub.f32 %v5744_v10, %v3061_v9  ;;  %v3067_v57 = vsub.f32 %v5742_v12, %v3061_v9 }
 0x408   : > { %v3068_v22 = vsub.f32 %v5740_v15, %v3061_v9  ;;  %v3069_v47 = vsub.f32 %v5738_v20, %v3061_v9  ;;  %v3070_v42 = vsub.f32 %v5766_v30, %v3061_v9  ;;  %v3071_v3 = vsub.f32 %v5757_v50, %v3061_v9 }
 0x409   : > { %v3064_v31 = vsub.f32 %v3062_v59, %v3063_v43  ;;  %v3072_v24 = vsub.f32 %v5746_v28, %v3061_v9  ;;  %v3073_v0 = vsub.f32 %v5748_v48, %v3061_v9  ;;  %v3074_v34 = vsub.f32 %v2978_v55, %v3061_v9 }
 0x40a   : > { %v3075_v45 = vsub.f32 %v2991_v13, %v3061_v9 }
 0x40b   : > { %v3065_v49 = vmax.f32 %v3064_v31, 0.0 }
 0x40d   : > { %v3076_v32 = vadd.f32 1e-05, %v3065_v49 }
 0x40f   : > { %3961 = vrsqrt.f32 %v3076_v32  ;;  %vm3083_vm11 = vweird.f32 %v3076_v32 }
 0x415   : > { %v3962_v8 = vpop.eup %3961 }
 0x416   : > { %v3078_v14 = vmul.f32 %v3962_v8, %v3076_v32  ;;  %vm3084_vm10 = vweird.f32 %v3962_v8 }
 0x417   : > { %vm3085_vm12 = vmor %vm3083_vm11, %vm3084_vm10 }
 0x418   : > { %v3079_v51 = vmul.f32 %v3962_v8, %v3078_v14 }
 0x41a   : > { %v3080_v2 = vmul.f32 0.5, %v3079_v51 }
 0x41c   : > { %v3081_v54 = vsub.f32 1.5, %v3080_v2 }
 0x41e   : > { %v3082_v60 = vmul.f32 %v3962_v8, %v3081_v54 }
 0x420   : > { %v3086_v10 = vsel %vm3085_vm12, %v3962_v8, %v3082_v60 }
 0x421   : > { %v3087_v41 = vmul.f32 %v3086_v10, %v3066_v40  ;;  %v3088_v12 = vmul.f32 %v3086_v10, %v3067_v57  ;;  %v3089_v36 = vmul.f32 %v3086_v10, %v3068_v22  ;;  %v3090_v15 = vmul.f32 %v3086_v10, %v3069_v47 }
 0x422   : > { %v3091_v63 = vmul.f32 %v3086_v10, %v3070_v42  ;;  %v3092_v26 = vmul.f32 %v3086_v10, %v3071_v3  ;;  %v3093_v44 = vmul.f32 %v3086_v10, %v3072_v24  ;;  %v3094_v20 = vmul.f32 %v3086_v10, %v3073_v0 }
 0x423   : > { %v3095_v39 = vmul.f32 %v3086_v10, %v3074_v34  ;;  %v3096_v30 = vmul.f32 %v3086_v10, %v3075_v45  ;;  %vm3098_vm13 = vcmp.ge.f32.partialorder %v3087_v41, 0.0  ;;  %vm3099_vm14 = vcmp.ge.f32.partialorder %v3088_v12, 0.0 }
 0x424   : > { %vm3100_vm15 = vcmp.ge.f32.partialorder %v3089_v36, 0.0  ;;  %vm3101_vm0 = vcmp.ge.f32.partialorder %v3090_v15, 0.0  ;;  %vm3102_vm1 = vcmp.ge.f32.partialorder %v3091_v63, 0.0  ;;  %vm3103_vm2 = vcmp.ge.f32.partialorder %v3092_v26, 0.0 }
 0x425   : > { %vm3104_vm3 = vcmp.ge.f32.partialorder %v3093_v44, 0.0  ;;  %vm3105_vm4 = vcmp.ge.f32.partialorder %v3094_v20, 0.0  ;;  %vm3106_vm5 = vcmp.ge.f32.partialorder %v3095_v39, 0.0  ;;  %vm3107_vm6 = vcmp.ge.f32.partialorder %v3096_v30, 0.0 }
 0x426   : > { %v3109_v28 = vmul.f32 %v3108_v33, %v3087_v41  ;;  %v3110_v48 = vmul.f32 %v3108_v33, %v3088_v12  ;;  %v3111_v50 = vmul.f32 %v3108_v33, %v3089_v36  ;;  %v3112_v13 = vmul.f32 %v3108_v33, %v3090_v15 }
 0x427   : > { %v3113_v55 = vmul.f32 %v3108_v33, %v3091_v63  ;;  %v3114_v25 = vmul.f32 %v3108_v33, %v3092_v26  ;;  %v3115_v17 = vmul.f32 %v3108_v33, %v3093_v44  ;;  %v3116_v58 = vmul.f32 %v3108_v33, %v3094_v20 }
 0x428   : > { %v3117_v38 = vmul.f32 %v3108_v33, %v3095_v39  ;;  %v3118_v61 = vmul.f32 %v3108_v33, %v3096_v30  ;;  %v3119_v7 = vsel %vm3098_vm13, %v3087_v41, %v3109_v28  ;;  %v3120_v53 = vsel %vm3099_vm14, %v3088_v12, %v3110_v48 }
 0x429   : > { %v3121_v19 = vsel %vm3100_vm15, %v3089_v36, %v3111_v50  ;;  %v3122_v18 = vsel %vm3101_vm0, %v3090_v15, %v3112_v13  ;;  %v3123_v29 = vsel %vm3102_vm1, %v3091_v63, %v3113_v55  ;;  %v3124_v21 = vsel %vm3103_vm2, %v3092_v26, %v3114_v25 }
 0x42a   : > { %v3125_v56 = vsel %vm3104_vm3, %v3093_v44, %v3115_v17  ;;  %v3126_v9 = vsel %vm3105_vm4, %v3094_v20, %v3116_v58  ;;  %v3127_v1 = vsel %vm3106_vm5, %v3095_v39, %v3117_v38  ;;  %v3128_v59 = vsel %vm3107_vm6, %v3096_v30, %v3118_v61 }
 0x42b   : > { %v3129_v43 = vmul.f32 %v3119_v7, %v2999_v6  ;;  %v3130_v31 = vmul.f32 %v3120_v53, %v3000_v16  ;;  %v3131_v49 = vmul.f32 %v3121_v19, %v3001_v35  ;;  %v3132_v32 = vmul.f32 %v3122_v18, %v3002_v23 }
 0x42c   : > { %v3133_v8 = vmul.f32 %v3123_v29, %v3003_v11  ;;  %v3134_v14 = vmul.f32 %v3124_v21, %v3004_v62  ;;  %v3135_v6 = vmul.f32 %v3125_v56, %v3005_v5  ;;  %v3136_v16 = vmul.f32 %v3126_v9, %v3006_v52 }
 0x42d   : > { %v3137_v35 = vmul.f32 %v3127_v1, %v3007_v46  ;;  %v3138_v23 = vmul.f32 %v3128_v59, %v3008_v27  ;;  %v3139_v51 = vpack.c.bf16 %v3130_v31, %v3129_v43  ;;  %v3140_v2 = vpack.c.bf16 %v3132_v32, %v3131_v49 }
 0x42e   : > { %v3141_v54 = vpack.c.bf16 %v3134_v14, %v3133_v8  ;;  %v3142_v33 = vpack.c.bf16 %v3136_v16, %v3135_v6 }
 0x42f   : > { %v3143_v11 = vpack.c.bf16 %v3138_v23, %v3137_v35  ;;  %3144 = vst [vmem:[%s237_s10] sm:$0xff] %v3139_v51 }
 0x430   : > { %3145 = vst [vmem:[%s237_s10 + $0x8] sm:$0xff] %v3140_v2 }
 0x431   : > { %3146 = vst [vmem:[%s237_s10 + $0x10] sm:$0xff] %v3141_v54 }
 0x432   : > { %3147 = vst [vmem:[%s237_s10 + $0x18] sm:$0xff] %v3142_v33 }
 0x433   : > { %3148 = vst [vmem:[%s237_s10 + $0x20] sm:$0xff] %v3143_v11 }
 0x434 PF: > { %s15_s19 = sadd.s32 1, %s3985_s19   ;;  %s5902_s17 = smov %s3981_s18 }
 0x435   : > { %p12_p5 = scmp.ge.s32.totalorder %s15_s19, 4   ;;  %s5903_s18 = smov %s5905_s3 }
 0x437   :  { %14 = sbr.rel (!%p12_p5) target bundleno = 2 (0x2), region = 167 }

</bundles_post_ra>
